<compile_context>
chip_gen: v6e
topology: v6e:2x2x1
jax: 0.10.0
libtpu: 0.0.40
codegen_flags: <defaults>
</compile_context>

<pallas_src>
import math
from functools import partial

import jax
import jax.numpy as jnp
from jax.experimental import pallas as pl
from jax.experimental.pallas import tpu as pltpu

VMEM_SPEC = pl.BlockSpec(memory_space=pltpu.MemorySpace.VMEM)
SMEM_SPEC = pl.BlockSpec(memory_space=pltpu.MemorySpace.SMEM)
# 56 MiB fits v7x's 64 MiB/core VMEM with headroom; also fine on v5e/v6e.
# TODO(synk): on v6e (128 MiB VMEM) raise toward ~100 MiB and use a larger Bt.
VMEM_LIMIT = 56 * 1024 * 1024


def _layernorm(x, g, b, eps=1e-5):
    # x: (..., D) f32; g, b: (1, D) f32 (lane-dense)
    mu = jnp.mean(x, axis=-1, keepdims=True)
    var = jnp.mean(jnp.square(x - mu), axis=-1, keepdims=True)
    return (x - mu) * jax.lax.rsqrt(var + eps) * g + b


# ---------------------------------------------------------------- vision path
def _vision_linear_kernel(x_ref, w_ref, b_ref, o_ref):
    # Output block is resident across the K grid axis -> f32 accumulator.
    @pl.when(pl.program_id(1) == 0)
    def _():
        o_ref[...] = jnp.broadcast_to(b_ref[...], o_ref.shape)

    o_ref[...] += jnp.dot(x_ref[...], w_ref[...],
                          preferred_element_type=jnp.float32)


def vision_linear(x, w, b):
    """x: (B, K) bf16, w: (K, N) bf16, b: (1, N) f32 -> (B, N) f32."""
    B, K = x.shape
    N = w.shape[1]
    tk = next((t for t in (2048, 1024, 512, 256, 128) if K % t == 0), K)
    tn = 128 if N % 128 == 0 else N
    return pl.pallas_call(
        _vision_linear_kernel,
        out_shape=jax.ShapeDtypeStruct((B, N), jnp.float32),
        grid_spec=pltpu.PrefetchScalarGridSpec(
            num_scalar_prefetch=0, grid=(N // tn, K // tk),
            in_specs=[pl.BlockSpec((B, tk), lambda n, k: (0, k)),
                      pl.BlockSpec((tk, tn), lambda n, k: (k, n)),
                      pl.BlockSpec((1, tn), lambda n, k: (0, n))],
            out_specs=pl.BlockSpec((B, tn), lambda n, k: (0, n))),
        compiler_params=pltpu.CompilerParams(
            dimension_semantics=("parallel", "arbitrary"),
            vmem_limit_bytes=VMEM_LIMIT),
    )(x, w, b)


# ------------------------------------------------- fused text transformer stack
def _transformer_kernel(n_head,
                        x_ref, mask_ref,
                        wqkv_ref, bqkv_ref, wout_ref, bout_ref,
                        ln1g_ref, ln1b_ref, ln2g_ref, ln2b_ref,
                        wfc_ref, bfc_ref, wproj_ref, bproj_ref,
                        o_ref):
    """One (batch-tile, layer) grid step.  Token-major residual stream
    (Bt, L, D) stays resident in the output block across the layer axis while
    per-layer weights stream from HBM (double-buffered)."""
    layer = pl.program_id(1)

    @pl.when(layer == 0)
    def _():
        o_ref[...] = x_ref[...]          # load embeddings into the carry

    Bt, L, D = o_ref.shape
    H = n_head
    Dh = D // H
    scale = 1.0 / math.sqrt(Dh)

    x2 = o_ref[...].reshape(Bt * L, D)   # leading-dim merge (free)

    # ---------------- x = x + attn(ln_1(x))
    h1 = _layernorm(x2, ln1g_ref[0], ln1b_ref[0]).astype(jnp.bfloat16)
    qkv = jnp.dot(h1, wqkv_ref[0],
                  preferred_element_type=jnp.float32) + bqkv_ref[0]   # (Bt*L, 3D)
    qkv3 = qkv.reshape(Bt, L, 3 * D)                                  # free split
    wout = wout_ref[0]                                                # (D, D) bf16
    mask3 = jnp.broadcast_to(mask_ref[...], (Bt, L, L))               # hoisted

    # Heads: contiguous lane slices, per-head attention, and per-head row-slab
    # output projection accumulation (== concat(heads) @ Wout, no lane concat,
    # no transposes).
    x_attn = x2 + bout_ref[0]
    for h in range(H):                                   # static, unrolled
        qh = (qkv3[:, :, h * Dh:(h + 1) * Dh] * scale).astype(jnp.bfloat16)
        kh = qkv3[:, :, D + h * Dh:D + (h + 1) * Dh].astype(jnp.bfloat16)
        vh = qkv3[:, :, 2 * D + h * Dh:2 * D + (h + 1) * Dh].astype(jnp.bfloat16)
        s = jnp.einsum('bqd,bkd->bqk', qh, kh,
                       preferred_element_type=jnp.float32) + mask3    # (Bt, L, L)
        s = s - jnp.max(s, axis=-1, keepdims=True)
        p = jnp.exp(s)
        p = p * pl.reciprocal(jnp.sum(p, axis=-1, keepdims=True), approx=True)
        ctx_h = jnp.einsum('bqk,bkd->bqd', p.astype(jnp.bfloat16), vh,
                           preferred_element_type=jnp.float32)        # (Bt, L, Dh)
        x_attn = x_attn + jnp.dot(
            ctx_h.reshape(Bt * L, Dh).astype(jnp.bfloat16),
            wout[h * Dh:(h + 1) * Dh, :],
            preferred_element_type=jnp.float32)
    x2 = x_attn

    # ---------------- x = x + c_proj(quick_gelu(c_fc(ln_2(x))))
    h2 = _layernorm(x2, ln2g_ref[0], ln2b_ref[0]).astype(jnp.bfloat16)
    f = jnp.dot(h2, wfc_ref[0],
                preferred_element_type=jnp.float32) + bfc_ref[0]      # (Bt*L, 4D)
    f = f * jax.nn.sigmoid(1.702 * f)                                 # QuickGELU
    m = jnp.dot(f.astype(jnp.bfloat16), wproj_ref[0],
                preferred_element_type=jnp.float32) + bproj_ref[0]
    o_ref[...] = (x2 + m).reshape(Bt, L, D)


def text_transformer(x, mask, params, n_head):
    """x: (B, L_pad, D) f32 token-major; mask: (L_pad, L_pad) f32 additive."""
    B, L, D = x.shape
    layers = params['wqkv'].shape[0]
    # Batch tile: amortizes weight DMA.  TODO(synk): re-derive Bt for v7x
    # (64 MiB VMEM) at large D; 8 is sized for D<=768 with L_pad=128.
    Bt = next(t for t in (8, 4, 2, 1) if B % t == 0)

    def w_spec(arr):
        return pl.BlockSpec((1,) + arr.shape[1:], lambda b, l: (l, 0, 0))

    x_spec = pl.BlockSpec((Bt, L, D), lambda b, l: (b, 0, 0))
    mask_spec = pl.BlockSpec((L, L), lambda b, l: (0, 0))
    in_specs = [x_spec, mask_spec,
                w_spec(params['wqkv']), w_spec(params['bqkv']),
                w_spec(params['wout']), w_spec(params['bout']),
                w_spec(params['ln1_g']), w_spec(params['ln1_b']),
                w_spec(params['ln2_g']), w_spec(params['ln2_b']),
                w_spec(params['wfc']), w_spec(params['bfc']),
                w_spec(params['wproj']), w_spec(params['bproj'])]

    return pl.pallas_call(
        partial(_transformer_kernel, n_head),
        out_shape=jax.ShapeDtypeStruct((B, L, D), jnp.float32),
        grid_spec=pltpu.PrefetchScalarGridSpec(
            num_scalar_prefetch=0, grid=(B // Bt, layers),
            in_specs=in_specs, out_specs=x_spec),
        compiler_params=pltpu.CompilerParams(
            dimension_semantics=("parallel", "arbitrary"),
            vmem_limit_bytes=VMEM_LIMIT),
    )(x, mask, params['wqkv'], params['bqkv'], params['wout'], params['bout'],
      params['ln1_g'], params['ln1_b'], params['ln2_g'], params['ln2_b'],
      params['wfc'], params['bfc'], params['wproj'], params['bproj'])


# ----------------------------------- projections, normalization, logit matmul
def _head_kernel(img_ref, txt_ref, lnfg_ref, lnfb_ref, wip_ref, wtp_ref,
                 ls_ref, logits_ref):
    # text_embed = ln_final(x_eot) @ text_projection
    t = _layernorm(txt_ref[...], lnfg_ref[...], lnfb_ref[...])
    txt_e = jnp.dot(t.astype(jnp.bfloat16), wtp_ref[...],
                    preferred_element_type=jnp.float32)
    # image_embed = visual_feats @ image_projection
    img_e = jnp.dot(img_ref[...].astype(jnp.bfloat16), wip_ref[...],
                    preferred_element_type=jnp.float32)
    # L2 normalize (f32)
    img_n = img_e * jax.lax.rsqrt(jnp.sum(img_e * img_e, axis=-1, keepdims=True))
    txt_n = txt_e * jax.lax.rsqrt(jnp.sum(txt_e * txt_e, axis=-1, keepdims=True))
    scale = jnp.exp(ls_ref[0, 0])            # logit_scale from SMEM
    logits_ref[...] = scale * jax.lax.dot_general(
        img_n, txt_n, (((1,), (1,)), ((), ())),
        preferred_element_type=jnp.float32)


def head(img_feats, txt_eot, params):
    B = img_feats.shape[0]
    return pl.pallas_call(
        _head_kernel,
        out_shape=jax.ShapeDtypeStruct((B, B), jnp.float32),
        in_specs=[VMEM_SPEC] * 6 + [SMEM_SPEC],
        out_specs=VMEM_SPEC,
        compiler_params=pltpu.CompilerParams(vmem_limit_bytes=VMEM_LIMIT),
    )(img_feats, txt_eot, params['lnf_g'], params['lnf_b'],
      params['image_projection'], params['text_projection'],
      params['logit_scale'])


# ------------------------------------------------------------------ end-to-end
def clip_forward(params, image, text, n_head):
    B = image.shape[0]

    # encode_image: synthetic vision model (single Linear on flattened NCHW).
    # TODO(synk): vision_model is an injected external nn.Module in the
    # reference; a deterministic K-tiled linear encoder stands in for it here.
    img_flat = image.reshape(B, -1).astype(jnp.bfloat16)   # bf16 cast in wrapper
    vis_feats = vision_linear(img_flat, params['vis_w'], params['vis_b'])

    # encode_text (embedding gather + pos add are XLA glue; transformer fused).
    x = jnp.take(params['tok_emb'], text, axis=0) + params['pos_emb'][None]
    L = x.shape[1]
    L_pad = ((L + 127) // 128) * 128                        # lane-dense context
    x = jnp.pad(x, ((0, 0), (0, L_pad - L), (0, 0))).astype(jnp.float32)
    # Additive causal mask over the padded length.  Padded key columns are
    # automatically masked for every real query because col >= L > row.
    rows = jnp.arange(L_pad)[:, None]
    cols = jnp.arange(L_pad)[None, :]
    mask = jnp.where(cols > rows, -1e9, 0.0).astype(jnp.float32)

    y = text_transformer(x, mask, params, n_head)           # (B, L_pad, D)

    # EOT gather mirrors CLIP's text.argmax(-1) convention; argmax is taken
    # over the ORIGINAL (unpadded) token ids so padding never leaks in.
    eot = jnp.argmax(text, axis=-1)
    x_eot = y[jnp.arange(B), eot]                            # (B, D)

    logits = head(vis_feats, x_eot, params)
    return logits, logits.T


def init_params(key, *, embed_dim, vision_width, vision_in,
                context_length, vocab_size, width, heads, layers):
    del heads  # head split handled at call time
    ks = jax.random.split(key, 9)
    proj_std = width ** -0.5 * (2 * layers) ** -0.5
    attn_std = width ** -0.5
    fc_std = (2 * width) ** -0.5

    def normal(k, shape, std, dtype=jnp.bfloat16):
        return (std * jax.random.normal(k, shape, jnp.float32)).astype(dtype)

    kq, ko, kf, kp2 = jax.random.split(ks[8], 4)
    # Transformer weights: stacked over layers, stored (in, out) so the token-
    # major stream does plain x @ W; bf16.  Biases / LayerNorm params: f32,
    # lane-dense (layers, 1, out).
    return {
        'tok_emb': normal(ks[0], (vocab_size, width), 0.02, jnp.float32),
        'pos_emb': normal(ks[1], (context_length, width), 0.01, jnp.float32),
        'image_projection': normal(ks[2], (vision_width, embed_dim),
                                   vision_width ** -0.5),
        'text_projection': normal(ks[3], (width, embed_dim), width ** -0.5),
        'logit_scale': jnp.full((1, 1), math.log(1.0 / 0.07), jnp.float32),
        'lnf_g': jnp.ones((1, width), jnp.float32),
        'lnf_b': jnp.zeros((1, width), jnp.float32),
        'vis_w': normal(ks[4], (vision_in, vision_width), vision_in ** -0.5),
        'vis_b': jnp.zeros((1, vision_width), jnp.float32),
        'wqkv': normal(kq, (layers, width, 3 * width), attn_std),
        'bqkv': jnp.zeros((layers, 1, 3 * width), jnp.float32),
        'wout': normal(ko, (layers, width, width), proj_std),
        'bout': jnp.zeros((layers, 1, width), jnp.float32),
        'ln1_g': jnp.ones((layers, 1, width), jnp.float32),
        'ln1_b': jnp.zeros((layers, 1, width), jnp.float32),
        'ln2_g': jnp.ones((layers, 1, width), jnp.float32),
        'ln2_b': jnp.zeros((layers, 1, width), jnp.float32),
        'wfc': normal(kf, (layers, width, 4 * width), fc_std),
        'bfc': jnp.zeros((layers, 1, 4 * width), jnp.float32),
        'wproj': normal(kp2, (layers, 4 * width, width), proj_std),
        'bproj': jnp.zeros((layers, 1, width), jnp.float32),
    }


if __name__ == "__main__":
    B, C, Hc, Wc = 2, 4, 16, 16
    context_length, vocab_size = 8, 64
    width, heads, layers = 32, 4, 2
    embed_dim, vision_width = 16, 32

    key = jax.random.PRNGKey(0)
    kp, ki, kt = jax.random.split(key, 3)
    params = init_params(kp, embed_dim=embed_dim, vision_width=vision_width,
                         vision_in=C * Hc * Wc, context_length=context_length,
                         vocab_size=vocab_size, width=width, heads=heads,
                         layers=layers)
    image = jax.random.normal(ki, (B, C, Hc, Wc), jnp.float32)
    text = jax.random.randint(kt, (B, context_length), 0, vocab_size, jnp.int32)

    fwd = jax.jit(partial(clip_forward, n_head=heads))
    logits, logits_t = fwd(params, image, text)
    jax.block_until_ready((logits, logits_t))

    assert logits.shape == (B, B) and logits_t.shape == (B, B)
    assert bool(jnp.allclose(logits, logits_t.T, atol=1e-4))
    assert bool(jnp.all(jnp.isfinite(logits)))
    print("KERNEL_OK")
</pallas_src>

<mosaic_0001>
module attributes {stable_mosaic.version = 11 : i64} {
  func.func @_transformer_kernel(%arg0: i32, %arg1: i32, %arg2: memref<2x128x32xf32, #tpu.memory_space<vmem>>, %arg3: memref<128x128xf32, #tpu.memory_space<vmem>>, %arg4: memref<1x32x96xbf16, #tpu.memory_space<vmem>>, %arg5: memref<1x1x96xf32, #tpu.memory_space<vmem>>, %arg6: memref<1x32x32xbf16, #tpu.memory_space<vmem>>, %arg7: memref<1x1x32xf32, #tpu.memory_space<vmem>>, %arg8: memref<1x1x32xf32, #tpu.memory_space<vmem>>, %arg9: memref<1x1x32xf32, #tpu.memory_space<vmem>>, %arg10: memref<1x1x32xf32, #tpu.memory_space<vmem>>, %arg11: memref<1x1x32xf32, #tpu.memory_space<vmem>>, %arg12: memref<1x32x128xbf16, #tpu.memory_space<vmem>>, %arg13: memref<1x1x128xf32, #tpu.memory_space<vmem>>, %arg14: memref<1x128x32xbf16, #tpu.memory_space<vmem>>, %arg15: memref<1x1x32xf32, #tpu.memory_space<vmem>>, %arg16: memref<2x128x32xf32, #tpu.memory_space<vmem>>) attributes {dimension_semantics = [#tpu.dimension_semantics<parallel>, #tpu.dimension_semantics<arbitrary>], iteration_bounds = array<i64: 1, 2>, scalar_prefetch = 0 : i64, scratch_operands = 0 : i64, tpu.core_type = #tpu.core_type<tc>, window_params = [{transform_indices = @transform_0, window_bounds = array<i64: 2, 128, 32>}, {pipeline_mode = #tpu.pipeline_mode<synchronous>, transform_indices = @transform_1, window_bounds = array<i64: 128, 128>}, {transform_indices = @transform_2, window_bounds = array<i64: 1, 32, 96>}, {transform_indices = @transform_3, window_bounds = array<i64: 1, 1, 96>}, {transform_indices = @transform_4, window_bounds = array<i64: 1, 32, 32>}, {transform_indices = @transform_5, window_bounds = array<i64: 1, 1, 32>}, {transform_indices = @transform_6, window_bounds = array<i64: 1, 1, 32>}, {transform_indices = @transform_7, window_bounds = array<i64: 1, 1, 32>}, {transform_indices = @transform_8, window_bounds = array<i64: 1, 1, 32>}, {transform_indices = @transform_9, window_bounds = array<i64: 1, 1, 32>}, {transform_indices = @transform_10, window_bounds = array<i64: 1, 32, 128>}, {transform_indices = @transform_11, window_bounds = array<i64: 1, 1, 128>}, {transform_indices = @transform_12, window_bounds = array<i64: 1, 128, 32>}, {transform_indices = @transform_13, window_bounds = array<i64: 1, 1, 32>}, {transform_indices = @transform_14, window_bounds = array<i64: 2, 128, 32>}]} {
    %c0_i32 = arith.constant 0 : i32
    %0 = arith.cmpi eq, %arg1, %c0_i32 : i32
    %1 = arith.extui %0 : i1 to i32
    %c0_i32_0 = arith.constant 0 : i32
    %2 = arith.cmpi ne, %1, %c0_i32_0 : i32
    scf.if %2 {
      %c0_82 = arith.constant 0 : index
      %c0_83 = arith.constant 0 : index
      %c0_84 = arith.constant 0 : index
      %210 = vector.load %arg2[%c0_82, %c0_83, %c0_84] : memref<2x128x32xf32, #tpu.memory_space<vmem>>, vector<2x128x32xf32>
      %c0_85 = arith.constant 0 : index
      %c0_86 = arith.constant 0 : index
      %c0_87 = arith.constant 0 : index
      %211 = vector.load %arg16[%c0_85, %c0_86, %c0_87] : memref<2x128x32xf32, #tpu.memory_space<vmem>>, vector<2x128x32xf32>
      tpu.vector_store %arg16[%c0_85, %c0_86, %c0_87], %210 {strides = array<i32>} : memref<2x128x32xf32, #tpu.memory_space<vmem>>, vector<2x128x32xf32>,
    } else {
    }
    %c0 = arith.constant 0 : index
    %c0_1 = arith.constant 0 : index
    %c0_2 = arith.constant 0 : index
    %3 = vector.load %arg16[%c0, %c0_1, %c0_2] : memref<2x128x32xf32, #tpu.memory_space<vmem>>, vector<2x128x32xf32>
    %4 = vector.shape_cast %3 : vector<2x128x32xf32> to vector<256x32xf32>
    %c0_3 = arith.constant 0 : index
    %c0_4 = arith.constant 0 : index
    %c0_5 = arith.constant 0 : index
    %5 = vector.load %arg8[%c0_3, %c0_4, %c0_5] : memref<1x1x32xf32, #tpu.memory_space<vmem>>, vector<1x1x32xf32>
    %6 = vector.shape_cast %5 : vector<1x1x32xf32> to vector<1x32xf32>
    %c0_6 = arith.constant 0 : index
    %c0_7 = arith.constant 0 : index
    %c0_8 = arith.constant 0 : index
    %7 = vector.load %arg9[%c0_6, %c0_7, %c0_8] : memref<1x1x32xf32, #tpu.memory_space<vmem>>, vector<1x1x32xf32>
    %8 = vector.shape_cast %7 : vector<1x1x32xf32> to vector<1x32xf32>
    %cst = arith.constant dense<0.000000e+00> : vector<256xf32>
    %9 = vector.multi_reduction <add>, %4, %cst [1] : vector<256x32xf32> to vector<256xf32>
    %10 = vector.shape_cast %9 : vector<256xf32> to vector<256x1xf32>
    %cst_9 = arith.constant 3.200000e+01 : f32
    %11 = vector.broadcast %cst_9 : f32 to vector<256x1xf32>
    %12 = arith.divf %10, %11 : vector<256x1xf32>
    %13 = vector.broadcast %12 : vector<256x1xf32> to vector<256x32xf32>
    %14 = arith.subf %4, %13 : vector<256x32xf32>
    %15 = arith.mulf %14, %14 : vector<256x32xf32>
    %cst_10 = arith.constant dense<0.000000e+00> : vector<256xf32>
    %16 = vector.multi_reduction <add>, %15, %cst_10 [1] : vector<256x32xf32> to vector<256xf32>
    %17 = vector.shape_cast %16 : vector<256xf32> to vector<256x1xf32>
    %cst_11 = arith.constant 3.200000e+01 : f32
    %18 = vector.broadcast %cst_11 : f32 to vector<256x1xf32>
    %19 = arith.divf %17, %18 : vector<256x1xf32>
    %20 = vector.broadcast %12 : vector<256x1xf32> to vector<256x32xf32>
    %21 = arith.subf %4, %20 : vector<256x32xf32>
    %cst_12 = arith.constant 9.99999974E-6 : f32
    %22 = vector.broadcast %cst_12 : f32 to vector<256x1xf32>
    %23 = arith.addf %19, %22 : vector<256x1xf32>
    %24 = math.rsqrt %23 : vector<256x1xf32>
    %25 = vector.broadcast %24 : vector<256x1xf32> to vector<256x32xf32>
    %26 = arith.mulf %21, %25 : vector<256x32xf32>
    %27 = vector.broadcast %6 : vector<1x32xf32> to vector<256x32xf32>
    %28 = arith.mulf %26, %27 : vector<256x32xf32>
    %29 = vector.broadcast %8 : vector<1x32xf32> to vector<256x32xf32>
    %30 = arith.addf %28, %29 : vector<256x32xf32>
    %31 = arith.truncf %30 : vector<256x32xf32> to vector<256x32xbf16>
    %c0_13 = arith.constant 0 : index
    %c0_14 = arith.constant 0 : index
    %c0_15 = arith.constant 0 : index
    %32 = vector.load %arg4[%c0_13, %c0_14, %c0_15] : memref<1x32x96xbf16, #tpu.memory_space<vmem>>, vector<1x32x96xbf16>
    %33 = vector.shape_cast %32 : vector<1x32x96xbf16> to vector<32x96xbf16>
    %cst_16 = arith.constant dense<0.000000e+00> : vector<256x96xf32>
    %34 = tpu.matmul %31, %33, %cst_16 {dimension_numbers = #tpu.dot_dimension_numbers<[1], [0], [0], [1], [0, 0, 1, 1], [], []>} : vector<256x32xbf16>, vector<32x96xbf16>, vector<256x96xf32> -> vector<256x96xf32>
    %c0_17 = arith.constant 0 : index
    %c0_18 = arith.constant 0 : index
    %c0_19 = arith.constant 0 : index
    %35 = vector.load %arg5[%c0_17, %c0_18, %c0_19] : memref<1x1x96xf32, #tpu.memory_space<vmem>>, vector<1x1x96xf32>
    %36 = vector.shape_cast %35 : vector<1x1x96xf32> to vector<1x96xf32>
    %37 = vector.broadcast %36 : vector<1x96xf32> to vector<256x96xf32>
    %38 = arith.addf %34, %37 : vector<256x96xf32>
    %39 = vector.shape_cast %38 : vector<256x96xf32> to vector<2x128x96xf32>
    %c0_20 = arith.constant 0 : index
    %c0_21 = arith.constant 0 : index
    %c0_22 = arith.constant 0 : index
    %40 = vector.load %arg6[%c0_20, %c0_21, %c0_22] : memref<1x32x32xbf16, #tpu.memory_space<vmem>>, vector<1x32x32xbf16>
    %41 = vector.shape_cast %40 : vector<1x32x32xbf16> to vector<32x32xbf16>
    %c0_23 = arith.constant 0 : index
    %c0_24 = arith.constant 0 : index
    %42 = vector.load %arg3[%c0_23, %c0_24] : memref<128x128xf32, #tpu.memory_space<vmem>>, vector<128x128xf32>
    %43 = vector.shape_cast %42 : vector<128x128xf32> to vector<1x128x128xf32>
    %44 = vector.broadcast %43 : vector<1x128x128xf32> to vector<2x128x128xf32>
    %c0_25 = arith.constant 0 : index
    %c0_26 = arith.constant 0 : index
    %c0_27 = arith.constant 0 : index
    %45 = vector.load %arg7[%c0_25, %c0_26, %c0_27] : memref<1x1x32xf32, #tpu.memory_space<vmem>>, vector<1x1x32xf32>
    %46 = vector.shape_cast %45 : vector<1x1x32xf32> to vector<1x32xf32>
    %47 = vector.broadcast %46 : vector<1x32xf32> to vector<256x32xf32>
    %48 = arith.addf %4, %47 : vector<256x32xf32>
    %49 = vector.extract_strided_slice %39 {offsets = [0, 0, 0], sizes = [2, 128, 8], strides = [1, 1, 1]} : vector<2x128x96xf32> to vector<2x128x8xf32>
    %cst_28 = arith.constant 0.353553385 : f32
    %50 = vector.broadcast %cst_28 : f32 to vector<2x128x8xf32>
    %51 = arith.mulf %49, %50 : vector<2x128x8xf32>
    %52 = arith.truncf %51 : vector<2x128x8xf32> to vector<2x128x8xbf16>
    %53 = vector.extract_strided_slice %39 {offsets = [0, 0, 32], sizes = [2, 128, 8], strides = [1, 1, 1]} : vector<2x128x96xf32> to vector<2x128x8xf32>
    %54 = arith.truncf %53 : vector<2x128x8xf32> to vector<2x128x8xbf16>
    %55 = vector.extract_strided_slice %39 {offsets = [0, 0, 64], sizes = [2, 128, 8], strides = [1, 1, 1]} : vector<2x128x96xf32> to vector<2x128x8xf32>
    %56 = arith.truncf %55 : vector<2x128x8xf32> to vector<2x128x8xbf16>
    "tpu.trace_start"() <{level = 10 : i32, message = "bqd,bkd->bqk"}> : () -> ()
    %cst_29 = arith.constant dense<0.000000e+00> : vector<2x128x128xf32>
    %57 = tpu.matmul %52, %54, %cst_29 {dimension_numbers = #tpu.dot_dimension_numbers<[2], [2], [1], [1], [0, 0, 0, 1, 1, 1], [0], [0]>} : vector<2x128x8xbf16>, vector<2x128x8xbf16>, vector<2x128x128xf32> -> vector<2x128x128xf32>
    "tpu.trace_stop"() : () -> ()
    %58 = arith.addf %57, %44 : vector<2x128x128xf32>
    %cst_30 = arith.constant dense<0xFF800000> : vector<2x128xf32>
    %59 = vector.multi_reduction <maximumf>, %58, %cst_30 [2] : vector<2x128x128xf32> to vector<2x128xf32>
    %60 = vector.shape_cast %59 : vector<2x128xf32> to vector<2x128x1xf32>
    %61 = vector.broadcast %60 : vector<2x128x1xf32> to vector<2x128x128xf32>
    %62 = arith.subf %58, %61 : vector<2x128x128xf32>
    %63 = math.exp %62 : vector<2x128x128xf32>
    %cst_31 = arith.constant dense<0.000000e+00> : vector<2x128xf32>
    %64 = vector.multi_reduction <add>, %63, %cst_31 [2] : vector<2x128x128xf32> to vector<2x128xf32>
    %65 = vector.shape_cast %64 : vector<2x128xf32> to vector<2x128x1xf32>
    %66 = tpu.reciprocal %65 {approx = true} : vector<2x128x1xf32> -> vector<2x128x1xf32>
    %67 = vector.broadcast %66 : vector<2x128x1xf32> to vector<2x128x128xf32>
    %68 = arith.mulf %63, %67 : vector<2x128x128xf32>
    %69 = arith.truncf %68 : vector<2x128x128xf32> to vector<2x128x128xbf16>
    "tpu.trace_start"() <{level = 10 : i32, message = "bqk,bkd->bqd"}> : () -> ()
    %cst_32 = arith.constant dense<0.000000e+00> : vector<2x128x8xf32>
    %70 = tpu.matmul %69, %56, %cst_32 {dimension_numbers = #tpu.dot_dimension_numbers<[2], [1], [1], [2], [0, 0, 0, 1, 1, 2], [0], [0]>} : vector<2x128x128xbf16>, vector<2x128x8xbf16>, vector<2x128x8xf32> -> vector<2x128x8xf32>
    "tpu.trace_stop"() : () -> ()
    %71 = vector.shape_cast %70 : vector<2x128x8xf32> to vector<256x8xf32>
    %72 = arith.truncf %71 : vector<256x8xf32> to vector<256x8xbf16>
    %73 = vector.extract_strided_slice %41 {offsets = [0, 0], sizes = [8, 32], strides = [1, 1]} : vector<32x32xbf16> to vector<8x32xbf16>
    %cst_33 = arith.constant dense<0.000000e+00> : vector<256x32xf32>
    %74 = tpu.matmul %72, %73, %cst_33 {dimension_numbers = #tpu.dot_dimension_numbers<[1], [0], [0], [1], [0, 0, 1, 1], [], []>} : vector<256x8xbf16>, vector<8x32xbf16>, vector<256x32xf32> -> vector<256x32xf32>
    %75 = arith.addf %48, %74 : vector<256x32xf32>
    %76 = vector.extract_strided_slice %39 {offsets = [0, 0, 8], sizes = [2, 128, 8], strides = [1, 1, 1]} : vector<2x128x96xf32> to vector<2x128x8xf32>
    %cst_34 = arith.constant 0.353553385 : f32
    %77 = vector.broadcast %cst_34 : f32 to vector<2x128x8xf32>
    %78 = arith.mulf %76, %77 : vector<2x128x8xf32>
    %79 = arith.truncf %78 : vector<2x128x8xf32> to vector<2x128x8xbf16>
    %80 = vector.extract_strided_slice %39 {offsets = [0, 0, 40], sizes = [2, 128, 8], strides = [1, 1, 1]} : vector<2x128x96xf32> to vector<2x128x8xf32>
    %81 = arith.truncf %80 : vector<2x128x8xf32> to vector<2x128x8xbf16>
    %82 = vector.extract_strided_slice %39 {offsets = [0, 0, 72], sizes = [2, 128, 8], strides = [1, 1, 1]} : vector<2x128x96xf32> to vector<2x128x8xf32>
    %83 = arith.truncf %82 : vector<2x128x8xf32> to vector<2x128x8xbf16>
    "tpu.trace_start"() <{level = 10 : i32, message = "bqd,bkd->bqk"}> : () -> ()
    %cst_35 = arith.constant dense<0.000000e+00> : vector<2x128x128xf32>
    %84 = tpu.matmul %79, %81, %cst_35 {dimension_numbers = #tpu.dot_dimension_numbers<[2], [2], [1], [1], [0, 0, 0, 1, 1, 1], [0], [0]>} : vector<2x128x8xbf16>, vector<2x128x8xbf16>, vector<2x128x128xf32> -> vector<2x128x128xf32>
    "tpu.trace_stop"() : () -> ()
    %85 = arith.addf %84, %44 : vector<2x128x128xf32>
    %cst_36 = arith.constant dense<0xFF800000> : vector<2x128xf32>
    %86 = vector.multi_reduction <maximumf>, %85, %cst_36 [2] : vector<2x128x128xf32> to vector<2x128xf32>
    %87 = vector.shape_cast %86 : vector<2x128xf32> to vector<2x128x1xf32>
    %88 = vector.broadcast %87 : vector<2x128x1xf32> to vector<2x128x128xf32>
    %89 = arith.subf %85, %88 : vector<2x128x128xf32>
    %90 = math.exp %89 : vector<2x128x128xf32>
    %cst_37 = arith.constant dense<0.000000e+00> : vector<2x128xf32>
    %91 = vector.multi_reduction <add>, %90, %cst_37 [2] : vector<2x128x128xf32> to vector<2x128xf32>
    %92 = vector.shape_cast %91 : vector<2x128xf32> to vector<2x128x1xf32>
    %93 = tpu.reciprocal %92 {approx = true} : vector<2x128x1xf32> -> vector<2x128x1xf32>
    %94 = vector.broadcast %93 : vector<2x128x1xf32> to vector<2x128x128xf32>
    %95 = arith.mulf %90, %94 : vector<2x128x128xf32>
    %96 = arith.truncf %95 : vector<2x128x128xf32> to vector<2x128x128xbf16>
    "tpu.trace_start"() <{level = 10 : i32, message = "bqk,bkd->bqd"}> : () -> ()
    %cst_38 = arith.constant dense<0.000000e+00> : vector<2x128x8xf32>
    %97 = tpu.matmul %96, %83, %cst_38 {dimension_numbers = #tpu.dot_dimension_numbers<[2], [1], [1], [2], [0, 0, 0, 1, 1, 2], [0], [0]>} : vector<2x128x128xbf16>, vector<2x128x8xbf16>, vector<2x128x8xf32> -> vector<2x128x8xf32>
    "tpu.trace_stop"() : () -> ()
    %98 = vector.shape_cast %97 : vector<2x128x8xf32> to vector<256x8xf32>
    %99 = arith.truncf %98 : vector<256x8xf32> to vector<256x8xbf16>
    %100 = vector.extract_strided_slice %41 {offsets = [8, 0], sizes = [8, 32], strides = [1, 1]} : vector<32x32xbf16> to vector<8x32xbf16>
    %cst_39 = arith.constant dense<0.000000e+00> : vector<256x32xf32>
    %101 = tpu.matmul %99, %100, %cst_39 {dimension_numbers = #tpu.dot_dimension_numbers<[1], [0], [0], [1], [0, 0, 1, 1], [], []>} : vector<256x8xbf16>, vector<8x32xbf16>, vector<256x32xf32> -> vector<256x32xf32>
    %102 = arith.addf %75, %101 : vector<256x32xf32>
    %103 = vector.extract_strided_slice %39 {offsets = [0, 0, 16], sizes = [2, 128, 8], strides = [1, 1, 1]} : vector<2x128x96xf32> to vector<2x128x8xf32>
    %cst_40 = arith.constant 0.353553385 : f32
    %104 = vector.broadcast %cst_40 : f32 to vector<2x128x8xf32>
    %105 = arith.mulf %103, %104 : vector<2x128x8xf32>
    %106 = arith.truncf %105 : vector<2x128x8xf32> to vector<2x128x8xbf16>
    %107 = vector.extract_strided_slice %39 {offsets = [0, 0, 48], sizes = [2, 128, 8], strides = [1, 1, 1]} : vector<2x128x96xf32> to vector<2x128x8xf32>
    %108 = arith.truncf %107 : vector<2x128x8xf32> to vector<2x128x8xbf16>
    %109 = vector.extract_strided_slice %39 {offsets = [0, 0, 80], sizes = [2, 128, 8], strides = [1, 1, 1]} : vector<2x128x96xf32> to vector<2x128x8xf32>
    %110 = arith.truncf %109 : vector<2x128x8xf32> to vector<2x128x8xbf16>
    "tpu.trace_start"() <{level = 10 : i32, message = "bqd,bkd->bqk"}> : () -> ()
    %cst_41 = arith.constant dense<0.000000e+00> : vector<2x128x128xf32>
    %111 = tpu.matmul %106, %108, %cst_41 {dimension_numbers = #tpu.dot_dimension_numbers<[2], [2], [1], [1], [0, 0, 0, 1, 1, 1], [0], [0]>} : vector<2x128x8xbf16>, vector<2x128x8xbf16>, vector<2x128x128xf32> -> vector<2x128x128xf32>
    "tpu.trace_stop"() : () -> ()
    %112 = arith.addf %111, %44 : vector<2x128x128xf32>
    %cst_42 = arith.constant dense<0xFF800000> : vector<2x128xf32>
    %113 = vector.multi_reduction <maximumf>, %112, %cst_42 [2] : vector<2x128x128xf32> to vector<2x128xf32>
    %114 = vector.shape_cast %113 : vector<2x128xf32> to vector<2x128x1xf32>
    %115 = vector.broadcast %114 : vector<2x128x1xf32> to vector<2x128x128xf32>
    %116 = arith.subf %112, %115 : vector<2x128x128xf32>
    %117 = math.exp %116 : vector<2x128x128xf32>
    %cst_43 = arith.constant dense<0.000000e+00> : vector<2x128xf32>
    %118 = vector.multi_reduction <add>, %117, %cst_43 [2] : vector<2x128x128xf32> to vector<2x128xf32>
    %119 = vector.shape_cast %118 : vector<2x128xf32> to vector<2x128x1xf32>
    %120 = tpu.reciprocal %119 {approx = true} : vector<2x128x1xf32> -> vector<2x128x1xf32>
    %121 = vector.broadcast %120 : vector<2x128x1xf32> to vector<2x128x128xf32>
    %122 = arith.mulf %117, %121 : vector<2x128x128xf32>
    %123 = arith.truncf %122 : vector<2x128x128xf32> to vector<2x128x128xbf16>
    "tpu.trace_start"() <{level = 10 : i32, message = "bqk,bkd->bqd"}> : () -> ()
    %cst_44 = arith.constant dense<0.000000e+00> : vector<2x128x8xf32>
    %124 = tpu.matmul %123, %110, %cst_44 {dimension_numbers = #tpu.dot_dimension_numbers<[2], [1], [1], [2], [0, 0, 0, 1, 1, 2], [0], [0]>} : vector<2x128x128xbf16>, vector<2x128x8xbf16>, vector<2x128x8xf32> -> vector<2x128x8xf32>
    "tpu.trace_stop"() : () -> ()
    %125 = vector.shape_cast %124 : vector<2x128x8xf32> to vector<256x8xf32>
    %126 = arith.truncf %125 : vector<256x8xf32> to vector<256x8xbf16>
    %127 = vector.extract_strided_slice %41 {offsets = [16, 0], sizes = [8, 32], strides = [1, 1]} : vector<32x32xbf16> to vector<8x32xbf16>
    %cst_45 = arith.constant dense<0.000000e+00> : vector<256x32xf32>
    %128 = tpu.matmul %126, %127, %cst_45 {dimension_numbers = #tpu.dot_dimension_numbers<[1], [0], [0], [1], [0, 0, 1, 1], [], []>} : vector<256x8xbf16>, vector<8x32xbf16>, vector<256x32xf32> -> vector<256x32xf32>
    %129 = arith.addf %102, %128 : vector<256x32xf32>
    %130 = vector.extract_strided_slice %39 {offsets = [0, 0, 24], sizes = [2, 128, 8], strides = [1, 1, 1]} : vector<2x128x96xf32> to vector<2x128x8xf32>
    %cst_46 = arith.constant 0.353553385 : f32
    %131 = vector.broadcast %cst_46 : f32 to vector<2x128x8xf32>
    %132 = arith.mulf %130, %131 : vector<2x128x8xf32>
    %133 = arith.truncf %132 : vector<2x128x8xf32> to vector<2x128x8xbf16>
    %134 = vector.extract_strided_slice %39 {offsets = [0, 0, 56], sizes = [2, 128, 8], strides = [1, 1, 1]} : vector<2x128x96xf32> to vector<2x128x8xf32>
    %135 = arith.truncf %134 : vector<2x128x8xf32> to vector<2x128x8xbf16>
    %136 = vector.extract_strided_slice %39 {offsets = [0, 0, 88], sizes = [2, 128, 8], strides = [1, 1, 1]} : vector<2x128x96xf32> to vector<2x128x8xf32>
    %137 = arith.truncf %136 : vector<2x128x8xf32> to vector<2x128x8xbf16>
    "tpu.trace_start"() <{level = 10 : i32, message = "bqd,bkd->bqk"}> : () -> ()
    %cst_47 = arith.constant dense<0.000000e+00> : vector<2x128x128xf32>
    %138 = tpu.matmul %133, %135, %cst_47 {dimension_numbers = #tpu.dot_dimension_numbers<[2], [2], [1], [1], [0, 0, 0, 1, 1, 1], [0], [0]>} : vector<2x128x8xbf16>, vector<2x128x8xbf16>, vector<2x128x128xf32> -> vector<2x128x128xf32>
    "tpu.trace_stop"() : () -> ()
    %139 = arith.addf %138, %44 : vector<2x128x128xf32>
    %cst_48 = arith.constant dense<0xFF800000> : vector<2x128xf32>
    %140 = vector.multi_reduction <maximumf>, %139, %cst_48 [2] : vector<2x128x128xf32> to vector<2x128xf32>
    %141 = vector.shape_cast %140 : vector<2x128xf32> to vector<2x128x1xf32>
    %142 = vector.broadcast %141 : vector<2x128x1xf32> to vector<2x128x128xf32>
    %143 = arith.subf %139, %142 : vector<2x128x128xf32>
    %144 = math.exp %143 : vector<2x128x128xf32>
    %cst_49 = arith.constant dense<0.000000e+00> : vector<2x128xf32>
    %145 = vector.multi_reduction <add>, %144, %cst_49 [2] : vector<2x128x128xf32> to vector<2x128xf32>
    %146 = vector.shape_cast %145 : vector<2x128xf32> to vector<2x128x1xf32>
    %147 = tpu.reciprocal %146 {approx = true} : vector<2x128x1xf32> -> vector<2x128x1xf32>
    %148 = vector.broadcast %147 : vector<2x128x1xf32> to vector<2x128x128xf32>
    %149 = arith.mulf %144, %148 : vector<2x128x128xf32>
    %150 = arith.truncf %149 : vector<2x128x128xf32> to vector<2x128x128xbf16>
    "tpu.trace_start"() <{level = 10 : i32, message = "bqk,bkd->bqd"}> : () -> ()
    %cst_50 = arith.constant dense<0.000000e+00> : vector<2x128x8xf32>
    %151 = tpu.matmul %150, %137, %cst_50 {dimension_numbers = #tpu.dot_dimension_numbers<[2], [1], [1], [2], [0, 0, 0, 1, 1, 2], [0], [0]>} : vector<2x128x128xbf16>, vector<2x128x8xbf16>, vector<2x128x8xf32> -> vector<2x128x8xf32>
    "tpu.trace_stop"() : () -> ()
    %152 = vector.shape_cast %151 : vector<2x128x8xf32> to vector<256x8xf32>
    %153 = arith.truncf %152 : vector<256x8xf32> to vector<256x8xbf16>
    %154 = vector.extract_strided_slice %41 {offsets = [24, 0], sizes = [8, 32], strides = [1, 1]} : vector<32x32xbf16> to vector<8x32xbf16>
    %cst_51 = arith.constant dense<0.000000e+00> : vector<256x32xf32>
    %155 = tpu.matmul %153, %154, %cst_51 {dimension_numbers = #tpu.dot_dimension_numbers<[1], [0], [0], [1], [0, 0, 1, 1], [], []>} : vector<256x8xbf16>, vector<8x32xbf16>, vector<256x32xf32> -> vector<256x32xf32>
    %156 = arith.addf %129, %155 : vector<256x32xf32>
    %c0_52 = arith.constant 0 : index
    %c0_53 = arith.constant 0 : index
    %c0_54 = arith.constant 0 : index
    %157 = vector.load %arg10[%c0_52, %c0_53, %c0_54] : memref<1x1x32xf32, #tpu.memory_space<vmem>>, vector<1x1x32xf32>
    %158 = vector.shape_cast %157 : vector<1x1x32xf32> to vector<1x32xf32>
    %c0_55 = arith.constant 0 : index
    %c0_56 = arith.constant 0 : index
    %c0_57 = arith.constant 0 : index
    %159 = vector.load %arg11[%c0_55, %c0_56, %c0_57] : memref<1x1x32xf32, #tpu.memory_space<vmem>>, vector<1x1x32xf32>
    %160 = vector.shape_cast %159 : vector<1x1x32xf32> to vector<1x32xf32>
    %cst_58 = arith.constant dense<0.000000e+00> : vector<256xf32>
    %161 = vector.multi_reduction <add>, %156, %cst_58 [1] : vector<256x32xf32> to vector<256xf32>
    %162 = vector.shape_cast %161 : vector<256xf32> to vector<256x1xf32>
    %cst_59 = arith.constant 3.200000e+01 : f32
    %163 = vector.broadcast %cst_59 : f32 to vector<256x1xf32>
    %164 = arith.divf %162, %163 : vector<256x1xf32>
    %165 = vector.broadcast %164 : vector<256x1xf32> to vector<256x32xf32>
    %166 = arith.subf %156, %165 : vector<256x32xf32>
    %167 = arith.mulf %166, %166 : vector<256x32xf32>
    %cst_60 = arith.constant dense<0.000000e+00> : vector<256xf32>
    %168 = vector.multi_reduction <add>, %167, %cst_60 [1] : vector<256x32xf32> to vector<256xf32>
    %169 = vector.shape_cast %168 : vector<256xf32> to vector<256x1xf32>
    %cst_61 = arith.constant 3.200000e+01 : f32
    %170 = vector.broadcast %cst_61 : f32 to vector<256x1xf32>
    %171 = arith.divf %169, %170 : vector<256x1xf32>
    %172 = vector.broadcast %164 : vector<256x1xf32> to vector<256x32xf32>
    %173 = arith.subf %156, %172 : vector<256x32xf32>
    %cst_62 = arith.constant 9.99999974E-6 : f32
    %174 = vector.broadcast %cst_62 : f32 to vector<256x1xf32>
    %175 = arith.addf %171, %174 : vector<256x1xf32>
    %176 = math.rsqrt %175 : vector<256x1xf32>
    %177 = vector.broadcast %176 : vector<256x1xf32> to vector<256x32xf32>
    %178 = arith.mulf %173, %177 : vector<256x32xf32>
    %179 = vector.broadcast %158 : vector<1x32xf32> to vector<256x32xf32>
    %180 = arith.mulf %178, %179 : vector<256x32xf32>
    %181 = vector.broadcast %160 : vector<1x32xf32> to vector<256x32xf32>
    %182 = arith.addf %180, %181 : vector<256x32xf32>
    %183 = arith.truncf %182 : vector<256x32xf32> to vector<256x32xbf16>
    %c0_63 = arith.constant 0 : index
    %c0_64 = arith.constant 0 : index
    %c0_65 = arith.constant 0 : index
    %184 = vector.load %arg12[%c0_63, %c0_64, %c0_65] : memref<1x32x128xbf16, #tpu.memory_space<vmem>>, vector<1x32x128xbf16>
    %185 = vector.shape_cast %184 : vector<1x32x128xbf16> to vector<32x128xbf16>
    %cst_66 = arith.constant dense<0.000000e+00> : vector<256x128xf32>
    %186 = tpu.matmul %183, %185, %cst_66 {dimension_numbers = #tpu.dot_dimension_numbers<[1], [0], [0], [1], [0, 0, 1, 1], [], []>} : vector<256x32xbf16>, vector<32x128xbf16>, vector<256x128xf32> -> vector<256x128xf32>
    %c0_67 = arith.constant 0 : index
    %c0_68 = arith.constant 0 : index
    %c0_69 = arith.constant 0 : index
    %187 = vector.load %arg13[%c0_67, %c0_68, %c0_69] : memref<1x1x128xf32, #tpu.memory_space<vmem>>, vector<1x1x128xf32>
    %188 = vector.shape_cast %187 : vector<1x1x128xf32> to vector<1x128xf32>
    %189 = vector.broadcast %188 : vector<1x128xf32> to vector<256x128xf32>
    %190 = arith.addf %186, %189 : vector<256x128xf32>
    %cst_70 = arith.constant 1.702000e+00 : f32
    %191 = vector.broadcast %cst_70 : f32 to vector<256x128xf32>
    %192 = arith.mulf %191, %190 : vector<256x128xf32>
    %193 = arith.negf %192 : vector<256x128xf32>
    %194 = math.exp %193 : vector<256x128xf32>
    %cst_71 = arith.constant 1.000000e+00 : f32
    %195 = vector.broadcast %cst_71 : f32 to vector<256x128xf32>
    %196 = arith.addf %195, %194 : vector<256x128xf32>
    %197 = arith.divf %195, %196 : vector<256x128xf32>
    %198 = arith.mulf %190, %197 : vector<256x128xf32>
    %199 = arith.truncf %198 : vector<256x128xf32> to vector<256x128xbf16>
    %c0_72 = arith.constant 0 : index
    %c0_73 = arith.constant 0 : index
    %c0_74 = arith.constant 0 : index
    %200 = vector.load %arg14[%c0_72, %c0_73, %c0_74] : memref<1x128x32xbf16, #tpu.memory_space<vmem>>, vector<1x128x32xbf16>
    %201 = vector.shape_cast %200 : vector<1x128x32xbf16> to vector<128x32xbf16>
    %cst_75 = arith.constant dense<0.000000e+00> : vector<256x32xf32>
    %202 = tpu.matmul %199, %201, %cst_75 {dimension_numbers = #tpu.dot_dimension_numbers<[1], [0], [0], [1], [0, 0, 1, 1], [], []>} : vector<256x128xbf16>, vector<128x32xbf16>, vector<256x32xf32> -> vector<256x32xf32>
    %c0_76 = arith.constant 0 : index
    %c0_77 = arith.constant 0 : index
    %c0_78 = arith.constant 0 : index
    %203 = vector.load %arg15[%c0_76, %c0_77, %c0_78] : memref<1x1x32xf32, #tpu.memory_space<vmem>>, vector<1x1x32xf32>
    %204 = vector.shape_cast %203 : vector<1x1x32xf32> to vector<1x32xf32>
    %205 = vector.broadcast %204 : vector<1x32xf32> to vector<256x32xf32>
    %206 = arith.addf %202, %205 : vector<256x32xf32>
    %207 = arith.addf %156, %206 : vector<256x32xf32>
    %208 = vector.shape_cast %207 : vector<256x32xf32> to vector<2x128x32xf32>
    %c0_79 = arith.constant 0 : index
    %c0_80 = arith.constant 0 : index
    %c0_81 = arith.constant 0 : index
    %209 = vector.load %arg16[%c0_79, %c0_80, %c0_81] : memref<2x128x32xf32, #tpu.memory_space<vmem>>, vector<2x128x32xf32>
    tpu.vector_store %arg16[%c0_79, %c0_80, %c0_81], %208 {strides = array<i32>} : memref<2x128x32xf32, #tpu.memory_space<vmem>>, vector<2x128x32xf32>,
    return
  }
  func.func @transform_0(%arg0: i32, %arg1: i32) -> (i32, i32, i32) {
    %c0_i32 = arith.constant 0 : i32
    %c0_i32_0 = arith.constant 0 : i32
    %c0_i32_1 = arith.constant 0 : i32
    return %arg0, %c0_i32, %c0_i32_0 : i32, i32, i32
  }
  func.func @transform_1(%arg0: i32, %arg1: i32) -> (i32, i32) {
    %c0_i32 = arith.constant 0 : i32
    %c0_i32_0 = arith.constant 0 : i32
    %c0_i32_1 = arith.constant 0 : i32
    return %c0_i32, %c0_i32_0 : i32, i32
  }
  func.func @transform_2(%arg0: i32, %arg1: i32) -> (i32, i32, i32) {
    %c0_i32 = arith.constant 0 : i32
    %c0_i32_0 = arith.constant 0 : i32
    %c0_i32_1 = arith.constant 0 : i32
    return %arg1, %c0_i32, %c0_i32_0 : i32, i32, i32
  }
  func.func @transform_3(%arg0: i32, %arg1: i32) -> (i32, i32, i32) {
    %c0_i32 = arith.constant 0 : i32
    %c0_i32_0 = arith.constant 0 : i32
    %c0_i32_1 = arith.constant 0 : i32
    return %arg1, %c0_i32, %c0_i32_0 : i32, i32, i32
  }
  func.func @transform_4(%arg0: i32, %arg1: i32) -> (i32, i32, i32) {
    %c0_i32 = arith.constant 0 : i32
    %c0_i32_0 = arith.constant 0 : i32
    %c0_i32_1 = arith.constant 0 : i32
    return %arg1, %c0_i32, %c0_i32_0 : i32, i32, i32
  }
  func.func @transform_5(%arg0: i32, %arg1: i32) -> (i32, i32, i32) {
    %c0_i32 = arith.constant 0 : i32
    %c0_i32_0 = arith.constant 0 : i32
    %c0_i32_1 = arith.constant 0 : i32
    return %arg1, %c0_i32, %c0_i32_0 : i32, i32, i32
  }
  func.func @transform_6(%arg0: i32, %arg1: i32) -> (i32, i32, i32) {
    %c0_i32 = arith.constant 0 : i32
    %c0_i32_0 = arith.constant 0 : i32
    %c0_i32_1 = arith.constant 0 : i32
    return %arg1, %c0_i32, %c0_i32_0 : i32, i32, i32
  }
  func.func @transform_7(%arg0: i32, %arg1: i32) -> (i32, i32, i32) {
    %c0_i32 = arith.constant 0 : i32
    %c0_i32_0 = arith.constant 0 : i32
    %c0_i32_1 = arith.constant 0 : i32
    return %arg1, %c0_i32, %c0_i32_0 : i32, i32, i32
  }
  func.func @transform_8(%arg0: i32, %arg1: i32) -> (i32, i32, i32) {
    %c0_i32 = arith.constant 0 : i32
    %c0_i32_0 = arith.constant 0 : i32
    %c0_i32_1 = arith.constant 0 : i32
    return %arg1, %c0_i32, %c0_i32_0 : i32, i32, i32
  }
  func.func @transform_9(%arg0: i32, %arg1: i32) -> (i32, i32, i32) {
    %c0_i32 = arith.constant 0 : i32
    %c0_i32_0 = arith.constant 0 : i32
    %c0_i32_1 = arith.constant 0 : i32
    return %arg1, %c0_i32, %c0_i32_0 : i32, i32, i32
  }
  func.func @transform_10(%arg0: i32, %arg1: i32) -> (i32, i32, i32) {
    %c0_i32 = arith.constant 0 : i32
    %c0_i32_0 = arith.constant 0 : i32
    %c0_i32_1 = arith.constant 0 : i32
    return %arg1, %c0_i32, %c0_i32_0 : i32, i32, i32
  }
  func.func @transform_11(%arg0: i32, %arg1: i32) -> (i32, i32, i32) {
    %c0_i32 = arith.constant 0 : i32
    %c0_i32_0 = arith.constant 0 : i32
    %c0_i32_1 = arith.constant 0 : i32
    return %arg1, %c0_i32, %c0_i32_0 : i32, i32, i32
  }
  func.func @transform_12(%arg0: i32, %arg1: i32) -> (i32, i32, i32) {
    %c0_i32 = arith.constant 0 : i32
    %c0_i32_0 = arith.constant 0 : i32
    %c0_i32_1 = arith.constant 0 : i32
    return %arg1, %c0_i32, %c0_i32_0 : i32, i32, i32
  }
  func.func @transform_13(%arg0: i32, %arg1: i32) -> (i32, i32, i32) {
    %c0_i32 = arith.constant 0 : i32
    %c0_i32_0 = arith.constant 0 : i32
    %c0_i32_1 = arith.constant 0 : i32
    return %arg1, %c0_i32, %c0_i32_0 : i32, i32, i32
  }
  func.func @transform_14(%arg0: i32, %arg1: i32) -> (i32, i32, i32) {
    %c0_i32 = arith.constant 0 : i32
    %c0_i32_0 = arith.constant 0 : i32
    %c0_i32_1 = arith.constant 0 : i32
    return %arg0, %c0_i32, %c0_i32_0 : i32, i32, i32
  }
}

module attributes {stable_mosaic.version = 11 : i64} {
  func.func @_vision_linear_kernel(%arg0: i32, %arg1: i32, %arg2: memref<2x1024xbf16, #tpu.memory_space<vmem>>, %arg3: memref<1024x32xbf16, #tpu.memory_space<vmem>>, %arg4: memref<1x32xf32, #tpu.memory_space<vmem>>, %arg5: memref<2x32xf32, #tpu.memory_space<vmem>>) attributes {dimension_semantics = [#tpu.dimension_semantics<parallel>, #tpu.dimension_semantics<arbitrary>], iteration_bounds = array<i64: 1, 1>, scalar_prefetch = 0 : i64, scratch_operands = 0 : i64, tpu.core_type = #tpu.core_type<tc>, window_params = [{transform_indices = @transform_0, window_bounds = array<i64: 2, 1024>}, {transform_indices = @transform_1, window_bounds = array<i64: 1024, 32>}, {transform_indices = @transform_2, window_bounds = array<i64: 1, 32>}, {transform_indices = @transform_3, window_bounds = array<i64: 2, 32>}]} {
    %c0_i32 = arith.constant 0 : i32
    %0 = arith.cmpi eq, %arg1, %c0_i32 : i32
    %1 = arith.extui %0 : i1 to i32
    %c0_i32_0 = arith.constant 0 : i32
    %2 = arith.cmpi ne, %1, %c0_i32_0 : i32
    scf.if %2 {
      %c0_8 = arith.constant 0 : index
      %c0_9 = arith.constant 0 : index
      %9 = vector.load %arg4[%c0_8, %c0_9] : memref<1x32xf32, #tpu.memory_space<vmem>>, vector<1x32xf32>
      %10 = vector.shape_cast %9 : vector<1x32xf32> to vector<1x32xf32>
      %11 = vector.broadcast %10 : vector<1x32xf32> to vector<2x32xf32>
      %c0_10 = arith.constant 0 : index
      %c0_11 = arith.constant 0 : index
      %12 = vector.load %arg5[%c0_10, %c0_11] : memref<2x32xf32, #tpu.memory_space<vmem>>, vector<2x32xf32>
      tpu.vector_store %arg5[%c0_10, %c0_11], %11 {strides = array<i32>} : memref<2x32xf32, #tpu.memory_space<vmem>>, vector<2x32xf32>,
    } else {
    }
    %c0 = arith.constant 0 : index
    %c0_1 = arith.constant 0 : index
    %3 = vector.load %arg5[%c0, %c0_1] : memref<2x32xf32, #tpu.memory_space<vmem>>, vector<2x32xf32>
    %c0_2 = arith.constant 0 : index
    %c0_3 = arith.constant 0 : index
    %4 = vector.load %arg2[%c0_2, %c0_3] : memref<2x1024xbf16, #tpu.memory_space<vmem>>, vector<2x1024xbf16>
    %c0_4 = arith.constant 0 : index
    %c0_5 = arith.constant 0 : index
    %5 = vector.load %arg3[%c0_4, %c0_5] : memref<1024x32xbf16, #tpu.memory_space<vmem>>, vector<1024x32xbf16>
    %cst = arith.constant dense<0.000000e+00> : vector<2x32xf32>
    %6 = tpu.matmul %4, %5, %cst {dimension_numbers = #tpu.dot_dimension_numbers<[1], [0], [0], [1], [0, 0, 1, 1], [], []>} : vector<2x1024xbf16>, vector<1024x32xbf16>, vector<2x32xf32> -> vector<2x32xf32>
    %7 = arith.addf %3, %6 : vector<2x32xf32>
    %c0_6 = arith.constant 0 : index
    %c0_7 = arith.constant 0 : index
    %8 = vector.load %arg5[%c0_6, %c0_7] : memref<2x32xf32, #tpu.memory_space<vmem>>, vector<2x32xf32>
    tpu.vector_store %arg5[%c0_6, %c0_7], %7 {strides = array<i32>} : memref<2x32xf32, #tpu.memory_space<vmem>>, vector<2x32xf32>,
    return
  }
  func.func @transform_0(%arg0: i32, %arg1: i32) -> (i32, i32) {
    %c0_i32 = arith.constant 0 : i32
    %c0_i32_0 = arith.constant 0 : i32
    return %c0_i32, %arg1 : i32, i32
  }
  func.func @transform_1(%arg0: i32, %arg1: i32) -> (i32, i32) {
    %c0_i32 = arith.constant 0 : i32
    return %arg1, %arg0 : i32, i32
  }
  func.func @transform_2(%arg0: i32, %arg1: i32) -> (i32, i32) {
    %c0_i32 = arith.constant 0 : i32
    %c0_i32_0 = arith.constant 0 : i32
    return %c0_i32, %arg0 : i32, i32
  }
  func.func @transform_3(%arg0: i32, %arg1: i32) -> (i32, i32) {
    %c0_i32 = arith.constant 0 : i32
    %c0_i32_0 = arith.constant 0 : i32
    return %c0_i32, %arg0 : i32, i32
  }
}

module attributes {stable_mosaic.version = 11 : i64} {
  func.func @_head_kernel(%arg0: memref<2x32xf32, #tpu.memory_space<vmem>>, %arg1: memref<2x32xf32, #tpu.memory_space<vmem>>, %arg2: memref<1x32xf32, #tpu.memory_space<vmem>>, %arg3: memref<1x32xf32, #tpu.memory_space<vmem>>, %arg4: memref<32x16xbf16, #tpu.memory_space<vmem>>, %arg5: memref<32x16xbf16, #tpu.memory_space<vmem>>, %arg6: memref<1x1xf32, #tpu.memory_space<smem>>, %arg7: memref<2x2xf32, #tpu.memory_space<vmem>>) attributes {dimension_semantics = [], scalar_prefetch = 0 : i64, scratch_operands = 0 : i64, tpu.core_type = #tpu.core_type<tc>} {
    %c0 = arith.constant 0 : index
    %c0_0 = arith.constant 0 : index
    %0 = vector.load %arg1[%c0, %c0_0] : memref<2x32xf32, #tpu.memory_space<vmem>>, vector<2x32xf32>
    %c0_1 = arith.constant 0 : index
    %c0_2 = arith.constant 0 : index
    %1 = vector.load %arg2[%c0_1, %c0_2] : memref<1x32xf32, #tpu.memory_space<vmem>>, vector<1x32xf32>
    %c0_3 = arith.constant 0 : index
    %c0_4 = arith.constant 0 : index
    %2 = vector.load %arg3[%c0_3, %c0_4] : memref<1x32xf32, #tpu.memory_space<vmem>>, vector<1x32xf32>
    %cst = arith.constant dense<0.000000e+00> : vector<2xf32>
    %3 = vector.multi_reduction <add>, %0, %cst [1] : vector<2x32xf32> to vector<2xf32>
    %4 = vector.shape_cast %3 : vector<2xf32> to vector<2x1xf32>
    %cst_5 = arith.constant 3.200000e+01 : f32
    %5 = vector.broadcast %cst_5 : f32 to vector<2x1xf32>
    %6 = arith.divf %4, %5 : vector<2x1xf32>
    %7 = vector.broadcast %6 : vector<2x1xf32> to vector<2x32xf32>
    %8 = arith.subf %0, %7 : vector<2x32xf32>
    %9 = arith.mulf %8, %8 : vector<2x32xf32>
    %cst_6 = arith.constant dense<0.000000e+00> : vector<2xf32>
    %10 = vector.multi_reduction <add>, %9, %cst_6 [1] : vector<2x32xf32> to vector<2xf32>
    %11 = vector.shape_cast %10 : vector<2xf32> to vector<2x1xf32>
    %cst_7 = arith.constant 3.200000e+01 : f32
    %12 = vector.broadcast %cst_7 : f32 to vector<2x1xf32>
    %13 = arith.divf %11, %12 : vector<2x1xf32>
    %14 = vector.broadcast %6 : vector<2x1xf32> to vector<2x32xf32>
    %15 = arith.subf %0, %14 : vector<2x32xf32>
    %cst_8 = arith.constant 9.99999974E-6 : f32
    %16 = vector.broadcast %cst_8 : f32 to vector<2x1xf32>
    %17 = arith.addf %13, %16 : vector<2x1xf32>
    %18 = math.rsqrt %17 : vector<2x1xf32>
    %19 = vector.broadcast %18 : vector<2x1xf32> to vector<2x32xf32>
    %20 = arith.mulf %15, %19 : vector<2x32xf32>
    %21 = vector.broadcast %1 : vector<1x32xf32> to vector<2x32xf32>
    %22 = arith.mulf %20, %21 : vector<2x32xf32>
    %23 = vector.broadcast %2 : vector<1x32xf32> to vector<2x32xf32>
    %24 = arith.addf %22, %23 : vector<2x32xf32>
    %25 = arith.truncf %24 : vector<2x32xf32> to vector<2x32xbf16>
    %c0_9 = arith.constant 0 : index
    %c0_10 = arith.constant 0 : index
    %26 = vector.load %arg5[%c0_9, %c0_10] : memref<32x16xbf16, #tpu.memory_space<vmem>>, vector<32x16xbf16>
    %cst_11 = arith.constant dense<0.000000e+00> : vector<2x16xf32>
    %27 = tpu.matmul %25, %26, %cst_11 {dimension_numbers = #tpu.dot_dimension_numbers<[1], [0], [0], [1], [0, 0, 1, 1], [], []>} : vector<2x32xbf16>, vector<32x16xbf16>, vector<2x16xf32> -> vector<2x16xf32>
    %c0_12 = arith.constant 0 : index
    %c0_13 = arith.constant 0 : index
    %28 = vector.load %arg0[%c0_12, %c0_13] : memref<2x32xf32, #tpu.memory_space<vmem>>, vector<2x32xf32>
    %29 = arith.truncf %28 : vector<2x32xf32> to vector<2x32xbf16>
    %c0_14 = arith.constant 0 : index
    %c0_15 = arith.constant 0 : index
    %30 = vector.load %arg4[%c0_14, %c0_15] : memref<32x16xbf16, #tpu.memory_space<vmem>>, vector<32x16xbf16>
    %cst_16 = arith.constant dense<0.000000e+00> : vector<2x16xf32>
    %31 = tpu.matmul %29, %30, %cst_16 {dimension_numbers = #tpu.dot_dimension_numbers<[1], [0], [0], [1], [0, 0, 1, 1], [], []>} : vector<2x32xbf16>, vector<32x16xbf16>, vector<2x16xf32> -> vector<2x16xf32>
    %32 = arith.mulf %31, %31 : vector<2x16xf32>
    %cst_17 = arith.constant dense<0.000000e+00> : vector<2xf32>
    %33 = vector.multi_reduction <add>, %32, %cst_17 [1] : vector<2x16xf32> to vector<2xf32>
    %34 = vector.shape_cast %33 : vector<2xf32> to vector<2x1xf32>
    %35 = math.rsqrt %34 : vector<2x1xf32>
    %36 = vector.broadcast %35 : vector<2x1xf32> to vector<2x16xf32>
    %37 = arith.mulf %31, %36 : vector<2x16xf32>
    %38 = arith.mulf %27, %27 : vector<2x16xf32>
    %cst_18 = arith.constant dense<0.000000e+00> : vector<2xf32>
    %39 = vector.multi_reduction <add>, %38, %cst_18 [1] : vector<2x16xf32> to vector<2xf32>
    %40 = vector.shape_cast %39 : vector<2xf32> to vector<2x1xf32>
    %41 = math.rsqrt %40 : vector<2x1xf32>
    %42 = vector.broadcast %41 : vector<2x1xf32> to vector<2x16xf32>
    %43 = arith.mulf %27, %42 : vector<2x16xf32>
    %c0_19 = arith.constant 0 : index
    %c0_20 = arith.constant 0 : index
    %44 = memref.load %arg6[%c0_19, %c0_20] : memref<1x1xf32, #tpu.memory_space<smem>>
    %45 = math.exp %44 : f32
    %cst_21 = arith.constant dense<0.000000e+00> : vector<2x2xf32>
    %46 = tpu.matmul %37, %43, %cst_21 {dimension_numbers = #tpu.dot_dimension_numbers<[1], [1], [0], [0], [0, 0, 1, 0], [], []>} : vector<2x16xf32>, vector<2x16xf32>, vector<2x2xf32> -> vector<2x2xf32>
    %47 = vector.broadcast %45 : f32 to vector<2x2xf32>
    %48 = arith.mulf %47, %46 : vector<2x2xf32>
    %c0_22 = arith.constant 0 : index
    %c0_23 = arith.constant 0 : index
    %49 = vector.load %arg7[%c0_22, %c0_23] : memref<2x2xf32, #tpu.memory_space<vmem>>, vector<2x2xf32>
    tpu.vector_store %arg7[%c0_22, %c0_23], %48 {strides = array<i32>} : memref<2x2xf32, #tpu.memory_space<vmem>>, vector<2x2xf32>,
    return
  }
}

</mosaic_0001>

<bundles_post_ra>
// kernel: clip_forward.5
= control target key start
LH: loop header
LB: loop body
LE: loop exit
PB: predicated region body
PF: predicated region fallthrough
CT: control target
= control target key end

     0   :  { %vm31_vm0 = vcmask 254976   ;;  %v340_v7 = vmov 0.0   ;;  %vm341_vm1 = vmmov 0   ;;  %vm77_vm2 = vcmask 261120   ;;  %s415_s1 = inlined_call_operand.vmem [shape: f32[2,32], index: 1, kind: input, shape index: {}]   ;;  %s416_s5 = inlined_call_operand.vmem [shape: bf16[32,16], index: 5, kind: input, shape index: {}]   ;;  %s417_s4 = inlined_call_operand.vmem [shape: bf16[32,16], index: 4, kind: input, shape index: {}]   ;;  %s418_s0 = inlined_call_operand.vmem [shape: f32[2,32], index: 0, kind: input, shape index: {}]   ;;  %s419_s2 = inlined_call_operand.vmem [shape: f32[1,32], index: 2, kind: input, shape index: {}]   ;;  %s420_s3 = inlined_call_operand.vmem [shape: f32[1,32], index: 3, kind: input, shape index: {}]   ;;  %s421_s6 = inlined_call_operand.<no memory space> [shape: f32[1,1], index: 6, kind: input, shape index: {}]   ;;  %s422_s7 = inlined_call_operand.vmem [shape: f32[2,2], index: 7, kind: output, shape index: {}]  }
   0x1   :  { %v28_v0 = vld [vmem:[%s415_s1] sm:$0x3]  ;;  %303 = vmatprep.subr.bf16.mxu0 %v340_v7  ;;  %v328_v8 = vld [vmem:[%s416_s5 + $0x8] sm:$0xff]   ;;  %311 = vmatprep.subr.bf16.mxu1 %v340_v7  ;;  %vm183_vm3 = vcmask 123904   ;;  %v196_v36 = vstv %s421_s6  ;;  %vm200_vm4 = vcmask 130048   ;;  %vm279_vm5 = vcmask 9216  }
   0x2   :  { %v32_v1 = vsel %vm31_vm0, %v28_v0, 0.0  ;;  %v329_v9 = vld [vmem:[%s417_s4 + $0x8] sm:$0xff]   ;;  %307 = vmatprep.mubr.msk.bf16.mxu0 %vm341_vm1, %v340_v7  ;;  %315 = vmatprep.mubr.msk.bf16.mxu1 %vm341_vm1, %v340_v7  ;;  %v330_v10 = vld [vmem:[%s416_s5] sm:$0xff]   ;;  %v197_v37 = vmul.f32 1.442695, %v196_v36 }
   0x3   :  { %33 = vadd.xlane.f32.xlu0 %v32_v1  ;;  %304 = vmatpush3.bf16.msra.mxu0 %v328_v8  ;;  %v331_v11 = vld [vmem:[%s417_s4] sm:$0xff]  }
   0x4   :  { %312 = vmatpush3.bf16.msra.mxu1 %v329_v9  ;;  %305 = vmatprep.subr.bf16.mxu0 %v340_v7  ;;  %v121_v12 = vld [vmem:[%s418_s0] sm:$0x3] }
   0x5   :  { %313 = vmatprep.subr.bf16.mxu1 %v340_v7  ;;  %v122_v13 = vpack.c.bf16 %v121_v12, %v121_v12  ;;  %v285_v18 = vld [vmem:[%s419_s2] ss:$0 sm:$0xff] }
   0x6   :  { %v286_v20 = vld [vmem:[%s420_s3] ss:$0 sm:$0xff] }
   0x7   :  { %306 = vmatpush3.bf16.msra.mxu0 %v330_v10 }
   0x8   :  { %314 = vmatpush3.bf16.msra.mxu1 %v331_v11  ;;  %319 = vmatprep.subr.mxu0 %v340_v7 }
   0xb   :  { %316 = vmatmul.mubr.msk.bf16.vlgmr.msra.gmra.mxu1 %vm77_vm2, %v122_v13 }
  0x8c   :  { %v34_v2 = vpop.xlane.xlu0 %33 }
  0x8d   :  { %v36_v3 = vmul.f32 0.03125, %v34_v2 }
  0x8f   :  { %v37_v4 = vsub.f32 %v28_v0, %v36_v3 }
  0x91   :  { %v38_v5 = vmul.f32 %v37_v4, %v37_v4 }
  0x93   :  { %v39_v6 = vsel %vm31_vm0, %v38_v5, 0.0 }
  0x94   :  { %40 = vadd.xlane.f32.xlu0 %v39_v6 }
  0xcb   :  { %v176_v24 = vpop.f32.mrf.mxu1 }
  0xcc   :  { %v182_v29 = vmul.f32 %v176_v24, %v176_v24 }
  0xcd   :  { %v317_v25 = vpop.f32.mrf.mxu1 }
  0xce   :  { %v184_v34 = vsel %vm183_vm3, %v182_v29, 0.0 }
  0xcf   :  { %v179_v26 = vpop.f32.mrf.mxu1 }
  0xd1   :  { %v318_v27 = vpop.f32.mrf.mxu1 }
 0x11d   :  { %v41_v14 = vpop.xlane.xlu0 %40 }
 0x11e   :  { %v42_v15 = vmul.f32 0.03125, %v41_v14 }
 0x120   :  { %v43_v16 = vadd.f32 1e-05, %v42_v15 }
 0x122   :  { %332 = vrsqrt.f32 %v43_v16 }
 0x123   :  { %334 = vpow2.f32 %v197_v37 }
 0x12f   :  { %v333_v17 = vpop.eup %332 }
 0x130   :  { %v45_v19 = vmul.f32 %v333_v17, %v37_v4  ;;  %v335_v38 = vpop.eup %334 }
 0x131   :  { %324 = vpush %v335_v38 }
 0x132   :  { %v52_v21 = vmul.f32 %v285_v18, %v45_v19 }
 0x134   :  { %v59_v22 = vadd.f32 %v286_v20, %v52_v21 }
 0x136   :  { %v60_v23 = vpack.c.bf16 %v59_v22, %v59_v22 }
 0x138   :  { %308 = vmatmul.mubr.msk.bf16.vlgmr.msra.gmra.mxu0 %vm77_vm2, %v60_v23 }
 0x139   :  { %321 = vmatprep.mubr.msk.f32.mxu0 %vm341_vm1, %v340_v7 }
 0x162   :  { %s325_s3 = spop %324 }
 0x163   :  { %v277_v45 = vstv %s325_s3 }
 0x1f8   :  { %v115_v28 = vpop.f32.mrf.mxu0 }
 0x1f9   :  { %v189_v30 = vmul.f32 %v115_v28, %v115_v28 }
 0x1fa   :  { %v309_v31 = vpop.f32.mrf.mxu0 }
 0x1fb   :  { %v190_v32 = vsel %vm183_vm3, %v189_v30, 0.0 }
 0x1fc   :  { %191 = vadd.xlane.f32.xlu1 %v190_v32  ;;  %v118_v33 = vpop.f32.mrf.mxu0 }
 0x1fe   :  { %v310_v35 = vpop.f32.mrf.mxu0 }
 0x200   :  { %185 = vadd.xlane.f32.xlu1 %v184_v34 }
 0x285   :  { %v192_v39 = vpop.xlane.xlu1 %191 }
 0x286   :  { %336 = vrsqrt.f32 %v192_v39 }
 0x289   :  { %v186_v40 = vpop.xlane.xlu1 %185 }
 0x28a   :  { %338 = vrsqrt.f32 %v186_v40 }
 0x293   :  { %v337_v41 = vpop.eup %336 }
 0x294   :  { %v194_v42 = vmul.f32 %v337_v41, %v115_v28 }
 0x296   :  { %320 = vmatpush3.xpose.msk.msra.mxu0 %vm200_vm4, %v194_v42 }
 0x297   :  { %v339_v43 = vpop.eup %338 }
 0x298   :  { %v188_v44 = vmul.f32 %v339_v43, %v176_v24 }
 0x29a   :  { %322 = vmatmul.mubr.msk.f32.vlgmr.msra.gmra.mxu0 %vm200_vm4, %v188_v44 }
 0x35a   :  { %v273_v46 = vpop.f32.mrf.mxu0 }
 0x35b   :  { %v278_v47 = vmul.f32 %v277_v45, %v273_v46 }
 0x35c   :  { %v323_v48 = vpop.f32.mrf.mxu0 }
 0x35d   :  { %280 = vst.msk [vmem:[%s422_s7] sm:$0x3] %vm279_vm5, %v278_v47 }

// kernel: clip_forward.3
= control target key start
LH: loop header
LB: loop body
LE: loop exit
PB: predicated region body
PF: predicated region fallthrough
CT: control target
= control target key end

     0   :  { %v986_v22 = vmov 1966171168   ;;  %v163_v24 = vlaneseq  ;;  %vm26_vm0 = vcmask 254976   ;;  %s1229_s1 = inlined_call_operand.vmem [shape: bf16[1024,32], index: 1, kind: input, shape index: {}]   ;;  %s1230_s0 = inlined_call_operand.vmem [shape: bf16[2,1024], index: 0, kind: input, shape index: {}]   ;;  %s1231_s2 = inlined_call_operand.vmem [shape: f32[1,32], index: 2, kind: input, shape index: {}]   ;;  %s1232_s3 = inlined_call_operand.vmem [shape: f32[2,32], index: 3, kind: output, shape index: {}]  }
   0x1   :  { %v921_v0 = vld [vmem:[%s1229_s1 + $0x78] sm:$0xff]   ;;  %v925_v4 = vld [vmem:[%s1229_s1 + $0x70] sm:$0xff]   ;;  %v929_v8 = vld [vmem:[%s1229_s1 + $0x68] sm:$0xff]   ;;  %v161_v23 = vunpack.c.l.s4 %v986_v22 }
   0x2   :  { %v922_v1 = vld [vmem:[%s1229_s1 + $0xf8] sm:$0xff]   ;;  %832 = vmatprep.subr.bf16.mxu0 %v921_v0  ;;  %v926_v5 = vld [vmem:[%s1229_s1 + $0xf0] sm:$0xff]   ;;  %v930_v9 = vld [vmem:[%s1229_s1 + $0xe8] sm:$0xff]   ;;  %v164_v30 = vshrl.u32 %v163_v24, 7 }
   0x3   :  { %v923_v2 = vld [vmem:[%s1229_s1 + $0x38] sm:$0xff]   ;;  %854 = vmatprep.subr.bf16.mxu1 %v922_v1  ;;  %v927_v6 = vld [vmem:[%s1229_s1 + $0x30] sm:$0xff]   ;;  %v931_v10 = vld [vmem:[%s1229_s1 + $0x28] sm:$0xff]   ;;  %v162_v29 = vunpack.c.0.s8 %v161_v23 }
   0x4   :  { %v924_v3 = vld [vmem:[%s1229_s1 + $0xb8] sm:$0xff]   ;;  %833 = vmatpush3.bf16.msra.mxu0 %v923_v2  ;;  %v928_v7 = vld [vmem:[%s1229_s1 + $0xb0] sm:$0xff]   ;;  %v932_v11 = vld [vmem:[%s1229_s1 + $0xa8] sm:$0xff]  }
   0x5   :  { %855 = vmatpush3.bf16.msra.mxu1 %v924_v3  ;;  %834 = vmatprep.subr.bf16.mxu0 %v925_v4  ;;  %v933_v12 = vld [vmem:[%s1229_s1 + $0x60] sm:$0xff]   ;;  %v937_v16 = vld [vmem:[%s1229_s1 + $0x58] sm:$0xff]   ;;  %v941_v20 = vld [vmem:[%s1229_s1 + $0x50] sm:$0xff]   ;;  %v1097_v35 = vsub.s32 %v162_v29, %v164_v30 }
   0x6   :  { %856 = vmatprep.subr.bf16.mxu1 %v926_v5  ;;  %v934_v13 = vld [vmem:[%s1229_s1 + $0xe0] sm:$0xff]   ;;  %v938_v17 = vld [vmem:[%s1229_s1 + $0xd8] sm:$0xff]   ;;  %v942_v21 = vld [vmem:[%s1229_s1 + $0xd0] sm:$0xff]  }
   0x7   :  { %v935_v14 = vld [vmem:[%s1229_s1 + $0x20] sm:$0xff]   ;;  %v939_v18 = vld [vmem:[%s1229_s1 + $0x18] sm:$0xff]   ;;  %v943_v25 = vld [vmem:[%s1229_s1 + $0x10] sm:$0xff]  }
   0x8   :  { %835 = vmatpush3.bf16.msra.mxu0 %v927_v6  ;;  %v936_v15 = vld [vmem:[%s1229_s1 + $0xa0] sm:$0xff]   ;;  %v940_v19 = vld [vmem:[%s1229_s1 + $0x98] sm:$0xff]   ;;  %v944_v26 = vld [vmem:[%s1229_s1 + $0x90] sm:$0xff]  }
   0x9   :  { %857 = vmatpush3.bf16.msra.mxu1 %v928_v7  ;;  %836 = vmatprep.subr.bf16.mxu0 %v929_v8  ;;  %v945_v27 = vld [vmem:[%s1229_s1 + $0x48] sm:$0xff]   ;;  %v949_v33 = vld [vmem:[%s1229_s1 + $0x40] sm:$0xff]   ;;  %v954_v41 = vld [vmem:[%s1229_s1 + $0x178] sm:$0xff]  }
   0xa   :  { %858 = vmatprep.subr.bf16.mxu1 %v930_v9  ;;  %v946_v28 = vld [vmem:[%s1229_s1 + $0xc8] sm:$0xff]   ;;  %v950_v34 = vld [vmem:[%s1229_s1 + $0xc0] sm:$0xff]   ;;  %v955_v42 = vld [vmem:[%s1229_s1 + $0x1f8] sm:$0xff]  }
   0xb   :  { %v947_v31 = vld [vmem:[%s1229_s1 + $0x8] sm:$0xff]   ;;  %v951_v36 = vld [vmem:[%s1229_s1] sm:$0xff]   ;;  %v956_v47 = vld [vmem:[%s1229_s1 + $0x138] sm:$0xff]  }
   0xc   :  { %837 = vmatpush3.bf16.msra.mxu0 %v931_v10  ;;  %v948_v32 = vld [vmem:[%s1229_s1 + $0x88] sm:$0xff]   ;;  %v952_v37 = vld [vmem:[%s1229_s1 + $0x80] sm:$0xff]   ;;  %v958_v50 = vld [vmem:[%s1229_s1 + $0x170] sm:$0xff]  }
   0xd   :  { %859 = vmatpush3.bf16.msra.mxu1 %v932_v11  ;;  %838 = vmatprep.subr.bf16.mxu0 %v933_v12  ;;  %v29_v38 = vld [vmem:[%s1230_s0] sm:$0xff]  ;;  %v957_v52 = vld [vmem:[%s1229_s1 + $0x1b8] sm:$0xff]   ;;  %v959_v54 = vld [vmem:[%s1229_s1 + $0x1f0] sm:$0xff]  }
   0xe   :  { %860 = vmatprep.subr.bf16.mxu1 %v934_v13  ;;  %v159_v39 = vcombine.high %v29_v38, %v29_v38  ;;  %v166_v40 = vrot.slane %v29_v38, %v1097_v35  ;;  %v960_v55 = vld [vmem:[%s1229_s1 + $0x130] sm:$0xff]   ;;  %v962_v57 = vld [vmem:[%s1229_s1 + $0x168] sm:$0xff]   ;;  %v966_v61 = vld [vmem:[%s1229_s1 + $0x160] sm:$0xff]  }
   0xf   :  { %v961_v58 = vld [vmem:[%s1229_s1 + $0x1b0] sm:$0xff]   ;;  %v963_v59 = vld [vmem:[%s1229_s1 + $0x1e8] sm:$0xff]   ;;  %v967_v63 = vld [vmem:[%s1229_s1 + $0x1e0] sm:$0xff]  }
  0x10   :  { %839 = vmatpush3.bf16.msra.mxu0 %v935_v14  ;;  %v174_v43 = vcombine.high %v166_v40, %v166_v40  ;;  %v182_v44 = vrot.slane %v166_v40, %v1097_v35  ;;  %v1117_v45 = vrot.slane %v159_v39, %v1097_v35  ;;  %v964_v60 = vld [vmem:[%s1229_s1 + $0x128] sm:$0xff]   ;;  %v968_v0 = vld [vmem:[%s1229_s1 + $0x120] sm:$0xff]   ;;  %v970_v1 = vld [vmem:[%s1229_s1 + $0x158] sm:$0xff]  }
  0x11   :  { %861 = vmatpush3.bf16.msra.mxu1 %v936_v15  ;;  %840 = vmatprep.subr.bf16.mxu0 %v937_v16  ;;  %v965_v62 = vld [vmem:[%s1229_s1 + $0x1a8] sm:$0xff]   ;;  %v969_v2 = vld [vmem:[%s1229_s1 + $0x1a0] sm:$0xff]   ;;  %v971_v3 = vld [vmem:[%s1229_s1 + $0x1d8] sm:$0xff]  }
  0x12   :  { %862 = vmatprep.subr.bf16.mxu1 %v938_v17  ;;  %v196_v46 = vrot.slane %v174_v43, %v1097_v35  ;;  %v175_v48 = vcombine.high %v1117_v45, %v1117_v45  ;;  %v204_v49 = vcombine.high %v182_v44, %v182_v44  ;;  %v972_v4 = vld [vmem:[%s1229_s1 + $0x118] sm:$0xff]   ;;  %v974_v5 = vld [vmem:[%s1229_s1 + $0x150] sm:$0xff]   ;;  %v978_v9 = vld [vmem:[%s1229_s1 + $0x148] sm:$0xff]   ;;  %v189_v17 = vrot.slane %v1117_v45, %v1097_v35 }
  0x13   :  { %v973_v6 = vld [vmem:[%s1229_s1 + $0x198] sm:$0xff]   ;;  %v975_v7 = vld [vmem:[%s1229_s1 + $0x1d0] sm:$0xff]   ;;  %v979_v11 = vld [vmem:[%s1229_s1 + $0x1c8] sm:$0xff]  }
  0x14   :  { %841 = vmatpush3.bf16.msra.mxu0 %v939_v18  ;;  %632 = vmatprep.mubr.bf16.mxu0 %v196_v46  ;;  %v206_v51 = vcombine.high %v196_v46, %v196_v46  ;;  %v203_v53 = vrot.slane %v175_v48, %v1097_v35  ;;  %v976_v8 = vld [vmem:[%s1229_s1 + $0x110] sm:$0xff]   ;;  %v980_v12 = vld [vmem:[%s1229_s1 + $0x108] sm:$0xff]   ;;  %v982_v13 = vld [vmem:[%s1229_s1 + $0x140] sm:$0xff]  }
  0x15   :  { %863 = vmatpush3.bf16.msra.mxu1 %v940_v19  ;;  %842 = vmatprep.subr.bf16.mxu0 %v941_v20  ;;  %v977_v10 = vld [vmem:[%s1229_s1 + $0x190] sm:$0xff]   ;;  %v981_v14 = vld [vmem:[%s1229_s1 + $0x188] sm:$0xff]   ;;  %v983_v15 = vld [vmem:[%s1229_s1 + $0x1c0] sm:$0xff]   ;;  %v205_v19 = vcombine.high %v189_v17, %v189_v17 }
  0x16   :  { %864 = vmatprep.subr.bf16.mxu1 %v942_v21  ;;  %672 = vmatprep.mubr.bf16.mxu1 %v206_v51  ;;  %v207_v56 = vcombine.high %v203_v53, %v203_v53  ;;  %v984_v16 = vld [vmem:[%s1229_s1 + $0x100] sm:$0xff]  }
  0x17   :  { %v985_v18 = vld [vmem:[%s1229_s1 + $0x180] sm:$0xff]  }
  0x18   :  { %843 = vmatpush3.bf16.msra.mxu0 %v943_v25  ;;  %v767_v20 = vld [vmem:[%s1231_s2] ss:$0 sm:$0xff] }
  0x19   :  { %865 = vmatpush3.bf16.msra.mxu1 %v944_v26  ;;  %844 = vmatprep.subr.bf16.mxu0 %v945_v27  ;;  %27 = vst.msk [vmem:[%s1232_s3] sm:$0x3] %vm26_vm0, %v767_v20 }
  0x1a   :  { %866 = vmatprep.subr.bf16.mxu1 %v946_v28 }
  0x1c   :  { %845 = vmatpush3.bf16.msra.mxu0 %v947_v31 }
  0x1d   :  { %867 = vmatpush3.bf16.msra.mxu1 %v948_v32  ;;  %846 = vmatprep.subr.bf16.mxu0 %v949_v33 }
  0x1e   :  { %868 = vmatprep.subr.bf16.mxu1 %v950_v34 }
  0x20   :  { %847 = vmatpush3.bf16.msra.mxu0 %v951_v36  ;;  %v28_v40 = vld [vmem:[%s1232_s3] sm:$0x3] }
  0x21   :  { %869 = vmatpush3.bf16.msra.mxu1 %v952_v37  ;;  %876 = vmatprep.subr.bf16.mxu0 %v954_v41 }
  0x22   :  { %898 = vmatprep.subr.bf16.mxu1 %v955_v42 }
  0x23   :  { %633 = vmatmul.mubr.bf16.vlgmr.msra.gmra.mxu0 %v182_v44 }
  0x24   :  { %877 = vmatpush3.bf16.msra.mxu0 %v956_v47  ;;  %673 = vmatmul.mubr.bf16.vlgmr.msra.gmra.mxu1 %v204_v49 }
  0x25   :  { %878 = vmatprep.subr.bf16.mxu0 %v958_v50  ;;  %899 = vmatpush3.bf16.msra.mxu1 %v957_v52 }
  0x26   :  { %712 = vmatprep.mubr.bf16.mxu0 %v203_v53  ;;  %900 = vmatprep.subr.bf16.mxu1 %v959_v54 }
  0x27   :  { %752 = vmatprep.mubr.bf16.mxu1 %v207_v56 }
  0x28   :  { %879 = vmatpush3.bf16.msra.mxu0 %v960_v55 }
  0x29   :  { %880 = vmatprep.subr.bf16.mxu0 %v962_v57  ;;  %901 = vmatpush3.bf16.msra.mxu1 %v961_v58 }
  0x2a   :  { %902 = vmatprep.subr.bf16.mxu1 %v963_v59 }
  0x2c   :  { %881 = vmatpush3.bf16.msra.mxu0 %v964_v60 }
  0x2d   :  { %882 = vmatprep.subr.bf16.mxu0 %v966_v61  ;;  %903 = vmatpush3.bf16.msra.mxu1 %v965_v62 }
  0x2e   :  { %904 = vmatprep.subr.bf16.mxu1 %v967_v63 }
  0x30   :  { %883 = vmatpush3.bf16.msra.mxu0 %v968_v0 }
  0x31   :  { %884 = vmatprep.subr.bf16.mxu0 %v970_v1  ;;  %905 = vmatpush3.bf16.msra.mxu1 %v969_v2 }
  0x32   :  { %906 = vmatprep.subr.bf16.mxu1 %v971_v3 }
  0x34   :  { %885 = vmatpush3.bf16.msra.mxu0 %v972_v4 }
  0x35   :  { %886 = vmatprep.subr.bf16.mxu0 %v974_v5  ;;  %907 = vmatpush3.bf16.msra.mxu1 %v973_v6 }
  0x36   :  { %908 = vmatprep.subr.bf16.mxu1 %v975_v7 }
  0x38   :  { %887 = vmatpush3.bf16.msra.mxu0 %v976_v8 }
  0x39   :  { %888 = vmatprep.subr.bf16.mxu0 %v978_v9  ;;  %909 = vmatpush3.bf16.msra.mxu1 %v977_v10 }
  0x3a   :  { %910 = vmatprep.subr.bf16.mxu1 %v979_v11 }
  0x3c   :  { %889 = vmatpush3.bf16.msra.mxu0 %v980_v12 }
  0x3d   :  { %890 = vmatprep.subr.bf16.mxu0 %v982_v13  ;;  %911 = vmatpush3.bf16.msra.mxu1 %v981_v14 }
  0x3e   :  { %912 = vmatprep.subr.bf16.mxu1 %v983_v15 }
  0x40   :  { %891 = vmatpush3.bf16.msra.mxu0 %v984_v16 }
  0x41   :  { %913 = vmatpush3.bf16.msra.mxu1 %v985_v18 }
  0x43   :  { %713 = vmatmul.mubr.bf16.vlgmr.msra.gmra.mxu0 %v189_v17 }
  0x44   :  { %753 = vmatmul.mubr.bf16.vlgmr.msra.gmra.mxu1 %v205_v19 }
  0xe3   :  { %v848_v21 = vpop.f32.mrf.mxu0 }
  0xe4   :  { %v870_v22 = vpop.f32.mrf.mxu1 }
  0xe5   :  { %v849_v23 = vpop.f32.mrf.mxu0 }
  0xe6   :  { %v871_v24 = vpop.f32.mrf.mxu1  ;;  %v850_v29 = vadd.f32 %v849_v23, %v848_v21 }
  0xe7   :  { %v851_v25 = vpop.f32.mrf.mxu0  ;;  %v872_v30 = vadd.f32 %v871_v24, %v870_v22 }
  0xe8   :  { %v873_v26 = vpop.f32.mrf.mxu1 }
  0xe9   :  { %v852_v27 = vpop.f32.mrf.mxu0  ;;  %v675_v34 = vadd.f32 %v872_v30, %v850_v29 }
  0xea   :  { %v874_v28 = vpop.f32.mrf.mxu1 }
 0x103   :  { %v892_v31 = vpop.f32.mrf.mxu0 }
 0x104   :  { %v914_v32 = vpop.f32.mrf.mxu1 }
 0x105   :  { %v893_v33 = vpop.f32.mrf.mxu0 }
 0x106   :  { %v894_v35 = vadd.f32 %v893_v33, %v892_v31  ;;  %v915_v36 = vpop.f32.mrf.mxu1 }
 0x107   :  { %v895_v37 = vpop.f32.mrf.mxu0  ;;  %v916_v39 = vadd.f32 %v915_v36, %v914_v32 }
 0x108   :  { %v715_v38 = vadd.f32 %v894_v35, %v675_v34  ;;  %v917_v41 = vpop.f32.mrf.mxu1 }
 0x109   :  { %v896_v42 = vpop.f32.mrf.mxu0 }
 0x10a   :  { %v755_v43 = vadd.f32 %v916_v39, %v715_v38  ;;  %v918_v44 = vpop.f32.mrf.mxu1 }
 0x10c   :  { %v760_v45 = vadd.f32 %v755_v43, %v28_v40 }
 0x10e   :  { %762 = vst.msk [vmem:[%s1232_s3] sm:$0x3] %vm26_vm0, %v760_v45 }

// kernel: clip_forward.4
= control target key start
LH: loop header
LB: loop body
LE: loop exit
PB: predicated region body
PF: predicated region fallthrough
CT: control target
= control target key end

     0   :  { %s10251_s29 = smov 0   ;;  %s10253_s30 = smov 0   ;;  %s14702_s0 = inlined_call_operand.vmem [shape: f32[2,128,32], index: 0, kind: input, shape index: {}]   ;;  %s14703_s1 = inlined_call_operand.vmem [shape: f32[128,128], index: 1, kind: input, shape index: {}]   ;;  %s14704_s2 = inlined_call_operand.vmem [shape: bf16[2,32,96], index: 2, kind: input, shape index: {}]   ;;  %s14705_s3 = inlined_call_operand.vmem [shape: f32[2,1,96], index: 3, kind: input, shape index: {}]   ;;  %s14706_s4 = inlined_call_operand.vmem [shape: bf16[2,32,32], index: 4, kind: input, shape index: {}]   ;;  %s14707_s5 = inlined_call_operand.vmem [shape: f32[2,1,32], index: 5, kind: input, shape index: {}]   ;;  %s14708_s6 = inlined_call_operand.vmem [shape: f32[2,1,32], index: 6, kind: input, shape index: {}]   ;;  %s14709_s7 = inlined_call_operand.vmem [shape: f32[2,1,32], index: 7, kind: input, shape index: {}]   ;;  %s14710_s8 = inlined_call_operand.vmem [shape: f32[2,1,32], index: 8, kind: input, shape index: {}]   ;;  %s14711_s9 = inlined_call_operand.vmem [shape: f32[2,1,32], index: 9, kind: input, shape index: {}]   ;;  %s14712_s10 = inlined_call_operand.vmem [shape: bf16[2,32,128], index: 10, kind: input, shape index: {}]   ;;  %s14713_s11 = inlined_call_operand.vmem [shape: f32[2,1,128], index: 11, kind: input, shape index: {}]   ;;  %s14714_s12 = inlined_call_operand.vmem [shape: bf16[2,128,32], index: 12, kind: input, shape index: {}]   ;;  %s14715_s13 = inlined_call_operand.vmem [shape: f32[2,1,32], index: 13, kind: input, shape index: {}]   ;;  %s14716_s14 = inlined_call_operand.vmem [shape: f32[2,128,32], index: 14, kind: output, shape index: {}]  }
   0x1   :  { %14791 = sst [smem:[#allocation65_spill]] %s14703_s1  ;;  %s10255_s15 = smov 0  }
   0x2   :  { %14792 = sst [smem:[#allocation66_spill]] %s14704_s2 }
   0x3   :  { %14793 = sst [smem:[#allocation67_spill]] %s14705_s3 }
   0x4   :  { %14794 = sst [smem:[#allocation68_spill]] %s14706_s4 }
   0x5   :  { %14795 = sst [smem:[#allocation69_spill]] %s14707_s5 }
   0x6 LB: > { %14796 = sst [smem:[#allocation2_spill]] %s10159_s30  ;;  %s33_s16 = sadd.s32 1, %s10159_s30  ;;  %s10163_s15 = sphi %s10255_s15, %s24_s15   ;;  %s10159_s30 = sphi %s10253_s30, %s15094_s30   ;;  %s10155_s29 = sphi %s10251_s29, %s15093_s29  }
   0x7   : > { %14797 = sst [smem:[#allocation3_spill]] %s10163_s15  ;;  %p7792_p0 = scmp.ge.s32.totalorder %s10163_s15, 1 }
   0x8   : > { %p34_p1 = scmp.ge.s32.totalorder %s33_s16, 2  ;;  %p530_p2 = scmp.lt.s32.totalorder %s10163_s15, 3 }
   0xa   : > { %s15096_s16 = smov (%p34_p1, %s33_s16), 0  ;;  %p531_p3 = pnand %p7792_p0, %p530_p2 }
   0xb   : > { %14798 = sst [smem:[#allocation4_spill]] %s15096_s16 }
   0xc   : > { %534 = sbr.rel (%p531_p3) target bundleno = 5045 (0x13b5), region = 76 }
  0x11   : > { %p629_p4 = scmp.lt.s32.totalorder %s10155_s29, 1  ;;  %s14800_s2 = sld [smem:[#allocation66_spill]] }
  0x12   : > { %s14801_s4 = sld [smem:[#allocation68_spill]]  ;;  %p7801_p5 = scmp.ne.s32.totalorder %s10155_s29, 0 }
  0x13   : > { %s10269_s17 = scalar_select %p629_p4, %s10155_s29, 1 }
  0x14   : > { %s14803_s5 = sld [smem:[#allocation69_spill]] }
  0x15   : > { %s8018_s18 = sshll.u32 %s10269_s17, 4  ;;  %s653_s3 = scalar_lea.vmem %s14710_s8, %s10269_s17 }
  0x16   : > { %s10311_s28 = scalar_lea.vmem %s14712_s10, %s8018_s18  ;;  %s664_s15 = scalar_lea.vmem %s14713_s11, %s10269_s17 }
  0x17   : > { %s10279_s24 = scalar_lea.vmem %s14800_s2, %s8018_s18  ;;  %s8021_s19 = sshll.u32 %s10269_s17, 6 }
  0x18   : > { %s10284_s27 = scalar_lea.vmem %s14801_s4, %s8018_s18  ;;  %s656_s4 = scalar_lea.vmem %s14711_s9, %s10269_s17 }
  0x19   : > { %14802 = sst [smem:[#allocation5_spill]] %s10284_s27  ;;  %s10321_s22 = scalar_lea.vmem %s14714_s12, %s8021_s19 }
  0x1a   : > { %s10290_s30 = scalar_lea.vmem %s14803_s5, %s10269_s17  ;;  %s672_s25 = scalar_lea.vmem %s14715_s13, %s10269_s17 }
  0x1b   : > { %684 = sbr.rel (%p7801_p5) target bundleno = 49 (0x31), region = 80 }
  0x20   : > { %v685_v0 = vld [vmem:[%s14702_s0] sm:$0xff]  ;;  %vm717_vm0 = vcmask 261120   ;;  %v686_v1 = vld [vmem:[%s14702_s0 + $0x8] sm:$0xff]  ;;  %v687_v2 = vld [vmem:[%s14702_s0 + $0x10] sm:$0xff] }
  0x21   : > { %718 = vst.msk [vmem:[%s14716_s14] sm:$0xff] %vm717_vm0, %v685_v0  ;;  %719 = vst.msk [vmem:[%s14716_s14 + $0x8] sm:$0xff] %vm717_vm0, %v686_v1  ;;  %v688_v3 = vld [vmem:[%s14702_s0 + $0x18] sm:$0xff]  ;;  %v689_v4 = vld [vmem:[%s14702_s0 + $0x20] sm:$0xff] }
  0x22   : > { %720 = vst.msk [vmem:[%s14716_s14 + $0x10] sm:$0xff] %vm717_vm0, %v687_v2  ;;  %v690_v5 = vld [vmem:[%s14702_s0 + $0x28] sm:$0xff]  ;;  %721 = vst.msk [vmem:[%s14716_s14 + $0x18] sm:$0xff] %vm717_vm0, %v688_v3  ;;  %v691_v6 = vld [vmem:[%s14702_s0 + $0x30] sm:$0xff] }
  0x23   : > { %722 = vst.msk [vmem:[%s14716_s14 + $0x20] sm:$0xff] %vm717_vm0, %v689_v4  ;;  %723 = vst.msk [vmem:[%s14716_s14 + $0x28] sm:$0xff] %vm717_vm0, %v690_v5  ;;  %v692_v7 = vld [vmem:[%s14702_s0 + $0x38] sm:$0xff]  ;;  %v693_v8 = vld [vmem:[%s14702_s0 + $0x40] sm:$0xff] }
  0x24   : > { %724 = vst.msk [vmem:[%s14716_s14 + $0x30] sm:$0xff] %vm717_vm0, %v691_v6  ;;  %725 = vst.msk [vmem:[%s14716_s14 + $0x38] sm:$0xff] %vm717_vm0, %v692_v7  ;;  %v694_v9 = vld [vmem:[%s14702_s0 + $0x48] sm:$0xff]  ;;  %v695_v10 = vld [vmem:[%s14702_s0 + $0x50] sm:$0xff] }
  0x25   : > { %726 = vst.msk [vmem:[%s14716_s14 + $0x40] sm:$0xff] %vm717_vm0, %v693_v8  ;;  %v696_v11 = vld [vmem:[%s14702_s0 + $0x58] sm:$0xff]  ;;  %727 = vst.msk [vmem:[%s14716_s14 + $0x48] sm:$0xff] %vm717_vm0, %v694_v9  ;;  %v697_v12 = vld [vmem:[%s14702_s0 + $0x60] sm:$0xff] }
  0x26   : > { %728 = vst.msk [vmem:[%s14716_s14 + $0x50] sm:$0xff] %vm717_vm0, %v695_v10  ;;  %729 = vst.msk [vmem:[%s14716_s14 + $0x58] sm:$0xff] %vm717_vm0, %v696_v11  ;;  %v698_v13 = vld [vmem:[%s14702_s0 + $0x68] sm:$0xff]  ;;  %v699_v14 = vld [vmem:[%s14702_s0 + $0x70] sm:$0xff] }
  0x27   : > { %730 = vst.msk [vmem:[%s14716_s14 + $0x60] sm:$0xff] %vm717_vm0, %v697_v12  ;;  %731 = vst.msk [vmem:[%s14716_s14 + $0x68] sm:$0xff] %vm717_vm0, %v698_v13  ;;  %v700_v15 = vld [vmem:[%s14702_s0 + $0x78] sm:$0xff]  ;;  %v701_v16 = vld [vmem:[%s14702_s0 + $0x80] sm:$0xff] }
  0x28   : > { %732 = vst.msk [vmem:[%s14716_s14 + $0x70] sm:$0xff] %vm717_vm0, %v699_v14  ;;  %v702_v17 = vld [vmem:[%s14702_s0 + $0x88] sm:$0xff]  ;;  %733 = vst.msk [vmem:[%s14716_s14 + $0x78] sm:$0xff] %vm717_vm0, %v700_v15  ;;  %v703_v18 = vld [vmem:[%s14702_s0 + $0x90] sm:$0xff] }
  0x29   : > { %734 = vst.msk [vmem:[%s14716_s14 + $0x80] sm:$0xff] %vm717_vm0, %v701_v16  ;;  %735 = vst.msk [vmem:[%s14716_s14 + $0x88] sm:$0xff] %vm717_vm0, %v702_v17  ;;  %v704_v19 = vld [vmem:[%s14702_s0 + $0x98] sm:$0xff]  ;;  %v705_v20 = vld [vmem:[%s14702_s0 + $0xa0] sm:$0xff] }
  0x2a   : > { %736 = vst.msk [vmem:[%s14716_s14 + $0x90] sm:$0xff] %vm717_vm0, %v703_v18  ;;  %737 = vst.msk [vmem:[%s14716_s14 + $0x98] sm:$0xff] %vm717_vm0, %v704_v19  ;;  %v706_v21 = vld [vmem:[%s14702_s0 + $0xa8] sm:$0xff]  ;;  %v707_v22 = vld [vmem:[%s14702_s0 + $0xb0] sm:$0xff] }
  0x2b   : > { %738 = vst.msk [vmem:[%s14716_s14 + $0xa0] sm:$0xff] %vm717_vm0, %v705_v20  ;;  %v708_v23 = vld [vmem:[%s14702_s0 + $0xb8] sm:$0xff]  ;;  %739 = vst.msk [vmem:[%s14716_s14 + $0xa8] sm:$0xff] %vm717_vm0, %v706_v21  ;;  %v709_v24 = vld [vmem:[%s14702_s0 + $0xc0] sm:$0xff] }
  0x2c   : > { %740 = vst.msk [vmem:[%s14716_s14 + $0xb0] sm:$0xff] %vm717_vm0, %v707_v22  ;;  %741 = vst.msk [vmem:[%s14716_s14 + $0xb8] sm:$0xff] %vm717_vm0, %v708_v23  ;;  %v710_v25 = vld [vmem:[%s14702_s0 + $0xc8] sm:$0xff]  ;;  %v711_v26 = vld [vmem:[%s14702_s0 + $0xd0] sm:$0xff] }
  0x2d   : > { %742 = vst.msk [vmem:[%s14716_s14 + $0xc0] sm:$0xff] %vm717_vm0, %v709_v24  ;;  %743 = vst.msk [vmem:[%s14716_s14 + $0xc8] sm:$0xff] %vm717_vm0, %v710_v25  ;;  %v712_v27 = vld [vmem:[%s14702_s0 + $0xd8] sm:$0xff]  ;;  %v713_v28 = vld [vmem:[%s14702_s0 + $0xe0] sm:$0xff] }
  0x2e   : > { %744 = vst.msk [vmem:[%s14716_s14 + $0xd0] sm:$0xff] %vm717_vm0, %v711_v26  ;;  %v714_v29 = vld [vmem:[%s14702_s0 + $0xe8] sm:$0xff]  ;;  %745 = vst.msk [vmem:[%s14716_s14 + $0xd8] sm:$0xff] %vm717_vm0, %v712_v27  ;;  %v715_v30 = vld [vmem:[%s14702_s0 + $0xf0] sm:$0xff] }
  0x2f   : > { %746 = vst.msk [vmem:[%s14716_s14 + $0xe0] sm:$0xff] %vm717_vm0, %v713_v28  ;;  %747 = vst.msk [vmem:[%s14716_s14 + $0xe8] sm:$0xff] %vm717_vm0, %v714_v29  ;;  %v716_v31 = vld [vmem:[%s14702_s0 + $0xf8] sm:$0xff] }
  0x30   : > { %748 = vst.msk [vmem:[%s14716_s14 + $0xf0] sm:$0xff] %vm717_vm0, %v715_v30  ;;  %749 = vst.msk [vmem:[%s14716_s14 + $0xf8] sm:$0xff] %vm717_vm0, %v716_v31 }
  0x31 PF: > { %v10554_v32 = vld [vmem:[%s14716_s14] sm:$0xff]  ;;  %vm784_vm1 = vcmask 261120   ;;  %v10559_v33 = vld [vmem:[%s14716_s14 + $0x10] sm:$0xff]  ;;  %v10564_v34 = vld [vmem:[%s14716_s14 + $0x8] sm:$0xff]  ;;  %s14804_s27 = scalar_lea.vmem %s14708_s6, %s10269_s17  ;;  %s14805_s16 = scalar_lea.vmem %s14709_s7, %s10269_s17  ;;  %vm1673_vm2 = vcmask 64512   ;;  %vm2598_vm3 = vcmask 1043456  }
  0x32   : > { %v785_v35 = vsel %vm784_vm1, %v10554_v32, 0.0  ;;  %v791_v36 = vsel %vm784_vm1, %v10559_v33, 0.0  ;;  %v10573_v37 = vld [vmem:[%s14716_s14 + $0x18] sm:$0xff]  ;;  %v788_v38 = vsel %vm784_vm1, %v10564_v34, 0.0  ;;  %v10582_v40 = vld [vmem:[%s14716_s14 + $0x20] sm:$0xff]  ;;  %v10587_v41 = vld [vmem:[%s14716_s14 + $0x28] sm:$0xff] }
  0x33   : > { %786 = vadd.xlane.f32.xlu0 %v785_v35  ;;  %792 = vadd.xlane.f32.xlu1 %v791_v36  ;;  %v794_v39 = vsel %vm784_vm1, %v10573_v37, 0.0  ;;  %v797_v42 = vsel %vm784_vm1, %v10582_v40, 0.0  ;;  %v800_v43 = vsel %vm784_vm1, %v10587_v41, 0.0  ;;  %v10596_v44 = vld [vmem:[%s14716_s14 + $0x30] sm:$0xff]  ;;  %v10601_v45 = vld [vmem:[%s14716_s14 + $0x38] sm:$0xff]  ;;  %v10606_v46 = vld [vmem:[%s14716_s14 + $0x40] sm:$0xff] }
  0x34   : > { %v10611_v47 = vld [vmem:[%s14716_s14 + $0x48] sm:$0xff]  ;;  %v803_v48 = vsel %vm784_vm1, %v10596_v44, 0.0  ;;  %v806_v49 = vsel %vm784_vm1, %v10601_v45, 0.0  ;;  %v809_v50 = vsel %vm784_vm1, %v10606_v46, 0.0  ;;  %v10624_v52 = vld [vmem:[%s14716_s14 + $0x50] sm:$0xff]  ;;  %v10629_v53 = vld [vmem:[%s14716_s14 + $0x58] sm:$0xff] }
  0x35   : > { %v812_v51 = vsel %vm784_vm1, %v10611_v47, 0.0  ;;  %v815_v54 = vsel %vm784_vm1, %v10624_v52, 0.0  ;;  %v818_v55 = vsel %vm784_vm1, %v10629_v53, 0.0  ;;  %v10638_v56 = vld [vmem:[%s14716_s14 + $0x60] sm:$0xff]  ;;  %v10643_v57 = vld [vmem:[%s14716_s14 + $0x68] sm:$0xff]  ;;  %v10652_v60 = vld [vmem:[%s14716_s14 + $0x70] sm:$0xff] }
  0x36   : > { %v821_v58 = vsel %vm784_vm1, %v10638_v56, 0.0  ;;  %v824_v59 = vsel %vm784_vm1, %v10643_v57, 0.0  ;;  %v10657_v61 = vld [vmem:[%s14716_s14 + $0x78] sm:$0xff]  ;;  %v827_v62 = vsel %vm784_vm1, %v10652_v60, 0.0  ;;  %v10666_v0 = vld [vmem:[%s14716_s14 + $0x80] sm:$0xff]  ;;  %v10671_v1 = vld [vmem:[%s14716_s14 + $0x88] sm:$0xff] }
  0x37   : > { %789 = vadd.xlane.f32.xlu0 %v788_v38  ;;  %795 = vadd.xlane.f32.xlu1 %v794_v39  ;;  %v830_v63 = vsel %vm784_vm1, %v10657_v61, 0.0  ;;  %v833_v2 = vsel %vm784_vm1, %v10666_v0, 0.0  ;;  %v836_v3 = vsel %vm784_vm1, %v10671_v1, 0.0  ;;  %v10680_v4 = vld [vmem:[%s14716_s14 + $0x90] sm:$0xff]  ;;  %v10685_v5 = vld [vmem:[%s14716_s14 + $0x98] sm:$0xff]  ;;  %v10694_v8 = vld [vmem:[%s14716_s14 + $0xa0] sm:$0xff] }
  0x38   : > { %v839_v6 = vsel %vm784_vm1, %v10680_v4, 0.0  ;;  %v842_v7 = vsel %vm784_vm1, %v10685_v5, 0.0  ;;  %v10699_v9 = vld [vmem:[%s14716_s14 + $0xa8] sm:$0xff]  ;;  %v845_v10 = vsel %vm784_vm1, %v10694_v8, 0.0  ;;  %v10708_v12 = vld [vmem:[%s14716_s14 + $0xb0] sm:$0xff]  ;;  %v10713_v13 = vld [vmem:[%s14716_s14 + $0xb8] sm:$0xff] }
  0x39   : > { %v848_v11 = vsel %vm784_vm1, %v10699_v9, 0.0  ;;  %v851_v14 = vsel %vm784_vm1, %v10708_v12, 0.0  ;;  %v854_v15 = vsel %vm784_vm1, %v10713_v13, 0.0  ;;  %v10722_v16 = vld [vmem:[%s14716_s14 + $0xc0] sm:$0xff]  ;;  %v10727_v17 = vld [vmem:[%s14716_s14 + $0xc8] sm:$0xff]  ;;  %v10736_v20 = vld [vmem:[%s14716_s14 + $0xd0] sm:$0xff] }
  0x3a   : > { %v857_v18 = vsel %vm784_vm1, %v10722_v16, 0.0  ;;  %v860_v19 = vsel %vm784_vm1, %v10727_v17, 0.0  ;;  %v10741_v21 = vld [vmem:[%s14716_s14 + $0xd8] sm:$0xff]  ;;  %v863_v22 = vsel %vm784_vm1, %v10736_v20, 0.0  ;;  %v10750_v24 = vld [vmem:[%s14716_s14 + $0xe0] sm:$0xff]  ;;  %v10755_v25 = vld [vmem:[%s14716_s14 + $0xe8] sm:$0xff] }
  0x3b   : > { %798 = vadd.xlane.f32.xlu0 %v797_v42  ;;  %801 = vadd.xlane.f32.xlu1 %v800_v43  ;;  %v866_v23 = vsel %vm784_vm1, %v10741_v21, 0.0  ;;  %v869_v26 = vsel %vm784_vm1, %v10750_v24, 0.0  ;;  %v872_v27 = vsel %vm784_vm1, %v10755_v25, 0.0  ;;  %v10764_v28 = vld [vmem:[%s14716_s14 + $0xf0] sm:$0xff]  ;;  %v10769_v29 = vld [vmem:[%s14716_s14 + $0xf8] sm:$0xff]  ;;  %s14806_s21 = sld [smem:[#allocation67_spill]] }
  0x3c   : > { %v875_v30 = vsel %vm784_vm1, %v10764_v28, 0.0  ;;  %v878_v31 = vsel %vm784_vm1, %v10769_v29, 0.0  ;;  %s10165_s20 = smov 96   ;;  %s10166_s2 = smov 64  }
  0x3d   : > { %s14829_s26 = sld [smem:[#allocation65_spill]]  ;;  %s10167_s23 = smov 88  }
  0x3e   : > { %s10170_s5 = smov 80   ;;  %s10173_s1 = smov 72  }
  0x3f   : > { %804 = vadd.xlane.f32.xlu0 %v803_v48  ;;  %807 = vadd.xlane.f32.xlu1 %v806_v49  ;;  %s10175_s19 = smov 40  }
  0x41   : > { %s14807_s29 = scalar_lea.vmem %s14806_s21, %s10269_s17 }
  0x43   : > { %810 = vadd.xlane.f32.xlu0 %v809_v50  ;;  %813 = vadd.xlane.f32.xlu1 %v812_v51 }
  0x47   : > { %816 = vadd.xlane.f32.xlu0 %v815_v54  ;;  %819 = vadd.xlane.f32.xlu1 %v818_v55 }
  0x4b   : > { %822 = vadd.xlane.f32.xlu0 %v821_v58  ;;  %825 = vadd.xlane.f32.xlu1 %v824_v59 }
  0x4f   : > { %828 = vadd.xlane.f32.xlu0 %v827_v62  ;;  %831 = vadd.xlane.f32.xlu1 %v830_v63 }
  0x53   : > { %834 = vadd.xlane.f32.xlu0 %v833_v2  ;;  %837 = vadd.xlane.f32.xlu1 %v836_v3 }
  0x57   : > { %840 = vadd.xlane.f32.xlu0 %v839_v6  ;;  %843 = vadd.xlane.f32.xlu1 %v842_v7 }
  0x5b   : > { %846 = vadd.xlane.f32.xlu0 %v845_v10  ;;  %849 = vadd.xlane.f32.xlu1 %v848_v11 }
  0x5f   : > { %852 = vadd.xlane.f32.xlu0 %v851_v14  ;;  %855 = vadd.xlane.f32.xlu1 %v854_v15 }
  0x63   : > { %858 = vadd.xlane.f32.xlu0 %v857_v18  ;;  %861 = vadd.xlane.f32.xlu1 %v860_v19 }
  0x67   : > { %864 = vadd.xlane.f32.xlu0 %v863_v22  ;;  %867 = vadd.xlane.f32.xlu1 %v866_v23 }
  0x6b   : > { %870 = vadd.xlane.f32.xlu0 %v869_v26  ;;  %873 = vadd.xlane.f32.xlu1 %v872_v27 }
  0x6f   : > { %876 = vadd.xlane.f32.xlu0 %v875_v30  ;;  %879 = vadd.xlane.f32.xlu1 %v878_v31 }
  0xbc   : > { %v787_v35 = vpop.xlane.xlu0 %786  ;;  %v793_v36 = vpop.xlane.xlu1 %792 }
  0xbd   : > { %v882_v38 = vmul.f32 0.03125, %v787_v35  ;;  %v884_v39 = vmul.f32 0.03125, %v793_v36 }
  0xbf   : > { %v10776_v42 = vsub.f32 %v10554_v32, %v882_v38  ;;  %v10779_v43 = vsub.f32 %v10559_v33, %v884_v39 }
  0xc0   : > { %v790_v48 = vpop.xlane.xlu0 %789  ;;  %v796_v49 = vpop.xlane.xlu1 %795 }
  0xc1   : > { %v883_v50 = vmul.f32 0.03125, %v790_v48  ;;  %v885_v51 = vmul.f32 0.03125, %v796_v49  ;;  %v946_v54 = vmul.f32 %v10776_v42, %v10776_v42  ;;  %v948_v55 = vmul.f32 %v10779_v43, %v10779_v43 }
  0xc3   : > { %v10786_v58 = vsub.f32 %v10564_v34, %v883_v50  ;;  %v10789_v59 = vsub.f32 %v10573_v37, %v885_v51  ;;  %v978_v32 = vsel %vm784_vm1, %v946_v54, 0.0  ;;  %v984_v63 = vsel %vm784_vm1, %v948_v55, 0.0 }
  0xc4   : > { %979 = vadd.xlane.f32.xlu0 %v978_v32  ;;  %v799_v33 = vpop.xlane.xlu0 %798  ;;  %v802_v62 = vpop.xlane.xlu1 %801 }
  0xc5   : > { %v886_v2 = vmul.f32 0.03125, %v799_v33  ;;  %v887_v3 = vmul.f32 0.03125, %v802_v62  ;;  %v947_v6 = vmul.f32 %v10786_v58, %v10786_v58  ;;  %v949_v7 = vmul.f32 %v10789_v59, %v10789_v59 }
  0xc7   : > { %v10798_v34 = vsub.f32 %v10582_v40, %v886_v2  ;;  %v10801_v37 = vsub.f32 %v10587_v41, %v887_v3  ;;  %v981_v10 = vsel %vm784_vm1, %v947_v6, 0.0  ;;  %v987_v15 = vsel %vm784_vm1, %v949_v7, 0.0 }
  0xc8   : > { %985 = vadd.xlane.f32.xlu0 %v984_v63  ;;  %982 = vadd.xlane.f32.xlu1 %v981_v10  ;;  %v805_v11 = vpop.xlane.xlu0 %804  ;;  %v808_v14 = vpop.xlane.xlu1 %807 }
  0xc9   : > { %v888_v18 = vmul.f32 0.03125, %v805_v11  ;;  %v889_v19 = vmul.f32 0.03125, %v808_v14  ;;  %v950_v22 = vmul.f32 %v10798_v34, %v10798_v34  ;;  %v951_v40 = vmul.f32 %v10801_v37, %v10801_v37 }
  0xcb   : > { %v10810_v23 = vsub.f32 %v10596_v44, %v888_v18  ;;  %v10813_v41 = vsub.f32 %v10601_v45, %v889_v19  ;;  %v990_v26 = vsel %vm784_vm1, %v950_v22, 0.0  ;;  %v993_v31 = vsel %vm784_vm1, %v951_v40, 0.0 }
  0xcc   : > { %988 = vadd.xlane.f32.xlu1 %v987_v15  ;;  %991 = vadd.xlane.f32.xlu0 %v990_v26  ;;  %v811_v27 = vpop.xlane.xlu0 %810  ;;  %v814_v30 = vpop.xlane.xlu1 %813 }
  0xcd   : > { %v890_v35 = vmul.f32 0.03125, %v811_v27  ;;  %v891_v36 = vmul.f32 0.03125, %v814_v30  ;;  %v952_v38 = vmul.f32 %v10810_v23, %v10810_v23  ;;  %v953_v44 = vmul.f32 %v10813_v41, %v10813_v41 }
  0xcf   : > { %v10822_v39 = vsub.f32 %v10606_v46, %v890_v35  ;;  %v10825_v45 = vsub.f32 %v10611_v47, %v891_v36  ;;  %v996_v48 = vsel %vm784_vm1, %v952_v38, 0.0  ;;  %v999_v51 = vsel %vm784_vm1, %v953_v44, 0.0 }
  0xd0   : > { %994 = vadd.xlane.f32.xlu1 %v993_v31  ;;  %997 = vadd.xlane.f32.xlu0 %v996_v48  ;;  %v817_v49 = vpop.xlane.xlu0 %816  ;;  %v820_v50 = vpop.xlane.xlu1 %819 }
  0xd1   : > { %v892_v54 = vmul.f32 0.03125, %v817_v49  ;;  %v893_v55 = vmul.f32 0.03125, %v820_v50  ;;  %v954_v32 = vmul.f32 %v10822_v39, %v10822_v39  ;;  %v955_v46 = vmul.f32 %v10825_v45, %v10825_v45 }
  0xd3   : > { %v10834_v33 = vsub.f32 %v10624_v52, %v892_v54  ;;  %v10837_v47 = vsub.f32 %v10629_v53, %v893_v55  ;;  %v1002_v62 = vsel %vm784_vm1, %v954_v32, 0.0  ;;  %v1005_v3 = vsel %vm784_vm1, %v955_v46, 0.0 }
  0xd4   : > { %1000 = vadd.xlane.f32.xlu1 %v999_v51  ;;  %1003 = vadd.xlane.f32.xlu0 %v1002_v62  ;;  %v823_v63 = vpop.xlane.xlu0 %822  ;;  %v826_v2 = vpop.xlane.xlu1 %825 }
  0xd5   : > { %v894_v6 = vmul.f32 0.03125, %v823_v63  ;;  %v895_v7 = vmul.f32 0.03125, %v826_v2  ;;  %v956_v10 = vmul.f32 %v10834_v33, %v10834_v33  ;;  %v957_v52 = vmul.f32 %v10837_v47, %v10837_v47 }
  0xd7   : > { %v10846_v11 = vsub.f32 %v10638_v56, %v894_v6  ;;  %v10849_v53 = vsub.f32 %v10643_v57, %v895_v7  ;;  %v1008_v14 = vsel %vm784_vm1, %v956_v10, 0.0  ;;  %v1011_v19 = vsel %vm784_vm1, %v957_v52, 0.0 }
  0xd8   : > { %1006 = vadd.xlane.f32.xlu1 %v1005_v3  ;;  %1009 = vadd.xlane.f32.xlu0 %v1008_v14  ;;  %v829_v15 = vpop.xlane.xlu0 %828  ;;  %v832_v18 = vpop.xlane.xlu1 %831 }
  0xd9   : > { %v896_v22 = vmul.f32 0.03125, %v829_v15  ;;  %v897_v40 = vmul.f32 0.03125, %v832_v18  ;;  %v958_v26 = vmul.f32 %v10846_v11, %v10846_v11  ;;  %v959_v56 = vmul.f32 %v10849_v53, %v10849_v53 }
  0xdb   : > { %v10858_v27 = vsub.f32 %v10652_v60, %v896_v22  ;;  %v10861_v57 = vsub.f32 %v10657_v61, %v897_v40  ;;  %v1014_v30 = vsel %vm784_vm1, %v958_v26, 0.0  ;;  %v1017_v36 = vsel %vm784_vm1, %v959_v56, 0.0 }
  0xdc   : > { %1012 = vadd.xlane.f32.xlu1 %v1011_v19  ;;  %1015 = vadd.xlane.f32.xlu0 %v1014_v30  ;;  %v835_v31 = vpop.xlane.xlu0 %834  ;;  %v838_v35 = vpop.xlane.xlu1 %837  ;;  %v9280_v19 = vld [vmem:[%s10279_s24 + $0x8] sm:$0xff]  }
  0xdd   : > { %v898_v38 = vmul.f32 0.03125, %v835_v31  ;;  %v899_v44 = vmul.f32 0.03125, %v838_v35  ;;  %v960_v48 = vmul.f32 %v10858_v27, %v10858_v27  ;;  %v961_v60 = vmul.f32 %v10861_v57, %v10861_v57  ;;  %8406 = vmatprep.subr.bf16.mxu0 %v9280_v19 }
  0xde   : > { %8407 = vmatpush3.bf16.msra.mxu0 %v9280_v19 }
  0xdf   : > { %v10870_v49 = vsub.f32 %v10666_v0, %v898_v38  ;;  %v10873_v61 = vsub.f32 %v10671_v1, %v899_v44  ;;  %v1020_v50 = vsel %vm784_vm1, %v960_v48, 0.0  ;;  %v1023_v55 = vsel %vm784_vm1, %v961_v60, 0.0  ;;  %v9281_v38 = vld [vmem:[%s10279_s24] sm:$0xff]   ;;  %s10169_s24 = smov 56  }
  0xe0   : > { %1018 = vadd.xlane.f32.xlu1 %v1017_v36  ;;  %1021 = vadd.xlane.f32.xlu0 %v1020_v50  ;;  %v841_v51 = vpop.xlane.xlu0 %840  ;;  %v844_v54 = vpop.xlane.xlu1 %843 }
  0xe1   : > { %v900_v32 = vmul.f32 0.03125, %v841_v51  ;;  %v901_v46 = vmul.f32 0.03125, %v844_v54  ;;  %v962_v62 = vmul.f32 %v10870_v49, %v10870_v49  ;;  %v963_v0 = vmul.f32 %v10873_v61, %v10873_v61  ;;  %8408 = vmatprep.subr.bf16.mxu0 %v9281_v38 }
  0xe2   : > { %8409 = vmatpush3.bf16.msra.mxu0 %v9281_v38 }
  0xe3   : > { %v10882_v1 = vsub.f32 %v10680_v4, %v900_v32  ;;  %v10885_v63 = vsub.f32 %v10685_v5, %v901_v46  ;;  %v1026_v2 = vsel %vm784_vm1, %v962_v62, 0.0  ;;  %v1029_v7 = vsel %vm784_vm1, %v963_v0, 0.0 }
  0xe4   : > { %1024 = vadd.xlane.f32.xlu1 %v1023_v55  ;;  %1027 = vadd.xlane.f32.xlu0 %v1026_v2  ;;  %v847_v3 = vpop.xlane.xlu0 %846  ;;  %v850_v6 = vpop.xlane.xlu1 %849 }
  0xe5   : > { %v902_v10 = vmul.f32 0.03125, %v847_v3  ;;  %v903_v52 = vmul.f32 0.03125, %v850_v6  ;;  %v964_v14 = vmul.f32 %v10882_v1, %v10882_v1  ;;  %v965_v4 = vmul.f32 %v10885_v63, %v10885_v63 }
  0xe7   : > { %v10894_v15 = vsub.f32 %v10694_v8, %v902_v10  ;;  %v10897_v5 = vsub.f32 %v10699_v9, %v903_v52  ;;  %v1032_v18 = vsel %vm784_vm1, %v964_v14, 0.0  ;;  %v1035_v26 = vsel %vm784_vm1, %v965_v4, 0.0 }
  0xe8   : > { %1030 = vadd.xlane.f32.xlu1 %v1029_v7  ;;  %1033 = vadd.xlane.f32.xlu0 %v1032_v18  ;;  %v853_v22 = vpop.xlane.xlu0 %852  ;;  %v856_v40 = vpop.xlane.xlu1 %855 }
  0xe9   : > { %v904_v56 = vmul.f32 0.03125, %v853_v22  ;;  %v905_v30 = vmul.f32 0.03125, %v856_v40  ;;  %v966_v31 = vmul.f32 %v10894_v15, %v10894_v15  ;;  %v967_v8 = vmul.f32 %v10897_v5, %v10897_v5 }
  0xeb   : > { %v10907_v9 = vsub.f32 %v10708_v12, %v904_v56  ;;  %v10910_v35 = vsub.f32 %v10713_v13, %v905_v30  ;;  %v1038_v36 = vsel %vm784_vm1, %v966_v31, 0.0  ;;  %v1041_v60 = vsel %vm784_vm1, %v967_v8, 0.0 }
  0xec   : > { %1036 = vadd.xlane.f32.xlu1 %v1035_v26  ;;  %1039 = vadd.xlane.f32.xlu0 %v1038_v36  ;;  %v859_v44 = vpop.xlane.xlu0 %858  ;;  %v862_v48 = vpop.xlane.xlu1 %861 }
  0xed   : > { %v906_v50 = vmul.f32 0.03125, %v859_v44  ;;  %v907_v51 = vmul.f32 0.03125, %v862_v48  ;;  %v968_v54 = vmul.f32 %v10907_v9, %v10907_v9  ;;  %v969_v12 = vmul.f32 %v10910_v35, %v10910_v35 }
  0xef   : > { %v10920_v13 = vsub.f32 %v10722_v16, %v906_v50  ;;  %v10923_v55 = vsub.f32 %v10727_v17, %v907_v51  ;;  %v1044_v32 = vsel %vm784_vm1, %v968_v54, 0.0  ;;  %v1047_v0 = vsel %vm784_vm1, %v969_v12, 0.0 }
  0xf0   : > { %1042 = vadd.xlane.f32.xlu1 %v1041_v60  ;;  %1045 = vadd.xlane.f32.xlu0 %v1044_v32  ;;  %v865_v46 = vpop.xlane.xlu0 %864  ;;  %v868_v62 = vpop.xlane.xlu1 %867 }
  0xf1   : > { %v908_v2 = vmul.f32 0.03125, %v865_v46  ;;  %v909_v3 = vmul.f32 0.03125, %v868_v62  ;;  %v970_v6 = vmul.f32 %v10920_v13, %v10920_v13  ;;  %v971_v16 = vmul.f32 %v10923_v55, %v10923_v55 }
  0xf3   : > { %v10932_v7 = vsub.f32 %v10736_v20, %v908_v2  ;;  %v10935_v17 = vsub.f32 %v10741_v21, %v909_v3  ;;  %v1050_v10 = vsel %vm784_vm1, %v970_v6, 0.0  ;;  %v1053_v4 = vsel %vm784_vm1, %v971_v16, 0.0 }
  0xf4   : > { %1048 = vadd.xlane.f32.xlu1 %v1047_v0  ;;  %1051 = vadd.xlane.f32.xlu0 %v1050_v10  ;;  %v871_v52 = vpop.xlane.xlu0 %870  ;;  %v874_v14 = vpop.xlane.xlu1 %873 }
  0xf5   : > { %v910_v18 = vmul.f32 0.03125, %v871_v52  ;;  %v911_v19 = vmul.f32 0.03125, %v874_v14  ;;  %v972_v22 = vmul.f32 %v10932_v7, %v10932_v7  ;;  %v973_v20 = vmul.f32 %v10935_v17, %v10935_v17 }
  0xf7   : > { %v10944_v40 = vsub.f32 %v10750_v24, %v910_v18  ;;  %v10947_v21 = vsub.f32 %v10755_v25, %v911_v19  ;;  %v1056_v26 = vsel %vm784_vm1, %v972_v22, 0.0  ;;  %v1059_v31 = vsel %vm784_vm1, %v973_v20, 0.0 }
  0xf8   : > { %1054 = vadd.xlane.f32.xlu1 %v1053_v4  ;;  %1057 = vadd.xlane.f32.xlu0 %v1056_v26  ;;  %v877_v56 = vpop.xlane.xlu0 %876  ;;  %v880_v30 = vpop.xlane.xlu1 %879 }
  0xf9   : > { %v912_v8 = vmul.f32 0.03125, %v877_v56  ;;  %v913_v36 = vmul.f32 0.03125, %v880_v30  ;;  %v974_v38 = vmul.f32 %v10944_v40, %v10944_v40  ;;  %v975_v24 = vmul.f32 %v10947_v21, %v10947_v21 }
  0xfb   : > { %v10956_v44 = vsub.f32 %v10764_v28, %v912_v8  ;;  %v10959_v25 = vsub.f32 %v10769_v29, %v913_v36  ;;  %v1062_v48 = vsel %vm784_vm1, %v974_v38, 0.0  ;;  %v1065_v60 = vsel %vm784_vm1, %v975_v24, 0.0 }
  0xfc   : > { %1060 = vadd.xlane.f32.xlu1 %v1059_v31  ;;  %1063 = vadd.xlane.f32.xlu0 %v1062_v48 }
  0xfd   : > { %v976_v50 = vmul.f32 %v10956_v44, %v10956_v44  ;;  %v977_v51 = vmul.f32 %v10959_v25, %v10959_v25 }
  0xff   : > { %v1068_v54 = vsel %vm784_vm1, %v976_v50, 0.0  ;;  %v1071_v28 = vsel %vm784_vm1, %v977_v51, 0.0  ;;  %v10974_v50 = vld [vmem:[%s14804_s27] ss:$0 sm:$0xff] }
 0x100   : > { %1066 = vadd.xlane.f32.xlu1 %v1065_v60  ;;  %1069 = vadd.xlane.f32.xlu0 %v1068_v54 }
 0x104   : > { %1072 = vadd.xlane.f32.xlu1 %v1071_v28 }
 0x14d   : > { %v980_v29 = vpop.xlane.xlu0 %979 }
 0x14e   : > { %v1074_v12 = vmul.f32 0.03125, %v980_v29 }
 0x150   : > { %v1106_v32 = vadd.f32 1e-05, %v1074_v12 }
 0x151   : > { %v983_v46 = vpop.xlane.xlu1 %982  ;;  %v986_v62 = vpop.xlane.xlu0 %985 }
 0x152   : > { %9292 = vrsqrt.f32 %v1106_v32  ;;  %v1075_v0 = vmul.f32 0.03125, %v983_v46  ;;  %v1076_v2 = vmul.f32 0.03125, %v986_v62 }
 0x154   : > { %v1107_v3 = vadd.f32 1e-05, %v1075_v0  ;;  %v1108_v6 = vadd.f32 1e-05, %v1076_v2 }
 0x155   : > { %v989_v16 = vpop.xlane.xlu1 %988  ;;  %v992_v10 = vpop.xlane.xlu0 %991 }
 0x156   : > { %9294 = vrsqrt.f32 %v1107_v3  ;;  %v1077_v52 = vmul.f32 0.03125, %v989_v16  ;;  %v1078_v14 = vmul.f32 0.03125, %v992_v10  ;;  %v10983_v3 = vld [vmem:[%s14805_s16] ss:$0 sm:$0xff]  ;;  %s10172_s16 = smov 48  }
 0x157   : > { %9296 = vrsqrt.f32 %v1108_v6 }
 0x158   : > { %v1109_v4 = vadd.f32 1e-05, %v1077_v52  ;;  %v1110_v18 = vadd.f32 1e-05, %v1078_v14 }
 0x159   : > { %v995_v19 = vpop.xlane.xlu1 %994  ;;  %v998_v22 = vpop.xlane.xlu0 %997 }
 0x15a   : > { %9298 = vrsqrt.f32 %v1109_v4  ;;  %v1079_v20 = vmul.f32 0.03125, %v995_v19  ;;  %v1080_v26 = vmul.f32 0.03125, %v998_v22 }
 0x15b   : > { %9300 = vrsqrt.f32 %v1110_v18 }
 0x15c   : > { %v1111_v56 = vadd.f32 1e-05, %v1079_v20  ;;  %v1112_v30 = vadd.f32 1e-05, %v1080_v26 }
 0x15d   : > { %v1001_v31 = vpop.xlane.xlu1 %1000  ;;  %v1004_v8 = vpop.xlane.xlu0 %1003 }
 0x15e   : > { %9302 = vrsqrt.f32 %v1111_v56  ;;  %v1081_v36 = vmul.f32 0.03125, %v1001_v31  ;;  %v1082_v38 = vmul.f32 0.03125, %v1004_v8 }
 0x15f   : > { %v9293_v24 = vpop.eup %9292  ;;  %9304 = vrsqrt.f32 %v1112_v30 }
 0x160   : > { %v1113_v48 = vadd.f32 1e-05, %v1081_v36  ;;  %v1114_v60 = vadd.f32 1e-05, %v1082_v38  ;;  %v1170_v51 = vmul.f32 %v9293_v24, %v10776_v42 }
 0x161   : > { %v1007_v54 = vpop.xlane.xlu1 %1006  ;;  %v1010_v28 = vpop.xlane.xlu0 %1009 }
 0x162   : > { %9306 = vrsqrt.f32 %v1113_v48  ;;  %v1083_v29 = vmul.f32 0.03125, %v1007_v54  ;;  %v1084_v12 = vmul.f32 0.03125, %v1010_v28  ;;  %v1208_v46 = vmul.f32 %v10974_v50, %v1170_v51 }
 0x163   : > { %v9295_v32 = vpop.eup %9294  ;;  %9308 = vrsqrt.f32 %v1114_v60 }
 0x164   : > { %v9297_v62 = vpop.eup %9296  ;;  %v1115_v0 = vadd.f32 1e-05, %v1083_v29  ;;  %v1116_v2 = vadd.f32 1e-05, %v1084_v12  ;;  %v1171_v42 = vmul.f32 %v9295_v32, %v10786_v58  ;;  %v1246_v19 = vadd.f32 %v10983_v3, %v1208_v46 }
 0x165   : > { %v1013_v6 = vpop.xlane.xlu1 %1012  ;;  %v1016_v16 = vpop.xlane.xlu0 %1015  ;;  %v1172_v10 = vmul.f32 %v9297_v62, %v10779_v43 }
 0x166   : > { %9310 = vrsqrt.f32 %v1115_v0  ;;  %v1085_v52 = vmul.f32 0.03125, %v1013_v6  ;;  %v1086_v14 = vmul.f32 0.03125, %v1016_v16  ;;  %v1209_v4 = vmul.f32 %v10974_v50, %v1171_v42 }
 0x167   : > { %v9299_v18 = vpop.eup %9298  ;;  %9312 = vrsqrt.f32 %v1116_v2  ;;  %v1210_v43 = vmul.f32 %v10974_v50, %v1172_v10 }
 0x168   : > { %v9301_v22 = vpop.eup %9300  ;;  %v1117_v20 = vadd.f32 1e-05, %v1085_v52  ;;  %v1118_v26 = vadd.f32 1e-05, %v1086_v14  ;;  %v1247_v56 = vadd.f32 %v10983_v3, %v1209_v4  ;;  %v1173_v58 = vmul.f32 %v9299_v18, %v10789_v59 }
 0x169   : > { %v1019_v30 = vpop.xlane.xlu1 %1018  ;;  %v1022_v31 = vpop.xlane.xlu0 %1021  ;;  %v1174_v8 = vmul.f32 %v9301_v22, %v10798_v34  ;;  %v1248_v34 = vadd.f32 %v10983_v3, %v1210_v43 }
 0x16a   : > { %9314 = vrsqrt.f32 %v1117_v20  ;;  %v1087_v36 = vmul.f32 0.03125, %v1019_v30  ;;  %v1088_v38 = vmul.f32 0.03125, %v1022_v31  ;;  %v1278_v24 = vpack.c.bf16 %v1247_v56, %v1246_v19 }
 0x16b   : > { %v9303_v48 = vpop.eup %9302  ;;  %9316 = vrsqrt.f32 %v1118_v26  ;;  %v1211_v60 = vmul.f32 %v10974_v50, %v1173_v58  ;;  %v1212_v51 = vmul.f32 %v10974_v50, %v1174_v8 }
 0x16c   : > { %v9305_v54 = vpop.eup %9304  ;;  %v1119_v28 = vadd.f32 1e-05, %v1087_v36  ;;  %v1120_v29 = vadd.f32 1e-05, %v1088_v38  ;;  %8410 = vmatprep.mubr.msk.bf16.mxu0 %vm784_vm1, %v1278_v24  ;;  %v1175_v59 = vmul.f32 %v9303_v48, %v10801_v37 }
 0x16d   : > { %v1025_v12 = vpop.xlane.xlu1 %1024  ;;  %v1028_v32 = vpop.xlane.xlu0 %1027  ;;  %v1249_v46 = vadd.f32 %v10983_v3, %v1211_v60  ;;  %v1176_v62 = vmul.f32 %v9305_v54, %v10810_v23  ;;  %v1250_v10 = vadd.f32 %v10983_v3, %v1212_v51 }
 0x16e   : > { %9318 = vrsqrt.f32 %v1119_v28  ;;  %v1089_v0 = vmul.f32 0.03125, %v1025_v12  ;;  %v1090_v2 = vmul.f32 0.03125, %v1028_v32  ;;  %v1213_v42 = vmul.f32 %v10974_v50, %v1175_v59 }
 0x16f   : > { %v9307_v6 = vpop.eup %9306  ;;  %9320 = vrsqrt.f32 %v1120_v29  ;;  %v1279_v16 = vpack.c.bf16 %v1249_v46, %v1248_v34  ;;  %v1214_v22 = vmul.f32 %v10974_v50, %v1176_v62 }
 0x170   : > { %v9309_v52 = vpop.eup %9308  ;;  %v1121_v37 = vadd.f32 1e-05, %v1089_v0  ;;  %v1122_v14 = vadd.f32 1e-05, %v1090_v2  ;;  %v1251_v4 = vadd.f32 %v10983_v3, %v1213_v42  ;;  %v1177_v18 = vmul.f32 %v9307_v6, %v10813_v41 }
 0x171   : > { %8411 = vmatmul.mubr.msk.bf16.vlgmr.msra.gmra.mxu0 %vm784_vm1, %v1279_v16  ;;  %v1031_v23 = vpop.xlane.xlu1 %1030  ;;  %v1034_v19 = vpop.xlane.xlu0 %1033  ;;  %v1178_v20 = vmul.f32 %v9309_v52, %v10822_v39  ;;  %v1252_v39 = vadd.f32 %v10983_v3, %v1214_v22 }
 0x172   : > { %9322 = vrsqrt.f32 %v1121_v37  ;;  %v1091_v26 = vmul.f32 0.03125, %v1031_v23  ;;  %v1092_v56 = vmul.f32 0.03125, %v1034_v19  ;;  %v1280_v58 = vpack.c.bf16 %v1251_v4, %v1250_v10 }
 0x173   : > { %v9311_v30 = vpop.eup %9310  ;;  %9324 = vrsqrt.f32 %v1122_v14  ;;  %v1215_v31 = vmul.f32 %v10974_v50, %v1177_v18  ;;  %v1216_v43 = vmul.f32 %v10974_v50, %v1178_v20 }
 0x174   : > { %v9313_v8 = vpop.eup %9312  ;;  %v1123_v41 = vadd.f32 1e-05, %v1091_v26  ;;  %v1124_v36 = vadd.f32 1e-05, %v1092_v56  ;;  %8414 = vmatprep.mubr.msk.bf16.mxu0 %vm784_vm1, %v1280_v58  ;;  %v1179_v38 = vmul.f32 %v9311_v30, %v10825_v45 }
 0x175   : > { %v1037_v24 = vpop.xlane.xlu1 %1036  ;;  %v1040_v48 = vpop.xlane.xlu0 %1039  ;;  %v1253_v60 = vadd.f32 %v10983_v3, %v1215_v31  ;;  %v1180_v51 = vmul.f32 %v9313_v8, %v10834_v33  ;;  %v1254_v32 = vadd.f32 %v10983_v3, %v1216_v43 }
 0x176   : > { %9326 = vrsqrt.f32 %v1123_v41  ;;  %v1093_v54 = vmul.f32 0.03125, %v1037_v24  ;;  %v1094_v28 = vmul.f32 0.03125, %v1040_v48  ;;  %v1217_v29 = vmul.f32 %v10974_v50, %v1179_v38 }
 0x177   : > { %v9315_v59 = vpop.eup %9314  ;;  %9328 = vrsqrt.f32 %v1124_v36  ;;  %v1281_v12 = vpack.c.bf16 %v1253_v60, %v1252_v39  ;;  %v1218_v42 = vmul.f32 %v10974_v50, %v1180_v51 }
 0x178   : > { %v9317_v34 = vpop.eup %9316  ;;  %v1125_v45 = vadd.f32 1e-05, %v1093_v54  ;;  %v1126_v46 = vadd.f32 1e-05, %v1094_v28  ;;  %v1255_v62 = vadd.f32 %v10983_v3, %v1217_v29  ;;  %v1181_v0 = vmul.f32 %v9315_v59, %v10837_v47 }
 0x179   : > { %8415 = vmatmul.mubr.msk.bf16.gmra.mxu0 %vm784_vm1, %v1281_v12  ;;  %v1043_v33 = vpop.xlane.xlu1 %1042  ;;  %v1046_v2 = vpop.xlane.xlu0 %1045  ;;  %v1182_v6 = vmul.f32 %v9317_v34, %v10846_v11  ;;  %v1256_v11 = vadd.f32 %v10983_v3, %v1218_v42 }
 0x17a   : > { %9330 = vrsqrt.f32 %v1125_v45  ;;  %v1095_v16 = vmul.f32 0.03125, %v1043_v33  ;;  %v1096_v10 = vmul.f32 0.03125, %v1046_v2  ;;  %v1282_v52 = vpack.c.bf16 %v1255_v62, %v1254_v32 }
 0x17b   : > { %v9319_v37 = vpop.eup %9318  ;;  %9332 = vrsqrt.f32 %v1126_v46  ;;  %v1219_v14 = vmul.f32 %v10974_v50, %v1181_v0  ;;  %v1220_v4 = vmul.f32 %v10974_v50, %v1182_v6 }
 0x17c   : > { %v9321_v18 = vpop.eup %9320  ;;  %v1127_v47 = vadd.f32 1e-05, %v1095_v16  ;;  %v1128_v23 = vadd.f32 1e-05, %v1096_v10  ;;  %8418 = vmatprep.mubr.msk.bf16.mxu0 %vm784_vm1, %v1282_v52  ;;  %v1183_v19 = vmul.f32 %v9319_v37, %v10849_v53 }
 0x17d   : > { %v1049_v22 = vpop.xlane.xlu1 %1048  ;;  %v1052_v20 = vpop.xlane.xlu0 %1051  ;;  %v1257_v26 = vadd.f32 %v10983_v3, %v1219_v14  ;;  %v1184_v56 = vmul.f32 %v9321_v18, %v10858_v27  ;;  %v1258_v41 = vadd.f32 %v10983_v3, %v1220_v4 }
 0x17e   : > { %9334 = vrsqrt.f32 %v1127_v47  ;;  %v1097_v58 = vmul.f32 0.03125, %v1049_v22  ;;  %v1098_v30 = vmul.f32 0.03125, %v1052_v20  ;;  %v1221_v31 = vmul.f32 %v10974_v50, %v1183_v19 }
 0x17f   : > { %v9323_v43 = vpop.eup %9322  ;;  %9336 = vrsqrt.f32 %v1128_v23  ;;  %v1283_v8 = vpack.c.bf16 %v1257_v26, %v1256_v11  ;;  %v1222_v60 = vmul.f32 %v10974_v50, %v1184_v56 }
 0x180   : > { %v9325_v36 = vpop.eup %9324  ;;  %v1129_v53 = vadd.f32 1e-05, %v1097_v58  ;;  %v1130_v38 = vadd.f32 1e-05, %v1098_v30  ;;  %v1259_v24 = vadd.f32 %v10983_v3, %v1221_v31  ;;  %v1185_v48 = vmul.f32 %v9323_v43, %v10861_v57 }
 0x181   : > { %8419 = vmatmul.mubr.msk.bf16.gmra.mxu0 %vm784_vm1, %v1283_v8  ;;  %v1055_v27 = vpop.xlane.xlu1 %1054  ;;  %v1058_v39 = vpop.xlane.xlu0 %1057  ;;  %v1186_v51 = vmul.f32 %v9325_v36, %v10870_v49  ;;  %v1260_v49 = vadd.f32 %v10983_v3, %v1222_v60 }
 0x182   : > { %9338 = vrsqrt.f32 %v1129_v53  ;;  %v1099_v54 = vmul.f32 0.03125, %v1055_v27  ;;  %v1100_v28 = vmul.f32 0.03125, %v1058_v39  ;;  %v1284_v29 = vpack.c.bf16 %v1259_v24, %v1258_v41 }
 0x183   : > { %v9327_v59 = vpop.eup %9326  ;;  %9340 = vrsqrt.f32 %v1130_v38  ;;  %v1223_v12 = vmul.f32 %v10974_v50, %v1185_v48  ;;  %v1224_v32 = vmul.f32 %v10974_v50, %v1186_v51 }
 0x184   : > { %v9329_v34 = vpop.eup %9328  ;;  %v1131_v57 = vadd.f32 1e-05, %v1099_v54  ;;  %v1132_v45 = vadd.f32 1e-05, %v1100_v28  ;;  %8422 = vmatprep.mubr.msk.bf16.mxu0 %vm784_vm1, %v1284_v29  ;;  %v1187_v46 = vmul.f32 %v9327_v59, %v10873_v61 }
 0x185   : > { %v1061_v62 = vpop.xlane.xlu1 %1060  ;;  %v1064_v0 = vpop.xlane.xlu0 %1063  ;;  %v1261_v33 = vadd.f32 %v10983_v3, %v1223_v12  ;;  %v1188_v2 = vmul.f32 %v9329_v34, %v10882_v1  ;;  %v1262_v37 = vadd.f32 %v10983_v3, %v1224_v32 }
 0x186   : > { %9342 = vrsqrt.f32 %v1131_v57  ;;  %v1101_v42 = vmul.f32 0.03125, %v1061_v62  ;;  %v1102_v6 = vmul.f32 0.03125, %v1064_v0  ;;  %v1225_v16 = vmul.f32 %v10974_v50, %v1187_v46 }
 0x187   : > { %v9331_v10 = vpop.eup %9330  ;;  %9344 = vrsqrt.f32 %v1132_v45  ;;  %v1285_v52 = vpack.c.bf16 %v1261_v33, %v1260_v49  ;;  %v1226_v19 = vmul.f32 %v10974_v50, %v1188_v2 }
 0x188   : > { %v9333_v14 = vpop.eup %9332  ;;  %v1133_v61 = vadd.f32 1e-05, %v1101_v42  ;;  %v1134_v4 = vadd.f32 1e-05, %v1102_v6  ;;  %v1263_v18 = vadd.f32 %v10983_v3, %v1225_v16  ;;  %v1189_v47 = vmul.f32 %v9331_v10, %v10885_v63 }
 0x189   : > { %8423 = vmatmul.mubr.msk.bf16.gmra.mxu0 %vm784_vm1, %v1285_v52  ;;  %v1067_v1 = vpop.xlane.xlu1 %1066  ;;  %v1070_v23 = vpop.xlane.xlu0 %1069  ;;  %v1190_v22 = vmul.f32 %v9333_v14, %v10894_v15  ;;  %v1264_v15 = vadd.f32 %v10983_v3, %v1226_v19 }
 0x18a   : > { %9346 = vrsqrt.f32 %v1133_v61  ;;  %v1103_v20 = vmul.f32 0.03125, %v1067_v1  ;;  %v1104_v11 = vmul.f32 0.03125, %v1070_v23  ;;  %v1286_v26 = vpack.c.bf16 %v1263_v18, %v1262_v37 }
 0x18b   : > { %v9335_v56 = vpop.eup %9334  ;;  %9348 = vrsqrt.f32 %v1134_v4  ;;  %v1227_v58 = vmul.f32 %v10974_v50, %v1189_v47  ;;  %v1228_v30 = vmul.f32 %v10974_v50, %v1190_v22 }
 0x18c   : > { %v9337_v31 = vpop.eup %9336  ;;  %v1135_v63 = vadd.f32 1e-05, %v1103_v20  ;;  %v1136_v43 = vadd.f32 1e-05, %v1104_v11  ;;  %8426 = vmatprep.mubr.msk.bf16.mxu0 %vm784_vm1, %v1286_v26  ;;  %v1191_v8 = vmul.f32 %v9335_v56, %v10897_v5 }
 0x18d   : > { %v1073_v41 = vpop.xlane.xlu1 %1072  ;;  %v1265_v36 = vadd.f32 %v10983_v3, %v1227_v58  ;;  %v1192_v53 = vmul.f32 %v9337_v31, %v10907_v9  ;;  %v1266_v39 = vadd.f32 %v10983_v3, %v1228_v30 }
 0x18e   : > { %9350 = vrsqrt.f32 %v1135_v63  ;;  %v1105_v38 = vmul.f32 0.03125, %v1073_v41  ;;  %v1229_v24 = vmul.f32 %v10974_v50, %v1191_v8 }
 0x18f   : > { %v9339_v48 = vpop.eup %9338  ;;  %9352 = vrsqrt.f32 %v1136_v43  ;;  %v1287_v27 = vpack.c.bf16 %v1265_v36, %v1264_v15  ;;  %v1230_v28 = vmul.f32 %v10974_v50, %v1192_v53 }
 0x190   : > { %v9341_v60 = vpop.eup %9340  ;;  %v1137_v51 = vadd.f32 1e-05, %v1105_v38  ;;  %v1267_v5 = vadd.f32 %v10983_v3, %v1229_v24  ;;  %v1193_v54 = vmul.f32 %v9339_v48, %v10910_v35 }
 0x191   : > { %8427 = vmatmul.mubr.msk.bf16.gmra.mxu0 %vm784_vm1, %v1287_v27  ;;  %v1194_v9 = vmul.f32 %v9341_v60, %v10920_v13  ;;  %v1268_v34 = vadd.f32 %v10983_v3, %v1230_v28 }
 0x192   : > { %9354 = vrsqrt.f32 %v1137_v51  ;;  %v1288_v29 = vpack.c.bf16 %v1267_v5, %v1266_v39  ;;  %v1231_v59 = vmul.f32 %v10974_v50, %v1193_v54 }
 0x193   : > { %v9343_v12 = vpop.eup %9342  ;;  %v1232_v45 = vmul.f32 %v10974_v50, %v1194_v9 }
 0x194   : > { %v9345_v32 = vpop.eup %9344  ;;  %8430 = vmatprep.mubr.msk.bf16.mxu0 %vm784_vm1, %v1288_v29  ;;  %v1269_v57 = vadd.f32 %v10983_v3, %v1231_v59  ;;  %v1195_v35 = vmul.f32 %v9343_v12, %v10923_v55 }
 0x195   : > { %v1196_v46 = vmul.f32 %v9345_v32, %v10932_v7  ;;  %v1270_v33 = vadd.f32 %v10983_v3, %v1232_v45 }
 0x196   : > { %v1289_v62 = vpack.c.bf16 %v1269_v57, %v1268_v34  ;;  %v1233_v13 = vmul.f32 %v10974_v50, %v1195_v35 }
 0x197   : > { %v9347_v0 = vpop.eup %9346  ;;  %v1234_v6 = vmul.f32 %v10974_v50, %v1196_v46 }
 0x198   : > { %v9349_v49 = vpop.eup %9348  ;;  %v1271_v2 = vadd.f32 %v10983_v3, %v1233_v13  ;;  %v1197_v42 = vmul.f32 %v9347_v0, %v10935_v17 }
 0x199   : > { %8431 = vmatmul.mubr.msk.bf16.gmra.mxu0 %vm784_vm1, %v1289_v62  ;;  %v1198_v55 = vmul.f32 %v9349_v49, %v10944_v40  ;;  %v1272_v37 = vadd.f32 %v10983_v3, %v1234_v6 }
 0x19a   : > { %v1290_v16 = vpack.c.bf16 %v1271_v2, %v1270_v33  ;;  %v1235_v7 = vmul.f32 %v10974_v50, %v1197_v42 }
 0x19b   : > { %v9351_v10 = vpop.eup %9350  ;;  %v1236_v17 = vmul.f32 %v10974_v50, %v1198_v55 }
 0x19c   : > { %v9353_v52 = vpop.eup %9352  ;;  %8434 = vmatprep.mubr.msk.bf16.mxu0 %vm784_vm1, %v1290_v16  ;;  %v1273_v14 = vadd.f32 %v10983_v3, %v1235_v7  ;;  %v1199_v61 = vmul.f32 %v9351_v10, %v10947_v21 }
 0x19d   : > { %v1200_v4 = vmul.f32 %v9353_v52, %v10956_v44  ;;  %v1274_v1 = vadd.f32 %v10983_v3, %v1236_v17 }
 0x19e   : > { %v1291_v18 = vpack.c.bf16 %v1273_v14, %v1272_v37  ;;  %v1237_v40 = vmul.f32 %v10974_v50, %v1199_v61 }
 0x19f   : > { %v9355_v47 = vpop.eup %9354  ;;  %v1238_v22 = vmul.f32 %v10974_v50, %v1200_v4 }
 0x1a0   : > { %v1275_v23 = vadd.f32 %v10983_v3, %v1237_v40  ;;  %v1201_v19 = vmul.f32 %v9355_v47, %v10959_v25  ;;  %v11100_v25 = vld [vmem:[%s14807_s29] ss:$0 sm:$0xff] }
 0x1a1   : > { %8435 = vmatmul.mubr.msk.bf16.gmra.mxu0 %vm784_vm1, %v1291_v18  ;;  %v1276_v44 = vadd.f32 %v10983_v3, %v1238_v22 }
 0x1a2   : > { %v1292_v21 = vpack.c.bf16 %v1275_v23, %v1274_v1  ;;  %v1239_v20 = vmul.f32 %v10974_v50, %v1201_v19 }
 0x1a4   : > { %8438 = vmatprep.mubr.msk.bf16.mxu0 %vm784_vm1, %v1292_v21  ;;  %v1277_v11 = vadd.f32 %v10983_v3, %v1239_v20 }
 0x1a6   : > { %v1293_v26 = vpack.c.bf16 %v1277_v11, %v1276_v44 }
 0x1a9   : > { %8439 = vmatmul.mubr.msk.bf16.gmra.mxu0 %vm784_vm1, %v1293_v26 }
 0x231   : > { %v8412_v56 = vpop.f32.mrf.mxu0 }
 0x232   : > { %v11103_v30 = vadd.f32 %v8412_v56, %v11100_v25 }
 0x233   : > { %v1399_v58 = vpop.f32.mrf.mxu0 }
 0x234   : > { %v11106_v31 = vadd.f32 %v11100_v25, %v1399_v58  ;;  %v1587_v43 = vmul.f32 0.35355338, %v11103_v30 }
 0x235   : > { %v8413_v50 = vpop.f32.mrf.mxu0 }
 0x236   : > { %v11109_v3 = vadd.f32 %v8413_v50, %v11100_v25  ;;  %v1585_v36 = vmul.f32 0.35355338, %v11106_v31 }
 0x237   : > { %v1402_v63 = vpop.f32.mrf.mxu0 }
 0x238   : > { %v1588_v8 = vmul.f32 0.35355338, %v11109_v3  ;;  %v11114_v41 = vadd.f32 %v11100_v25, %v1402_v63 }
 0x239   : > { %v8416_v15 = vpop.f32.mrf.mxu0 }
 0x23a   : > { %v11117_v53 = vpack.c.bf16 %v1588_v8, %v1587_v43  ;;  %v1586_v38 = vmul.f32 0.35355338, %v11114_v41  ;;  %v1424_v27 = vadd.f32 %v8416_v15, %v11100_v25 }
 0x23b   : > { %v1415_v24 = vpop.f32.mrf.mxu0 }
 0x23c   : > { %v11120_v48 = vpack.c.bf16 %v1586_v38, %v1585_v36  ;;  %v1416_v60 = vadd.f32 %v11100_v25, %v1415_v24  ;;  %v1591_v54 = vmul.f32 0.35355338, %v1424_v27 }
 0x23d   : > { %v8417_v39 = vpop.f32.mrf.mxu0 }
 0x23e   : > { %14808 = vst [vmem:[#allocation6_spill] sm:$0xff] %v11120_v48  ;;  %v1427_v51 = vadd.f32 %v8417_v39, %v11100_v25  ;;  %8458 = vmatprep.mubr.msk.bf16.mxu1 %vm1673_vm2, %v11120_v48  ;;  %v1589_v59 = vmul.f32 0.35355338, %v1416_v60 }
 0x23f   : > { %v1418_v5 = vpop.f32.mrf.mxu0 }
 0x240   : > { %v1592_v28 = vmul.f32 0.35355338, %v1427_v51  ;;  %v1419_v9 = vadd.f32 %v11100_v25, %v1418_v5  ;;  %v11152_v20 = vpack.c.bf16 %v1427_v51, %v1424_v27  ;;  %v11184_v5 = vpack.c.bf16 %v11109_v3, %v11103_v30 }
 0x241   : > { %v8420_v29 = vpop.f32.mrf.mxu0  ;;  %v11199_v3 = vpack.c.bf16 %v11114_v41, %v11106_v31 }
 0x242   : > { %v11128_v12 = vpack.c.bf16 %v1592_v28, %v1591_v54  ;;  %v1590_v32 = vmul.f32 0.35355338, %v1419_v9  ;;  %v1440_v35 = vadd.f32 %v8420_v29, %v11100_v25  ;;  %14815 = vst [vmem:[#allocation13_spill] sm:$0xff] %v11152_v20  ;;  %v11167_v43 = vpack.c.bf16 %v1419_v9, %v1416_v60  ;;  %14819 = vst [vmem:[#allocation17_spill] sm:$0xff] %v11184_v5 }
 0x243   : > { %v1431_v34 = vpop.f32.mrf.mxu0  ;;  %14821 = vst [vmem:[#allocation19_spill] sm:$0xff] %v11199_v3 }
 0x244   : > { %14809 = vst [vmem:[#allocation7_spill] sm:$0xff] %v11128_v12  ;;  %v11130_v57 = vpack.c.bf16 %v1590_v32, %v1589_v59  ;;  %v1432_v46 = vadd.f32 %v11100_v25, %v1431_v34  ;;  %v1595_v0 = vmul.f32 0.35355338, %v1440_v35  ;;  %14817 = vst [vmem:[#allocation15_spill] sm:$0xff] %v11167_v43 }
 0x245   : > { %v8421_v45 = vpop.f32.mrf.mxu0 }
 0x246   : > { %14810 = vst [vmem:[#allocation8_spill] sm:$0xff] %v11130_v57  ;;  %v1443_v62 = vadd.f32 %v8421_v45, %v11100_v25  ;;  %v1593_v42 = vmul.f32 0.35355338, %v1432_v46 }
 0x247   : > { %v1434_v13 = vpop.f32.mrf.mxu0 }
 0x248   : > { %v1596_v49 = vmul.f32 0.35355338, %v1443_v62  ;;  %v1435_v33 = vadd.f32 %v11100_v25, %v1434_v13  ;;  %v11159_v56 = vpack.c.bf16 %v1443_v62, %v1440_v35 }
 0x249   : > { %v8424_v2 = vpop.f32.mrf.mxu0 }
 0x24a   : > { %v11136_v6 = vpack.c.bf16 %v1596_v49, %v1595_v0  ;;  %v1594_v55 = vmul.f32 0.35355338, %v1435_v33  ;;  %v1456_v10 = vadd.f32 %v8424_v2, %v11100_v25  ;;  %v11174_v24 = vpack.c.bf16 %v1435_v33, %v1432_v46 }
 0x24b   : > { %v1447_v16 = vpop.f32.mrf.mxu0 }
 0x24c   : > { %14811 = vst [vmem:[#allocation9_spill] sm:$0xff] %v11136_v6  ;;  %v11138_v7 = vpack.c.bf16 %v1594_v55, %v1593_v42  ;;  %v1448_v37 = vadd.f32 %v11100_v25, %v1447_v16  ;;  %v1599_v17 = vmul.f32 0.35355338, %v1456_v10 }
 0x24d   : > { %v8425_v52 = vpop.f32.mrf.mxu0 }
 0x24e   : > { %14812 = vst [vmem:[#allocation10_spill] sm:$0xff] %v11138_v7  ;;  %v1459_v14 = vadd.f32 %v8425_v52, %v11100_v25  ;;  %v1597_v1 = vmul.f32 0.35355338, %v1448_v37 }
 0x24f   : > { %v1450_v61 = vpop.f32.mrf.mxu0 }
 0x250   : > { %v1600_v4 = vmul.f32 0.35355338, %v1459_v14  ;;  %v11143_v18 = vpack.c.bf16 %v1459_v14, %v1456_v10  ;;  %v1451_v40 = vadd.f32 %v11100_v25, %v1450_v61 }
 0x251   : > { %v8428_v47 = vpop.f32.mrf.mxu0 }
 0x252   : > { %14813 = vst [vmem:[#allocation11_spill] sm:$0xff] %v11143_v18  ;;  %v11146_v23 = vpack.c.bf16 %v1600_v4, %v1599_v17  ;;  %v1598_v19 = vmul.f32 0.35355338, %v1451_v40  ;;  %v11148_v22 = vpack.c.bf16 %v1451_v40, %v1448_v37  ;;  %1671 = vrot.lane.b32.xlu0 %v11143_v18, %s10165_s20  ;;  %v1472_v11 = vadd.f32 %v8428_v47, %v11100_v25 }
 0x253   : > { %v1463_v21 = vpop.f32.mrf.mxu0 }
 0x254   : > { %14814 = vst [vmem:[#allocation12_spill] sm:$0xff] %v11146_v23  ;;  %v11154_v44 = vpack.c.bf16 %v1598_v19, %v1597_v1  ;;  %1669 = vrot.lane.b32.xlu1 %v11148_v22, %s10165_s20  ;;  %v11162_v58 = vadd.f32 %v11100_v25, %v1463_v21  ;;  %v1603_v8 = vmul.f32 0.35355338, %v1472_v11 }
 0x255   : > { %v8429_v26 = vpop.f32.mrf.mxu0 }
 0x256   : > { %14816 = vst [vmem:[#allocation14_spill] sm:$0xff] %v11154_v44  ;;  %v1475_v50 = vadd.f32 %v8429_v26, %v11100_v25  ;;  %1663 = vrot.lane.b32.xlu0 %v11152_v20, %s10165_s20  ;;  %v1601_v27 = vmul.f32 0.35355338, %v11162_v58 }
 0x257   : > { %v1466_v63 = vpop.f32.mrf.mxu0 }
 0x258   : > { %v1604_v15 = vmul.f32 0.35355338, %v1475_v50  ;;  %v11170_v36 = vadd.f32 %v11100_v25, %v1466_v63  ;;  %1667 = vrot.lane.b32.xlu1 %v11159_v56, %s10165_s20  ;;  %v11215_v16 = vpack.c.bf16 %v1475_v50, %v1472_v11 }
 0x259   : > { %v8432_v38 = vpop.f32.mrf.mxu0 }
 0x25a   : > { %v11177_v39 = vpack.c.bf16 %v1604_v15, %v1603_v8  ;;  %v1602_v51 = vmul.f32 0.35355338, %v11170_v36  ;;  %1661 = vrot.lane.b32.xlu0 %v11167_v43, %s10165_s20  ;;  %v1488_v28 = vadd.f32 %v8432_v38, %v11100_v25 }
 0x25b   : > { %v1479_v60 = vpop.f32.mrf.mxu0 }
 0x25c   : > { %14818 = vst [vmem:[#allocation16_spill] sm:$0xff] %v11177_v39  ;;  %v11186_v54 = vpack.c.bf16 %v1602_v51, %v1601_v27  ;;  %1665 = vrot.lane.b32.xlu1 %v11174_v24, %s10165_s20  ;;  %v1480_v29 = vadd.f32 %v11100_v25, %v1479_v60  ;;  %v1607_v32 = vmul.f32 0.35355338, %v1488_v28 }
 0x25d   : > { %v8433_v9 = vpop.f32.mrf.mxu0 }
 0x25e   : > { %14820 = vst [vmem:[#allocation18_spill] sm:$0xff] %v11186_v54  ;;  %v1491_v59 = vadd.f32 %v8433_v9, %v11100_v25  ;;  %1659 = vrot.lane.b32.xlu0 %v11184_v5, %s10165_s20  ;;  %8490 = vmatprep.mubr.msk.bf16.mxu0 %vm1673_vm2, %v11186_v54  ;;  %v1605_v46 = vmul.f32 0.35355338, %v1480_v29 }
 0x25f   : > { %v1482_v30 = vpop.f32.mrf.mxu0 }
 0x260   : > { %v1608_v34 = vmul.f32 0.35355338, %v1491_v59  ;;  %v1483_v35 = vadd.f32 %v11100_v25, %v1482_v30  ;;  %v11206_v49 = vpack.c.bf16 %v1491_v59, %v1488_v28  ;;  %v11266_v30 = vpack.c.bf16 %v11170_v36, %v11162_v58 }
 0x261   : > { %v8436_v45 = vpop.f32.mrf.mxu0 }
 0x262   : > { %v11202_v62 = vpack.c.bf16 %v1608_v34, %v1607_v32  ;;  %v1606_v13 = vmul.f32 0.35355338, %v1483_v35  ;;  %1657 = vrot.lane.b32.xlu0 %v11199_v3, %s10165_s20  ;;  %14823 = vst [vmem:[#allocation21_spill] sm:$0xff] %v11206_v49  ;;  %v1504_v31 = vadd.f32 %v8436_v45, %v11100_v25  ;;  %v11258_v59 = vpack.c.bf16 %v1483_v35, %v1480_v29 }
 0x263   : > { %v1495_v0 = vpop.f32.mrf.mxu0 }
 0x264   : > { %14822 = vst [vmem:[#allocation20_spill] sm:$0xff] %v11202_v62  ;;  %v11208_v33 = vpack.c.bf16 %v1606_v13, %v1605_v46  ;;  %v1496_v2 = vadd.f32 %v11100_v25, %v1495_v0  ;;  %v1611_v10 = vmul.f32 0.35355338, %v1504_v31 }
 0x265   : > { %v8437_v41 = vpop.f32.mrf.mxu0 }
 0x266   : > { %14824 = vst [vmem:[#allocation22_spill] sm:$0xff] %v11208_v33  ;;  %v1507_v42 = vadd.f32 %v8437_v41, %v11100_v25  ;;  %1833 = vrot.lane.b32.xlu0 %v11206_v49, %s10165_s20  ;;  %v1609_v61 = vmul.f32 0.35355338, %v1496_v2 }
 0x267   : > { %v1498_v55 = vpop.f32.mrf.mxu0 }
 0x268   : > { %v1612_v52 = vmul.f32 0.35355338, %v1507_v42  ;;  %v1499_v37 = vadd.f32 %v11100_v25, %v1498_v55 }
 0x269   : > { %v8440_v14 = vpop.f32.mrf.mxu0 }
 0x26a   : > { %v11218_v17 = vpack.c.bf16 %v1612_v52, %v1611_v10  ;;  %v1610_v4 = vmul.f32 0.35355338, %v1499_v37  ;;  %1829 = vrot.lane.b32.xlu0 %v11215_v16, %s10165_s20  ;;  %v1520_v1 = vadd.f32 %v8440_v14, %v11100_v25  ;;  %v11252_v9 = vpack.c.bf16 %v1499_v37, %v1496_v2 }
 0x26b   : > { %v1511_v40 = vpop.f32.mrf.mxu0 }
 0x26c   : > { %14825 = vst [vmem:[#allocation23_spill] sm:$0xff] %v11218_v17  ;;  %v11222_v47 = vpack.c.bf16 %v1610_v4, %v1609_v61  ;;  %v1512_v21 = vadd.f32 %v11100_v25, %v1511_v40  ;;  %v1615_v50 = vmul.f32 0.35355338, %v1520_v1 }
 0x26d   : > { %v8441_v19 = vpop.f32.mrf.mxu0 }
 0x26e   : > { %14826 = vst [vmem:[#allocation24_spill] sm:$0xff] %v11222_v47  ;;  %v1523_v11 = vadd.f32 %v8441_v19, %v11100_v25  ;;  %2306 = vrot.lane.b32.xlu0 %v11143_v18, %s10166_s2  ;;  %v1613_v38 = vmul.f32 0.35355338, %v1512_v21 }
 0x26f   : > { %v1514_v26 = vpop.f32.mrf.mxu0 }
 0x270   : > { %v1616_v63 = vmul.f32 0.35355338, %v1523_v11  ;;  %v11229_v8 = vpack.c.bf16 %v1523_v11, %v1520_v1  ;;  %v1515_v15 = vadd.f32 %v11100_v25, %v1514_v26  ;;  %v11246_v25 = vpack.c.bf16 %v1507_v42, %v1504_v31 }
 0x272   : > { %v11232_v27 = vpack.c.bf16 %v1616_v63, %v1615_v50  ;;  %v1614_v51 = vmul.f32 0.35355338, %v1515_v15  ;;  %2302 = vrot.lane.b32.xlu0 %v11159_v56, %s10166_s2  ;;  %1841 = vrot.lane.b32.xlu1 %v11229_v8, %s10165_s20  ;;  %v11240_v28 = vpack.c.bf16 %v1515_v15, %v1512_v21 }
 0x274   : > { %14827 = vst [vmem:[#allocation25_spill] sm:$0xff] %v11232_v27  ;;  %v11238_v60 = vpack.c.bf16 %v1614_v51, %v1613_v38 }
 0x276   : > { %14828 = vst [vmem:[#allocation26_spill] sm:$0xff] %v11238_v60  ;;  %2300 = vrot.lane.b32.xlu0 %v11174_v24, %s10166_s2  ;;  %1839 = vrot.lane.b32.xlu1 %v11240_v28, %s10165_s20 }
 0x27a   : > { %2294 = vrot.lane.b32.xlu0 %v11184_v5, %s10166_s2  ;;  %1837 = vrot.lane.b32.xlu1 %v11246_v25, %s10165_s20 }
 0x27e   : > { %2427 = vrot.lane.b32.xlu0 %v11229_v8, %s10166_s2  ;;  %1835 = vrot.lane.b32.xlu1 %v11252_v9, %s10165_s20 }
 0x282   : > { %2423 = vrot.lane.b32.xlu0 %v11246_v25, %s10166_s2  ;;  %1831 = vrot.lane.b32.xlu1 %v11258_v59, %s10165_s20 }
 0x286   : > { %2419 = vrot.lane.b32.xlu0 %v11206_v49, %s10166_s2  ;;  %1827 = vrot.lane.b32.xlu1 %v11266_v30, %s10165_s20  ;;  %s14830_s20 = sld [smem:[#allocation5_spill]] }
 0x28a   : > { %2304 = vrot.lane.b32.xlu1 %v11148_v22, %s10166_s2 }
 0x28e   : > { %2298 = vrot.lane.b32.xlu1 %v11152_v20, %s10166_s2 }
 0x292   : > { %2296 = vrot.lane.b32.xlu1 %v11167_v43, %s10166_s2 }
 0x296   : > { %2292 = vrot.lane.b32.xlu1 %v11199_v3, %s10166_s2 }
 0x29a   : > { %2421 = vrot.lane.b32.xlu1 %v11252_v9, %s10166_s2 }
 0x29e   : > { %2417 = vrot.lane.b32.xlu1 %v11258_v59, %s10166_s2 }
 0x2a2   : > { %2425 = vrot.lane.b32.xlu1 %v11240_v28, %s10166_s2 }
 0x2c4   : > { %v1672_v58 = vpop.permute.xlu0 %1671 }
 0x2c5   : > { %9176 = vmatprep.subr.msk.bf16.mxu1 %vm1673_vm2, %v1672_v58  ;;  %v1720_v36 = vsel %vm1673_vm2, %v1672_v58, 0 }
 0x2c6   : > { %v1670_v29 = vpop.permute.xlu1 %1669  ;;  %8443 = vmatpush3.bf16.xpose.msra.mxu1 %v1720_v36 }
 0x2c7   : > { %9177 = vmatprep.subr.msk.bf16.mxu1 %vm1673_vm2, %v1670_v29  ;;  %v1717_v32 = vsel %vm1673_vm2, %v1670_v29, 0 }
 0x2c8   : > { %v1664_v46 = vpop.permute.xlu0 %1663 }
 0x2c9   : > { %v1708_v41 = vsel %vm1673_vm2, %v1664_v46, 0 }
 0x2ca   : > { %v1668_v34 = vpop.permute.xlu1 %1667 }
 0x2cb   : > { %v1714_v35 = vsel %vm1673_vm2, %v1668_v34, 0 }
 0x2cc   : > { %v1662_v0 = vpop.permute.xlu0 %1661 }
 0x2cd   : > { %v1705_v37 = vsel %vm1673_vm2, %v1662_v0, 0 }
 0x2ce   : > { %8445 = vmatpush3.bf16.xpose.msra.mxu1 %v1717_v32  ;;  %v1666_v45 = vpop.permute.xlu1 %1665 }
 0x2cf   : > { %9178 = vmatprep.subr.msk.bf16.mxu1 %vm1673_vm2, %v1668_v34  ;;  %v1711_v13 = vsel %vm1673_vm2, %v1666_v45, 0 }
 0x2d0   : > { %v1660_v42 = vpop.permute.xlu0 %1659 }
 0x2d1   : > { %v1702_v40 = vsel %vm1673_vm2, %v1660_v42, 0 }
 0x2d4   : > { %v1658_v10 = vpop.permute.xlu0 %1657 }
 0x2d5   : > { %v1699_v26 = vsel %vm1673_vm2, %v1658_v10, 0 }
 0x2d6   : > { %8447 = vmatpush3.bf16.xpose.msra.mxu1 %v1714_v35 }
 0x2d7   : > { %9179 = vmatprep.subr.msk.bf16.mxu1 %vm1673_vm2, %v1666_v45 }
 0x2d8   : > { %v1834_v4 = vpop.permute.xlu0 %1833 }
 0x2d9   : > { %v1877_v38 = vsel %vm1673_vm2, %v1834_v4, 0 }
 0x2dc   : > { %v1830_v21 = vpop.permute.xlu0 %1829 }
 0x2dd   : > { %v1871_v35 = vsel %vm1673_vm2, %v1830_v21, 0 }
 0x2de   : > { %8449 = vmatpush3.bf16.xpose.msra.mxu1 %v1711_v13 }
 0x2df   : > { %9180 = vmatprep.subr.msk.bf16.mxu1 %vm1673_vm2, %v1664_v46 }
 0x2e0   : > { %v2307_v63 = vpop.permute.xlu0 %2306 }
 0x2e4   : > { %v1842_v31 = vpop.permute.xlu1 %1841  ;;  %v2303_v58 = vpop.permute.xlu0 %2302 }
 0x2e5   : > { %9184 = vmatprep.subr.msk.bf16.mxu0 %vm1673_vm2, %v1842_v31  ;;  %v1889_v2 = vsel %vm1673_vm2, %v1842_v31, 0 }
 0x2e6   : > { %8451 = vmatpush3.bf16.xpose.msra.mxu1 %v1708_v41  ;;  %8475 = vmatpush3.bf16.xpose.msra.mxu0 %v1889_v2 }
 0x2e7   : > { %9181 = vmatprep.subr.msk.bf16.mxu1 %vm1673_vm2, %v1662_v0 }
 0x2e8   : > { %v1840_v55 = vpop.permute.xlu1 %1839  ;;  %v2301_v32 = vpop.permute.xlu0 %2300 }
 0x2e9   : > { %9185 = vmatprep.subr.msk.bf16.mxu0 %vm1673_vm2, %v1840_v55  ;;  %v1886_v14 = vsel %vm1673_vm2, %v1840_v55, 0  ;;  %v11349_v55 = vld [vmem:[%s14829_s26 + $0x10] sm:$0xff] }
 0x2ec   : > { %v1838_v52 = vpop.permute.xlu1 %1837  ;;  %v2295_v45 = vpop.permute.xlu0 %2294 }
 0x2ed   : > { %v1883_v1 = vsel %vm1673_vm2, %v1838_v52, 0 }
 0x2ee   : > { %8453 = vmatpush3.bf16.xpose.msra.mxu1 %v1705_v37  ;;  %8477 = vmatpush3.bf16.xpose.msra.mxu0 %v1886_v14  ;;  %v11357_v14 = vld [vmem:[%s14829_s26] sm:$0xff] }
 0x2ef   : > { %9182 = vmatprep.subr.msk.bf16.mxu1 %vm1673_vm2, %v1660_v42  ;;  %9186 = vmatprep.subr.msk.bf16.mxu0 %vm1673_vm2, %v1838_v52 }
 0x2f0   : > { %v1836_v61 = vpop.permute.xlu1 %1835  ;;  %v2428_v0 = vpop.permute.xlu0 %2427 }
 0x2f1   : > { %v1880_v50 = vsel %vm1673_vm2, %v1836_v61, 0 }
 0x2f4   : > { %v1832_v19 = vpop.permute.xlu1 %1831  ;;  %v2424_v2 = vpop.permute.xlu0 %2423 }
 0x2f5   : > { %v1874_v36 = vsel %vm1673_vm2, %v1832_v19, 0 }
 0x2f6   : > { %8455 = vmatpush3.bf16.xpose.msra.mxu1 %v1702_v40  ;;  %8479 = vmatpush3.bf16.xpose.msra.mxu0 %v1883_v1  ;;  %v1533_v1 = vld [vmem:[%s14829_s26 + $0x18] sm:$0xff] }
 0x2f7   : > { %9183 = vmatprep.subr.msk.bf16.mxu1 %vm1673_vm2, %v1658_v10  ;;  %9187 = vmatprep.subr.msk.bf16.mxu0 %vm1673_vm2, %v1836_v61 }
 0x2f8   : > { %v1828_v11 = vpop.permute.xlu1 %1827  ;;  %v2420_v42 = vpop.permute.xlu0 %2419 }
 0x2f9   : > { %v1868_v13 = vsel %vm1673_vm2, %v1828_v11, 0 }
 0x2fc   : > { %v2305_v15 = vpop.permute.xlu1 %2304 }
 0x2fe   : > { %8457 = vmatpush3.bf16.xpose.msra.mxu1 %v1699_v26  ;;  %8481 = vmatpush3.bf16.xpose.msra.mxu0 %v1880_v50  ;;  %v11381_v50 = vld [vmem:[%s14829_s26 + $0x30] sm:$0xff] }
 0x2ff   : > { %9188 = vmatprep.subr.msk.bf16.mxu0 %vm1673_vm2, %v1834_v4  ;;  %8506 = vmatprep.subr.bf16.mxu1 %v2307_v63  ;;  %v11363_v4 = vld [vmem:[%s14829_s26 + $0x8] sm:$0xff] }
 0x300   : > { %v2299_v51 = vpop.permute.xlu1 %2298 }
 0x304   : > { %v2297_v29 = vpop.permute.xlu1 %2296 }
 0x305   : > { %8459 = vmatmul.mubr.msk.bf16.vlgmr.msra.gmra.mxu1 %vm1673_vm2, %v11117_v53 }
 0x306   : > { %8462 = vmatprep.mubr.msk.bf16.mxu1 %vm1673_vm2, %v11130_v57  ;;  %8483 = vmatpush3.bf16.xpose.msra.mxu0 %v1877_v38 }
 0x307   : > { %8507 = vmatpush3.bf16.msra.mxu1 %v2307_v63  ;;  %9189 = vmatprep.subr.msk.bf16.mxu0 %vm1673_vm2, %v1832_v19 }
 0x308   : > { %8508 = vmatprep.subr.bf16.mxu1 %v2305_v15  ;;  %v2293_v34 = vpop.permute.xlu1 %2292 }
 0x30b   : > { %8509 = vmatpush3.bf16.msra.mxu1 %v2305_v15  ;;  %v1537_v15 = vld [vmem:[%s14829_s26 + $0x38] sm:$0xff] }
 0x30c   : > { %8510 = vmatprep.subr.bf16.mxu1 %v2303_v58  ;;  %v2422_v46 = vpop.permute.xlu1 %2421 }
 0x30d   : > { %8463 = vmatmul.mubr.msk.bf16.gmra.mxu1 %vm1673_vm2, %v11128_v12 }
 0x30e   : > { %8466 = vmatprep.mubr.msk.bf16.mxu1 %vm1673_vm2, %v11138_v7  ;;  %8485 = vmatpush3.bf16.xpose.msra.mxu0 %v1874_v36  ;;  %v1534_v36 = vld [vmem:[%s14829_s26 + $0x20] sm:$0xff] }
 0x30f   : > { %8511 = vmatpush3.bf16.msra.mxu1 %v2303_v58  ;;  %9190 = vmatprep.subr.msk.bf16.mxu0 %vm1673_vm2, %v1830_v21 }
 0x310   : > { %8512 = vmatprep.subr.bf16.mxu1 %v2301_v32  ;;  %v2418_v31 = vpop.permute.xlu1 %2417 }
 0x313   : > { %8513 = vmatpush3.bf16.msra.mxu1 %v2301_v32  ;;  %v1535_v32 = vld [vmem:[%s14829_s26 + $0x28] sm:$0xff] }
 0x314   : > { %8514 = vmatprep.subr.bf16.mxu1 %v2299_v51  ;;  %v2426_v41 = vpop.permute.xlu1 %2425 }
 0x315   : > { %8467 = vmatmul.mubr.msk.bf16.gmra.mxu1 %vm1673_vm2, %v11136_v6 }
 0x316   : > { %8470 = vmatprep.mubr.msk.bf16.mxu1 %vm1673_vm2, %v11154_v44  ;;  %8487 = vmatpush3.bf16.xpose.msra.mxu0 %v1871_v35 }
 0x317   : > { %8515 = vmatpush3.bf16.msra.mxu1 %v2299_v51  ;;  %9191 = vmatprep.subr.msk.bf16.mxu0 %vm1673_vm2, %v1828_v11 }
 0x318   : > { %8516 = vmatprep.subr.bf16.mxu1 %v2297_v29 }
 0x31b   : > { %8517 = vmatpush3.bf16.msra.mxu1 %v2297_v29 }
 0x31c   : > { %8518 = vmatprep.subr.bf16.mxu1 %v2295_v45 }
 0x31d   : > { %8471 = vmatmul.mubr.msk.bf16.gmra.mxu1 %vm1673_vm2, %v11146_v23 }
 0x31e   : > { %8489 = vmatpush3.bf16.xpose.msra.mxu0 %v1868_v13 }
 0x31f   : > { %8519 = vmatpush3.bf16.msra.mxu1 %v2295_v45  ;;  %8538 = vmatprep.subr.bf16.mxu0 %v2428_v0 }
 0x320   : > { %8520 = vmatprep.subr.bf16.mxu1 %v2293_v34 }
 0x323   : > { %8521 = vmatpush3.bf16.msra.mxu1 %v2293_v34 }
 0x325   : > { %8491 = vmatmul.mubr.msk.bf16.vlgmr.msra.gmra.mxu0 %vm1673_vm2, %v11177_v39 }
 0x326   : > { %8494 = vmatprep.mubr.msk.bf16.mxu0 %vm1673_vm2, %v11208_v33  ;;  %8539 = vmatpush3.bf16.msra.mxu0 %v2428_v0  ;;  %v1541_v0 = vld [vmem:[%s14829_s26 + $0x58] sm:$0xff] }
 0x327   : > { %8540 = vmatprep.subr.bf16.mxu0 %v2426_v41 }
 0x32a   : > { %8541 = vmatpush3.bf16.msra.mxu0 %v2426_v41 }
 0x32b   : > { %8542 = vmatprep.subr.bf16.mxu0 %v2424_v2 }
 0x32d   : > { %8495 = vmatmul.mubr.msk.bf16.gmra.mxu0 %vm1673_vm2, %v11202_v62 }
 0x32e   : > { %8498 = vmatprep.mubr.msk.bf16.mxu0 %vm1673_vm2, %v11222_v47  ;;  %8543 = vmatpush3.bf16.msra.mxu0 %v2424_v2  ;;  %v1543_v47 = vld [vmem:[%s14829_s26 + $0x68] sm:$0xff] }
 0x32f   : > { %8544 = vmatprep.subr.bf16.mxu0 %v2422_v46 }
 0x332   : > { %8545 = vmatpush3.bf16.msra.mxu0 %v2422_v46  ;;  %v1540_v46 = vld [vmem:[%s14829_s26 + $0x50] sm:$0xff] }
 0x333   : > { %8546 = vmatprep.subr.bf16.mxu0 %v2420_v42 }
 0x335   : > { %8499 = vmatmul.mubr.msk.bf16.gmra.mxu0 %vm1673_vm2, %v11218_v17 }
 0x336   : > { %8502 = vmatprep.mubr.msk.bf16.mxu0 %vm1673_vm2, %v11238_v60  ;;  %8547 = vmatpush3.bf16.msra.mxu0 %v2420_v42  ;;  %v1538_v42 = vld [vmem:[%s14829_s26 + $0x40] sm:$0xff] }
 0x337   : > { %8548 = vmatprep.subr.bf16.mxu0 %v2418_v31 }
 0x33a   : > { %8549 = vmatpush3.bf16.msra.mxu0 %v2418_v31 }
 0x33d   : > { %8503 = vmatmul.mubr.msk.bf16.gmra.mxu0 %vm1673_vm2, %v11232_v27 }
 0x3c5   : > { %v8460_v10 = vpop.f32.mrf.mxu1 }
 0x3c6   : > { %v11352_v52 = vadd.f32 %v8460_v10, %v11349_v55 }
 0x3c7   : > { %v1756_v37 = vpop.f32.mrf.mxu1 }
 0x3c8   : > { %1992 = vmax.xlane.f32.xlu0 %v11352_v52  ;;  %v11366_v40 = vadd.f32 %v1756_v37, %v11357_v14  ;;  %v1539_v37 = vld [vmem:[%s14829_s26 + $0x48] sm:$0xff] }
 0x3c9   : > { %v8461_v61 = vpop.f32.mrf.mxu1 }
 0x3ca   : > { %v11375_v26 = vadd.f32 %v8461_v61, %v1533_v1 }
 0x3cb   : > { %v1759_v19 = vpop.f32.mrf.mxu1 }
 0x3cc   : > { %1988 = vmax.xlane.f32.xlu0 %v11366_v40  ;;  %v11373_v21 = vadd.f32 %v1759_v19, %v11363_v4 }
 0x3cd   : > { %v8464_v11 = vpop.f32.mrf.mxu1 }
 0x3ce   : > { %1990 = vmax.xlane.f32.xlu1 %v11373_v21  ;;  %v11388_v51 = vadd.f32 %v8464_v11, %v11381_v50 }
 0x3cf   : > { %v1772_v63 = vpop.f32.mrf.mxu1 }
 0x3d0   : > { %1994 = vmax.xlane.f32.xlu0 %v11375_v26  ;;  %v11400_v35 = vadd.f32 %v1772_v63, %v1534_v36  ;;  %v1544_v63 = vld [vmem:[%s14829_s26 + $0x70] sm:$0xff] }
 0x3d1   : > { %v8465_v38 = vpop.f32.mrf.mxu1 }
 0x3d2   : > { %v11390_v58 = vadd.f32 %v8465_v38, %v1537_v15 }
 0x3d3   : > { %v1775_v29 = vpop.f32.mrf.mxu1 }
 0x3d4   : > { %2002 = vmax.xlane.f32.xlu1 %v11390_v58  ;;  %2000 = vmax.xlane.f32.xlu0 %v11388_v51  ;;  %v11402_v45 = vadd.f32 %v1775_v29, %v1535_v32  ;;  %v1545_v29 = vld [vmem:[%s14829_s26 + $0x78] sm:$0xff] }
 0x3d5   : > { %v8468_v34 = vpop.f32.mrf.mxu1 }
 0x3d6   : > { %v11412_v41 = vadd.f32 %v8468_v34, %v1540_v46 }
 0x3d7   : > { %v1788_v13 = vpop.f32.mrf.mxu1 }
 0x3d8   : > { %1998 = vmax.xlane.f32.xlu1 %v11402_v45  ;;  %1996 = vmax.xlane.f32.xlu0 %v11400_v35  ;;  %v11424_v19 = vadd.f32 %v1788_v13, %v1538_v42 }
 0x3d9   : > { %v8469_v31 = vpop.f32.mrf.mxu1 }
 0x3da   : > { %v11414_v2 = vadd.f32 %v8469_v31, %v1541_v0 }
 0x3db   : > { %v1791_v10 = vpop.f32.mrf.mxu1 }
 0x3dc   : > { %2010 = vmax.xlane.f32.xlu1 %v11414_v2  ;;  %2008 = vmax.xlane.f32.xlu0 %v11412_v41  ;;  %v11426_v11 = vadd.f32 %v1791_v10, %v1539_v37  ;;  %v1542_v10 = vld [vmem:[%s14829_s26 + $0x60] sm:$0xff] }
 0x3dd   : > { %v8472_v61 = vpop.f32.mrf.mxu1 }
 0x3de   : > { %v11436_v31 = vadd.f32 %v8472_v61, %v1544_v63 }
 0x3df   : > { %v1804_v38 = vpop.f32.mrf.mxu1 }
 0x3e0   : > { %2006 = vmax.xlane.f32.xlu1 %v11426_v11  ;;  %2004 = vmax.xlane.f32.xlu0 %v11424_v19  ;;  %v11448_v54 = vadd.f32 %v1804_v38, %v1542_v10 }
 0x3e1   : > { %v8473_v34 = vpop.f32.mrf.mxu1 }
 0x3e2   : > { %v11438_v13 = vadd.f32 %v8473_v34, %v1545_v29 }
 0x3e3   : > { %v1807_v60 = vpop.f32.mrf.mxu1 }
 0x3e4   : > { %2018 = vmax.xlane.f32.xlu1 %v11438_v13  ;;  %2016 = vmax.xlane.f32.xlu0 %v11436_v31  ;;  %v11450_v61 = vadd.f32 %v1807_v60, %v1543_v47 }
 0x3e5   : > { %v8492_v33 = vpop.f32.mrf.mxu0 }
 0x3e6   : > { %v11455_v7 = vadd.f32 %v8492_v33, %v11349_v55 }
 0x3e7   : > { %v1925_v34 = vpop.f32.mrf.mxu0 }
 0x3e8   : > { %2014 = vmax.xlane.f32.xlu1 %v11450_v61  ;;  %2012 = vmax.xlane.f32.xlu0 %v11448_v54  ;;  %v11462_v60 = vadd.f32 %v1925_v34, %v11357_v14 }
 0x3e9   : > { %v8493_v23 = vpop.f32.mrf.mxu0 }
 0x3ea   : > { %v11457_v12 = vadd.f32 %v8493_v23, %v1533_v1 }
 0x3eb   : > { %v1928_v49 = vpop.f32.mrf.mxu0 }
 0x3ec   : > { %2024 = vmax.xlane.f32.xlu0 %v11455_v7  ;;  %2026 = vmax.xlane.f32.xlu1 %v11457_v12  ;;  %v11465_v48 = vadd.f32 %v1928_v49, %v11363_v4 }
 0x3ed   : > { %v8496_v38 = vpop.f32.mrf.mxu0 }
 0x3ee   : > { %v11470_v23 = vadd.f32 %v8496_v38, %v11381_v50 }
 0x3ef   : > { %v1941_v3 = vpop.f32.mrf.mxu0 }
 0x3f0   : > { %2022 = vmax.xlane.f32.xlu1 %v11465_v48  ;;  %2020 = vmax.xlane.f32.xlu0 %v11462_v60  ;;  %v11476_v34 = vadd.f32 %v1941_v3, %v1534_v36 }
 0x3f1   : > { %v8497_v33 = vpop.f32.mrf.mxu0 }
 0x3f2   : > { %v11472_v55 = vadd.f32 %v8497_v33, %v1537_v15 }
 0x3f3   : > { %v1944_v1 = vpop.f32.mrf.mxu0 }
 0x3f4   : > { %2034 = vmax.xlane.f32.xlu1 %v11472_v55  ;;  %2032 = vmax.xlane.f32.xlu0 %v11470_v23  ;;  %v11478_v49 = vadd.f32 %v1944_v1, %v1535_v32 }
 0x3f5   : > { %v8500_v14 = vpop.f32.mrf.mxu0 }
 0x3f6   : > { %v11482_v50 = vadd.f32 %v8500_v14, %v1540_v46 }
 0x3f7   : > { %v1957_v4 = vpop.f32.mrf.mxu0 }
 0x3f8   : > { %2030 = vmax.xlane.f32.xlu1 %v11478_v49  ;;  %2028 = vmax.xlane.f32.xlu0 %v11476_v34  ;;  %v11488_v3 = vadd.f32 %v1957_v4, %v1538_v42 }
 0x3f9   : > { %v8501_v5 = vpop.f32.mrf.mxu0 }
 0x3fa   : > { %v11484_v15 = vadd.f32 %v8501_v5, %v1541_v0 }
 0x3fb   : > { %v1960_v38 = vpop.f32.mrf.mxu0 }
 0x3fc   : > { %2042 = vmax.xlane.f32.xlu1 %v11484_v15  ;;  %2040 = vmax.xlane.f32.xlu0 %v11482_v50  ;;  %v11490_v36 = vadd.f32 %v1960_v38, %v1539_v37 }
 0x3fd   : > { %v8504_v33 = vpop.f32.mrf.mxu0 }
 0x3fe   : > { %v11494_v46 = vadd.f32 %v8504_v33, %v1544_v63 }
 0x3ff   : > { %v1973_v32 = vpop.f32.mrf.mxu0 }
 0x400   : > { %2038 = vmax.xlane.f32.xlu1 %v11490_v36  ;;  %2036 = vmax.xlane.f32.xlu0 %v11488_v3  ;;  %v11500_v14 = vadd.f32 %v1973_v32, %v1542_v10 }
 0x401   : > { %v8505_v1 = vpop.f32.mrf.mxu0 }
 0x402   : > { %v11496_v5 = vadd.f32 %v8505_v1, %v1545_v29 }
 0x403   : > { %v1976_v0 = vpop.f32.mrf.mxu0 }
 0x404   : > { %2050 = vmax.xlane.f32.xlu1 %v11496_v5  ;;  %2048 = vmax.xlane.f32.xlu0 %v11494_v46  ;;  %v11502_v42 = vadd.f32 %v1976_v0, %v1543_v47 }
 0x408   : > { %2046 = vmax.xlane.f32.xlu1 %v11502_v42  ;;  %2044 = vmax.xlane.f32.xlu0 %v11500_v14 }
 0x451   : > { %v1993_v37 = vpop.xlane.xlu0 %1992 }
 0x452   : > { %v2054_v4 = vsub.f32 %v11352_v52, %v1993_v37 }
 0x454   : > { %v2088_v63 = vmul.f32 1.442695, %v2054_v4 }
 0x455   : > { %v1989_v38 = vpop.xlane.xlu0 %1988 }
 0x456   : > { %9356 = vpow2.f32 %v2088_v63  ;;  %v2052_v29 = vsub.f32 %v11366_v40, %v1989_v38 }
 0x457   : > { %v1991_v33 = vpop.xlane.xlu1 %1990 }
 0x458   : > { %v2084_v1 = vmul.f32 1.442695, %v2052_v29  ;;  %v2053_v10 = vsub.f32 %v11373_v21, %v1991_v33 }
 0x459   : > { %v1995_v43 = vpop.xlane.xlu0 %1994 }
 0x45a   : > { %9358 = vpow2.f32 %v2084_v1  ;;  %v2055_v47 = vsub.f32 %v11375_v26, %v1995_v43  ;;  %v2086_v20 = vmul.f32 1.442695, %v2053_v10 }
 0x45c   : > { %v2090_v32 = vmul.f32 1.442695, %v2055_v47 }
 0x45d   : > { %v2003_v0 = vpop.xlane.xlu1 %2002  ;;  %v2001_v27 = vpop.xlane.xlu0 %2000 }
 0x45e   : > { %9360 = vpow2.f32 %v2090_v32  ;;  %v2058_v52 = vsub.f32 %v11388_v51, %v2001_v27  ;;  %v2059_v21 = vsub.f32 %v11390_v58, %v2003_v0 }
 0x45f   : > { %9362 = vpow2.f32 %v2086_v20 }
 0x460   : > { %v2096_v37 = vmul.f32 1.442695, %v2058_v52  ;;  %v2098_v20 = vmul.f32 1.442695, %v2059_v21 }
 0x461   : > { %v1999_v4 = vpop.xlane.xlu1 %1998  ;;  %v1997_v63 = vpop.xlane.xlu0 %1996 }
 0x462   : > { %v2057_v40 = vsub.f32 %v11402_v45, %v1999_v4  ;;  %v2056_v38 = vsub.f32 %v11400_v35, %v1997_v63  ;;  %9364 = vpow2.f32 %v2096_v37 }
 0x463   : > { %v11513_v29 = vpop.eup %9356 }
 0x464   : > { %v2094_v43 = vmul.f32 1.442695, %v2057_v40  ;;  %v2092_v26 = vmul.f32 1.442695, %v2056_v38  ;;  %2152 = vadd.xlane.f32.xlu1 %v11513_v29 }
 0x465   : > { %v2011_v33 = vpop.xlane.xlu1 %2010  ;;  %v2009_v1 = vpop.xlane.xlu0 %2008 }
 0x466   : > { %9366 = vpow2.f32 %v2094_v43  ;;  %v2062_v27 = vsub.f32 %v11412_v41, %v2009_v1  ;;  %v2063_v58 = vsub.f32 %v11414_v2, %v2011_v33 }
 0x467   : > { %v11518_v51 = vpop.eup %9358  ;;  %9368 = vpow2.f32 %v2092_v26 }
 0x468   : > { %2148 = vadd.xlane.f32.xlu1 %v11518_v51  ;;  %v2104_v10 = vmul.f32 1.442695, %v2062_v27  ;;  %9370 = vpow2.f32 %v2098_v20  ;;  %v2106_v37 = vmul.f32 1.442695, %v2063_v58 }
 0x469   : > { %v2007_v35 = vpop.xlane.xlu1 %2006  ;;  %v2005_v45 = vpop.xlane.xlu0 %2004 }
 0x46a   : > { %v2060_v47 = vsub.f32 %v11424_v19, %v2005_v45  ;;  %9372 = vpow2.f32 %v2104_v10  ;;  %v2061_v4 = vsub.f32 %v11426_v11, %v2007_v35 }
 0x46b   : > { %v11523_v32 = vpop.eup %9360 }
 0x46c   : > { %v2100_v0 = vmul.f32 1.442695, %v2060_v47  ;;  %2154 = vadd.xlane.f32.xlu1 %v11523_v32  ;;  %v11528_v40 = vpop.eup %9362  ;;  %v2102_v43 = vmul.f32 1.442695, %v2061_v4 }
 0x46d   : > { %v2019_v41 = vpop.xlane.xlu1 %2018  ;;  %v2017_v52 = vpop.xlane.xlu0 %2016 }
 0x46e   : > { %v2066_v63 = vsub.f32 %v11436_v31, %v2017_v52  ;;  %9374 = vpow2.f32 %v2100_v0  ;;  %v2067_v26 = vsub.f32 %v11438_v13, %v2019_v41 }
 0x46f   : > { %v11530_v2 = vpop.eup %9364  ;;  %9376 = vpow2.f32 %v2106_v37 }
 0x470   : > { %v2112_v19 = vmul.f32 1.442695, %v2066_v63  ;;  %2150 = vadd.xlane.f32.xlu1 %v11528_v40  ;;  %2160 = vadd.xlane.f32.xlu0 %v11530_v2  ;;  %v2114_v35 = vmul.f32 1.442695, %v2067_v26 }
 0x471   : > { %v2015_v38 = vpop.xlane.xlu1 %2014  ;;  %v2013_v21 = vpop.xlane.xlu0 %2012 }
 0x472   : > { %v2064_v11 = vsub.f32 %v11448_v54, %v2013_v21  ;;  %9378 = vpow2.f32 %v2112_v19  ;;  %v2065_v45 = vsub.f32 %v11450_v61, %v2015_v38 }
 0x473   : > { %v11536_v33 = vpop.eup %9366  ;;  %9380 = vpow2.f32 %v2102_v43 }
 0x474   : > { %v11538_v31 = vpop.eup %9368  ;;  %v2108_v1 = vmul.f32 1.442695, %v2064_v11  ;;  %2158 = vadd.xlane.f32.xlu1 %v11536_v33  ;;  %v2110_v0 = vmul.f32 1.442695, %v2065_v45 }
 0x475   : > { %2156 = vadd.xlane.f32.xlu0 %v11538_v31  ;;  %v2027_v27 = vpop.xlane.xlu1 %2026  ;;  %v2025_v20 = vpop.xlane.xlu0 %2024 }
 0x476   : > { %v2070_v13 = vsub.f32 %v11455_v7, %v2025_v20  ;;  %9382 = vpow2.f32 %v2108_v1  ;;  %v11544_v54 = vpop.eup %9370  ;;  %v2071_v41 = vsub.f32 %v11457_v12, %v2027_v27 }
 0x477   : > { %9384 = vpow2.f32 %v2114_v35  ;;  %v11549_v37 = vpop.eup %9372 }
 0x478   : > { %v2120_v58 = vmul.f32 1.442695, %v2070_v13  ;;  %v2122_v19 = vmul.f32 1.442695, %v2071_v41 }
 0x479   : > { %2162 = vadd.xlane.f32.xlu0 %v11544_v54  ;;  %v2023_v10 = vpop.xlane.xlu1 %2022  ;;  %v2021_v47 = vpop.xlane.xlu0 %2020 }
 0x47a   : > { %v2068_v52 = vsub.f32 %v11462_v60, %v2021_v47  ;;  %9386 = vpow2.f32 %v2120_v58  ;;  %v2069_v38 = vsub.f32 %v11465_v48, %v2023_v10 }
 0x47b   : > { %v11551_v61 = vpop.eup %9374  ;;  %9388 = vpow2.f32 %v2110_v0 }
 0x47c   : > { %v2116_v7 = vmul.f32 1.442695, %v2068_v52  ;;  %2164 = vadd.xlane.f32.xlu1 %v11551_v61  ;;  %v11557_v21 = vpop.eup %9376  ;;  %v2118_v1 = vmul.f32 1.442695, %v2069_v38 }
 0x47d   : > { %2168 = vadd.xlane.f32.xlu0 %v11549_v37  ;;  %v2035_v4 = vpop.xlane.xlu1 %2034  ;;  %v2033_v63 = vpop.xlane.xlu0 %2032 }
 0x47e   : > { %v2074_v12 = vsub.f32 %v11470_v23, %v2033_v63  ;;  %9390 = vpow2.f32 %v2116_v7  ;;  %v2075_v27 = vsub.f32 %v11472_v55, %v2035_v4 }
 0x47f   : > { %v11559_v60 = vpop.eup %9378  ;;  %9392 = vpow2.f32 %v2122_v19 }
 0x480   : > { %v2128_v43 = vmul.f32 1.442695, %v2074_v12  ;;  %2176 = vadd.xlane.f32.xlu1 %v11559_v60  ;;  %v11565_v20 = vpop.eup %9380  ;;  %v2130_v58 = vmul.f32 1.442695, %v2075_v27 }
 0x481   : > { %2170 = vadd.xlane.f32.xlu0 %v11557_v21  ;;  %v2031_v26 = vpop.xlane.xlu1 %2030  ;;  %v2029_v11 = vpop.xlane.xlu0 %2028 }
 0x482   : > { %v2072_v48 = vsub.f32 %v11476_v34, %v2029_v11  ;;  %9394 = vpow2.f32 %v2128_v43  ;;  %v2073_v10 = vsub.f32 %v11478_v49, %v2031_v26 }
 0x483   : > { %v11567_v23 = vpop.eup %9382  ;;  %9396 = vpow2.f32 %v2118_v1 }
 0x484   : > { %v2124_v35 = vmul.f32 1.442695, %v2072_v48  ;;  %2172 = vadd.xlane.f32.xlu1 %v11567_v23  ;;  %v11573_v47 = vpop.eup %9384  ;;  %v2126_v52 = vmul.f32 1.442695, %v2073_v10 }
 0x485   : > { %2166 = vadd.xlane.f32.xlu0 %v11565_v20  ;;  %v2043_v45 = vpop.xlane.xlu1 %2042  ;;  %v2041_v13 = vpop.xlane.xlu0 %2040 }
 0x486   : > { %v2078_v55 = vsub.f32 %v11482_v50, %v2041_v13  ;;  %9398 = vpow2.f32 %v2124_v35  ;;  %v2079_v7 = vsub.f32 %v11484_v15, %v2043_v45 }
 0x487   : > { %v11575_v34 = vpop.eup %9386  ;;  %9400 = vpow2.f32 %v2130_v58 }
 0x488   : > { %v2136_v0 = vmul.f32 1.442695, %v2078_v55  ;;  %2184 = vadd.xlane.f32.xlu1 %v11575_v34  ;;  %v11581_v49 = vpop.eup %9388  ;;  %v2138_v12 = vmul.f32 1.442695, %v2079_v7  ;;  %v11635_v7 = vld [vmem:[%s14830_s20] sm:$0xf] }
 0x489   : > { %2178 = vadd.xlane.f32.xlu0 %v11573_v47  ;;  %v2037_v41 = vpop.xlane.xlu0 %2036  ;;  %v2039_v50 = vpop.xlane.xlu1 %2038  ;;  %9192 = vmatprep.subr.msk.bf16.mxu1 %vm2598_vm3, %v11635_v7 }
 0x48a   : > { %v2076_v4 = vsub.f32 %v11488_v3, %v2037_v41  ;;  %9402 = vpow2.f32 %v2136_v0  ;;  %v2077_v43 = vsub.f32 %v11490_v36, %v2039_v50 }
 0x48b   : > { %v11583_v63 = vpop.eup %9390  ;;  %9404 = vpow2.f32 %v2126_v52 }
 0x48c   : > { %v2132_v19 = vmul.f32 1.442695, %v2076_v4  ;;  %2180 = vadd.xlane.f32.xlu1 %v11583_v63  ;;  %v11589_v26 = vpop.eup %9392  ;;  %v2134_v27 = vmul.f32 1.442695, %v2077_v43 }
 0x48d   : > { %2174 = vadd.xlane.f32.xlu0 %v11581_v49  ;;  %v2049_v38 = vpop.xlane.xlu0 %2048  ;;  %v2051_v52 = vpop.xlane.xlu1 %2050 }
 0x48e   : > { %v2082_v15 = vsub.f32 %v11494_v46, %v2049_v38  ;;  %9406 = vpow2.f32 %v2132_v19  ;;  %v2083_v19 = vsub.f32 %v11496_v5, %v2051_v52  ;;  %v14833_v52 = vld [vmem:[#allocation15_spill] sm:$0xff] }
 0x48f   : > { %v11591_v3 = vpop.eup %9394  ;;  %9408 = vpow2.f32 %v2138_v12 }
 0x490   : > { %v2144_v11 = vmul.f32 1.442695, %v2082_v15  ;;  %2192 = vadd.xlane.f32.xlu1 %v11591_v3  ;;  %v11596_v35 = vpop.eup %9396  ;;  %v2146_v12 = vmul.f32 1.442695, %v2083_v19  ;;  %v14834_v19 = vld [vmem:[#allocation17_spill] sm:$0xff] }
 0x491   : > { %2186 = vadd.xlane.f32.xlu0 %v11589_v26  ;;  %v2045_v1 = vpop.xlane.xlu0 %2044  ;;  %v2047_v4 = vpop.xlane.xlu1 %2046 }
 0x492   : > { %v2080_v48 = vsub.f32 %v11500_v14, %v2045_v1  ;;  %9410 = vpow2.f32 %v2144_v11  ;;  %v2081_v50 = vsub.f32 %v11502_v42, %v2047_v4  ;;  %v14831_v1 = vld [vmem:[#allocation13_spill] sm:$0xff] }
 0x493   : > { %v11598_v36 = vpop.eup %9398  ;;  %9412 = vpow2.f32 %v2134_v27 }
 0x494   : > { %v2140_v46 = vmul.f32 1.442695, %v2080_v48  ;;  %2188 = vadd.xlane.f32.xlu1 %v11598_v36  ;;  %v11602_v45 = vpop.eup %9400  ;;  %v2142_v38 = vmul.f32 1.442695, %v2081_v50  ;;  %v14832_v48 = vld [vmem:[#allocation25_spill] sm:$0xff] }
 0x495   : > { %2182 = vadd.xlane.f32.xlu0 %v11596_v35 }
 0x496   : > { %9414 = vpow2.f32 %v2140_v46 }
 0x497   : > { %v11604_v13 = vpop.eup %9402  ;;  %9416 = vpow2.f32 %v2142_v38 }
 0x498   : > { %2200 = vadd.xlane.f32.xlu1 %v11604_v13  ;;  %v11608_v14 = vpop.eup %9404  ;;  %9418 = vpow2.f32 %v2146_v12 }
 0x499   : > { %2194 = vadd.xlane.f32.xlu0 %v11602_v45 }
 0x49b   : > { %v11610_v58 = vpop.eup %9406 }
 0x49c   : > { %2196 = vadd.xlane.f32.xlu1 %v11610_v58  ;;  %v11614_v10 = vpop.eup %9408 }
 0x49d   : > { %2190 = vadd.xlane.f32.xlu0 %v11608_v14 }
 0x49f   : > { %v11616_v55 = vpop.eup %9410 }
 0x4a0   : > { %2208 = vadd.xlane.f32.xlu1 %v11616_v55  ;;  %v11620_v0 = vpop.eup %9412 }
 0x4a1   : > { %2202 = vadd.xlane.f32.xlu0 %v11614_v10 }
 0x4a3   : > { %v11622_v41 = vpop.eup %9414 }
 0x4a4   : > { %2204 = vadd.xlane.f32.xlu1 %v11622_v41  ;;  %v11653_v42 = vpop.eup %9416 }
 0x4a5   : > { %2198 = vadd.xlane.f32.xlu0 %v11620_v0  ;;  %v11658_v5 = vpop.eup %9418 }
 0x4b5   : > { %2413 = vrot.lane.b32.xlu1 %v11266_v30, %s10166_s2 }
 0x4b9   : > { %2831 = vrot.lane.b32.xlu1 %v11148_v22, %s10167_s23 }
 0x4bb   : > { %2415 = vrot.lane.b32.xlu0 %v11215_v16, %s10166_s2  ;;  %s10168_s2 = smov 120  }
 0x4bd   : > { %2829 = vrot.lane.b32.xlu1 %v11159_v56, %s10167_s23 }
 0x4c1   : > { %2827 = vrot.lane.b32.xlu1 %v11174_v24, %s10167_s23 }
 0x4c5   : > { %3018 = vrot.lane.b32.xlu1 %v11229_v8, %s10167_s23 }
 0x4c9   : > { %3016 = vrot.lane.b32.xlu1 %v11240_v28, %s10167_s23 }
 0x4cd   : > { %3014 = vrot.lane.b32.xlu1 %v11246_v25, %s10167_s23 }
 0x4d1   : > { %3012 = vrot.lane.b32.xlu1 %v11252_v9, %s10167_s23 }
 0x4d5   : > { %2805 = vrot.lane.b32.xlu1 %v11117_v53, %s10168_s2 }
 0x4d9   : > { %2807 = vrot.lane.b32.xlu1 %v11130_v57, %s10168_s2 }
 0x4da   : > { %2206 = vadd.xlane.f32.xlu0 %v11653_v42 }
 0x4dd   : > { %3008 = vrot.lane.b32.xlu1 %v11258_v59, %s10167_s23 }
 0x4de   : > { %2210 = vadd.xlane.f32.xlu0 %v11658_v5 }
 0x4e1   : > { %2813 = vrot.lane.b32.xlu1 %v11136_v6, %s10168_s2 }
 0x4e5   : > { %2815 = vrot.lane.b32.xlu1 %v11154_v44, %s10168_s2 }
 0x4e9   : > { %3004 = vrot.lane.b32.xlu1 %v11266_v30, %s10167_s23 }
 0x4ed   : > { %v2153_v43 = vpop.xlane.xlu1 %2152  ;;  %2990 = vrot.lane.b32.xlu1 %v11177_v39, %s10168_s2 }
 0x4f1   : > { %v2149_v15 = vpop.xlane.xlu1 %2148  ;;  %2994 = vrot.lane.b32.xlu1 %v11202_v62, %s10168_s2 }
 0x4f4   : > { %2833 = vrot.lane.b32.xlu0 %v11143_v18, %s10167_s23 }
 0x4f5   : > { %v2155_v11 = vpop.xlane.xlu1 %2154  ;;  %2998 = vrot.lane.b32.xlu1 %v11218_v17, %s10168_s2 }
 0x4f6   : > { %9420 = vrcp.f32 %v2155_v11 }
 0x4f7   : > { %9422 = vrcp.f32 %v2149_v15 }
 0x4f8   : > { %2825 = vrot.lane.b32.xlu0 %v14831_v1, %s10167_s23  ;;  %9424 = vrcp.f32 %v2153_v43  ;;  %v14835_v43 = vld [vmem:[#allocation19_spill] sm:$0xff] }
 0x4f9   : > { %v2151_v27 = vpop.xlane.xlu1 %2150  ;;  %3002 = vrot.lane.b32.xlu1 %v14832_v48, %s10168_s2  ;;  %v2161_v46 = vpop.xlane.xlu0 %2160 }
 0x4fa   : > { %9426 = vrcp.f32 %v2151_v27 }
 0x4fc   : > { %2823 = vrot.lane.b32.xlu0 %v14833_v52, %s10167_s23 }
 0x4fd   : > { %v2159_v4 = vpop.xlane.xlu1 %2158  ;;  %3481 = vrot.lane.b32.xlu1 %v11148_v22, %s10169_s24 }
 0x4fe   : > { %9428 = vrcp.f32 %v2159_v4  ;;  %v2157_v50 = vpop.xlane.xlu0 %2156 }
 0x4ff   : > { %9430 = vrcp.f32 %v2157_v50 }
 0x500   : > { %2821 = vrot.lane.b32.xlu0 %v14834_v19, %s10167_s23  ;;  %9432 = vrcp.f32 %v2161_v46  ;;  %v14836_v46 = vld [vmem:[#allocation6_spill] sm:$0xff] }
 0x501   : > { %3475 = vrot.lane.b32.xlu1 %v14831_v1, %s10169_s24 }
 0x502   : > { %v2163_v38 = vpop.xlane.xlu0 %2162 }
 0x503   : > { %9434 = vrcp.f32 %v2163_v38  ;;  %v9421_v12 = vpop.eup %9420 }
 0x504   : > { %2819 = vrot.lane.b32.xlu0 %v14835_v43, %s10167_s23  ;;  %v9423_v15 = vpop.eup %9422  ;;  %v2247_v48 = vmul.f32 %v9421_v12, %v11523_v32  ;;  %v2600_v32 = vsel %vm2598_vm3, %v11635_v7, 0 }
 0x505   : > { %v9425_v11 = vpop.eup %9424  ;;  %v2165_v27 = vpop.xlane.xlu1 %2164  ;;  %3473 = vrot.lane.b32.xlu1 %v14833_v52, %s10169_s24  ;;  %v2244_v17 = vmul.f32 %v9423_v15, %v11518_v51 }
 0x506   : > { %v2169_v4 = vpop.xlane.xlu0 %2168  ;;  %v2246_v62 = vmul.f32 %v9425_v11, %v11513_v29 }
 0x507   : > { %v9427_v50 = vpop.eup %9426 }
 0x508   : > { %2803 = vrot.lane.b32.xlu0 %v14836_v46, %s10168_s2  ;;  %v2245_v38 = vmul.f32 %v9427_v50, %v11528_v40  ;;  %v2277_v6 = vpack.c.bf16 %v2247_v48, %v2246_v62  ;;  %v14837_v46 = vld [vmem:[#allocation21_spill] sm:$0xff] }
 0x509   : > { %v2177_v39 = vpop.xlane.xlu1 %2176  ;;  %3469 = vrot.lane.b32.xlu1 %v14835_v43, %s10169_s24 }
 0x50a   : > { %v2171_v1 = vpop.xlane.xlu0 %2170  ;;  %v2276_v44 = vpack.c.bf16 %v2245_v38, %v2244_v17 }
 0x50b   : > { %v9429_v52 = vpop.eup %9428  ;;  %9436 = vrcp.f32 %v2171_v1 }
 0x50c   : > { %v9431_v12 = vpop.eup %9430  ;;  %3010 = vrot.lane.b32.xlu0 %v14837_v46, %s10167_s23  ;;  %8522 = vmatprep.mubr.bf16.mxu1 %v2276_v44  ;;  %v2249_v51 = vmul.f32 %v9429_v52, %v11536_v33  ;;  %9438 = vrcp.f32 %v2165_v27  ;;  %v14838_v44 = vld [vmem:[#allocation7_spill] sm:$0xff]  ;;  %v14839_v52 = vld [vmem:[#allocation10_spill] sm:$0xff] }
 0x50d   : > { %8523 = vmatmul.mubr.bf16.vlgmr.msra.gmra.mxu1 %v2277_v6  ;;  %v2248_v29 = vmul.f32 %v9431_v12, %v11538_v31  ;;  %v9433_v40 = vpop.eup %9432  ;;  %v2173_v15 = vpop.xlane.xlu1 %2172  ;;  %3602 = vrot.lane.b32.xlu1 %v11240_v28, %s10169_s24  ;;  %9440 = vrcp.f32 %v2169_v4 }
 0x50e   : > { %v2167_v62 = vpop.xlane.xlu0 %2166  ;;  %8571 = vmatpush3.bf16.msra.mxu1 %v2600_v32  ;;  %v2250_v6 = vmul.f32 %v9433_v40, %v11530_v2  ;;  %v14840_v32 = vld [vmem:[#allocation12_spill] sm:$0xff] }
 0x50f   : > { %v2278_v17 = vpack.c.bf16 %v2249_v51, %v2248_v29  ;;  %9442 = vrcp.f32 %v2167_v62 }
 0x510   : > { %v9435_v7 = vpop.eup %9434  ;;  %2809 = vrot.lane.b32.xlu0 %v14838_v44, %s10168_s2 }
 0x511   : > { %8526 = vmatprep.mubr.bf16.mxu1 %v2278_v17  ;;  %v2251_v33 = vmul.f32 %v9435_v7, %v11544_v54  ;;  %v2185_v31 = vpop.xlane.xlu1 %2184  ;;  %3598 = vrot.lane.b32.xlu1 %v11252_v9, %s10169_s24  ;;  %v14841_v17 = vld [vmem:[#allocation18_spill] sm:$0xff] }
 0x512   : > { %v2179_v1 = vpop.xlane.xlu0 %2178 }
 0x513   : > { %v2279_v48 = vpack.c.bf16 %v2251_v33, %v2250_v6  ;;  %9444 = vrcp.f32 %v2179_v1 }
 0x514   : > { %2811 = vrot.lane.b32.xlu0 %v14839_v52, %s10168_s2  ;;  %9446 = vrcp.f32 %v2173_v15 }
 0x515   : > { %8527 = vmatmul.mubr.bf16.gmra.mxu1 %v2279_v48  ;;  %v2181_v11 = vpop.xlane.xlu1 %2180  ;;  %9448 = vrcp.f32 %v2177_v39 }
 0x516   : > { %v2175_v27 = vpop.xlane.xlu0 %2174 }
 0x517   : > { %9450 = vrcp.f32 %v2175_v27  ;;  %v14842_v27 = vld [vmem:[#allocation22_spill] sm:$0xff] }
 0x518   : > { %3006 = vrot.lane.b32.xlu0 %v11215_v16, %s10167_s23  ;;  %v9437_v2 = vpop.eup %9436  ;;  %9452 = vrcp.f32 %v2181_v11 }
 0x519   : > { %v2193_v54 = vpop.xlane.xlu1 %2192  ;;  %v9439_v50 = vpop.eup %9438  ;;  %v2255_v51 = vmul.f32 %v9437_v2, %v11557_v21 }
 0x51a   : > { %v2187_v4 = vpop.xlane.xlu0 %2186  ;;  %v9441_v38 = vpop.eup %9440  ;;  %v2252_v39 = vmul.f32 %v9439_v50, %v11551_v61 }
 0x51b   : > { %v2254_v62 = vmul.f32 %v9441_v38, %v11549_v37 }
 0x51c   : > { %2817 = vrot.lane.b32.xlu0 %v14840_v32, %s10168_s2  ;;  %v9443_v12 = vpop.eup %9442 }
 0x51d   : > { %v2189_v29 = vpop.xlane.xlu1 %2188  ;;  %v2253_v15 = vmul.f32 %v9443_v12, %v11565_v20  ;;  %v2281_v6 = vpack.c.bf16 %v2255_v51, %v2254_v62  ;;  %v14843_v51 = vld [vmem:[#allocation24_spill] sm:$0xff] }
 0x51e   : > { %v2183_v40 = vpop.xlane.xlu0 %2182 }
 0x51f   : > { %9454 = vrcp.f32 %v2183_v40  ;;  %v2280_v7 = vpack.c.bf16 %v2253_v15, %v2252_v39  ;;  %v14844_v15 = vld [vmem:[#allocation26_spill] sm:$0xff] }
 0x520   : > { %2988 = vrot.lane.b32.xlu0 %v14841_v17, %s10168_s2  ;;  %v9445_v33 = vpop.eup %9444  ;;  %9456 = vrcp.f32 %v2187_v4 }
 0x521   : > { %8530 = vmatprep.mubr.bf16.mxu1 %v2280_v7  ;;  %v2201_v1 = vpop.xlane.xlu1 %2200  ;;  %v9447_v21 = vpop.eup %9446  ;;  %v2259_v37 = vmul.f32 %v9445_v33, %v11573_v47  ;;  %9458 = vrcp.f32 %v2185_v31 }
 0x522   : > { %v2195_v48 = vpop.xlane.xlu0 %2194  ;;  %8531 = vmatmul.mubr.bf16.gmra.mxu1 %v2281_v6  ;;  %v9449_v11 = vpop.eup %9448  ;;  %v2256_v50 = vmul.f32 %v9447_v21, %v11567_v23  ;;  %9460 = vrcp.f32 %v2189_v29 }
 0x523   : > { %v2258_v12 = vmul.f32 %v9449_v11, %v11559_v60 }
 0x524   : > { %2992 = vrot.lane.b32.xlu0 %v14842_v27, %s10168_s2  ;;  %v9451_v61 = vpop.eup %9450 }
 0x525   : > { %v2197_v20 = vpop.xlane.xlu1 %2196  ;;  %v2257_v38 = vmul.f32 %v9451_v61, %v11581_v49  ;;  %v2283_v39 = vpack.c.bf16 %v2259_v37, %v2258_v12  ;;  %v9453_v31 = vpop.eup %9452 }
 0x526   : > { %v2191_v2 = vpop.xlane.xlu0 %2190  ;;  %v2260_v29 = vmul.f32 %v9453_v31, %v11583_v63 }
 0x527   : > { %9462 = vrcp.f32 %v2191_v2  ;;  %v2282_v40 = vpack.c.bf16 %v2257_v38, %v2256_v50 }
 0x528   : > { %2996 = vrot.lane.b32.xlu0 %v14843_v51, %s10168_s2  ;;  %9464 = vrcp.f32 %v2195_v48 }
 0x529   : > { %8534 = vmatprep.mubr.bf16.mxu1 %v2282_v40  ;;  %v11735_v4 = vpop.xlane.xlu1 %2208  ;;  %9466 = vrcp.f32 %v2193_v54 }
 0x52a   : > { %v2203_v47 = vpop.xlane.xlu0 %2202  ;;  %8535 = vmatmul.mubr.bf16.gmra.mxu1 %v2283_v39  ;;  %9468 = vrcp.f32 %v2197_v20 }
 0x52c   : > { %3000 = vrot.lane.b32.xlu0 %v14844_v15, %s10168_s2  ;;  %v9455_v23 = vpop.eup %9454 }
 0x52d   : > { %v2205_v49 = vpop.xlane.xlu1 %2204  ;;  %v2261_v62 = vmul.f32 %v9455_v23, %v11596_v35  ;;  %v9457_v6 = vpop.eup %9456 }
 0x52e   : > { %v2199_v60 = vpop.xlane.xlu0 %2198  ;;  %v9459_v11 = vpop.eup %9458  ;;  %v2263_v35 = vmul.f32 %v9457_v6, %v11589_v26 }
 0x52f   : > { %9470 = vrcp.f32 %v2199_v60  ;;  %v2284_v7 = vpack.c.bf16 %v2261_v62, %v2260_v29  ;;  %v9461_v48 = vpop.eup %9460  ;;  %v2262_v37 = vmul.f32 %v9459_v11, %v11575_v34 }
 0x530   : > { %3483 = vrot.lane.b32.xlu0 %v11143_v18, %s10169_s24  ;;  %9472 = vrcp.f32 %v2203_v47  ;;  %v2264_v20 = vmul.f32 %v9461_v48, %v11598_v36 }
 0x531   : > { %8554 = vmatprep.mubr.bf16.mxu0 %v2284_v7  ;;  %v2414_v33 = vpop.permute.xlu1 %2413  ;;  %9474 = vrcp.f32 %v2201_v1  ;;  %v2285_v2 = vpack.c.bf16 %v2263_v35, %v2262_v37 }
 0x532   : > { %v2416_v21 = vpop.permute.xlu0 %2415  ;;  %9476 = vrcp.f32 %v2205_v49 }
 0x533   : > { %8550 = vmatprep.subr.bf16.mxu0 %v2416_v21 }
 0x534   : > { %3479 = vrot.lane.b32.xlu0 %v11159_v56, %s10169_s24  ;;  %8551 = vmatpush3.bf16.msra.mxu0 %v2416_v21  ;;  %v9463_v63 = vpop.eup %9462 }
 0x535   : > { %8552 = vmatprep.subr.bf16.mxu0 %v2414_v33  ;;  %v2832_v54 = vpop.permute.xlu1 %2831  ;;  %v2265_v61 = vmul.f32 %v9463_v63, %v11608_v14  ;;  %v9465_v50 = vpop.eup %9464 }
 0x536   : > { %v9467_v40 = vpop.eup %9466  ;;  %v2267_v34 = vmul.f32 %v9465_v50, %v11602_v45 }
 0x537   : > { %v2286_v12 = vpack.c.bf16 %v2265_v61, %v2264_v20  ;;  %v9469_v39 = vpop.eup %9468  ;;  %v2266_v47 = vmul.f32 %v9467_v40, %v11591_v3  ;;  %v2878_v20 = vsel %vm1673_vm2, %v2832_v54, 0 }
 0x538   : > { %3477 = vrot.lane.b32.xlu0 %v11174_v24, %s10169_s24  ;;  %8553 = vmatpush3.bf16.msra.mxu0 %v2414_v33  ;;  %v2268_v36 = vmul.f32 %v9469_v39, %v11610_v58 }
 0x539   : > { %v2830_v38 = vpop.permute.xlu1 %2829  ;;  %v2287_v31 = vpack.c.bf16 %v2267_v34, %v2266_v47 }
 0x53b   : > { %8555 = vmatmul.mubr.bf16.vlgmr.msra.gmra.mxu0 %v2285_v2 }
 0x53c   : > { %3471 = vrot.lane.b32.xlu0 %v14834_v19, %s10169_s24  ;;  %8558 = vmatprep.mubr.bf16.mxu0 %v2286_v12  ;;  %v9471_v26 = vpop.eup %9470 }
 0x53d   : > { %v2828_v14 = vpop.permute.xlu1 %2827  ;;  %v2269_v1 = vmul.f32 %v9471_v26, %v11620_v0  ;;  %v9473_v23 = vpop.eup %9472 }
 0x53e   : > { %v9475_v45 = vpop.eup %9474  ;;  %v2271_v3 = vmul.f32 %v9473_v23, %v11614_v10 }
 0x53f   : > { %v2288_v29 = vpack.c.bf16 %v2269_v1, %v2268_v36  ;;  %v2270_v0 = vmul.f32 %v9475_v45, %v11604_v13  ;;  %v9477_v10 = vpop.eup %9476 }
 0x540   : > { %3604 = vrot.lane.b32.xlu0 %v11229_v8, %s10169_s24  ;;  %v2272_v35 = vmul.f32 %v9477_v10, %v11622_v41 }
 0x541   : > { %v11759_v60 = vpop.permute.xlu1 %3018  ;;  %v2289_v62 = vpack.c.bf16 %v2271_v3, %v2270_v0 }
 0x542   : > { %9201 = vmatprep.subr.msk.bf16.mxu1 %vm1673_vm2, %v11759_v60 }
 0x543   : > { %8559 = vmatmul.mubr.bf16.gmra.mxu0 %v2287_v31 }
 0x544   : > { %3600 = vrot.lane.b32.xlu0 %v11246_v25, %s10169_s24  ;;  %8562 = vmatprep.mubr.bf16.mxu0 %v2288_v29 }
 0x545   : > { %v11767_v58 = vpop.permute.xlu1 %3016 }
 0x549   : > { %v11769_v6 = vpop.permute.xlu1 %3014 }
 0x54b   : > { %8563 = vmatmul.mubr.bf16.gmra.mxu0 %v2289_v62 }
 0x54d   : > { %v11772_v21 = vpop.permute.xlu1 %3012 }
 0x551   : > { %v2806_v63 = vpop.permute.xlu1 %2805 }
 0x555   : > { %v2808_v39 = vpop.permute.xlu1 %2807 }
 0x559   : > { %v11784_v1 = vpop.permute.xlu1 %3008 }
 0x55d   : > { %v2814_v47 = vpop.permute.xlu1 %2813 }
 0x561   : > { %v2816_v31 = vpop.permute.xlu1 %2815 }
 0x563   : > { %v2207_v7 = vpop.xlane.xlu0 %2206 }
 0x564   : > { %9478 = vrcp.f32 %v2207_v7 }
 0x565   : > { %9480 = vrcp.f32 %v11735_v4  ;;  %v11794_v29 = vpop.permute.xlu1 %3004 }
 0x567   : > { %v2211_v33 = vpop.xlane.xlu0 %2210 }
 0x568   : > { %9482 = vrcp.f32 %v2211_v33 }
 0x569   : > { %v11799_v62 = vpop.permute.xlu1 %2990 }
 0x56b   : > { %v2834_v11 = vpop.permute.xlu0 %2833 }
 0x56c   : > { %9193 = vmatprep.subr.msk.bf16.mxu0 %vm1673_vm2, %v2834_v11  ;;  %v2881_v13 = vsel %vm1673_vm2, %v2834_v11, 0 }
 0x56d   : > { %8605 = vmatpush3.bf16.xpose.msra.mxu0 %v2881_v13  ;;  %v11804_v7 = vpop.permute.xlu1 %2994 }
 0x56e   : > { %9194 = vmatprep.subr.msk.bf16.mxu0 %vm1673_vm2, %v2832_v54 }
 0x56f   : > { %v2826_v49 = vpop.permute.xlu0 %2825 }
 0x571   : > { %v9479_v48 = vpop.eup %9478  ;;  %v11812_v10 = vpop.permute.xlu1 %2998 }
 0x572   : > { %v2273_v4 = vmul.f32 %v9479_v48, %v11653_v42  ;;  %v9481_v61 = vpop.eup %9480  ;;  %v2875_v42 = vsel %vm1673_vm2, %v2830_v38, 0 }
 0x573   : > { %v2824_v37 = vpop.permute.xlu0 %2823  ;;  %v2274_v12 = vmul.f32 %v9481_v61, %v11616_v55  ;;  %v2872_v55 = vsel %vm1673_vm2, %v2828_v14, 0 }
 0x574   : > { %v2290_v2 = vpack.c.bf16 %v2273_v4, %v2272_v35  ;;  %v2866_v0 = vsel %vm1673_vm2, %v2824_v37, 0 }
 0x575   : > { %v9483_v50 = vpop.eup %9482  ;;  %8607 = vmatpush3.bf16.xpose.msra.mxu0 %v2878_v20  ;;  %v11817_v35 = vpop.permute.xlu1 %3002 }
 0x576   : > { %8566 = vmatprep.mubr.bf16.mxu0 %v2290_v2  ;;  %9195 = vmatprep.subr.msk.bf16.mxu0 %vm1673_vm2, %v2830_v38  ;;  %v2275_v40 = vmul.f32 %v9483_v50, %v11658_v5  ;;  %v2869_v38 = vsel %vm1673_vm2, %v2826_v49, 0 }
 0x577   : > { %v2822_v26 = vpop.permute.xlu0 %2821 }
 0x578   : > { %v2291_v34 = vpack.c.bf16 %v2275_v40, %v2274_v12  ;;  %v2863_v11 = vsel %vm1673_vm2, %v2822_v26, 0 }
 0x579   : > { %v3482_v61 = vpop.permute.xlu1 %3481 }
 0x57a   : > { %8567 = vmatmul.mubr.bf16.gmra.mxu0 %v2291_v34 }
 0x57b   : > { %v2820_v41 = vpop.permute.xlu0 %2819 }
 0x57c   : > { %v2860_v48 = vsel %vm1673_vm2, %v2820_v41, 0 }
 0x57d   : > { %8609 = vmatpush3.bf16.xpose.msra.mxu0 %v2875_v42  ;;  %v3476_v2 = vpop.permute.xlu1 %3475 }
 0x57e   : > { %9196 = vmatprep.subr.msk.bf16.mxu0 %vm1673_vm2, %v2828_v14 }
 0x57f   : > { %v2804_v54 = vpop.permute.xlu0 %2803 }
 0x580   : > { %8620 = vmatprep.mubr.msk.bf16.mxu0 %vm1673_vm2, %v2804_v54 }
 0x583   : > { %v11788_v36 = vpop.permute.xlu0 %3010 }
 0x585   : > { %8611 = vmatpush3.bf16.xpose.msra.mxu0 %v2872_v55  ;;  %v3066_v55 = vsel %vm1673_vm2, %v11759_v60, 0 }
 0x586   : > { %9197 = vmatprep.subr.msk.bf16.mxu0 %vm1673_vm2, %v2826_v49 }
 0x587   : > { %v2810_v5 = vpop.permute.xlu0 %2809 }
 0x58b   : > { %v2812_v23 = vpop.permute.xlu0 %2811 }
 0x58d   : > { %8613 = vmatpush3.bf16.xpose.msra.mxu0 %v2869_v38 }
 0x58e   : > { %9198 = vmatprep.subr.msk.bf16.mxu0 %vm1673_vm2, %v2824_v37 }
 0x58f   : > { %v11796_v45 = vpop.permute.xlu0 %3006 }
 0x593   : > { %v2818_v3 = vpop.permute.xlu0 %2817 }
 0x595   : > { %8615 = vmatpush3.bf16.xpose.msra.mxu0 %v2866_v0 }
 0x596   : > { %9199 = vmatprep.subr.msk.bf16.mxu0 %vm1673_vm2, %v2822_v26 }
 0x597   : > { %v11802_v14 = vpop.permute.xlu0 %2988 }
 0x59b   : > { %v11806_v33 = vpop.permute.xlu0 %2992 }
 0x59d   : > { %8617 = vmatpush3.bf16.xpose.msra.mxu0 %v2863_v11 }
 0x59e   : > { %9200 = vmatprep.subr.msk.bf16.mxu0 %vm1673_vm2, %v2820_v41 }
 0x59f   : > { %v11810_v13 = vpop.permute.xlu0 %2996 }
 0x5a3   : > { %v11814_v49 = vpop.permute.xlu0 %3000 }
 0x5a5   : > { %8619 = vmatpush3.bf16.xpose.msra.mxu0 %v2860_v48  ;;  %v3060_v48 = vsel %vm1673_vm2, %v11769_v6, 0 }
 0x5a7   : > { %v3484_v4 = vpop.permute.xlu0 %3483 }
 0x5a8   : > { %8668 = vmatprep.subr.bf16.mxu0 %v3484_v4 }
 0x5ab   : > { %v3480_v37 = vpop.permute.xlu0 %3479 }
 0x5ac   : > { %8621 = vmatmul.mubr.msk.bf16.vlgmr.msra.gmra.mxu0 %vm1673_vm2, %v2806_v63  ;;  %v3474_v63 = vpop.permute.xlu1 %3473 }
 0x5ad   : > { %8624 = vmatprep.mubr.msk.bf16.mxu0 %vm1673_vm2, %v2808_v39  ;;  %8669 = vmatpush3.bf16.msra.mxu0 %v3484_v4 }
 0x5ae   : > { %8670 = vmatprep.subr.bf16.mxu0 %v3482_v61 }
 0x5af   : > { %v3478_v20 = vpop.permute.xlu0 %3477 }
 0x5b0   : > { %v3470_v12 = vpop.permute.xlu1 %3469 }
 0x5b1   : > { %8671 = vmatpush3.bf16.msra.mxu0 %v3482_v61 }
 0x5b2   : > { %8672 = vmatprep.subr.bf16.mxu0 %v3480_v37 }
 0x5b3   : > { %v3472_v50 = vpop.permute.xlu0 %3471 }
 0x5b4   : > { %8625 = vmatmul.mubr.msk.bf16.gmra.mxu0 %vm1673_vm2, %v2810_v5 }
 0x5b5   : > { %8628 = vmatprep.mubr.msk.bf16.mxu0 %vm1673_vm2, %v2812_v23  ;;  %8673 = vmatpush3.bf16.msra.mxu0 %v3480_v37 }
 0x5b6   : > { %8674 = vmatprep.subr.bf16.mxu0 %v3478_v20 }
 0x5b9   : > { %8675 = vmatpush3.bf16.msra.mxu0 %v3478_v20 }
 0x5ba   : > { %8676 = vmatprep.subr.bf16.mxu0 %v3476_v2 }
 0x5bc   : > { %8629 = vmatmul.mubr.msk.bf16.gmra.mxu0 %vm1673_vm2, %v2814_v47 }
 0x5bd   : > { %8632 = vmatprep.mubr.msk.bf16.mxu0 %vm1673_vm2, %v2816_v31  ;;  %8677 = vmatpush3.bf16.msra.mxu0 %v3476_v2 }
 0x5be   : > { %8678 = vmatprep.subr.bf16.mxu0 %v3474_v63 }
 0x5c1   : > { %8679 = vmatpush3.bf16.msra.mxu0 %v3474_v63  ;;  %v3057_v63 = vsel %vm1673_vm2, %v11772_v21, 0 }
 0x5c2   : > { %8680 = vmatprep.subr.bf16.mxu0 %v3472_v50 }
 0x5c4   : > { %8633 = vmatmul.mubr.msk.bf16.gmra.mxu0 %vm1673_vm2, %v2818_v3  ;;  %v3063_v3 = vsel %vm1673_vm2, %v11767_v58, 0 }
 0x5c5   : > { %8681 = vmatpush3.bf16.msra.mxu0 %v3472_v50 }
 0x5c6   : > { %8682 = vmatprep.subr.bf16.mxu0 %v3470_v12 }
 0x5c9   : > { %8683 = vmatpush3.bf16.msra.mxu0 %v3470_v12 }
 0x5cd   : > { %v8524_v40 = vpop.f32.mrf.mxu1 }
 0x5cf   : > { %v2350_v39 = vpop.f32.mrf.mxu1 }
 0x5d1   : > { %v8525_v26 = vpop.f32.mrf.mxu1 }
 0x5d2   : > { %v2535_v42 = vpack.c.bf16 %v8525_v26, %v8524_v40  ;;  %v3054_v40 = vsel %vm1673_vm2, %v11788_v36, 0 }
 0x5d3   : > { %v2353_v34 = vpop.f32.mrf.mxu1 }
 0x5d4   : > { %v2534_v41 = vpack.c.bf16 %v2353_v34, %v2350_v39  ;;  %v3051_v34 = vsel %vm1673_vm2, %v11784_v1, 0 }
 0x5d5   : > { %v8528_v54 = vpop.f32.mrf.mxu1 }
 0x5d6   : > { %8572 = vmatprep.mubr.msk.bf16.mxu1 %vm1673_vm2, %v2534_v41 }
 0x5d7   : > { %v2366_v47 = vpop.f32.mrf.mxu1  ;;  %8573 = vmatmul.mubr.msk.bf16.vlgmr.msra.gmra.mxu1 %vm1673_vm2, %v2535_v42 }
 0x5d8   : > { %8637 = vmatpush3.bf16.xpose.msra.mxu1 %v3066_v55 }
 0x5d9   : > { %9202 = vmatprep.subr.msk.bf16.mxu1 %vm1673_vm2, %v11767_v58  ;;  %v8529_v5 = vpop.f32.mrf.mxu1 }
 0x5da   : > { %v2537_v38 = vpack.c.bf16 %v8529_v5, %v8528_v54  ;;  %v3048_v5 = vsel %vm1673_vm2, %v11796_v45, 0 }
 0x5db   : > { %v2369_v31 = vpop.f32.mrf.mxu1 }
 0x5dc   : > { %v2536_v23 = vpack.c.bf16 %v2369_v31, %v2366_v47 }
 0x5de   : > { %8576 = vmatprep.mubr.msk.bf16.mxu1 %vm1673_vm2, %v2536_v23 }
 0x5df   : > { %8577 = vmatmul.mubr.msk.bf16.gmra.mxu1 %vm1673_vm2, %v2537_v38 }
 0x5e0   : > { %8639 = vmatpush3.bf16.xpose.msra.mxu1 %v3063_v3 }
 0x5e1   : > { %9203 = vmatprep.subr.msk.bf16.mxu1 %vm1673_vm2, %v11769_v6 }
 0x5e2   : > { %v8532_v60 = vpop.f32.mrf.mxu1 }
 0x5e4   : > { %v2382_v0 = vpop.f32.mrf.mxu1 }
 0x5e6   : > { %v8533_v11 = vpop.f32.mrf.mxu1 }
 0x5e7   : > { %v2539_v37 = vpack.c.bf16 %v8533_v11, %v8532_v60  ;;  %v3605_v11 = vpop.permute.xlu0 %3604 }
 0x5e8   : > { %8641 = vmatpush3.bf16.xpose.msra.mxu1 %v3060_v48  ;;  %v2385_v4 = vpop.f32.mrf.mxu1 }
 0x5e9   : > { %9204 = vmatprep.subr.msk.bf16.mxu1 %vm1673_vm2, %v11772_v21  ;;  %v2538_v61 = vpack.c.bf16 %v2385_v4, %v2382_v0  ;;  %v3045_v0 = vsel %vm1673_vm2, %v11794_v29, 0 }
 0x5ea   : > { %v8536_v20 = vpop.f32.mrf.mxu1 }
 0x5eb   : > { %8580 = vmatprep.mubr.msk.bf16.mxu1 %vm1673_vm2, %v2538_v61 }
 0x5ec   : > { %v2398_v58 = vpop.f32.mrf.mxu1  ;;  %8581 = vmatmul.mubr.msk.bf16.gmra.mxu1 %vm1673_vm2, %v2539_v37 }
 0x5ee   : > { %v8537_v2 = vpop.f32.mrf.mxu1 }
 0x5ef   : > { %v2541_v12 = vpack.c.bf16 %v8537_v2, %v8536_v20 }
 0x5f0   : > { %8643 = vmatpush3.bf16.xpose.msra.mxu1 %v3057_v63  ;;  %v2401_v50 = vpop.f32.mrf.mxu1 }
 0x5f1   : > { %9205 = vmatprep.subr.msk.bf16.mxu1 %vm1673_vm2, %v11788_v36  ;;  %v2540_v6 = vpack.c.bf16 %v2401_v50, %v2398_v58  ;;  %v3601_v50 = vpop.permute.xlu0 %3600 }
 0x5f3   : > { %8584 = vmatprep.mubr.msk.bf16.mxu1 %vm1673_vm2, %v2540_v6 }
 0x5f4   : > { %8585 = vmatmul.mubr.msk.bf16.gmra.mxu1 %vm1673_vm2, %v2541_v12  ;;  %v11908_v12 = vld [vmem:[%s14829_s26 + $0x8] sm:$0xff] }
 0x5f8   : > { %8645 = vmatpush3.bf16.xpose.msra.mxu1 %v3054_v40 }
 0x5f9   : > { %9206 = vmatprep.subr.msk.bf16.mxu1 %vm1673_vm2, %v11784_v1 }
 0x5fb   : > { %v8556_v39 = vpop.f32.mrf.mxu0 }
 0x5fd   : > { %v2471_v21 = vpop.f32.mrf.mxu0 }
 0x5ff   : > { %v8557_v26 = vpop.f32.mrf.mxu0 }
 0x600   : > { %8647 = vmatpush3.bf16.xpose.msra.mxu1 %v3051_v34  ;;  %v2543_v54 = vpack.c.bf16 %v8557_v26, %v8556_v39 }
 0x601   : > { %v2474_v41 = vpop.f32.mrf.mxu0  ;;  %9207 = vmatprep.subr.msk.bf16.mxu1 %vm1673_vm2, %v11796_v45 }
 0x602   : > { %v2542_v42 = vpack.c.bf16 %v2474_v41, %v2471_v21  ;;  %v11917_v21 = vld [vmem:[%s14829_s26 + $0x18] sm:$0xff] }
 0x603   : > { %v8560_v47 = vpop.f32.mrf.mxu0 }
 0x604   : > { %8588 = vmatprep.mubr.msk.bf16.mxu1 %vm1673_vm2, %v2542_v42  ;;  %v11927_v42 = vld [vmem:[%s14829_s26 + $0x30] sm:$0xff] }
 0x605   : > { %v2487_v36 = vpop.f32.mrf.mxu0  ;;  %8589 = vmatmul.mubr.msk.bf16.gmra.mxu1 %vm1673_vm2, %v2543_v54 }
 0x607   : > { %v8561_v55 = vpop.f32.mrf.mxu0 }
 0x608   : > { %8649 = vmatpush3.bf16.xpose.msra.mxu1 %v3048_v5  ;;  %v2545_v23 = vpack.c.bf16 %v8561_v55, %v8560_v47  ;;  %v11935_v47 = vld [vmem:[%s14829_s26 + $0x38] sm:$0xff] }
 0x609   : > { %v2490_v31 = vpop.f32.mrf.mxu0  ;;  %9208 = vmatprep.subr.msk.bf16.mxu1 %vm1673_vm2, %v11794_v29  ;;  %v3603_v29 = vpop.permute.xlu1 %3602 }
 0x60a   : > { %v2544_v1 = vpack.c.bf16 %v2490_v31, %v2487_v36  ;;  %v11945_v31 = vld [vmem:[%s14829_s26 + $0x20] sm:$0xff] }
 0x60b   : > { %v8564_v38 = vpop.f32.mrf.mxu0 }
 0x60c   : > { %8592 = vmatprep.mubr.msk.bf16.mxu1 %vm1673_vm2, %v2544_v1 }
 0x60d   : > { %v2503_v3 = vpop.f32.mrf.mxu0  ;;  %8593 = vmatmul.mubr.msk.bf16.gmra.mxu1 %vm1673_vm2, %v2545_v23  ;;  %v3599_v6 = vpop.permute.xlu1 %3598  ;;  %v11953_v23 = vld [vmem:[%s14829_s26 + $0x28] sm:$0xff] }
 0x60f   : > { %v8565_v60 = vpop.f32.mrf.mxu0 }
 0x610   : > { %8651 = vmatpush3.bf16.xpose.msra.mxu1 %v3045_v0  ;;  %v2547_v4 = vpack.c.bf16 %v8565_v60, %v8564_v38  ;;  %v11963_v0 = vld [vmem:[%s14829_s26 + $0x50] sm:$0xff] }
 0x611   : > { %v2506_v45 = vpop.f32.mrf.mxu0  ;;  %8700 = vmatprep.subr.bf16.mxu1 %v3605_v11 }
 0x612   : > { %v2546_v48 = vpack.c.bf16 %v2506_v45, %v2503_v3  ;;  %v11971_v45 = vld [vmem:[%s14829_s26 + $0x58] sm:$0xff] }
 0x614   : > { %8596 = vmatprep.mubr.msk.bf16.mxu1 %vm1673_vm2, %v2546_v48 }
 0x615   : > { %8597 = vmatmul.mubr.msk.bf16.gmra.mxu1 %vm1673_vm2, %v2547_v4 }
 0x63a   : > { %v8568_v61 = vpop.f32.mrf.mxu0 }
 0x63c   : > { %v2519_v37 = vpop.f32.mrf.mxu0 }
 0x63e   : > { %v8569_v20 = vpop.f32.mrf.mxu0 }
 0x63f   : > { %v2549_v63 = vpack.c.bf16 %v8569_v20, %v8568_v61 }
 0x640   : > { %v2522_v58 = vpop.f32.mrf.mxu0 }
 0x641   : > { %v2548_v2 = vpack.c.bf16 %v2522_v58, %v2519_v37  ;;  %v11981_v37 = vld [vmem:[%s14829_s26 + $0x40] sm:$0xff]  ;;  %v11989_v58 = vld [vmem:[%s14829_s26 + $0x48] sm:$0xff] }
 0x643   : > { %8600 = vmatprep.mubr.msk.bf16.mxu1 %vm1673_vm2, %v2548_v2 }
 0x644   : > { %8601 = vmatmul.mubr.msk.bf16.gmra.mxu1 %vm1673_vm2, %v2549_v63 }
 0x645   : > { %8652 = vmatprep.mubr.msk.bf16.mxu1 %vm1673_vm2, %v11802_v14  ;;  %v11891_v14 = vld [vmem:[%s14829_s26 + $0x10] sm:$0xff] }
 0x64c   : > { %8653 = vmatmul.mubr.msk.bf16.vlgmr.msra.gmra.mxu1 %vm1673_vm2, %v11799_v62 }
 0x64d   : > { %8701 = vmatpush3.bf16.msra.mxu1 %v3605_v11  ;;  %8656 = vmatprep.mubr.msk.bf16.mxu1 %vm1673_vm2, %v11806_v33 }
 0x64e   : > { %8702 = vmatprep.subr.bf16.mxu1 %v3603_v29 }
 0x651   : > { %8703 = vmatpush3.bf16.msra.mxu1 %v3603_v29 }
 0x652   : > { %8704 = vmatprep.subr.bf16.mxu1 %v3601_v50 }
 0x654   : > { %8657 = vmatmul.mubr.msk.bf16.gmra.mxu1 %vm1673_vm2, %v11804_v7 }
 0x655   : > { %8705 = vmatpush3.bf16.msra.mxu1 %v3601_v50  ;;  %8660 = vmatprep.mubr.msk.bf16.mxu1 %vm1673_vm2, %v11810_v13  ;;  %v11999_v50 = vld [vmem:[%s14829_s26 + $0x70] sm:$0xff] }
 0x656   : > { %8706 = vmatprep.subr.bf16.mxu1 %v3599_v6 }
 0x659   : > { %8707 = vmatpush3.bf16.msra.mxu1 %v3599_v6 }
 0x65c   : > { %8661 = vmatmul.mubr.msk.bf16.gmra.mxu1 %vm1673_vm2, %v11812_v10  ;;  %v11900_v10 = vld [vmem:[%s14829_s26] sm:$0xff] }
 0x65d   : > { %8664 = vmatprep.mubr.msk.bf16.mxu1 %vm1673_vm2, %v11814_v49 }
 0x664   : > { %8665 = vmatmul.mubr.msk.bf16.gmra.mxu1 %vm1673_vm2, %v11817_v35 }
 0x66c   : > { %v8622_v62 = vpop.f32.mrf.mxu0 }
 0x66d   : > { %v11894_v7 = vadd.f32 %v11891_v14, %v8622_v62  ;;  %v12007_v62 = vld [vmem:[%s14829_s26 + $0x78] sm:$0xff] }
 0x66e   : > { %v2917_v33 = vpop.f32.mrf.mxu0 }
 0x66f   : > { %3169 = vmax.xlane.f32.xlu0 %v11894_v7  ;;  %v11903_v49 = vadd.f32 %v11900_v10, %v2917_v33 }
 0x670   : > { %v8623_v13 = vpop.f32.mrf.mxu0 }
 0x671   : > { %v11920_v26 = vadd.f32 %v11917_v21, %v8623_v13 }
 0x672   : > { %v2920_v35 = vpop.f32.mrf.mxu0 }
 0x673   : > { %v11911_v40 = vadd.f32 %v11908_v12, %v2920_v35  ;;  %3165 = vmax.xlane.f32.xlu0 %v11903_v49  ;;  %v12017_v35 = vld [vmem:[%s14829_s26 + $0x60] sm:$0xff] }
 0x674   : > { %v8626_v39 = vpop.f32.mrf.mxu0 }
 0x675   : > { %3167 = vmax.xlane.f32.xlu1 %v11911_v40  ;;  %v11930_v54 = vadd.f32 %v11927_v42, %v8626_v39 }
 0x676   : > { %v2933_v34 = vpop.f32.mrf.mxu0 }
 0x677   : > { %3171 = vmax.xlane.f32.xlu0 %v11920_v26  ;;  %v11948_v1 = vadd.f32 %v11945_v31, %v2933_v34  ;;  %v12025_v34 = vld [vmem:[%s14829_s26 + $0x68] sm:$0xff] }
 0x678   : > { %v8627_v41 = vpop.f32.mrf.mxu0 }
 0x679   : > { %v11938_v36 = vadd.f32 %v11935_v47, %v8627_v41 }
 0x67a   : > { %v2936_v55 = vpop.f32.mrf.mxu0 }
 0x67b   : > { %3177 = vmax.xlane.f32.xlu0 %v11930_v54  ;;  %3179 = vmax.xlane.f32.xlu1 %v11938_v36  ;;  %v11956_v38 = vadd.f32 %v11953_v23, %v2936_v55 }
 0x67c   : > { %v8630_v5 = vpop.f32.mrf.mxu0 }
 0x67d   : > { %v11966_v11 = vadd.f32 %v11963_v0, %v8630_v5 }
 0x67e   : > { %v2949_v3 = vpop.f32.mrf.mxu0 }
 0x67f   : > { %3175 = vmax.xlane.f32.xlu1 %v11956_v38  ;;  %3173 = vmax.xlane.f32.xlu0 %v11948_v1  ;;  %v11984_v20 = vadd.f32 %v11981_v37, %v2949_v3 }
 0x680   : > { %v8631_v60 = vpop.f32.mrf.mxu0 }
 0x681   : > { %v11974_v48 = vadd.f32 %v11971_v45, %v8631_v60 }
 0x682   : > { %v2952_v4 = vpop.f32.mrf.mxu0 }
 0x683   : > { %3185 = vmax.xlane.f32.xlu0 %v11966_v11  ;;  %3187 = vmax.xlane.f32.xlu1 %v11974_v48  ;;  %v11992_v2 = vadd.f32 %v11989_v58, %v2952_v4 }
 0x684   : > { %v8634_v61 = vpop.f32.mrf.mxu0 }
 0x685   : > { %v12002_v6 = vadd.f32 %v11999_v50, %v8634_v61 }
 0x686   : > { %v2965_v63 = vpop.f32.mrf.mxu0 }
 0x687   : > { %3183 = vmax.xlane.f32.xlu1 %v11992_v2  ;;  %3181 = vmax.xlane.f32.xlu0 %v11984_v20  ;;  %v12020_v39 = vadd.f32 %v12017_v35, %v2965_v63 }
 0x688   : > { %v8635_v29 = vpop.f32.mrf.mxu0 }
 0x689   : > { %v12010_v33 = vadd.f32 %v12007_v62, %v8635_v29 }
 0x68a   : > { %v2968_v13 = vpop.f32.mrf.mxu0 }
 0x68b   : > { %3193 = vmax.xlane.f32.xlu0 %v12002_v6  ;;  %3195 = vmax.xlane.f32.xlu1 %v12010_v33  ;;  %v12028_v41 = vadd.f32 %v12025_v34, %v2968_v13 }
 0x68f   : > { %3191 = vmax.xlane.f32.xlu1 %v12028_v41  ;;  %3189 = vmax.xlane.f32.xlu0 %v12020_v39 }
 0x697   : > { %v12032_v55 = vpop.f32.mrf.mxu1 }
 0x698   : > { %14845 = vst [vmem:[#allocation27_spill] sm:$0xff] %v12032_v55 }
 0x699   : > { %v12034_v5 = vpop.f32.mrf.mxu1 }
 0x69a   : > { %14846 = vst [vmem:[#allocation28_spill] sm:$0xff] %v12034_v5 }
 0x69b   : > { %v12036_v3 = vpop.f32.mrf.mxu1 }
 0x69c   : > { %14847 = vst [vmem:[#allocation29_spill] sm:$0xff] %v12036_v3 }
 0x69d   : > { %v12038_v60 = vpop.f32.mrf.mxu1 }
 0x69e   : > { %14848 = vst [vmem:[#allocation30_spill] sm:$0xff] %v12038_v60 }
 0x69f   : > { %v12040_v4 = vpop.f32.mrf.mxu1 }
 0x6a0   : > { %14849 = vst [vmem:[#allocation31_spill] sm:$0xff] %v12040_v4 }
 0x6a1   : > { %v12042_v61 = vpop.f32.mrf.mxu1 }
 0x6a2   : > { %14850 = vst [vmem:[#allocation32_spill] sm:$0xff] %v12042_v61 }
 0x6a3   : > { %v12044_v63 = vpop.f32.mrf.mxu1 }
 0x6a4   : > { %14851 = vst [vmem:[#allocation33_spill] sm:$0xff] %v12044_v63 }
 0x6a5   : > { %v12046_v29 = vpop.f32.mrf.mxu1 }
 0x6a6   : > { %14852 = vst [vmem:[#allocation34_spill] sm:$0xff] %v12046_v29 }
 0x6ac   : > { %v12048_v13 = vpop.f32.mrf.mxu1 }
 0x6ad   : > { %14853 = vst [vmem:[#allocation35_spill] sm:$0xff] %v12048_v13 }
 0x6ae   : > { %v12050_v15 = vpop.f32.mrf.mxu1 }
 0x6af   : > { %14854 = vst [vmem:[#allocation36_spill] sm:$0xff] %v12050_v15 }
 0x6b0   : > { %v12052_v51 = vpop.f32.mrf.mxu1 }
 0x6b1   : > { %14855 = vst [vmem:[#allocation37_spill] sm:$0xff] %v12052_v51 }
 0x6b2   : > { %v12054_v55 = vpop.f32.mrf.mxu1 }
 0x6b3   : > { %14856 = vst [vmem:[#allocation38_spill] sm:$0xff] %v12054_v55 }
 0x6b4   : > { %v12056_v5 = vpop.f32.mrf.mxu1 }
 0x6b5   : > { %14857 = vst [vmem:[#allocation39_spill] sm:$0xff] %v12056_v5 }
 0x6b6   : > { %v12058_v3 = vpop.f32.mrf.mxu1 }
 0x6b7   : > { %14858 = vst [vmem:[#allocation40_spill] sm:$0xff] %v12058_v3 }
 0x6b8   : > { %v12060_v60 = vpop.f32.mrf.mxu1 }
 0x6b9   : > { %14859 = vst [vmem:[#allocation41_spill] sm:$0xff] %v12060_v60 }
 0x6ba   : > { %v12062_v4 = vpop.f32.mrf.mxu1 }
 0x6bb   : > { %14860 = vst [vmem:[#allocation42_spill] sm:$0xff] %v12062_v4 }
 0x6c5   : > { %v12064_v61 = vpop.f32.mrf.mxu1 }
 0x6c6   : > { %14861 = vst [vmem:[#allocation43_spill] sm:$0xff] %v12064_v61 }
 0x6c7   : > { %v12066_v63 = vpop.f32.mrf.mxu1 }
 0x6c8   : > { %14862 = vst [vmem:[#allocation44_spill] sm:$0xff] %v12066_v63 }
 0x6c9   : > { %v12068_v29 = vpop.f32.mrf.mxu1 }
 0x6ca   : > { %14863 = vst [vmem:[#allocation45_spill] sm:$0xff] %v12068_v29 }
 0x6cb   : > { %v12070_v13 = vpop.f32.mrf.mxu1 }
 0x6cc   : > { %14864 = vst [vmem:[#allocation46_spill] sm:$0xff] %v12070_v13 }
 0x6cd   : > { %v12072_v15 = vpop.f32.mrf.mxu1 }
 0x6ce   : > { %14865 = vst [vmem:[#allocation47_spill] sm:$0xff] %v12072_v15 }
 0x6cf   : > { %v12074_v51 = vpop.f32.mrf.mxu1 }
 0x6d0   : > { %14866 = vst [vmem:[#allocation48_spill] sm:$0xff] %v12074_v51 }
 0x6d1   : > { %v12076_v55 = vpop.f32.mrf.mxu1 }
 0x6d2   : > { %14867 = vst [vmem:[#allocation49_spill] sm:$0xff] %v12076_v55 }
 0x6d3   : > { %v12078_v5 = vpop.f32.mrf.mxu1 }
 0x6d4   : > { %14868 = vst [vmem:[#allocation50_spill] sm:$0xff] %v12078_v5 }
 0x6d5   : > { %v12080_v3 = vpop.f32.mrf.mxu1 }
 0x6d6   : > { %14869 = vst [vmem:[#allocation51_spill] sm:$0xff] %v12080_v3 }
 0x6d7   : > { %v12083_v61 = vpop.f32.mrf.mxu1 }
 0x6d8   : > { %14870 = vst [vmem:[#allocation52_spill] sm:$0xff] %v12083_v61 }
 0x6d9   : > { %v12086_v29 = vpop.f32.mrf.mxu1 }
 0x6da   : > { %14871 = vst [vmem:[#allocation53_spill] sm:$0xff] %v12086_v29 }
 0x6db   : > { %v12090_v55 = vpop.f32.mrf.mxu1 }
 0x6dc   : > { %14872 = vst [vmem:[#allocation54_spill] sm:$0xff] %v12090_v55 }
 0x6f8   : > { %v3170_v60 = vpop.xlane.xlu0 %3169 }
 0x6f9   : > { %v3231_v4 = vsub.f32 %v11894_v7, %v3170_v60 }
 0x6fb   : > { %v3265_v63 = vmul.f32 1.442695, %v3231_v4 }
 0x6fc   : > { %v3166_v27 = vpop.xlane.xlu0 %3165 }
 0x6fd   : > { %9484 = vpow2.f32 %v3265_v63  ;;  %v3229_v13 = vsub.f32 %v11903_v49, %v3166_v27 }
 0x6fe   : > { %v3168_v15 = vpop.xlane.xlu1 %3167 }
 0x6ff   : > { %v3261_v51 = vmul.f32 1.442695, %v3229_v13  ;;  %v3230_v5 = vsub.f32 %v11911_v40, %v3168_v15 }
 0x700   : > { %v3172_v17 = vpop.xlane.xlu0 %3171 }
 0x701   : > { %9486 = vpow2.f32 %v3261_v51  ;;  %v3232_v3 = vsub.f32 %v11920_v26, %v3172_v17  ;;  %v3263_v61 = vmul.f32 1.442695, %v3230_v5 }
 0x703   : > { %v3267_v7 = vmul.f32 1.442695, %v3232_v3 }
 0x704   : > { %v12092_v60 = vpop.f32.mrf.mxu1  ;;  %v3180_v4 = vpop.xlane.xlu1 %3179 }
 0x705   : > { %14873 = vst [vmem:[#allocation55_spill] sm:$0xff] %v12092_v60  ;;  %9488 = vpow2.f32 %v3267_v7  ;;  %v3178_v63 = vpop.xlane.xlu0 %3177  ;;  %v3236_v26 = vsub.f32 %v11938_v36, %v3180_v4 }
 0x706   : > { %v3235_v27 = vsub.f32 %v11930_v54, %v3178_v63  ;;  %v12095_v49 = vpop.f32.mrf.mxu1  ;;  %9490 = vpow2.f32 %v3263_v61 }
 0x707   : > { %14874 = vst [vmem:[#allocation56_spill] sm:$0xff] %v12095_v49 }
 0x708   : > { %v3273_v13 = vmul.f32 1.442695, %v3235_v27  ;;  %v12097_v29 = vpop.f32.mrf.mxu1  ;;  %v3176_v51 = vpop.xlane.xlu1 %3175 }
 0x709   : > { %14875 = vst [vmem:[#allocation57_spill] sm:$0xff] %v12097_v29  ;;  %v3234_v17 = vsub.f32 %v11956_v38, %v3176_v51  ;;  %v3174_v15 = vpop.xlane.xlu0 %3173  ;;  %v3275_v38 = vmul.f32 1.442695, %v3236_v26 }
 0x70a   : > { %v12100_v40 = vpop.eup %9484  ;;  %9492 = vpow2.f32 %v3273_v13  ;;  %v3233_v5 = vsub.f32 %v11948_v1, %v3174_v15  ;;  %v12104_v3 = vpop.f32.mrf.mxu1 }
 0x70b   : > { %14876 = vst [vmem:[#allocation58_spill] sm:$0xff] %v12104_v3  ;;  %v3271_v54 = vmul.f32 1.442695, %v3234_v17  ;;  %3329 = vadd.xlane.f32.xlu1 %v12100_v40 }
 0x70c   : > { %v3269_v7 = vmul.f32 1.442695, %v3233_v5  ;;  %v8654_v63 = vpop.f32.mrf.mxu1  ;;  %v3188_v15 = vpop.xlane.xlu1 %3187 }
 0x70d   : > { %9494 = vpow2.f32 %v3271_v54  ;;  %v3186_v27 = vpop.xlane.xlu0 %3185 }
 0x70e   : > { %v12107_v61 = vpop.eup %9486  ;;  %9496 = vpow2.f32 %v3269_v7  ;;  %v3102_v51 = vpop.f32.mrf.mxu1  ;;  %v3239_v1 = vsub.f32 %v11966_v11, %v3186_v27  ;;  %v3240_v11 = vsub.f32 %v11974_v48, %v3188_v15 }
 0x70f   : > { %3325 = vadd.xlane.f32.xlu1 %v12107_v61  ;;  %9498 = vpow2.f32 %v3275_v38 }
 0x710   : > { %v8655_v17 = vpop.f32.mrf.mxu1  ;;  %v3281_v26 = vmul.f32 1.442695, %v3239_v1  ;;  %v3184_v27 = vpop.xlane.xlu1 %3183 }
 0x711   : > { %v3182_v36 = vpop.xlane.xlu0 %3181  ;;  %v3238_v29 = vsub.f32 %v11992_v2, %v3184_v27 }
 0x712   : > { %v12110_v4 = vpop.eup %9488  ;;  %v3237_v13 = vsub.f32 %v11984_v20, %v3182_v36  ;;  %v3105_v55 = vpop.f32.mrf.mxu1 }
 0x713   : > { %3331 = vadd.xlane.f32.xlu1 %v12110_v4  ;;  %v12115_v3 = vpop.eup %9490 }
 0x714   : > { %v3277_v5 = vmul.f32 1.442695, %v3237_v13  ;;  %v8658_v13 = vpop.f32.mrf.mxu1  ;;  %v3196_v2 = vpop.xlane.xlu1 %3195 }
 0x715   : > { %v3194_v54 = vpop.xlane.xlu0 %3193 }
 0x716   : > { %9500 = vpow2.f32 %v3277_v5  ;;  %v3243_v38 = vsub.f32 %v12002_v6, %v3194_v54  ;;  %v3283_v5 = vmul.f32 1.442695, %v3240_v11  ;;  %v3279_v6 = vmul.f32 1.442695, %v3238_v29 }
 0x717   : > { %v12117_v7 = vpop.eup %9492  ;;  %3327 = vadd.xlane.f32.xlu1 %v12115_v3  ;;  %9502 = vpow2.f32 %v3281_v26  ;;  %v3118_v26 = vpop.f32.mrf.mxu1  ;;  %v12135_v54 = vadd.f32 %v11891_v14, %v8654_v63  ;;  %v12149_v14 = vadd.f32 %v11900_v10, %v3102_v51  ;;  %v3244_v63 = vsub.f32 %v12010_v33, %v3196_v2 }
 0x718   : > { %3337 = vadd.xlane.f32.xlu0 %v12117_v7  ;;  %v3289_v49 = vmul.f32 1.442695, %v3243_v38  ;;  %9504 = vpow2.f32 %v3283_v5  ;;  %v3192_v38 = vpop.xlane.xlu1 %3191  ;;  %v12179_v2 = vadd.f32 %v11945_v31, %v3118_v26 }
 0x719   : > { %v3190_v1 = vpop.xlane.xlu0 %3189  ;;  %v8659_v11 = vpop.f32.mrf.mxu1 }
 0x71a   : > { %v12122_v20 = vpop.eup %9494  ;;  %v3241_v48 = vsub.f32 %v12020_v39, %v3190_v1  ;;  %9506 = vpow2.f32 %v3289_v49  ;;  %v12142_v39 = vadd.f32 %v11917_v21, %v8655_v17  ;;  %v12152_v49 = vadd.f32 %v11908_v12, %v3105_v55 }
 0x71b   : > { %v12125_v36 = vpop.eup %9496  ;;  %3335 = vadd.xlane.f32.xlu1 %v12122_v20  ;;  %9508 = vpow2.f32 %v3279_v6  ;;  %v3121_v29 = vpop.f32.mrf.mxu1  ;;  %v3242_v17 = vsub.f32 %v12028_v41, %v3192_v38  ;;  %v12171_v41 = vadd.f32 %v11927_v42, %v8658_v13 }
 0x71c   : > { %3333 = vadd.xlane.f32.xlu0 %v12125_v36  ;;  %v12131_v15 = vpop.eup %9498  ;;  %v3285_v60 = vmul.f32 1.442695, %v3241_v48  ;;  %v12174_v48 = vadd.f32 %v11935_v47, %v8659_v11 }
 0x71d   : > { %v8662_v1 = vpop.f32.mrf.mxu1  ;;  %v3287_v33 = vmul.f32 1.442695, %v3242_v17 }
 0x71e   : > { %9510 = vpow2.f32 %v3285_v60  ;;  %v3291_v60 = vmul.f32 1.442695, %v3244_v63  ;;  %v12182_v63 = vadd.f32 %v11953_v23, %v3121_v29 }
 0x71f   : > { %v3134_v10 = vpop.f32.mrf.mxu1 }
 0x720   : > { %3339 = vadd.xlane.f32.xlu0 %v12131_v15  ;;  %9512 = vpow2.f32 %v3291_v60 }
 0x721   : > { %v8663_v51 = vpop.f32.mrf.mxu1  ;;  %9514 = vpow2.f32 %v3287_v33 }
 0x722   : > { %v12187_v42 = vadd.f32 %v11971_v45, %v8663_v51  ;;  %v12201_v45 = vadd.f32 %v11963_v0, %v8662_v1 }
 0x723   : > { %v12137_v32 = vpop.eup %9500  ;;  %v3137_v6 = vpop.f32.mrf.mxu1 }
 0x724   : > { %3201 = vmax.xlane.f32.xlu0 %v12135_v54  ;;  %3341 = vadd.xlane.f32.xlu1 %v12137_v32  ;;  %v12144_v27 = vpop.eup %9502  ;;  %v12194_v31 = vadd.f32 %v11989_v58, %v3137_v6  ;;  %v12209_v58 = vadd.f32 %v11981_v37, %v3134_v10 }
 0x725   : > { %v12157_v21 = vpop.eup %9504  ;;  %v8666_v38 = vpop.f32.mrf.mxu1 }
 0x726   : > { %v12217_v0 = vadd.f32 %v11999_v50, %v8666_v38 }
 0x727   : > { %v12160_v5 = vpop.eup %9506  ;;  %v3150_v13 = vpop.f32.mrf.mxu1 }
 0x728   : > { %3345 = vadd.xlane.f32.xlu0 %v12144_v27  ;;  %3203 = vmax.xlane.f32.xlu1 %v12142_v39  ;;  %v12164_v12 = vpop.eup %9508 }
 0x729   : > { %v8667_v26 = vpop.f32.mrf.mxu1 }
 0x72a   : > { %v12204_v11 = vadd.f32 %v12007_v62, %v8667_v26  ;;  %v12221_v62 = vadd.f32 %v12017_v35, %v3150_v13 }
 0x72b   : > { %v12166_v55 = vpop.eup %9510  ;;  %v3153_v29 = vpop.f32.mrf.mxu1 }
 0x72c   : > { %3197 = vmax.xlane.f32.xlu0 %v12149_v14  ;;  %3199 = vmax.xlane.f32.xlu1 %v12152_v49  ;;  %v12212_v60 = vadd.f32 %v12025_v34, %v3153_v29 }
 0x72d   : > { %v12189_v47 = vpop.eup %9512 }
 0x72e   : > { %v12196_v23 = vpop.eup %9514 }
 0x730   : > { %3347 = vadd.xlane.f32.xlu0 %v12157_v21  ;;  %3353 = vadd.xlane.f32.xlu1 %v12160_v5 }
 0x734   : > { %3343 = vadd.xlane.f32.xlu0 %v12164_v12  ;;  %3349 = vadd.xlane.f32.xlu1 %v12166_v55 }
 0x738   : > { %3209 = vmax.xlane.f32.xlu0 %v12171_v41  ;;  %3211 = vmax.xlane.f32.xlu1 %v12174_v48 }
 0x73c   : > { %3205 = vmax.xlane.f32.xlu0 %v12179_v2  ;;  %3207 = vmax.xlane.f32.xlu1 %v12182_v63 }
 0x740   : > { %3355 = vadd.xlane.f32.xlu0 %v12189_v47  ;;  %3219 = vmax.xlane.f32.xlu1 %v12187_v42 }
 0x744   : > { %3351 = vadd.xlane.f32.xlu0 %v12196_v23  ;;  %3215 = vmax.xlane.f32.xlu1 %v12194_v31 }
 0x748   : > { %3217 = vmax.xlane.f32.xlu0 %v12201_v45  ;;  %3227 = vmax.xlane.f32.xlu1 %v12204_v11 }
 0x74c   : > { %3213 = vmax.xlane.f32.xlu0 %v12209_v58  ;;  %3223 = vmax.xlane.f32.xlu1 %v12212_v60 }
 0x750   : > { %3225 = vmax.xlane.f32.xlu0 %v12217_v0 }
 0x754   : > { %3221 = vmax.xlane.f32.xlu0 %v12221_v62 }
 0x75d   : > { %3594 = vrot.lane.b32.xlu1 %v11258_v59, %s10169_s24 }
 0x76a   : > { %3596 = vrot.lane.b32.xlu0 %v14837_v46, %s10169_s24 }
 0x794   : > { %v3330_v37 = vpop.xlane.xlu1 %3329 }
 0x798   : > { %v3326_v34 = vpop.xlane.xlu1 %3325 }
 0x79c   : > { %v3332_v1 = vpop.xlane.xlu1 %3331 }
 0x79d   : > { %9516 = vrcp.f32 %v3332_v1 }
 0x79e   : > { %9518 = vrcp.f32 %v3326_v34 }
 0x79f   : > { %9520 = vrcp.f32 %v3330_v37 }
 0x7a0   : > { %v3328_v50 = vpop.xlane.xlu1 %3327 }
 0x7a1   : > { %9522 = vrcp.f32 %v3328_v50  ;;  %v3338_v17 = vpop.xlane.xlu0 %3337 }
 0x7a4   : > { %v3336_v10 = vpop.xlane.xlu1 %3335 }
 0x7a5   : > { %9524 = vrcp.f32 %v3336_v10  ;;  %v3334_v35 = vpop.xlane.xlu0 %3333 }
 0x7a6   : > { %9526 = vrcp.f32 %v3334_v35 }
 0x7a7   : > { %9528 = vrcp.f32 %v3338_v17 }
 0x7a9   : > { %v3340_v33 = vpop.xlane.xlu0 %3339 }
 0x7aa   : > { %9530 = vrcp.f32 %v3340_v33  ;;  %v9517_v51 = vpop.eup %9516 }
 0x7ab   : > { %v9519_v6 = vpop.eup %9518  ;;  %v3424_v37 = vmul.f32 %v9517_v51, %v12110_v4 }
 0x7ac   : > { %v9521_v38 = vpop.eup %9520  ;;  %v3421_v34 = vmul.f32 %v9519_v6, %v12107_v61 }
 0x7ad   : > { %v3342_v13 = vpop.xlane.xlu1 %3341  ;;  %v3202_v26 = vpop.xlane.xlu0 %3201  ;;  %v3423_v35 = vmul.f32 %v9521_v38, %v12100_v40 }
 0x7ae   : > { %v9523_v29 = vpop.eup %9522  ;;  %v3247_v1 = vsub.f32 %v12135_v54, %v3202_v26 }
 0x7af   : > { %v3422_v50 = vmul.f32 %v9523_v29, %v12115_v3  ;;  %v3454_v43 = vpack.c.bf16 %v3424_v37, %v3423_v35 }
 0x7b0   : > { %v3297_v10 = vmul.f32 1.442695, %v3247_v1 }
 0x7b1   : > { %v3204_v17 = vpop.xlane.xlu1 %3203  ;;  %v3346_v52 = vpop.xlane.xlu0 %3345  ;;  %v3453_v33 = vpack.c.bf16 %v3422_v50, %v3421_v34 }
 0x7b2   : > { %v9525_v44 = vpop.eup %9524  ;;  %9532 = vpow2.f32 %v3297_v10  ;;  %v3248_v46 = vsub.f32 %v12142_v39, %v3204_v17 }
 0x7b3   : > { %v9527_v19 = vpop.eup %9526  ;;  %8684 = vmatprep.mubr.bf16.mxu0 %v3453_v33  ;;  %v3426_v54 = vmul.f32 %v9525_v44, %v12122_v20 }
 0x7b4   : > { %v3299_v4 = vmul.f32 1.442695, %v3248_v46  ;;  %8685 = vmatmul.mubr.bf16.vlgmr.msra.gmra.mxu0 %v3454_v43  ;;  %v3425_v61 = vmul.f32 %v9527_v19, %v12125_v36  ;;  %v9529_v3 = vpop.eup %9528 }
 0x7b5   : > { %v3200_v51 = vpop.xlane.xlu1 %3199  ;;  %v3198_v6 = vpop.xlane.xlu0 %3197  ;;  %v3427_v37 = vmul.f32 %v9529_v3, %v12117_v7 }
 0x7b6   : > { %9534 = vpow2.f32 %v3299_v4  ;;  %v3246_v40 = vsub.f32 %v12152_v49, %v3200_v51  ;;  %v3245_v38 = vsub.f32 %v12149_v14, %v3198_v6  ;;  %v3455_v26 = vpack.c.bf16 %v3426_v54, %v3425_v61 }
 0x7b7   : > { %v9531_v29 = vpop.eup %9530 }
 0x7b8   : > { %v3295_v39 = vmul.f32 1.442695, %v3246_v40  ;;  %v3293_v1 = vmul.f32 1.442695, %v3245_v38  ;;  %8688 = vmatprep.mubr.bf16.mxu0 %v3455_v26  ;;  %v3428_v46 = vmul.f32 %v9531_v29, %v12131_v15 }
 0x7b9   : > { %v3354_v43 = vpop.xlane.xlu1 %3353  ;;  %v3348_v44 = vpop.xlane.xlu0 %3347 }
 0x7ba   : > { %9536 = vpow2.f32 %v3295_v39  ;;  %v3456_v19 = vpack.c.bf16 %v3428_v46, %v3427_v37 }
 0x7bb   : > { %9538 = vpow2.f32 %v3293_v1 }
 0x7bc   : > { %9540 = vrcp.f32 %v3342_v13  ;;  %8689 = vmatmul.mubr.bf16.gmra.mxu0 %v3456_v19 }
 0x7bd   : > { %9542 = vrcp.f32 %v3348_v44  ;;  %v3350_v20 = vpop.xlane.xlu1 %3349  ;;  %v3344_v36 = vpop.xlane.xlu0 %3343 }
 0x7be   : > { %9544 = vrcp.f32 %v3346_v52 }
 0x7bf   : > { %v12240_v14 = vpop.eup %9532  ;;  %9546 = vrcp.f32 %v3344_v36 }
 0x7c0   : > { %3361 = vadd.xlane.f32.xlu1 %v12240_v14 }
 0x7c1   : > { %v3212_v49 = vpop.xlane.xlu1 %3211  ;;  %v3210_v7 = vpop.xlane.xlu0 %3209 }
 0x7c2   : > { %v3252_v15 = vsub.f32 %v12174_v48, %v3212_v49  ;;  %v3251_v34 = vsub.f32 %v12171_v41, %v3210_v7 }
 0x7c3   : > { %v12245_v50 = vpop.eup %9534 }
 0x7c4   : > { %v3307_v10 = vmul.f32 1.442695, %v3252_v15  ;;  %v3305_v13 = vmul.f32 1.442695, %v3251_v34  ;;  %3363 = vadd.xlane.f32.xlu0 %v12245_v50 }
 0x7c5   : > { %v3208_v35 = vpop.xlane.xlu1 %3207  ;;  %v3206_v17 = vpop.xlane.xlu0 %3205 }
 0x7c6   : > { %9548 = vpow2.f32 %v3307_v10  ;;  %v3250_v52 = vsub.f32 %v12182_v63, %v3208_v35  ;;  %v3249_v33 = vsub.f32 %v12179_v2, %v3206_v17 }
 0x7c7   : > { %v12250_v54 = vpop.eup %9536  ;;  %9550 = vpow2.f32 %v3305_v13 }
 0x7c8   : > { %v12252_v4 = vpop.eup %9538  ;;  %v3303_v48 = vmul.f32 1.442695, %v3250_v52  ;;  %v3301_v41 = vmul.f32 1.442695, %v3249_v33  ;;  %3359 = vadd.xlane.f32.xlu0 %v12250_v54  ;;  %9552 = vrcp.f32 %v3354_v43 }
 0x7c9   : > { %v9541_v61 = vpop.eup %9540  ;;  %3357 = vadd.xlane.f32.xlu1 %v12252_v4  ;;  %v3220_v3 = vpop.xlane.xlu1 %3219 }
 0x7ca   : > { %v3356_v51 = vpop.xlane.xlu0 %3355  ;;  %v9543_v6 = vpop.eup %9542  ;;  %9554 = vpow2.f32 %v3303_v48  ;;  %v3256_v63 = vsub.f32 %v12187_v42, %v3220_v3  ;;  %v3429_v1 = vmul.f32 %v9541_v61, %v12137_v32 }
 0x7cb   : > { %v9545_v2 = vpop.eup %9544  ;;  %9556 = vpow2.f32 %v3301_v41  ;;  %v3432_v26 = vmul.f32 %v9543_v6, %v12157_v21 }
 0x7cc   : > { %v9547_v40 = vpop.eup %9546  ;;  %v3315_v38 = vmul.f32 1.442695, %v3256_v63  ;;  %9558 = vrcp.f32 %v3356_v51  ;;  %v3431_v43 = vmul.f32 %v9545_v2, %v12144_v27 }
 0x7cd   : > { %9560 = vrcp.f32 %v3350_v20  ;;  %v3216_v29 = vpop.xlane.xlu1 %3215  ;;  %v3430_v37 = vmul.f32 %v9547_v40, %v12164_v12 }
 0x7ce   : > { %v3352_v39 = vpop.xlane.xlu0 %3351  ;;  %9562 = vpow2.f32 %v3315_v38  ;;  %v3254_v46 = vsub.f32 %v12194_v31, %v3216_v29  ;;  %v3458_v19 = vpack.c.bf16 %v3432_v26, %v3431_v43  ;;  %v1527_v29 = vld [vmem:[%s14830_s20 + $0x4] sm:$0xf] }
 0x7cf   : > { %9564 = vrcp.f32 %v3352_v39  ;;  %v3457_v42 = vpack.c.bf16 %v3430_v37, %v3429_v1  ;;  %9209 = vmatprep.subr.msk.bf16.mxu0 %vm2598_vm3, %v1527_v29  ;;  %v3776_v39 = vsel %vm2598_vm3, %v1527_v29, 0 }
 0x7d0   : > { %v3311_v44 = vmul.f32 1.442695, %v3254_v46  ;;  %8733 = vmatpush3.bf16.msra.mxu0 %v3776_v39 }
 0x7d1   : > { %8692 = vmatprep.mubr.bf16.mxu0 %v3457_v42  ;;  %v3228_v15 = vpop.xlane.xlu1 %3227  ;;  %v14877_v42 = vld [vmem:[#allocation9_spill] sm:$0xff] }
 0x7d2   : > { %v3218_v36 = vpop.xlane.xlu0 %3217  ;;  %9566 = vpow2.f32 %v3311_v44  ;;  %8693 = vmatmul.mubr.bf16.gmra.mxu0 %v3458_v19  ;;  %v3260_v37 = vsub.f32 %v12204_v11, %v3228_v15  ;;  %v14878_v44 = vld [vmem:[#allocation14_spill] sm:$0xff]  ;;  %v14879_v19 = vld [vmem:[#allocation13_spill] sm:$0xff] }
 0x7d3   : > { %v3255_v21 = vsub.f32 %v12201_v45, %v3218_v36  ;;  %v12263_v20 = vpop.eup %9548  ;;  %v14880_v36 = vld [vmem:[#allocation15_spill] sm:$0xff]  ;;  %v14886_v15 = vld [vmem:[#allocation6_spill] sm:$0xff] }
 0x7d4   : > { %v12265_v32 = vpop.eup %9550  ;;  %3371 = vadd.xlane.f32.xlu0 %v12263_v20  ;;  %v3323_v43 = vmul.f32 1.442695, %v3260_v37 }
 0x7d5   : > { %v3313_v12 = vmul.f32 1.442695, %v3255_v21  ;;  %3369 = vadd.xlane.f32.xlu1 %v12265_v32  ;;  %v9553_v31 = vpop.eup %9552  ;;  %v3224_v41 = vpop.xlane.xlu1 %3223  ;;  %v14881_v21 = vld [vmem:[#allocation16_spill] sm:$0xff] }
 0x7d6   : > { %v3214_v27 = vpop.xlane.xlu0 %3213  ;;  %v3258_v1 = vsub.f32 %v12212_v60, %v3224_v41  ;;  %v14891_v41 = vld [vmem:[#allocation12_spill] sm:$0xff] }
 0x7d7   : > { %v3253_v49 = vsub.f32 %v12209_v58, %v3214_v27  ;;  %v12270_v7 = vpop.eup %9554  ;;  %9568 = vpow2.f32 %v3313_v12  ;;  %v14882_v12 = vld [vmem:[#allocation17_spill] sm:$0xff]  ;;  %v14883_v27 = vld [vmem:[#allocation20_spill] sm:$0xff] }
 0x7d8   : > { %v12272_v34 = vpop.eup %9556  ;;  %3367 = vadd.xlane.f32.xlu0 %v12270_v7  ;;  %v3319_v46 = vmul.f32 1.442695, %v3258_v1  ;;  %v14895_v1 = vld [vmem:[#allocation26_spill] sm:$0xff] }
 0x7d9   : > { %v3309_v45 = vmul.f32 1.442695, %v3253_v49  ;;  %v9559_v10 = vpop.eup %9558  ;;  %3365 = vadd.xlane.f32.xlu1 %v12272_v34  ;;  %v14885_v49 = vld [vmem:[#allocation23_spill] sm:$0xff] }
 0x7da   : > { %v3226_v13 = vpop.xlane.xlu0 %3225  ;;  %v9561_v35 = vpop.eup %9560  ;;  %v3436_v48 = vmul.f32 %v9559_v10, %v12189_v47  ;;  %v14888_v10 = vld [vmem:[#allocation21_spill] sm:$0xff] }
 0x7db   : > { %v3259_v17 = vsub.f32 %v12217_v0, %v3226_v13  ;;  %v12277_v52 = vpop.eup %9562  ;;  %9570 = vpow2.f32 %v3309_v45  ;;  %v3433_v3 = vmul.f32 %v9561_v35, %v12166_v55  ;;  %v3435_v0 = vmul.f32 %v9553_v31, %v12160_v5  ;;  %v3595_v55 = vpop.permute.xlu1 %3594  ;;  %v14884_v31 = vld [vmem:[#allocation19_spill] sm:$0xff]  ;;  %v14887_v45 = vld [vmem:[#allocation25_spill] sm:$0xff] }
 0x7dc   : > { %v9565_v58 = vpop.eup %9564  ;;  %3379 = vadd.xlane.f32.xlu0 %v12277_v52  ;;  %v14889_v13 = vld [vmem:[#allocation7_spill] sm:$0xff] }
 0x7dd   : > { %v3321_v33 = vmul.f32 1.442695, %v3259_v17  ;;  %v3434_v51 = vmul.f32 %v9565_v58, %v12196_v23  ;;  %v3460_v38 = vpack.c.bf16 %v3436_v48, %v3435_v0  ;;  %v14890_v58 = vld [vmem:[#allocation10_spill] sm:$0xff] }
 0x7de   : > { %v3222_v61 = vpop.xlane.xlu0 %3221 }
 0x7df   : > { %9572 = vpow2.f32 %v3321_v33  ;;  %v3257_v6 = vsub.f32 %v12221_v62, %v3222_v61  ;;  %v12285_v63 = vpop.eup %9566  ;;  %v3459_v2 = vpack.c.bf16 %v3434_v51, %v3433_v3  ;;  %v14892_v61 = vld [vmem:[#allocation18_spill] sm:$0xff] }
 0x7e0   : > { %3375 = vadd.xlane.f32.xlu0 %v12285_v63 }
 0x7e1   : > { %v3317_v40 = vmul.f32 1.442695, %v3257_v6  ;;  %8696 = vmatprep.mubr.bf16.mxu0 %v3459_v2  ;;  %v14893_v6 = vld [vmem:[#allocation22_spill] sm:$0xff] }
 0x7e2   : > { %v3597_v47 = vpop.permute.xlu0 %3596  ;;  %8697 = vmatmul.mubr.bf16.gmra.mxu0 %v3460_v38 }
 0x7e3   : > { %9574 = vpow2.f32 %v3317_v40  ;;  %8708 = vmatprep.subr.bf16.mxu1 %v3597_v47 }
 0x7e4   : > { %8709 = vmatpush3.bf16.msra.mxu1 %v3597_v47  ;;  %v12288_v23 = vpop.eup %9568  ;;  %9576 = vpow2.f32 %v3319_v46  ;;  %v14894_v47 = vld [vmem:[#allocation24_spill] sm:$0xff] }
 0x7e5   : > { %8710 = vmatprep.subr.bf16.mxu1 %v3595_v55  ;;  %3377 = vadd.xlane.f32.xlu1 %v12288_v23  ;;  %9578 = vpow2.f32 %v3323_v43 }
 0x7e8   : > { %8711 = vmatpush3.bf16.msra.mxu1 %v3595_v55  ;;  %v12291_v5 = vpop.eup %9570 }
 0x7e9   : > { %3373 = vadd.xlane.f32.xlu1 %v12291_v5 }
 0x7ec   : > { %v12294_v62 = vpop.eup %9572 }
 0x7ed   : > { %3385 = vadd.xlane.f32.xlu1 %v12294_v62 }
 0x7f0   : > { %v12297_v26 = vpop.eup %9574 }
 0x7f1   : > { %3381 = vadd.xlane.f32.xlu1 %v12297_v26  ;;  %v12317_v60 = vpop.eup %9576 }
 0x7f2   : > { %v12322_v11 = vpop.eup %9578 }
 0x7f6   : > { %3592 = vrot.lane.b32.xlu0 %v11215_v16, %s10169_s24 }
 0x802   : > { %3590 = vrot.lane.b32.xlu1 %v11266_v30, %s10169_s24  ;;  %s10171_s24 = smov 112  }
 0x806   : > { %3999 = vrot.lane.b32.xlu1 %v11148_v22, %s10170_s5 }
 0x80a   : > { %3997 = vrot.lane.b32.xlu1 %v11159_v56, %s10170_s5 }
 0x80e   : > { %3995 = vrot.lane.b32.xlu1 %v11174_v24, %s10170_s5 }
 0x812   : > { %4178 = vrot.lane.b32.xlu1 %v11229_v8, %s10170_s5 }
 0x815   : > { %3383 = vadd.xlane.f32.xlu0 %v12317_v60 }
 0x816   : > { %4176 = vrot.lane.b32.xlu1 %v11240_v28, %s10170_s5 }
 0x819   : > { %3387 = vadd.xlane.f32.xlu0 %v12322_v11 }
 0x81a   : > { %4174 = vrot.lane.b32.xlu1 %v11246_v25, %s10170_s5 }
 0x81e   : > { %4172 = vrot.lane.b32.xlu1 %v11252_v9, %s10170_s5 }
 0x822   : > { %3973 = vrot.lane.b32.xlu1 %v11117_v53, %s10171_s24 }
 0x826   : > { %3975 = vrot.lane.b32.xlu1 %v11130_v57, %s10171_s24 }
 0x82a   : > { %4168 = vrot.lane.b32.xlu1 %v11258_v59, %s10170_s5 }
 0x82e   : > { %3981 = vrot.lane.b32.xlu1 %v14877_v42, %s10171_s24 }
 0x82f   : > { %4001 = vrot.lane.b32.xlu0 %v11143_v18, %s10170_s5 }
 0x832   : > { %3983 = vrot.lane.b32.xlu1 %v14878_v44, %s10171_s24 }
 0x833   : > { %3993 = vrot.lane.b32.xlu0 %v14879_v19, %s10170_s5 }
 0x836   : > { %4164 = vrot.lane.b32.xlu1 %v11266_v30, %s10170_s5 }
 0x837   : > { %3991 = vrot.lane.b32.xlu0 %v14880_v36, %s10170_s5 }
 0x83a   : > { %4150 = vrot.lane.b32.xlu1 %v14881_v21, %s10171_s24 }
 0x83b   : > { %3989 = vrot.lane.b32.xlu0 %v14882_v12, %s10170_s5 }
 0x83e   : > { %4154 = vrot.lane.b32.xlu1 %v14883_v27, %s10171_s24  ;;  %v14925_v27 = vld [vmem:[#allocation44_spill] sm:$0xff] }
 0x83f   : > { %3987 = vrot.lane.b32.xlu0 %v14884_v31, %s10170_s5 }
 0x842   : > { %4158 = vrot.lane.b32.xlu1 %v14885_v49, %s10171_s24 }
 0x843   : > { %3971 = vrot.lane.b32.xlu0 %v14886_v15, %s10171_s24  ;;  %v10106_v15 = vld [vmem:[%s14716_s14 + $0x98] sm:$0xff] }
 0x846   : > { %4162 = vrot.lane.b32.xlu1 %v14887_v45, %s10171_s24 }
 0x847   : > { %4170 = vrot.lane.b32.xlu0 %v14888_v10, %s10170_s5 }
 0x849   : > { %v3362_v17 = vpop.xlane.xlu1 %3361 }
 0x84a   : > { %4641 = vrot.lane.b32.xlu1 %v11148_v22, %s10172_s16 }
 0x84b   : > { %3977 = vrot.lane.b32.xlu0 %v14889_v13, %s10171_s24 }
 0x84d   : > { %v3364_v35 = vpop.xlane.xlu0 %3363 }
 0x84e   : > { %4635 = vrot.lane.b32.xlu1 %v14879_v19, %s10172_s16 }
 0x84f   : > { %3979 = vrot.lane.b32.xlu0 %v14890_v58, %s10171_s24 }
 0x851   : > { %v3360_v33 = vpop.xlane.xlu0 %3359 }
 0x852   : > { %v3358_v48 = vpop.xlane.xlu1 %3357  ;;  %4633 = vrot.lane.b32.xlu1 %v14880_v36, %s10172_s16  ;;  %9580 = vrcp.f32 %v3360_v33  ;;  %v14927_v36 = vld [vmem:[#allocation45_spill] sm:$0xff] }
 0x853   : > { %9582 = vrcp.f32 %v3358_v48  ;;  %4166 = vrot.lane.b32.xlu0 %v11215_v16, %s10170_s5 }
 0x854   : > { %9584 = vrcp.f32 %v3364_v35 }
 0x856   : > { %4629 = vrot.lane.b32.xlu1 %v14884_v31, %s10172_s16 }
 0x857   : > { %3985 = vrot.lane.b32.xlu0 %v14891_v41, %s10171_s24 }
 0x85a   : > { %4762 = vrot.lane.b32.xlu1 %v11240_v28, %s10172_s16 }
 0x85b   : > { %4148 = vrot.lane.b32.xlu0 %v14892_v61, %s10171_s24  ;;  %v10104_v61 = vld [vmem:[%s14716_s14 + $0x90] sm:$0xff] }
 0x85d   : > { %v3372_v3 = vpop.xlane.xlu0 %3371 }
 0x85e   : > { %4758 = vrot.lane.b32.xlu1 %v11252_v9, %s10172_s16  ;;  %v3370_v29 = vpop.xlane.xlu1 %3369 }
 0x85f   : > { %v9581_v51 = vpop.eup %9580  ;;  %4152 = vrot.lane.b32.xlu0 %v14893_v6, %s10171_s24  ;;  %v12765_v6 = vld [vmem:[%s14829_s26 + $0x68] sm:$0xff] }
 0x860   : > { %v9583_v0 = vpop.eup %9582  ;;  %v3438_v2 = vmul.f32 %v9581_v51, %v12250_v54 }
 0x861   : > { %v3368_v40 = vpop.xlane.xlu0 %3367  ;;  %v3437_v38 = vmul.f32 %v9583_v0, %v12252_v4  ;;  %v9585_v51 = vpop.eup %9584 }
 0x862   : > { %v3366_v46 = vpop.xlane.xlu1 %3365  ;;  %9586 = vrcp.f32 %v3368_v40 }
 0x863   : > { %4156 = vrot.lane.b32.xlu0 %v14894_v47, %s10171_s24  ;;  %v3461_v55 = vpack.c.bf16 %v3438_v2, %v3437_v38  ;;  %9588 = vrcp.f32 %v3366_v46 }
 0x864   : > { %9590 = vrcp.f32 %v3362_v17 }
 0x865   : > { %8716 = vmatprep.mubr.bf16.mxu1 %v3461_v55  ;;  %v3380_v39 = vpop.xlane.xlu0 %3379  ;;  %9592 = vrcp.f32 %v3372_v3 }
 0x866   : > { %9594 = vrcp.f32 %v3370_v29 }
 0x867   : > { %4160 = vrot.lane.b32.xlu0 %v14895_v1, %s10171_s24 }
 0x869   : > { %v3376_v37 = vpop.xlane.xlu0 %3375 }
 0x86b   : > { %4643 = vrot.lane.b32.xlu0 %v11143_v18, %s10172_s16  ;;  %v14934_v18 = vld [vmem:[#allocation49_spill] sm:$0xff] }
 0x86d   : > { %v3593_v54 = vpop.permute.xlu0 %3592 }
 0x86e   : > { %v3378_v4 = vpop.xlane.xlu1 %3377  ;;  %8712 = vmatprep.subr.bf16.mxu1 %v3593_v54 }
 0x86f   : > { %4639 = vrot.lane.b32.xlu0 %v11159_v56, %s10172_s16  ;;  %8713 = vmatpush3.bf16.msra.mxu1 %v3593_v54  ;;  %v9587_v0 = vpop.eup %9586  ;;  %v3440_v54 = vmul.f32 %v9585_v51, %v12245_v50 }
 0x870   : > { %v9589_v38 = vpop.eup %9588  ;;  %v3442_v47 = vmul.f32 %v9587_v0, %v12270_v7 }
 0x871   : > { %v9591_v3 = vpop.eup %9590  ;;  %v3441_v1 = vmul.f32 %v9589_v38, %v12272_v34 }
 0x872   : > { %v3374_v43 = vpop.xlane.xlu1 %3373 }
 0x873   : > { %4637 = vrot.lane.b32.xlu0 %v11174_v24, %s10172_s16  ;;  %9596 = vrcp.f32 %v3374_v43 }
 0x874   : > { %v8686_v33 = vpop.f32.mrf.mxu0  ;;  %9598 = vrcp.f32 %v3376_v37 }
 0x875   : > { %9600 = vrcp.f32 %v3378_v4 }
 0x876   : > { %v12399_v48 = vpop.xlane.xlu1 %3385  ;;  %v3527_v35 = vpop.f32.mrf.mxu0  ;;  %9602 = vrcp.f32 %v3380_v39 }
 0x877   : > { %4631 = vrot.lane.b32.xlu0 %v14882_v12, %s10172_s16 }
 0x878   : > { %v8687_v17 = vpop.f32.mrf.mxu0 }
 0x879   : > { %v3712_v29 = vpack.c.bf16 %v8687_v17, %v8686_v33  ;;  %v3439_v33 = vmul.f32 %v9591_v3, %v12240_v14 }
 0x87a   : > { %v12403_v2 = vpop.xlane.xlu1 %3381  ;;  %v3530_v40 = vpop.f32.mrf.mxu0 }
 0x87b   : > { %v3711_v55 = vpack.c.bf16 %v3530_v40, %v3527_v35  ;;  %4764 = vrot.lane.b32.xlu0 %v11229_v8, %s10172_s16  ;;  %v9593_v35 = vpop.eup %9592  ;;  %v3462_v17 = vpack.c.bf16 %v3440_v54, %v3439_v33  ;;  %9604 = vrcp.f32 %v12403_v2 }
 0x87c   : > { %v8690_v46 = vpop.f32.mrf.mxu0  ;;  %v9595_v50 = vpop.eup %9594  ;;  %v3444_v14 = vmul.f32 %v9593_v35, %v12263_v20 }
 0x87d   : > { %8734 = vmatprep.mubr.msk.bf16.mxu0 %vm1673_vm2, %v3711_v55  ;;  %v3463_v55 = vpack.c.bf16 %v3442_v47, %v3441_v1  ;;  %v3443_v0 = vmul.f32 %v9595_v50, %v12265_v32 }
 0x87e   : > { %v3591_v37 = vpop.permute.xlu1 %3590  ;;  %v3543_v43 = vpop.f32.mrf.mxu0  ;;  %8735 = vmatmul.mubr.msk.bf16.vlgmr.msra.gmra.mxu0 %vm1673_vm2, %v3712_v29 }
 0x87f   : > { %8714 = vmatprep.subr.bf16.mxu1 %v3591_v37  ;;  %4760 = vrot.lane.b32.xlu0 %v11246_v25, %s10172_s16  ;;  %v3464_v1 = vpack.c.bf16 %v3444_v14, %v3443_v0 }
 0x880   : > { %8715 = vmatpush3.bf16.msra.mxu1 %v3591_v37  ;;  %v8691_v4 = vpop.f32.mrf.mxu0  ;;  %v9597_v29 = vpop.eup %9596 }
 0x881   : > { %v3714_v7 = vpack.c.bf16 %v8691_v4, %v8690_v46  ;;  %v9599_v39 = vpop.eup %9598  ;;  %v3445_v3 = vmul.f32 %v9597_v29, %v12291_v5 }
 0x882   : > { %v12415_v51 = vpop.permute.xlu1 %3999  ;;  %v3546_v40 = vpop.f32.mrf.mxu0  ;;  %v3446_v47 = vmul.f32 %v9599_v39, %v12285_v63 }
 0x883   : > { %8717 = vmatmul.mubr.bf16.vlgmr.msra.gmra.mxu1 %v3462_v17  ;;  %v3713_v34 = vpack.c.bf16 %v3546_v40, %v3543_v43  ;;  %v9601_v54 = vpop.eup %9600 }
 0x884   : > { %8720 = vmatprep.mubr.bf16.mxu1 %v3463_v55  ;;  %v3465_v46 = vpack.c.bf16 %v3446_v47, %v3445_v3  ;;  %v9603_v43 = vpop.eup %9602  ;;  %v3447_v32 = vmul.f32 %v9601_v54, %v12288_v23 }
 0x885   : > { %8738 = vmatprep.mubr.msk.bf16.mxu0 %vm1673_vm2, %v3713_v34  ;;  %v3448_v4 = vmul.f32 %v9603_v43, %v12277_v52 }
 0x886   : > { %v12420_v38 = vpop.permute.xlu1 %3997  ;;  %8739 = vmatmul.mubr.msk.bf16.gmra.mxu0 %vm1673_vm2, %v3714_v7 }
 0x887   : > { %v3466_v5 = vpack.c.bf16 %v3448_v4, %v3447_v32 }
 0x888   : > { %v9605_v32 = vpop.eup %9604 }
 0x88a   : > { %v12425_v37 = vpop.permute.xlu1 %3995 }
 0x88b   : > { %8721 = vmatmul.mubr.bf16.gmra.mxu1 %v3464_v1 }
 0x88c   : > { %8724 = vmatprep.mubr.bf16.mxu1 %v3465_v46 }
 0x88e   : > { %v4179_v33 = vpop.permute.xlu1 %4178 }
 0x88f   : > { %9218 = vmatprep.subr.msk.bf16.mxu0 %vm1673_vm2, %v4179_v33  ;;  %v4226_v20 = vsel %vm1673_vm2, %v4179_v33, 0 }
 0x890   : > { %8799 = vmatpush3.bf16.xpose.msra.mxu0 %v4226_v20 }
 0x892   : > { %v8694_v63 = vpop.f32.mrf.mxu0  ;;  %v4177_v35 = vpop.permute.xlu1 %4176 }
 0x893   : > { %8725 = vmatmul.mubr.bf16.gmra.mxu1 %v3466_v5  ;;  %9219 = vmatprep.subr.msk.bf16.mxu0 %vm1673_vm2, %v4177_v35  ;;  %v4223_v40 = vsel %vm1673_vm2, %v4177_v35, 0  ;;  %v3449_v5 = vmul.f32 %v9605_v32, %v12297_v26 }
 0x894   : > { %v3559_v17 = vpop.f32.mrf.mxu0 }
 0x896   : > { %v8695_v50 = vpop.f32.mrf.mxu0  ;;  %v4175_v55 = vpop.permute.xlu1 %4174 }
 0x897   : > { %v3716_v34 = vpack.c.bf16 %v8695_v50, %v8694_v63  ;;  %v4220_v7 = vsel %vm1673_vm2, %v4175_v55, 0 }
 0x898   : > { %v3562_v23 = vpop.f32.mrf.mxu0  ;;  %8801 = vmatpush3.bf16.xpose.msra.mxu0 %v4223_v40  ;;  %v4046_v40 = vsel %vm1673_vm2, %v12415_v51, 0 }
 0x899   : > { %v3715_v29 = vpack.c.bf16 %v3562_v23, %v3559_v17  ;;  %9220 = vmatprep.subr.msk.bf16.mxu0 %vm1673_vm2, %v4175_v55 }
 0x89a   : > { %v4173_v39 = vpop.permute.xlu1 %4172 }
 0x89b   : > { %8742 = vmatprep.mubr.msk.bf16.mxu0 %vm1673_vm2, %v3715_v29  ;;  %v4217_v54 = vsel %vm1673_vm2, %v4173_v39, 0 }
 0x89c   : > { %8743 = vmatmul.mubr.msk.bf16.gmra.mxu0 %vm1673_vm2, %v3716_v34 }
 0x89e   : > { %v3384_v52 = vpop.xlane.xlu0 %3383  ;;  %v12447_v4 = vpop.permute.xlu1 %3973 }
 0x89f   : > { %9606 = vrcp.f32 %v3384_v52 }
 0x8a0   : > { %8803 = vmatpush3.bf16.xpose.msra.mxu0 %v4220_v7  ;;  %9608 = vrcp.f32 %v12399_v48  ;;  %v4043_v7 = vsel %vm1673_vm2, %v12420_v38, 0 }
 0x8a1   : > { %9221 = vmatprep.subr.msk.bf16.mxu0 %vm1673_vm2, %v4173_v39 }
 0x8a2   : > { %v8698_v0 = vpop.f32.mrf.mxu0  ;;  %v3388_v14 = vpop.xlane.xlu0 %3387 }
 0x8a3   : > { %9610 = vrcp.f32 %v3388_v14  ;;  %v3976_v34 = vpop.permute.xlu1 %3975 }
 0x8a4   : > { %v3575_v3 = vpop.f32.mrf.mxu0 }
 0x8a6   : > { %v8699_v47 = vpop.f32.mrf.mxu0  ;;  %v4002_v1 = vpop.permute.xlu0 %4001 }
 0x8a7   : > { %9210 = vmatprep.subr.msk.bf16.mxu1 %vm1673_vm2, %v4002_v1  ;;  %v4049_v2 = vsel %vm1673_vm2, %v4002_v1, 0  ;;  %v3718_v33 = vpack.c.bf16 %v8699_v47, %v8698_v0  ;;  %v4169_v39 = vpop.permute.xlu1 %4168 }
 0x8a8   : > { %v3578_v46 = vpop.f32.mrf.mxu0  ;;  %8805 = vmatpush3.bf16.xpose.msra.mxu0 %v4217_v54  ;;  %8767 = vmatpush3.bf16.xpose.msra.mxu1 %v4049_v2  ;;  %v4211_v54 = vsel %vm1673_vm2, %v4169_v39, 0 }
 0x8a9   : > { %v3717_v43 = vpack.c.bf16 %v3578_v46, %v3575_v3  ;;  %9211 = vmatprep.subr.msk.bf16.mxu1 %vm1673_vm2, %v12415_v51 }
 0x8aa   : > { %v3994_v48 = vpop.permute.xlu0 %3993 }
 0x8ab   : > { %8746 = vmatprep.mubr.msk.bf16.mxu0 %vm1673_vm2, %v3717_v43  ;;  %v12462_v0 = vpop.permute.xlu1 %3981  ;;  %v4037_v1 = vsel %vm1673_vm2, %v3994_v48, 0 }
 0x8ac   : > { %v9607_v20 = vpop.eup %9606  ;;  %8747 = vmatmul.mubr.msk.bf16.gmra.mxu0 %vm1673_vm2, %v3718_v33 }
 0x8ad   : > { %v3450_v63 = vmul.f32 %v9607_v20, %v12317_v60  ;;  %v9609_v35 = vpop.eup %9608 }
 0x8ae   : > { %v3992_v17 = vpop.permute.xlu0 %3991  ;;  %v3451_v23 = vmul.f32 %v9609_v35, %v12294_v62 }
 0x8af   : > { %v3467_v50 = vpack.c.bf16 %v3450_v63, %v3449_v5  ;;  %v3984_v3 = vpop.permute.xlu1 %3983  ;;  %v4034_v43 = vsel %vm1673_vm2, %v3992_v17, 0 }
 0x8b0   : > { %v9611_v55 = vpop.eup %9610  ;;  %8769 = vmatpush3.bf16.xpose.msra.mxu1 %v4046_v40 }
 0x8b1   : > { %8728 = vmatprep.mubr.bf16.mxu1 %v3467_v50  ;;  %9212 = vmatprep.subr.msk.bf16.mxu1 %vm1673_vm2, %v12420_v38  ;;  %v3452_v29 = vmul.f32 %v9611_v55, %v12322_v11  ;;  %v4040_v11 = vsel %vm1673_vm2, %v12425_v37, 0 }
 0x8b2   : > { %v3990_v26 = vpop.permute.xlu0 %3989 }
 0x8b3   : > { %v3468_v52 = vpack.c.bf16 %v3452_v29, %v3451_v23  ;;  %v4031_v63 = vsel %vm1673_vm2, %v3990_v26, 0 }
 0x8b5   : > { %8729 = vmatmul.mubr.bf16.gmra.mxu1 %v3468_v52 }
 0x8b6   : > { %v3988_v60 = vpop.permute.xlu0 %3987 }
 0x8b7   : > { %v4028_v55 = vsel %vm1673_vm2, %v3988_v60, 0 }
 0x8b8   : > { %8771 = vmatpush3.bf16.xpose.msra.mxu1 %v4043_v7 }
 0x8b9   : > { %9213 = vmatprep.subr.msk.bf16.mxu1 %vm1673_vm2, %v12425_v37  ;;  %v4165_v37 = vpop.permute.xlu1 %4164 }
 0x8ba   : > { %v3972_v51 = vpop.permute.xlu0 %3971  ;;  %v4205_v35 = vsel %vm1673_vm2, %v4165_v37, 0 }
 0x8bb   : > { %8782 = vmatprep.mubr.msk.bf16.mxu1 %vm1673_vm2, %v3972_v51 }
 0x8bd   : > { %v12476_v33 = vpop.permute.xlu1 %4150 }
 0x8be   : > { %v4171_v62 = vpop.permute.xlu0 %4170 }
 0x8bf   : > { %9222 = vmatprep.subr.msk.bf16.mxu0 %vm1673_vm2, %v4171_v62  ;;  %v4214_v14 = vsel %vm1673_vm2, %v4171_v62, 0  ;;  %v12511_v62 = vld [vmem:[%s10290_s30] ss:$0 sm:$0xff] }
 0x8c0   : > { %8773 = vmatpush3.bf16.xpose.msra.mxu1 %v4040_v11  ;;  %8807 = vmatpush3.bf16.xpose.msra.mxu0 %v4214_v14  ;;  %v10076_v11 = vld [vmem:[%s14716_s14 + $0x10] sm:$0xff]  ;;  %v10077_v14 = vld [vmem:[%s14716_s14] sm:$0xff]  ;;  %v1571_v41 = vadd.f32 %v10104_v61, %v12511_v62  ;;  %v1572_v49 = vadd.f32 %v10106_v15, %v12511_v62 }
 0x8c1   : > { %9214 = vmatprep.subr.msk.bf16.mxu1 %vm1673_vm2, %v3994_v48  ;;  %9223 = vmatprep.subr.msk.bf16.mxu0 %vm1673_vm2, %v4169_v39  ;;  %v12482_v20 = vpop.permute.xlu1 %4154  ;;  %v10108_v15 = vld [vmem:[%s14716_s14 + $0xa0] sm:$0xff] }
 0x8c2   : > { %v3978_v38 = vpop.permute.xlu0 %3977  ;;  %v2782_v19 = vadd.f32 %v14927_v36, %v1572_v49  ;;  %v14931_v36 = vld [vmem:[#allocation47_spill] sm:$0xff] }
 0x8c5   : > { %v12491_v50 = vpop.permute.xlu1 %4158 }
 0x8c6   : > { %v3980_v47 = vpop.permute.xlu0 %3979 }
 0x8c8   : > { %8775 = vmatpush3.bf16.xpose.msra.mxu1 %v4037_v1  ;;  %8809 = vmatpush3.bf16.xpose.msra.mxu0 %v4211_v54  ;;  %v10078_v1 = vld [vmem:[%s14716_s14 + $0x18] sm:$0xff] }
 0x8c9   : > { %9215 = vmatprep.subr.msk.bf16.mxu1 %vm1673_vm2, %v3992_v17  ;;  %v12496_v23 = vpop.permute.xlu1 %4162  ;;  %v1556_v54 = vadd.f32 %v10078_v1, %v12511_v62  ;;  %v14904_v1 = vld [vmem:[#allocation32_spill] sm:$0xff] }
 0x8ca   : > { %v4167_v46 = vpop.permute.xlu0 %4166 }
 0x8cb   : > { %9224 = vmatprep.subr.msk.bf16.mxu0 %vm1673_vm2, %v4167_v46  ;;  %v4208_v32 = vsel %vm1673_vm2, %v4167_v46, 0  ;;  %v14897_v46 = vld [vmem:[#allocation28_spill] sm:$0xff] }
 0x8cd   : > { %v4642_v52 = vpop.permute.xlu1 %4641 }
 0x8ce   : > { %v3986_v2 = vpop.permute.xlu0 %3985 }
 0x8d0   : > { %8777 = vmatpush3.bf16.xpose.msra.mxu1 %v4034_v43  ;;  %8811 = vmatpush3.bf16.xpose.msra.mxu0 %v4208_v32 }
 0x8d1   : > { %9216 = vmatprep.subr.msk.bf16.mxu1 %vm1673_vm2, %v3990_v26  ;;  %9225 = vmatprep.subr.msk.bf16.mxu0 %vm1673_vm2, %v4165_v37 }
 0x8d2   : > { %v12480_v48 = vpop.permute.xlu0 %4148 }
 0x8d6   : > { %v12484_v5 = vpop.permute.xlu0 %4152 }
 0x8d8   : > { %8779 = vmatpush3.bf16.xpose.msra.mxu1 %v4031_v63  ;;  %8813 = vmatpush3.bf16.xpose.msra.mxu0 %v4205_v35  ;;  %v14899_v63 = vld [vmem:[#allocation29_spill] sm:$0xff] }
 0x8d9   : > { %9217 = vmatprep.subr.msk.bf16.mxu1 %vm1673_vm2, %v3988_v60  ;;  %v4636_v60 = vpop.permute.xlu1 %4635  ;;  %v2766_v35 = vadd.f32 %v14899_v63, %v1556_v54 }
 0x8da   : > { %v12489_v17 = vpop.permute.xlu0 %4156 }
 0x8de   : > { %v12493_v40 = vpop.permute.xlu0 %4160 }
 0x8e0   : > { %8781 = vmatpush3.bf16.xpose.msra.mxu1 %v4028_v55  ;;  %v10079_v55 = vld [vmem:[%s14716_s14 + $0x30] sm:$0xff] }
 0x8e2   : > { %v4644_v29 = vpop.permute.xlu0 %4643 }
 0x8e3   : > { %8830 = vmatprep.subr.bf16.mxu1 %v4644_v29 }
 0x8e6   : > { %v4640_v26 = vpop.permute.xlu0 %4639 }
 0x8e7   : > { %8783 = vmatmul.mubr.msk.bf16.vlgmr.msra.gmra.mxu1 %vm1673_vm2, %v12447_v4  ;;  %v4634_v4 = vpop.permute.xlu1 %4633 }
 0x8e8   : > { %8786 = vmatprep.mubr.msk.bf16.mxu1 %vm1673_vm2, %v3976_v34  ;;  %8831 = vmatpush3.bf16.msra.mxu1 %v4644_v29  ;;  %v1559_v29 = vadd.f32 %v10079_v55, %v12511_v62 }
 0x8e9   : > { %8832 = vmatprep.subr.bf16.mxu1 %v4642_v52 }
 0x8ea   : > { %v4638_v7 = vpop.permute.xlu0 %4637 }
 0x8eb   : > { %v4630_v34 = vpop.permute.xlu1 %4629 }
 0x8ec   : > { %8833 = vmatpush3.bf16.msra.mxu1 %v4642_v52 }
 0x8ed   : > { %8834 = vmatprep.subr.bf16.mxu1 %v4640_v26 }
 0x8ee   : > { %v4632_v39 = vpop.permute.xlu0 %4631 }
 0x8ef   : > { %8787 = vmatmul.mubr.msk.bf16.gmra.mxu1 %vm1673_vm2, %v3978_v38  ;;  %v1553_v38 = vadd.f32 %v10077_v14, %v12511_v62  ;;  %v10081_v14 = vld [vmem:[%s14716_s14 + $0x38] sm:$0xff] }
 0x8f0   : > { %8790 = vmatprep.mubr.msk.bf16.mxu1 %vm1673_vm2, %v3980_v47  ;;  %8835 = vmatpush3.bf16.msra.mxu1 %v4640_v26 }
 0x8f1   : > { %8836 = vmatprep.subr.bf16.mxu1 %v4638_v7 }
 0x8f2   : > { %v12503_v51 = vpop.permute.xlu0 %4764 }
 0x8f3   : > { %8862 = vmatprep.subr.bf16.mxu0 %v12503_v51 }
 0x8f4   : > { %8837 = vmatpush3.bf16.msra.mxu1 %v4638_v7  ;;  %v10080_v7 = vld [vmem:[%s14716_s14 + $0x20] sm:$0xff] }
 0x8f5   : > { %8838 = vmatprep.subr.bf16.mxu1 %v4636_v60 }
 0x8f7   : > { %8791 = vmatmul.mubr.msk.bf16.gmra.mxu1 %vm1673_vm2, %v12462_v0  ;;  %v1555_v0 = vadd.f32 %v10076_v11, %v12511_v62  ;;  %v14903_v11 = vld [vmem:[#allocation31_spill] sm:$0xff] }
 0x8f8   : > { %8794 = vmatprep.mubr.msk.bf16.mxu1 %vm1673_vm2, %v3984_v3  ;;  %8839 = vmatpush3.bf16.msra.mxu1 %v4636_v60  ;;  %v14896_v3 = vld [vmem:[#allocation27_spill] sm:$0xff] }
 0x8f9   : > { %8840 = vmatprep.subr.bf16.mxu1 %v4634_v4  ;;  %v2765_v47 = vadd.f32 %v14896_v3, %v1555_v0  ;;  %v2769_v0 = vadd.f32 %v14903_v11, %v1559_v29 }
 0x8fc   : > { %8841 = vmatpush3.bf16.msra.mxu1 %v4634_v4 }
 0x8fd   : > { %8842 = vmatprep.subr.bf16.mxu1 %v4632_v39 }
 0x8ff   : > { %8795 = vmatmul.mubr.msk.bf16.gmra.mxu1 %vm1673_vm2, %v3986_v2  ;;  %v2763_v2 = vadd.f32 %v14897_v46, %v1553_v38  ;;  %v1560_v38 = vadd.f32 %v10081_v14, %v12511_v62 }
 0x900   : > { %8843 = vmatpush3.bf16.msra.mxu1 %v4632_v39  ;;  %v1557_v39 = vadd.f32 %v10080_v7, %v12511_v62 }
 0x901   : > { %8844 = vmatprep.subr.bf16.mxu1 %v4630_v34 }
 0x902   : > { %v2767_v54 = vadd.f32 %v14904_v1, %v1557_v39 }
 0x904   : > { %8845 = vmatpush3.bf16.msra.mxu1 %v4630_v34 }
 0x93e   : > { %v8736_v37 = vpop.f32.mrf.mxu0 }
 0x93f   : > { %v12527_v43 = vadd.f32 %v8736_v37, %v2765_v47 }
 0x940   : > { %v3812_v32 = vpop.f32.mrf.mxu0 }
 0x941   : > { %14898 = vst [vmem:[#allocation21_spill] sm:$0xff] %v12527_v43  ;;  %v12534_v26 = vadd.f32 %v3812_v32, %v2763_v2  ;;  %v14906_v32 = vld [vmem:[#allocation33_spill] sm:$0xff]  ;;  %v12757_v43 = vld [vmem:[%s14829_s26 + $0x60] sm:$0xff] }
 0x942   : > { %v8737_v52 = vpop.f32.mrf.mxu0  ;;  %v2770_v63 = vadd.f32 %v14906_v32, %v1560_v38 }
 0x943   : > { %14900 = vst [vmem:[#allocation27_spill] sm:$0xff] %v12534_v26  ;;  %v8718_v60 = vpop.f32.mrf.mxu1  ;;  %v12540_v4 = vadd.f32 %v8737_v52, %v2766_v35 }
 0x944   : > { %v12542_v34 = vpop.f32.mrf.mxu0 }
 0x945   : > { %14901 = vst [vmem:[#allocation28_spill] sm:$0xff] %v12540_v4  ;;  %14902 = vst [vmem:[#allocation29_spill] sm:$0xff] %v12542_v34  ;;  %v3648_v3 = vpop.f32.mrf.mxu1  ;;  %v12747_v4 = vld [vmem:[%s14829_s26 + $0x78] sm:$0xff] }
 0x946   : > { %v8740_v47 = vpop.f32.mrf.mxu0 }
 0x947   : > { %v8719_v37 = vpop.f32.mrf.mxu1  ;;  %v12550_v46 = vadd.f32 %v8740_v47, %v2769_v0 }
 0x948   : > { %v3828_v2 = vpop.f32.mrf.mxu0  ;;  %v3720_v7 = vpack.c.bf16 %v8719_v37, %v8718_v60  ;;  %v10082_v60 = vld [vmem:[%s14716_s14 + $0x50] sm:$0xff]  ;;  %v10083_v37 = vld [vmem:[%s14716_s14 + $0x40] sm:$0xff] }
 0x949   : > { %14905 = vst [vmem:[#allocation31_spill] sm:$0xff] %v12550_v46  ;;  %v3651_v35 = vpop.f32.mrf.mxu1  ;;  %v12553_v55 = vadd.f32 %v3828_v2, %v2767_v54  ;;  %v1561_v2 = vadd.f32 %v10083_v37, %v12511_v62 }
 0x94a   : > { %v3719_v29 = vpack.c.bf16 %v3651_v35, %v3648_v3  ;;  %v8741_v52 = vpop.f32.mrf.mxu0  ;;  %v1563_v3 = vadd.f32 %v10082_v60, %v12511_v62 }
 0x94b   : > { %14907 = vst [vmem:[#allocation32_spill] sm:$0xff] %v12553_v55  ;;  %v8722_v11 = vpop.f32.mrf.mxu1  ;;  %v12555_v34 = vadd.f32 %v8741_v52, %v2770_v63  ;;  %v12739_v55 = vld [vmem:[%s14829_s26 + $0x70] sm:$0xff] }
 0x94c   : > { %8750 = vmatprep.mubr.msk.bf16.mxu0 %vm1673_vm2, %v3719_v29  ;;  %v12569_v63 = vpop.f32.mrf.mxu0  ;;  %v14910_v29 = vld [vmem:[#allocation35_spill] sm:$0xff] }
 0x94d   : > { %14908 = vst [vmem:[#allocation33_spill] sm:$0xff] %v12555_v34  ;;  %v3664_v14 = vpop.f32.mrf.mxu1  ;;  %8751 = vmatmul.mubr.msk.bf16.gmra.mxu0 %vm1673_vm2, %v3720_v7  ;;  %14909 = vst [vmem:[#allocation59_spill] sm:$0xff] %v12569_v63  ;;  %v2773_v52 = vadd.f32 %v14910_v29, %v1563_v3  ;;  %v10084_v7 = vld [vmem:[%s14716_s14 + $0x58] sm:$0xff] }
 0x94f   : > { %v8723_v39 = vpop.f32.mrf.mxu1 }
 0x950   : > { %v3722_v1 = vpack.c.bf16 %v8723_v39, %v8722_v11  ;;  %v1564_v11 = vadd.f32 %v10084_v7, %v12511_v62  ;;  %v14917_v7 = vld [vmem:[#allocation39_spill] sm:$0xff] }
 0x951   : > { %v3667_v0 = vpop.f32.mrf.mxu1 }
 0x952   : > { %v3721_v47 = vpack.c.bf16 %v3667_v0, %v3664_v14  ;;  %v14911_v0 = vld [vmem:[#allocation36_spill] sm:$0xff] }
 0x953   : > { %v8726_v46 = vpop.f32.mrf.mxu1 }
 0x954   : > { %8754 = vmatprep.mubr.msk.bf16.mxu0 %vm1673_vm2, %v3721_v47  ;;  %v2771_v47 = vadd.f32 %v14911_v0, %v1561_v2  ;;  %v10086_v2 = vld [vmem:[%s14716_s14 + $0x60] sm:$0xff] }
 0x955   : > { %v3680_v38 = vpop.f32.mrf.mxu1  ;;  %8755 = vmatmul.mubr.msk.bf16.gmra.mxu0 %vm1673_vm2, %v3722_v1 }
 0x957   : > { %v8727_v54 = vpop.f32.mrf.mxu1 }
 0x958   : > { %v3724_v14 = vpack.c.bf16 %v8727_v54, %v8726_v46  ;;  %v10085_v46 = vld [vmem:[%s14716_s14 + $0x70] sm:$0xff] }
 0x959   : > { %v3683_v32 = vpop.f32.mrf.mxu1  ;;  %v1567_v54 = vadd.f32 %v10085_v46, %v12511_v62 }
 0x95a   : > { %v3723_v35 = vpack.c.bf16 %v3683_v32, %v3680_v38  ;;  %v14913_v38 = vld [vmem:[#allocation37_spill] sm:$0xff] }
 0x95b   : > { %v2774_v37 = vadd.f32 %v14913_v38, %v1564_v11  ;;  %v2777_v11 = vadd.f32 %v14917_v7, %v1567_v54 }
 0x95c   : > { %v8744_v39 = vpop.f32.mrf.mxu0  ;;  %8758 = vmatprep.mubr.msk.bf16.mxu0 %vm1673_vm2, %v3723_v35  ;;  %v1565_v35 = vadd.f32 %v10086_v2, %v12511_v62 }
 0x95d   : > { %v12578_v1 = vadd.f32 %v8744_v39, %v2773_v52  ;;  %8759 = vmatmul.mubr.msk.bf16.gmra.mxu0 %vm1673_vm2, %v3724_v14  ;;  %v10087_v14 = vld [vmem:[%s14716_s14 + $0x78] sm:$0xff] }
 0x95e   : > { %v3844_v60 = vpop.f32.mrf.mxu0  ;;  %v1568_v39 = vadd.f32 %v10087_v14, %v12511_v62 }
 0x95f   : > { %14912 = vst [vmem:[#allocation35_spill] sm:$0xff] %v12578_v1  ;;  %v12582_v3 = vadd.f32 %v3844_v60, %v2771_v47  ;;  %v14918_v47 = vld [vmem:[#allocation40_spill] sm:$0xff] }
 0x960   : > { %v8745_v32 = vpop.f32.mrf.mxu0  ;;  %v2775_v60 = vadd.f32 %v14918_v47, %v1565_v35  ;;  %v4763_v35 = vpop.permute.xlu1 %4762  ;;  %v12667_v47 = vld [vmem:[%s14829_s26 + $0x30] sm:$0xff] }
 0x961   : > { %14914 = vst [vmem:[#allocation36_spill] sm:$0xff] %v12582_v3  ;;  %v12584_v29 = vadd.f32 %v8745_v32, %v2774_v37  ;;  %v14920_v32 = vld [vmem:[#allocation41_spill] sm:$0xff] }
 0x962   : > { %v12594_v52 = vpop.f32.mrf.mxu0  ;;  %v2778_v46 = vadd.f32 %v14920_v32, %v1568_v39 }
 0x963   : > { %14915 = vst [vmem:[#allocation37_spill] sm:$0xff] %v12584_v29  ;;  %14916 = vst [vmem:[#allocation60_spill] sm:$0xff] %v12594_v52 }
 0x96c   : > { %v8748_v0 = vpop.f32.mrf.mxu0 }
 0x96d   : > { %v12602_v38 = vadd.f32 %v8748_v0, %v2777_v11  ;;  %v4761_v11 = vpop.permute.xlu0 %4760 }
 0x96e   : > { %v3860_v37 = vpop.f32.mrf.mxu0 }
 0x96f   : > { %14919 = vst [vmem:[#allocation39_spill] sm:$0xff] %v12602_v38  ;;  %v12605_v63 = vadd.f32 %v3860_v37, %v2775_v60  ;;  %v12675_v37 = vld [vmem:[%s14829_s26 + $0x38] sm:$0xff] }
 0x970   : > { %v8749_v2 = vpop.f32.mrf.mxu0 }
 0x971   : > { %14921 = vst [vmem:[#allocation40_spill] sm:$0xff] %v12605_v63  ;;  %v12607_v52 = vadd.f32 %v8749_v2, %v2778_v46 }
 0x972   : > { %v12780_v13 = vpop.f32.mrf.mxu0 }
 0x973   : > { %14922 = vst [vmem:[#allocation41_spill] sm:$0xff] %v12607_v52  ;;  %v12729_v52 = vld [vmem:[%s14829_s26 + $0x48] sm:$0xff]  ;;  %14923 = vst [vmem:[#allocation61_spill] sm:$0xff] %v12780_v13 }
 0x975   : > { %v8730_v54 = vpop.f32.mrf.mxu1 }
 0x977   : > { %v3696_v7 = vpop.f32.mrf.mxu1 }
 0x979   : > { %v8731_v29 = vpop.f32.mrf.mxu1 }
 0x97a   : > { %v3726_v34 = vpack.c.bf16 %v8731_v29, %v8730_v54  ;;  %v12657_v29 = vld [vmem:[%s14829_s26 + $0x18] sm:$0xff]  ;;  %v12685_v54 = vld [vmem:[%s14829_s26 + $0x20] sm:$0xff] }
 0x97b   : > { %v3699_v3 = vpop.f32.mrf.mxu1 }
 0x97c   : > { %v3725_v1 = vpack.c.bf16 %v3699_v3, %v3696_v7 }
 0x97e   : > { %8762 = vmatprep.mubr.msk.bf16.mxu0 %vm1673_vm2, %v3725_v1 }
 0x97f   : > { %8763 = vmatmul.mubr.msk.bf16.gmra.mxu0 %vm1673_vm2, %v3726_v34  ;;  %v4759_v34 = vpop.permute.xlu1 %4758 }
 0x980   : > { %8814 = vmatprep.mubr.msk.bf16.mxu0 %vm1673_vm2, %v12480_v48  ;;  %v12631_v48 = vld [vmem:[%s14829_s26 + $0x10] sm:$0xff] }
 0x987   : > { %8815 = vmatmul.mubr.msk.bf16.vlgmr.msra.gmra.mxu0 %vm1673_vm2, %v12476_v33 }
 0x988   : > { %8863 = vmatpush3.bf16.msra.mxu0 %v12503_v51  ;;  %8818 = vmatprep.mubr.msk.bf16.mxu0 %vm1673_vm2, %v12484_v5  ;;  %v12648_v51 = vld [vmem:[%s14829_s26 + $0x8] sm:$0xff] }
 0x989   : > { %8864 = vmatprep.subr.bf16.mxu0 %v4763_v35 }
 0x98c   : > { %8865 = vmatpush3.bf16.msra.mxu0 %v4763_v35  ;;  %v12693_v35 = vld [vmem:[%s14829_s26 + $0x28] sm:$0xff] }
 0x98d   : > { %8866 = vmatprep.subr.bf16.mxu0 %v4761_v11 }
 0x98f   : > { %8819 = vmatmul.mubr.msk.bf16.gmra.mxu0 %vm1673_vm2, %v12482_v20 }
 0x990   : > { %8867 = vmatpush3.bf16.msra.mxu0 %v4761_v11  ;;  %8822 = vmatprep.mubr.msk.bf16.mxu0 %vm1673_vm2, %v12489_v17 }
 0x991   : > { %8868 = vmatprep.subr.bf16.mxu0 %v4759_v34 }
 0x994   : > { %8869 = vmatpush3.bf16.msra.mxu0 %v4759_v34 }
 0x997   : > { %8823 = vmatmul.mubr.msk.bf16.gmra.mxu0 %vm1673_vm2, %v12491_v50  ;;  %v12640_v50 = vld [vmem:[%s14829_s26] sm:$0xff] }
 0x998   : > { %8826 = vmatprep.mubr.msk.bf16.mxu0 %vm1673_vm2, %v12493_v40 }
 0x99f   : > { %8827 = vmatmul.mubr.msk.bf16.gmra.mxu0 %vm1673_vm2, %v12496_v23 }
 0x9a7   : > { %v8784_v33 = vpop.f32.mrf.mxu1 }
 0x9a8   : > { %v12634_v20 = vadd.f32 %v12631_v48, %v8784_v33 }
 0x9a9   : > { %v4085_v5 = vpop.f32.mrf.mxu1 }
 0x9aa   : > { %4329 = vmax.xlane.f32.xlu0 %v12634_v20  ;;  %v12643_v40 = vadd.f32 %v12640_v50, %v4085_v5  ;;  %v12703_v5 = vld [vmem:[%s14829_s26 + $0x50] sm:$0xff] }
 0x9ab   : > { %v8785_v17 = vpop.f32.mrf.mxu1 }
 0x9ac   : > { %v12660_v14 = vadd.f32 %v12657_v29, %v8785_v17 }
 0x9ad   : > { %v4088_v23 = vpop.f32.mrf.mxu1 }
 0x9ae   : > { %v12651_v1 = vadd.f32 %v12648_v51, %v4088_v23  ;;  %4325 = vmax.xlane.f32.xlu0 %v12643_v40  ;;  %v12711_v23 = vld [vmem:[%s14829_s26 + $0x58] sm:$0xff] }
 0x9af   : > { %v8788_v3 = vpop.f32.mrf.mxu1 }
 0x9b0   : > { %4327 = vmax.xlane.f32.xlu1 %v12651_v1  ;;  %v12670_v60 = vadd.f32 %v12667_v47, %v8788_v3 }
 0x9b1   : > { %v4101_v39 = vpop.f32.mrf.mxu1 }
 0x9b2   : > { %4331 = vmax.xlane.f32.xlu0 %v12660_v14  ;;  %v12688_v7 = vadd.f32 %v12685_v54, %v4101_v39 }
 0x9b3   : > { %v8789_v0 = vpop.f32.mrf.mxu1 }
 0x9b4   : > { %v12678_v32 = vadd.f32 %v12675_v37, %v8789_v0 }
 0x9b5   : > { %v4104_v46 = vpop.f32.mrf.mxu1 }
 0x9b6   : > { %4337 = vmax.xlane.f32.xlu0 %v12670_v60  ;;  %4339 = vmax.xlane.f32.xlu1 %v12678_v32  ;;  %v12696_v11 = vadd.f32 %v12693_v35, %v4104_v46  ;;  %v12721_v46 = vld [vmem:[%s14829_s26 + $0x40] sm:$0xff] }
 0x9b7   : > { %v8792_v2 = vpop.f32.mrf.mxu1 }
 0x9b8   : > { %v12706_v17 = vadd.f32 %v12703_v5, %v8792_v2 }
 0x9b9   : > { %v4117_v34 = vpop.f32.mrf.mxu1 }
 0x9ba   : > { %4335 = vmax.xlane.f32.xlu1 %v12696_v11  ;;  %4333 = vmax.xlane.f32.xlu0 %v12688_v7  ;;  %v12724_v2 = vadd.f32 %v12721_v46, %v4117_v34 }
 0x9bb   : > { %v8793_v33 = vpop.f32.mrf.mxu1 }
 0x9bc   : > { %v12714_v3 = vadd.f32 %v12711_v23, %v8793_v33 }
 0x9bd   : > { %v4120_v39 = vpop.f32.mrf.mxu1 }
 0x9be   : > { %4345 = vmax.xlane.f32.xlu0 %v12706_v17  ;;  %4347 = vmax.xlane.f32.xlu1 %v12714_v3  ;;  %v12732_v33 = vadd.f32 %v12729_v52, %v4120_v39 }
 0x9bf   : > { %v8796_v0 = vpop.f32.mrf.mxu1 }
 0x9c0   : > { %v12742_v34 = vadd.f32 %v12739_v55, %v8796_v0 }
 0x9c1   : > { %v4133_v63 = vpop.f32.mrf.mxu1 }
 0x9c2   : > { %4343 = vmax.xlane.f32.xlu1 %v12732_v33  ;;  %4341 = vmax.xlane.f32.xlu0 %v12724_v2  ;;  %v12760_v0 = vadd.f32 %v12757_v43, %v4133_v63  ;;  %v10105_v63 = vld [vmem:[%s14716_s14 + $0x80] sm:$0xff] }
 0x9c3   : > { %v8797_v38 = vpop.f32.mrf.mxu1  ;;  %v1569_v58 = vadd.f32 %v10105_v63, %v12511_v62  ;;  %v10107_v63 = vld [vmem:[%s14716_s14 + $0xb0] sm:$0xff] }
 0x9c4   : > { %v12750_v39 = vadd.f32 %v12747_v4, %v8797_v38 }
 0x9c5   : > { %v4136_v26 = vpop.f32.mrf.mxu1  ;;  %v2779_v12 = vadd.f32 %v14925_v27, %v1569_v58  ;;  %v1573_v27 = vadd.f32 %v10108_v15, %v12511_v62  ;;  %v10109_v58 = vld [vmem:[%s14716_s14 + $0xb8] sm:$0xff] }
 0x9c6   : > { %4353 = vmax.xlane.f32.xlu0 %v12742_v34  ;;  %4355 = vmax.xlane.f32.xlu1 %v12750_v39  ;;  %v12768_v38 = vadd.f32 %v12765_v6, %v4136_v26  ;;  %v14924_v26 = vld [vmem:[#allocation43_spill] sm:$0xff] }
 0x9c7   : > { %v2781_v45 = vadd.f32 %v14924_v26, %v1571_v41  ;;  %v1575_v41 = vadd.f32 %v10107_v63, %v12511_v62  ;;  %v14932_v63 = vld [vmem:[#allocation48_spill] sm:$0xff] }
 0x9c9   : > { %v2785_v49 = vadd.f32 %v14931_v36, %v1575_v41 }
 0x9ca   : > { %4351 = vmax.xlane.f32.xlu1 %v12768_v38  ;;  %4349 = vmax.xlane.f32.xlu0 %v12760_v0 }
 0xa0d   : > { %v8752_v31 = vpop.f32.mrf.mxu0 }
 0xa0e   : > { %v12788_v61 = vadd.f32 %v8752_v31, %v2781_v45 }
 0xa0f   : > { %v3876_v21 = vpop.f32.mrf.mxu0 }
 0xa10   : > { %14926 = vst [vmem:[#allocation43_spill] sm:$0xff] %v12788_v61  ;;  %v12795_v26 = vadd.f32 %v3876_v21, %v2779_v12  ;;  %v1576_v21 = vadd.f32 %v10109_v58, %v12511_v62  ;;  %v10111_v58 = vld [vmem:[%s14716_s14 + $0xc0] sm:$0xff] }
 0xa11   : > { %v8753_v13 = vpop.f32.mrf.mxu0 }
 0xa12   : > { %14928 = vst [vmem:[#allocation44_spill] sm:$0xff] %v12795_v26  ;;  %v12801_v31 = vadd.f32 %v8753_v13, %v2782_v19  ;;  %v2783_v26 = vadd.f32 %v14932_v63, %v1573_v27  ;;  %v2786_v15 = vadd.f32 %v14934_v18, %v1576_v21  ;;  %v10110_v19 = vld [vmem:[%s14716_s14 + $0xd0] sm:$0xff]  ;;  %v1577_v27 = vadd.f32 %v10111_v58, %v12511_v62  ;;  %v14938_v18 = vld [vmem:[#allocation51_spill] sm:$0xff]  ;;  %v10112_v63 = vld [vmem:[%s14716_s14 + $0xd8] sm:$0xff] }
 0xa13   : > { %v12803_v45 = vpop.f32.mrf.mxu0  ;;  %v1579_v13 = vadd.f32 %v10110_v19, %v12511_v62  ;;  %v14939_v19 = vld [vmem:[#allocation52_spill] sm:$0xff] }
 0xa14   : > { %14929 = vst [vmem:[#allocation45_spill] sm:$0xff] %v12801_v31  ;;  %14930 = vst [vmem:[#allocation62_spill] sm:$0xff] %v12803_v45  ;;  %v2787_v45 = vadd.f32 %v14939_v19, %v1577_v27  ;;  %v14940_v31 = vld [vmem:[#allocation53_spill] sm:$0xff]  ;;  %v10113_v27 = vld [vmem:[%s14716_s14 + $0xf0] sm:$0xff] }
 0xa15   : > { %v8756_v12 = vpop.f32.mrf.mxu0  ;;  %v2789_v21 = vadd.f32 %v14938_v18, %v1579_v13  ;;  %v10115_v19 = vld [vmem:[%s14716_s14 + $0xf8] sm:$0xff] }
 0xa16   : > { %v12811_v61 = vadd.f32 %v8756_v12, %v2785_v49 }
 0xa17   : > { %v3892_v44 = vpop.f32.mrf.mxu0 }
 0xa18   : > { %14933 = vst [vmem:[#allocation47_spill] sm:$0xff] %v12811_v61  ;;  %v12818_v41 = vadd.f32 %v3892_v44, %v2783_v26  ;;  %v1580_v44 = vadd.f32 %v10112_v63, %v12511_v62 }
 0xa19   : > { %v8757_v36 = vpop.f32.mrf.mxu0 }
 0xa1a   : > { %14935 = vst [vmem:[#allocation48_spill] sm:$0xff] %v12818_v41  ;;  %v12824_v49 = vadd.f32 %v8757_v36, %v2786_v15  ;;  %v2790_v58 = vadd.f32 %v14940_v31, %v1580_v44  ;;  %v1583_v31 = vadd.f32 %v10113_v27, %v12511_v62  ;;  %v14944_v44 = vld [vmem:[#allocation55_spill] sm:$0xff] }
 0xa1b   : > { %v12826_v12 = vpop.f32.mrf.mxu0 }
 0xa1c   : > { %14936 = vst [vmem:[#allocation49_spill] sm:$0xff] %v12824_v49  ;;  %14937 = vst [vmem:[#allocation63_spill] sm:$0xff] %v12826_v12 }
 0xa1d   : > { %v8760_v26 = vpop.f32.mrf.mxu0 }
 0xa1e   : > { %v12834_v41 = vadd.f32 %v8760_v26, %v2789_v21  ;;  %v10114_v21 = vld [vmem:[%s14716_s14 + $0xe0] sm:$0xff]  ;;  %v2793_v26 = vadd.f32 %v14944_v44, %v1583_v31  ;;  %v14947_v31 = vld [vmem:[#allocation57_spill] sm:$0xff] }
 0xa1f   : > { %v3908_v61 = vpop.f32.mrf.mxu0 }
 0xa20   : > { %v12837_v15 = vadd.f32 %v3908_v61, %v2787_v45 }
 0xa21   : > { %v8761_v36 = vpop.f32.mrf.mxu0 }
 0xa22   : > { %14941 = vst [vmem:[#allocation51_spill] sm:$0xff] %v12837_v15  ;;  %v12839_v12 = vadd.f32 %v8761_v36, %v2790_v58  ;;  %v1584_v58 = vadd.f32 %v10115_v19, %v12511_v62 }
 0xa24   : > { %14942 = vst [vmem:[#allocation52_spill] sm:$0xff] %v12839_v12 }
 0xa33   : > { %v4330_v13 = vpop.xlane.xlu0 %4329 }
 0xa34   : > { %v4391_v18 = vsub.f32 %v12634_v20, %v4330_v13  ;;  %v1581_v20 = vadd.f32 %v10114_v21, %v12511_v62  ;;  %v2794_v21 = vadd.f32 %v14947_v31, %v1584_v58 }
 0xa36   : > { %v4425_v49 = vmul.f32 1.442695, %v4391_v18 }
 0xa37   : > { %v4326_v42 = vpop.xlane.xlu0 %4325 }
 0xa38   : > { %9612 = vpow2.f32 %v4425_v49  ;;  %v4389_v63 = vsub.f32 %v12643_v40, %v4326_v42  ;;  %v12853_v40 = vpop.f32.mrf.mxu0 }
 0xa39   : > { %v4328_v57 = vpop.xlane.xlu1 %4327  ;;  %14943 = vst [vmem:[#allocation53_spill] sm:$0xff] %v12853_v40 }
 0xa3a   : > { %v4421_v61 = vmul.f32 1.442695, %v4389_v63  ;;  %v4390_v49 = vsub.f32 %v12651_v1, %v4328_v57  ;;  %v14945_v63 = vld [vmem:[#allocation56_spill] sm:$0xff] }
 0xa3b   : > { %v4332_v45 = vpop.xlane.xlu0 %4331  ;;  %v2791_v27 = vadd.f32 %v14945_v63, %v1581_v20 }
 0xa3c   : > { %9614 = vpow2.f32 %v4421_v61  ;;  %v4392_v42 = vsub.f32 %v12660_v14, %v4332_v45  ;;  %v4423_v61 = vmul.f32 1.442695, %v4390_v49 }
 0xa3e   : > { %v4427_v36 = vmul.f32 1.442695, %v4392_v42 }
 0xa3f   : > { %v8764_v13 = vpop.f32.mrf.mxu0  ;;  %v4340_v18 = vpop.xlane.xlu1 %4339 }
 0xa40   : > { %9616 = vpow2.f32 %v4427_v36  ;;  %v12861_v57 = vadd.f32 %v8764_v13, %v2793_v26  ;;  %v4338_v1 = vpop.xlane.xlu0 %4337  ;;  %v4396_v26 = vsub.f32 %v12678_v32, %v4340_v18 }
 0xa41   : > { %v4395_v14 = vsub.f32 %v12670_v60, %v4338_v1  ;;  %v3924_v45 = vpop.f32.mrf.mxu0  ;;  %9618 = vpow2.f32 %v4423_v61 }
 0xa42   : > { %14946 = vst [vmem:[#allocation55_spill] sm:$0xff] %v12861_v57  ;;  %v12865_v44 = vadd.f32 %v3924_v45, %v2791_v27 }
 0xa43   : > { %v4433_v40 = vmul.f32 1.442695, %v4395_v14  ;;  %v8765_v12 = vpop.f32.mrf.mxu0  ;;  %v4336_v62 = vpop.xlane.xlu1 %4335 }
 0xa44   : > { %14948 = vst [vmem:[#allocation56_spill] sm:$0xff] %v12865_v44  ;;  %v12867_v42 = vadd.f32 %v8765_v12, %v2794_v21  ;;  %v4394_v20 = vsub.f32 %v12696_v11, %v4336_v62  ;;  %v4334_v49 = vpop.xlane.xlu0 %4333  ;;  %v4435_v11 = vmul.f32 1.442695, %v4396_v26 }
 0xa45   : > { %v12870_v19 = vpop.eup %9612  ;;  %9620 = vpow2.f32 %v4433_v40  ;;  %v4393_v60 = vsub.f32 %v12688_v7, %v4334_v49  ;;  %v12874_v36 = vpop.f32.mrf.mxu0 }
 0xa46   : > { %14949 = vst [vmem:[#allocation57_spill] sm:$0xff] %v12867_v42  ;;  %14950 = vst [vmem:[#allocation64_spill] sm:$0xff] %v12874_v36  ;;  %v4431_v58 = vmul.f32 1.442695, %v4394_v20  ;;  %4489 = vadd.xlane.f32.xlu1 %v12870_v19 }
 0xa47   : > { %v4429_v13 = vmul.f32 1.442695, %v4393_v60  ;;  %v8816_v63 = vpop.f32.mrf.mxu0  ;;  %v4348_v14 = vpop.xlane.xlu1 %4347 }
 0xa48   : > { %9622 = vpow2.f32 %v4431_v58  ;;  %v4346_v12 = vpop.xlane.xlu0 %4345 }
 0xa49   : > { %v12877_v27 = vpop.eup %9614  ;;  %9624 = vpow2.f32 %v4429_v13  ;;  %v4262_v61 = vpop.f32.mrf.mxu0  ;;  %v4399_v7 = vsub.f32 %v12706_v17, %v4346_v12  ;;  %v4400_v17 = vsub.f32 %v12714_v3, %v4348_v14 }
 0xa4a   : > { %4485 = vadd.xlane.f32.xlu1 %v12877_v27  ;;  %9626 = vpow2.f32 %v4435_v11 }
 0xa4b   : > { %v8817_v1 = vpop.f32.mrf.mxu0  ;;  %v4441_v62 = vmul.f32 1.442695, %v4399_v7  ;;  %v4344_v26 = vpop.xlane.xlu1 %4343  ;;  %v4443_v11 = vmul.f32 1.442695, %v4400_v17 }
 0xa4c   : > { %v4342_v32 = vpop.xlane.xlu0 %4341 }
 0xa4d   : > { %v12880_v40 = vpop.eup %9616  ;;  %v4397_v18 = vsub.f32 %v12724_v2, %v4342_v32  ;;  %v4265_v49 = vpop.f32.mrf.mxu0  ;;  %v4398_v32 = vsub.f32 %v12732_v33, %v4344_v26 }
 0xa4e   : > { %4491 = vadd.xlane.f32.xlu1 %v12880_v40  ;;  %v12885_v21 = vpop.eup %9618 }
 0xa4f   : > { %v4437_v45 = vmul.f32 1.442695, %v4397_v18  ;;  %v8820_v13 = vpop.f32.mrf.mxu0  ;;  %v4356_v33 = vpop.xlane.xlu1 %4355 }
 0xa50   : > { %v4354_v31 = vpop.xlane.xlu0 %4353 }
 0xa51   : > { %9628 = vpow2.f32 %v4437_v45  ;;  %v4403_v60 = vsub.f32 %v12742_v34, %v4354_v31  ;;  %v4278_v14 = vpop.f32.mrf.mxu0  ;;  %v4439_v34 = vmul.f32 1.442695, %v4398_v32  ;;  %v12905_v45 = vadd.f32 %v12631_v48, %v8816_v63 }
 0xa52   : > { %v12887_v20 = vpop.eup %9620  ;;  %4487 = vadd.xlane.f32.xlu1 %v12885_v21  ;;  %9630 = vpow2.f32 %v4441_v62  ;;  %v12919_v48 = vadd.f32 %v12640_v50, %v4262_v61  ;;  %v12922_v63 = vadd.f32 %v12648_v51, %v4265_v49 }
 0xa53   : > { %4497 = vadd.xlane.f32.xlu0 %v12887_v20  ;;  %v4449_v7 = vmul.f32 1.442695, %v4403_v60  ;;  %9632 = vpow2.f32 %v4443_v11  ;;  %v8821_v17 = vpop.f32.mrf.mxu0  ;;  %v4352_v11 = vpop.xlane.xlu1 %4351 }
 0xa54   : > { %v4350_v12 = vpop.xlane.xlu0 %4349 }
 0xa55   : > { %v12892_v2 = vpop.eup %9622  ;;  %v4401_v3 = vsub.f32 %v12760_v0, %v4350_v12  ;;  %9634 = vpow2.f32 %v4449_v7  ;;  %v12912_v0 = vadd.f32 %v12657_v29, %v8817_v1  ;;  %v4281_v60 = vpop.f32.mrf.mxu0  ;;  %v4404_v12 = vsub.f32 %v12750_v39, %v4356_v33 }
 0xa56   : > { %v12895_v58 = vpop.eup %9624  ;;  %4495 = vadd.xlane.f32.xlu1 %v12892_v2  ;;  %9636 = vpow2.f32 %v4439_v34  ;;  %v4402_v7 = vsub.f32 %v12768_v38, %v4352_v11  ;;  %v12941_v38 = vadd.f32 %v12667_v47, %v8820_v13  ;;  %v12944_v34 = vadd.f32 %v12675_v37, %v8821_v17 }
 0xa57   : > { %4493 = vadd.xlane.f32.xlu0 %v12895_v58  ;;  %v12901_v18 = vpop.eup %9626  ;;  %v4445_v31 = vmul.f32 1.442695, %v4401_v3  ;;  %v8824_v32 = vpop.f32.mrf.mxu0  ;;  %v4451_v1 = vmul.f32 1.442695, %v4404_v12  ;;  %v12949_v33 = vadd.f32 %v12685_v54, %v4278_v14  ;;  %v12952_v12 = vadd.f32 %v12693_v35, %v4281_v60 }
 0xa58   : > { %v4447_v39 = vmul.f32 1.442695, %v4402_v7 }
 0xa59   : > { %9638 = vpow2.f32 %v4445_v31  ;;  %v4294_v50 = vpop.f32.mrf.mxu0 }
 0xa5a   : > { %9640 = vpow2.f32 %v4451_v1 }
 0xa5b   : > { %4499 = vadd.xlane.f32.xlu0 %v12901_v18  ;;  %v8825_v49 = vpop.f32.mrf.mxu0  ;;  %9642 = vpow2.f32 %v4447_v39 }
 0xa5c   : > { %v12957_v47 = vadd.f32 %v12711_v23, %v8825_v49  ;;  %v12971_v23 = vadd.f32 %v12703_v5, %v8824_v32 }
 0xa5d   : > { %v4297_v31 = vpop.f32.mrf.mxu0 }
 0xa5e   : > { %v12907_v62 = vpop.eup %9628  ;;  %v12964_v54 = vadd.f32 %v12729_v52, %v4297_v31  ;;  %v12979_v52 = vadd.f32 %v12721_v46, %v4294_v50 }
 0xa5f   : > { %4361 = vmax.xlane.f32.xlu0 %v12905_v45  ;;  %4501 = vadd.xlane.f32.xlu1 %v12907_v62  ;;  %v12914_v26 = vpop.eup %9630  ;;  %v8828_v11 = vpop.f32.mrf.mxu0 }
 0xa60   : > { %v12927_v29 = vpop.eup %9632  ;;  %v12987_v5 = vadd.f32 %v12739_v55, %v8828_v11 }
 0xa61   : > { %v4310_v13 = vpop.f32.mrf.mxu0 }
 0xa62   : > { %v12930_v3 = vpop.eup %9634 }
 0xa63   : > { %4505 = vadd.xlane.f32.xlu0 %v12914_v26  ;;  %4363 = vmax.xlane.f32.xlu1 %v12912_v0  ;;  %v12934_v51 = vpop.eup %9636  ;;  %v8829_v14 = vpop.f32.mrf.mxu0 }
 0xa64   : > { %v12974_v17 = vadd.f32 %v12747_v4, %v8829_v14  ;;  %v12991_v4 = vadd.f32 %v12757_v43, %v4310_v13 }
 0xa65   : > { %v4313_v60 = vpop.f32.mrf.mxu0 }
 0xa66   : > { %v12936_v61 = vpop.eup %9638  ;;  %v12982_v1 = vadd.f32 %v12765_v6, %v4313_v60 }
 0xa67   : > { %4357 = vmax.xlane.f32.xlu0 %v12919_v48  ;;  %4359 = vmax.xlane.f32.xlu1 %v12922_v63  ;;  %v12959_v37 = vpop.eup %9640 }
 0xa68   : > { %v12966_v35 = vpop.eup %9642 }
 0xa6b   : > { %4507 = vadd.xlane.f32.xlu0 %v12927_v29  ;;  %4513 = vadd.xlane.f32.xlu1 %v12930_v3 }
 0xa6f   : > { %4503 = vadd.xlane.f32.xlu0 %v12934_v51  ;;  %4509 = vadd.xlane.f32.xlu1 %v12936_v61 }
 0xa73   : > { %4369 = vmax.xlane.f32.xlu0 %v12941_v38  ;;  %4371 = vmax.xlane.f32.xlu1 %v12944_v34 }
 0xa77   : > { %4365 = vmax.xlane.f32.xlu0 %v12949_v33  ;;  %4367 = vmax.xlane.f32.xlu1 %v12952_v12 }
 0xa7b   : > { %4515 = vadd.xlane.f32.xlu0 %v12959_v37  ;;  %4379 = vmax.xlane.f32.xlu1 %v12957_v47 }
 0xa7f   : > { %4511 = vadd.xlane.f32.xlu0 %v12966_v35  ;;  %4375 = vmax.xlane.f32.xlu1 %v12964_v54 }
 0xa83   : > { %4377 = vmax.xlane.f32.xlu0 %v12971_v23  ;;  %4387 = vmax.xlane.f32.xlu1 %v12974_v17 }
 0xa87   : > { %4373 = vmax.xlane.f32.xlu0 %v12979_v52  ;;  %4383 = vmax.xlane.f32.xlu1 %v12982_v1 }
 0xa8b   : > { %4385 = vmax.xlane.f32.xlu0 %v12987_v5 }
 0xa8f   : > { %4381 = vmax.xlane.f32.xlu0 %v12991_v4 }
 0xa98   : > { %4754 = vrot.lane.b32.xlu1 %v11258_v59, %s10172_s16 }
 0xaa5   : > { %4756 = vrot.lane.b32.xlu0 %v14888_v10, %s10172_s16 }
 0xacf   : > { %v4490_v6 = vpop.xlane.xlu1 %4489 }
 0xad3   : > { %v4486_v46 = vpop.xlane.xlu1 %4485 }
 0xad7   : > { %v4492_v32 = vpop.xlane.xlu1 %4491 }
 0xad8   : > { %9644 = vrcp.f32 %v4492_v32 }
 0xad9   : > { %9646 = vrcp.f32 %v4486_v46 }
 0xada   : > { %9648 = vrcp.f32 %v4490_v6 }
 0xadb   : > { %v4488_v55 = vpop.xlane.xlu1 %4487 }
 0xadc   : > { %9650 = vrcp.f32 %v4488_v55  ;;  %v4498_v7 = vpop.xlane.xlu0 %4497 }
 0xadf   : > { %v4496_v50 = vpop.xlane.xlu1 %4495 }
 0xae0   : > { %9652 = vrcp.f32 %v4496_v50  ;;  %v4494_v43 = vpop.xlane.xlu0 %4493 }
 0xae1   : > { %9654 = vrcp.f32 %v4494_v43 }
 0xae2   : > { %9656 = vrcp.f32 %v4498_v7 }
 0xae4   : > { %v4500_v39 = vpop.xlane.xlu0 %4499 }
 0xae5   : > { %9658 = vrcp.f32 %v4500_v39  ;;  %v9645_v49 = vpop.eup %9644 }
 0xae6   : > { %v9647_v31 = vpop.eup %9646  ;;  %v4584_v32 = vmul.f32 %v9645_v49, %v12880_v40 }
 0xae7   : > { %v9649_v11 = vpop.eup %9648  ;;  %v4581_v46 = vmul.f32 %v9647_v31, %v12877_v27 }
 0xae8   : > { %v4502_v13 = vpop.xlane.xlu1 %4501  ;;  %v4362_v14 = vpop.xlane.xlu0 %4361  ;;  %v4583_v50 = vmul.f32 %v9649_v11, %v12870_v19 }
 0xae9   : > { %v9651_v60 = vpop.eup %9650  ;;  %v4407_v6 = vsub.f32 %v12905_v45, %v4362_v14 }
 0xaea   : > { %v4582_v55 = vmul.f32 %v9651_v60, %v12885_v21  ;;  %v4614_v57 = vpack.c.bf16 %v4584_v32, %v4583_v50 }
 0xaeb   : > { %v4457_v43 = vmul.f32 1.442695, %v4407_v6 }
 0xaec   : > { %v4364_v7 = vpop.xlane.xlu1 %4363  ;;  %v4506_v36 = vpop.xlane.xlu0 %4505  ;;  %v4613_v39 = vpack.c.bf16 %v4582_v55, %v4581_v46 }
 0xaed   : > { %v9653_v42 = vpop.eup %9652  ;;  %9660 = vpow2.f32 %v4457_v43  ;;  %v4408_v44 = vsub.f32 %v12912_v0, %v4364_v7 }
 0xaee   : > { %v9655_v15 = vpop.eup %9654  ;;  %8846 = vmatprep.mubr.bf16.mxu1 %v4613_v39  ;;  %v4586_v40 = vmul.f32 %v9653_v42, %v12892_v2 }
 0xaef   : > { %v4459_v45 = vmul.f32 1.442695, %v4408_v44  ;;  %8847 = vmatmul.mubr.bf16.vlgmr.msra.gmra.mxu1 %v4614_v57  ;;  %v4585_v27 = vmul.f32 %v9655_v15, %v12895_v58  ;;  %v9657_v21 = vpop.eup %9656 }
 0xaf0   : > { %v4360_v49 = vpop.xlane.xlu1 %4359  ;;  %v4358_v19 = vpop.xlane.xlu0 %4357  ;;  %v4587_v6 = vmul.f32 %v9657_v21, %v12887_v20 }
 0xaf1   : > { %9662 = vpow2.f32 %v4459_v45  ;;  %v4406_v31 = vsub.f32 %v12922_v63, %v4360_v49  ;;  %v4405_v11 = vsub.f32 %v12919_v48, %v4358_v19  ;;  %v4615_v14 = vpack.c.bf16 %v4586_v40, %v4585_v27 }
 0xaf2   : > { %v9659_v60 = vpop.eup %9658 }
 0xaf3   : > { %v4455_v0 = vmul.f32 1.442695, %v4406_v31  ;;  %v4453_v32 = vmul.f32 1.442695, %v4405_v11  ;;  %8850 = vmatprep.mubr.bf16.mxu1 %v4615_v14  ;;  %v4588_v44 = vmul.f32 %v9659_v60, %v12901_v18 }
 0xaf4   : > { %v4514_v57 = vpop.xlane.xlu1 %4513  ;;  %v4508_v42 = vpop.xlane.xlu0 %4507 }
 0xaf5   : > { %9664 = vpow2.f32 %v4455_v0  ;;  %v4616_v15 = vpack.c.bf16 %v4588_v44, %v4587_v6 }
 0xaf6   : > { %9666 = vpow2.f32 %v4453_v32 }
 0xaf7   : > { %9668 = vrcp.f32 %v4502_v13  ;;  %8851 = vmatmul.mubr.bf16.gmra.mxu1 %v4616_v15 }
 0xaf8   : > { %9670 = vrcp.f32 %v4508_v42  ;;  %v4510_v2 = vpop.xlane.xlu1 %4509  ;;  %v4504_v58 = vpop.xlane.xlu0 %4503 }
 0xaf9   : > { %9672 = vrcp.f32 %v4506_v36 }
 0xafa   : > { %v13010_v48 = vpop.eup %9660  ;;  %9674 = vrcp.f32 %v4504_v58 }
 0xafb   : > { %4521 = vadd.xlane.f32.xlu1 %v13010_v48 }
 0xafc   : > { %v4372_v63 = vpop.xlane.xlu1 %4371  ;;  %v4370_v20 = vpop.xlane.xlu0 %4369 }
 0xafd   : > { %v4412_v18 = vsub.f32 %v12944_v34, %v4372_v63  ;;  %v4411_v46 = vsub.f32 %v12941_v38, %v4370_v20 }
 0xafe   : > { %v13015_v55 = vpop.eup %9662 }
 0xaff   : > { %v4467_v50 = vmul.f32 1.442695, %v4412_v18  ;;  %v4465_v13 = vmul.f32 1.442695, %v4411_v46  ;;  %4523 = vadd.xlane.f32.xlu0 %v13015_v55 }
 0xb00   : > { %v4368_v43 = vpop.xlane.xlu1 %4367  ;;  %v4366_v7 = vpop.xlane.xlu0 %4365 }
 0xb01   : > { %9676 = vpow2.f32 %v4467_v50  ;;  %v4410_v36 = vsub.f32 %v12952_v12, %v4368_v43  ;;  %v4409_v39 = vsub.f32 %v12949_v33, %v4366_v7 }
 0xb02   : > { %v13020_v40 = vpop.eup %9664  ;;  %9678 = vpow2.f32 %v4465_v13 }
 0xb03   : > { %v13022_v45 = vpop.eup %9666  ;;  %v4463_v34 = vmul.f32 1.442695, %v4410_v36  ;;  %v4461_v38 = vmul.f32 1.442695, %v4409_v39  ;;  %4519 = vadd.xlane.f32.xlu0 %v13020_v40  ;;  %9680 = vrcp.f32 %v4514_v57 }
 0xb04   : > { %v9669_v27 = vpop.eup %9668  ;;  %4517 = vadd.xlane.f32.xlu1 %v13022_v45  ;;  %v4380_v21 = vpop.xlane.xlu1 %4379 }
 0xb05   : > { %v4516_v49 = vpop.xlane.xlu0 %4515  ;;  %v9671_v19 = vpop.eup %9670  ;;  %9682 = vpow2.f32 %v4463_v34  ;;  %v4416_v12 = vsub.f32 %v12957_v47, %v4380_v21  ;;  %v4589_v32 = vmul.f32 %v9669_v27, %v12907_v62 }
 0xb06   : > { %v9673_v33 = vpop.eup %9672  ;;  %9684 = vpow2.f32 %v4461_v38  ;;  %v4592_v14 = vmul.f32 %v9671_v19, %v12927_v29 }
 0xb07   : > { %v9675_v31 = vpop.eup %9674  ;;  %v4475_v11 = vmul.f32 1.442695, %v4416_v12  ;;  %9686 = vrcp.f32 %v4516_v49  ;;  %v4591_v57 = vmul.f32 %v9673_v33, %v12914_v26 }
 0xb08   : > { %9688 = vrcp.f32 %v4510_v2  ;;  %v4376_v60 = vpop.xlane.xlu1 %4375  ;;  %v4590_v6 = vmul.f32 %v9675_v31, %v12934_v51 }
 0xb09   : > { %v4512_v0 = vpop.xlane.xlu0 %4511  ;;  %9690 = vpow2.f32 %v4475_v11  ;;  %v4414_v44 = vsub.f32 %v12964_v54, %v4376_v60  ;;  %v4618_v15 = vpack.c.bf16 %v4592_v14, %v4591_v57  ;;  %v1528_v60 = vld [vmem:[%s14830_s20 + $0x8] sm:$0xf] }
 0xb0a   : > { %9692 = vrcp.f32 %v4512_v0  ;;  %v4617_v47 = vpack.c.bf16 %v4590_v6, %v4589_v32  ;;  %9226 = vmatprep.subr.msk.bf16.mxu1 %vm2598_vm3, %v1528_v60  ;;  %v4936_v0 = vsel %vm2598_vm3, %v1528_v60, 0  ;;  %v14970_v60 = vld [vmem:[#allocation26_spill] sm:$0xff] }
 0xb0b   : > { %v4471_v42 = vmul.f32 1.442695, %v4414_v44  ;;  %8895 = vmatpush3.bf16.msra.mxu1 %v4936_v0 }
 0xb0c   : > { %8854 = vmatprep.mubr.bf16.mxu1 %v4617_v47  ;;  %v4388_v18 = vpop.xlane.xlu1 %4387  ;;  %v14951_v47 = vld [vmem:[#allocation8_spill] sm:$0xff] }
 0xb0d   : > { %v4378_v58 = vpop.xlane.xlu0 %4377  ;;  %9694 = vpow2.f32 %v4471_v42  ;;  %8855 = vmatmul.mubr.bf16.gmra.mxu1 %v4618_v15  ;;  %v4420_v6 = vsub.f32 %v12974_v17, %v4388_v18  ;;  %v14952_v42 = vld [vmem:[#allocation9_spill] sm:$0xff]  ;;  %v14953_v15 = vld [vmem:[#allocation11_spill] sm:$0xff] }
 0xb0e   : > { %v4415_v29 = vsub.f32 %v12971_v23, %v4378_v58  ;;  %v13033_v2 = vpop.eup %9676  ;;  %v14954_v58 = vld [vmem:[#allocation14_spill] sm:$0xff]  ;;  %v14961_v18 = vld [vmem:[#allocation23_spill] sm:$0xff] }
 0xb0f   : > { %v13035_v62 = vpop.eup %9678  ;;  %4531 = vadd.xlane.f32.xlu0 %v13033_v2  ;;  %v4483_v57 = vmul.f32 1.442695, %v4420_v6 }
 0xb10   : > { %v4473_v51 = vmul.f32 1.442695, %v4415_v29  ;;  %4529 = vadd.xlane.f32.xlu1 %v13035_v62  ;;  %v9681_v54 = vpop.eup %9680  ;;  %v4384_v38 = vpop.xlane.xlu1 %4383  ;;  %v14955_v29 = vld [vmem:[#allocation13_spill] sm:$0xff] }
 0xb11   : > { %v4374_v26 = vpop.xlane.xlu0 %4373  ;;  %v4418_v32 = vsub.f32 %v12982_v1, %v4384_v38  ;;  %v14967_v38 = vld [vmem:[#allocation18_spill] sm:$0xff] }
 0xb12   : > { %v4413_v63 = vsub.f32 %v12979_v52, %v4374_v26  ;;  %v13040_v20 = vpop.eup %9682  ;;  %9696 = vpow2.f32 %v4473_v51  ;;  %v14957_v51 = vld [vmem:[#allocation16_spill] sm:$0xff]  ;;  %v14958_v26 = vld [vmem:[#allocation17_spill] sm:$0xff] }
 0xb13   : > { %v13042_v46 = vpop.eup %9684  ;;  %4527 = vadd.xlane.f32.xlu0 %v13040_v20  ;;  %v4479_v44 = vmul.f32 1.442695, %v4418_v32 }
 0xb14   : > { %v4469_v23 = vmul.f32 1.442695, %v4413_v63  ;;  %v9687_v50 = vpop.eup %9686  ;;  %4525 = vadd.xlane.f32.xlu1 %v13042_v46  ;;  %v14960_v63 = vld [vmem:[#allocation19_spill] sm:$0xff] }
 0xb15   : > { %v4386_v13 = vpop.xlane.xlu0 %4385  ;;  %v9689_v43 = vpop.eup %9688  ;;  %v4596_v34 = vmul.f32 %v9687_v50, %v12959_v37  ;;  %v14963_v50 = vld [vmem:[#allocation25_spill] sm:$0xff] }
 0xb16   : > { %v4419_v7 = vsub.f32 %v12987_v5, %v4386_v13  ;;  %v13047_v36 = vpop.eup %9690  ;;  %9698 = vpow2.f32 %v4469_v23  ;;  %v4593_v21 = vmul.f32 %v9689_v43, %v12936_v61  ;;  %v4595_v5 = vmul.f32 %v9681_v54, %v12930_v3  ;;  %v4755_v61 = vpop.permute.xlu1 %4754  ;;  %v14959_v54 = vld [vmem:[#allocation20_spill] sm:$0xff]  ;;  %v14962_v23 = vld [vmem:[#allocation6_spill] sm:$0xff]  ;;  %v14964_v13 = vld [vmem:[#allocation7_spill] sm:$0xff] }
 0xb17   : > { %v9693_v52 = vpop.eup %9692  ;;  %4539 = vadd.xlane.f32.xlu0 %v13047_v36 }
 0xb18   : > { %v4481_v39 = vmul.f32 1.442695, %v4419_v7  ;;  %v4594_v49 = vmul.f32 %v9693_v52, %v12966_v35  ;;  %v4620_v11 = vpack.c.bf16 %v4596_v34, %v4595_v5  ;;  %v14965_v52 = vld [vmem:[#allocation10_spill] sm:$0xff] }
 0xb19   : > { %v4382_v27 = vpop.xlane.xlu0 %4381 }
 0xb1a   : > { %9700 = vpow2.f32 %v4481_v39  ;;  %v4417_v19 = vsub.f32 %v12991_v4, %v4382_v27  ;;  %v13055_v12 = vpop.eup %9694  ;;  %v4619_v33 = vpack.c.bf16 %v4594_v49, %v4593_v21  ;;  %v14968_v49 = vld [vmem:[#allocation22_spill] sm:$0xff] }
 0xb1b   : > { %4535 = vadd.xlane.f32.xlu0 %v13055_v12 }
 0xb1c   : > { %v4477_v31 = vmul.f32 1.442695, %v4417_v19  ;;  %8858 = vmatprep.mubr.bf16.mxu1 %v4619_v33 }
 0xb1d   : > { %v4757_v37 = vpop.permute.xlu0 %4756  ;;  %8859 = vmatmul.mubr.bf16.gmra.mxu1 %v4620_v11  ;;  %v14969_v11 = vld [vmem:[#allocation24_spill] sm:$0xff] }
 0xb1e   : > { %9702 = vpow2.f32 %v4477_v31  ;;  %8870 = vmatprep.subr.bf16.mxu0 %v4757_v37 }
 0xb1f   : > { %8871 = vmatpush3.bf16.msra.mxu0 %v4757_v37  ;;  %v13058_v35 = vpop.eup %9696  ;;  %9704 = vpow2.f32 %v4479_v44 }
 0xb20   : > { %8872 = vmatprep.subr.bf16.mxu0 %v4755_v61  ;;  %4537 = vadd.xlane.f32.xlu1 %v13058_v35  ;;  %9706 = vpow2.f32 %v4483_v57 }
 0xb23   : > { %8873 = vmatpush3.bf16.msra.mxu0 %v4755_v61  ;;  %v13061_v3 = vpop.eup %9698 }
 0xb24   : > { %4533 = vadd.xlane.f32.xlu1 %v13061_v3 }
 0xb27   : > { %v13064_v4 = vpop.eup %9700 }
 0xb28   : > { %4545 = vadd.xlane.f32.xlu1 %v13064_v4 }
 0xb2b   : > { %v13067_v14 = vpop.eup %9702 }
 0xb2c   : > { %4541 = vadd.xlane.f32.xlu1 %v13067_v14  ;;  %v13087_v1 = vpop.eup %9704 }
 0xb2d   : > { %v13092_v17 = vpop.eup %9706 }
 0xb31   : > { %4752 = vrot.lane.b32.xlu0 %v11215_v16, %s10172_s16 }
 0xb3d   : > { %4750 = vrot.lane.b32.xlu1 %v11266_v30, %s10172_s16  ;;  %s10174_s16 = smov 104  }
 0xb41   : > { %5159 = vrot.lane.b32.xlu1 %v11148_v22, %s10173_s1 }
 0xb45   : > { %5157 = vrot.lane.b32.xlu1 %v11159_v56, %s10173_s1 }
 0xb49   : > { %5155 = vrot.lane.b32.xlu1 %v11174_v24, %s10173_s1 }
 0xb4d   : > { %5338 = vrot.lane.b32.xlu1 %v11229_v8, %s10173_s1 }
 0xb50   : > { %4543 = vadd.xlane.f32.xlu0 %v13087_v1 }
 0xb51   : > { %5336 = vrot.lane.b32.xlu1 %v11240_v28, %s10173_s1 }
 0xb54   : > { %4547 = vadd.xlane.f32.xlu0 %v13092_v17 }
 0xb55   : > { %5334 = vrot.lane.b32.xlu1 %v11246_v25, %s10173_s1 }
 0xb59   : > { %5332 = vrot.lane.b32.xlu1 %v11252_v9, %s10173_s1 }
 0xb5d   : > { %5133 = vrot.lane.b32.xlu1 %v11117_v53, %s10174_s16  ;;  %v14956_v53 = vld [vmem:[#allocation15_spill] sm:$0xff] }
 0xb61   : > { %5135 = vrot.lane.b32.xlu1 %v14951_v47, %s10174_s16 }
 0xb65   : > { %5328 = vrot.lane.b32.xlu1 %v11258_v59, %s10173_s1 }
 0xb69   : > { %5141 = vrot.lane.b32.xlu1 %v14952_v42, %s10174_s16 }
 0xb6a   : > { %5161 = vrot.lane.b32.xlu0 %v14953_v15, %s10173_s1 }
 0xb6d   : > { %5143 = vrot.lane.b32.xlu1 %v14954_v58, %s10174_s16 }
 0xb6e   : > { %5153 = vrot.lane.b32.xlu0 %v14955_v29, %s10173_s1 }
 0xb71   : > { %5324 = vrot.lane.b32.xlu1 %v11266_v30, %s10173_s1 }
 0xb72   : > { %5151 = vrot.lane.b32.xlu0 %v14956_v53, %s10173_s1 }
 0xb75   : > { %5310 = vrot.lane.b32.xlu1 %v14957_v51, %s10174_s16 }
 0xb76   : > { %5149 = vrot.lane.b32.xlu0 %v14958_v26, %s10173_s1 }
 0xb79   : > { %5314 = vrot.lane.b32.xlu1 %v14959_v54, %s10174_s16 }
 0xb7a   : > { %5147 = vrot.lane.b32.xlu0 %v14960_v63, %s10173_s1 }
 0xb7d   : > { %5318 = vrot.lane.b32.xlu1 %v14961_v18, %s10174_s16 }
 0xb7e   : > { %5131 = vrot.lane.b32.xlu0 %v14962_v23, %s10174_s16 }
 0xb81   : > { %5322 = vrot.lane.b32.xlu1 %v14963_v50, %s10174_s16 }
 0xb82   : > { %5330 = vrot.lane.b32.xlu0 %v14888_v10, %s10173_s1 }
 0xb84   : > { %v4522_v7 = vpop.xlane.xlu1 %4521 }
 0xb85   : > { %5801 = vrot.lane.b32.xlu1 %v11148_v22, %s10175_s19  ;;  %v14966_v22 = vld [vmem:[#allocation12_spill] sm:$0xff] }
 0xb86   : > { %5137 = vrot.lane.b32.xlu0 %v14964_v13, %s10174_s16 }
 0xb88   : > { %v4524_v43 = vpop.xlane.xlu0 %4523 }
 0xb89   : > { %5795 = vrot.lane.b32.xlu1 %v14955_v29, %s10175_s19 }
 0xb8a   : > { %5139 = vrot.lane.b32.xlu0 %v14965_v52, %s10174_s16 }
 0xb8c   : > { %v4520_v39 = vpop.xlane.xlu0 %4519 }
 0xb8d   : > { %v4518_v34 = vpop.xlane.xlu1 %4517  ;;  %5793 = vrot.lane.b32.xlu1 %v14956_v53, %s10175_s19  ;;  %9708 = vrcp.f32 %v4520_v39 }
 0xb8e   : > { %9710 = vrcp.f32 %v4518_v34  ;;  %5326 = vrot.lane.b32.xlu0 %v11215_v16, %s10173_s1 }
 0xb8f   : > { %9712 = vrcp.f32 %v4524_v43 }
 0xb91   : > { %5789 = vrot.lane.b32.xlu1 %v14960_v63, %s10175_s19 }
 0xb92   : > { %5145 = vrot.lane.b32.xlu0 %v14966_v22, %s10174_s16 }
 0xb95   : > { %5922 = vrot.lane.b32.xlu1 %v11240_v28, %s10175_s19 }
 0xb96   : > { %5308 = vrot.lane.b32.xlu0 %v14967_v38, %s10174_s16 }
 0xb98   : > { %v4532_v27 = vpop.xlane.xlu0 %4531 }
 0xb99   : > { %5918 = vrot.lane.b32.xlu1 %v11252_v9, %s10175_s19  ;;  %v4530_v37 = vpop.xlane.xlu1 %4529 }
 0xb9a   : > { %v9709_v21 = vpop.eup %9708  ;;  %5312 = vrot.lane.b32.xlu0 %v14968_v49, %s10174_s16 }
 0xb9b   : > { %v9711_v19 = vpop.eup %9710  ;;  %v4598_v5 = vmul.f32 %v9709_v21, %v13020_v40 }
 0xb9c   : > { %v4528_v33 = vpop.xlane.xlu0 %4527  ;;  %v4597_v31 = vmul.f32 %v9711_v19, %v13022_v45  ;;  %v9713_v42 = vpop.eup %9712 }
 0xb9d   : > { %v4526_v0 = vpop.xlane.xlu1 %4525  ;;  %9714 = vrcp.f32 %v4528_v33  ;;  %v4600_v63 = vmul.f32 %v9713_v42, %v13015_v55 }
 0xb9e   : > { %5316 = vrot.lane.b32.xlu0 %v14969_v11, %s10174_s16  ;;  %v4621_v28 = vpack.c.bf16 %v4598_v5, %v4597_v31  ;;  %9716 = vrcp.f32 %v4526_v0 }
 0xb9f   : > { %9718 = vrcp.f32 %v4522_v7 }
 0xba0   : > { %8878 = vmatprep.mubr.bf16.mxu0 %v4621_v28  ;;  %v4540_v61 = vpop.xlane.xlu0 %4539  ;;  %9720 = vrcp.f32 %v4532_v27 }
 0xba1   : > { %9722 = vrcp.f32 %v4530_v37 }
 0xba2   : > { %5320 = vrot.lane.b32.xlu0 %v14970_v60, %s10174_s16 }
 0xba4   : > { %v4536_v9 = vpop.xlane.xlu0 %4535 }
 0xba6   : > { %5803 = vrot.lane.b32.xlu0 %v14953_v15, %s10175_s19 }
 0xba8   : > { %v4753_v40 = vpop.permute.xlu0 %4752 }
 0xba9   : > { %v4538_v45 = vpop.xlane.xlu1 %4537  ;;  %8874 = vmatprep.subr.bf16.mxu0 %v4753_v40 }
 0xbaa   : > { %5799 = vrot.lane.b32.xlu0 %v11159_v56, %s10175_s19  ;;  %8875 = vmatpush3.bf16.msra.mxu0 %v4753_v40  ;;  %v9715_v15 = vpop.eup %9714 }
 0xbab   : > { %v9717_v29 = vpop.eup %9716  ;;  %v4602_v50 = vmul.f32 %v9715_v15, %v13040_v20 }
 0xbac   : > { %v4601_v23 = vmul.f32 %v9717_v29, %v13042_v46 }
 0xbad   : > { %v4534_v32 = vpop.xlane.xlu1 %4533 }
 0xbae   : > { %5797 = vrot.lane.b32.xlu0 %v11174_v24, %s10175_s19  ;;  %9724 = vrcp.f32 %v4534_v32  ;;  %v9719_v24 = vpop.eup %9718  ;;  %v4623_v34 = vpack.c.bf16 %v4602_v50, %v4601_v23 }
 0xbaf   : > { %v8848_v6 = vpop.f32.mrf.mxu1  ;;  %9726 = vrcp.f32 %v4536_v9  ;;  %v4599_v13 = vmul.f32 %v9719_v24, %v13010_v48  ;;  %v9721_v55 = vpop.eup %9720 }
 0xbb0   : > { %9728 = vrcp.f32 %v4538_v45  ;;  %v9723_v7 = vpop.eup %9722 }
 0xbb1   : > { %v13169_v44 = vpop.xlane.xlu1 %4545  ;;  %v4687_v57 = vpop.f32.mrf.mxu1  ;;  %9730 = vrcp.f32 %v4540_v61  ;;  %v4622_v43 = vpack.c.bf16 %v4600_v63, %v4599_v13  ;;  %v4603_v38 = vmul.f32 %v9723_v7, %v13035_v62 }
 0xbb2   : > { %5791 = vrot.lane.b32.xlu0 %v14958_v26, %s10175_s19 }
 0xbb3   : > { %v8849_v47 = vpop.f32.mrf.mxu1 }
 0xbb4   : > { %v4872_v51 = vpack.c.bf16 %v8849_v47, %v8848_v6 }
 0xbb5   : > { %v13173_v56 = vpop.xlane.xlu1 %4541  ;;  %v4690_v58 = vpop.f32.mrf.mxu1 }
 0xbb6   : > { %v4871_v53 = vpack.c.bf16 %v4690_v58, %v4687_v57  ;;  %5924 = vrot.lane.b32.xlu0 %v11229_v8, %s10175_s19  ;;  %9732 = vrcp.f32 %v13173_v56 }
 0xbb7   : > { %v8852_v54 = vpop.f32.mrf.mxu1 }
 0xbb8   : > { %8896 = vmatprep.mubr.msk.bf16.mxu1 %vm1673_vm2, %v4871_v53 }
 0xbb9   : > { %v4751_v26 = vpop.permute.xlu1 %4750  ;;  %v4703_v18 = vpop.f32.mrf.mxu1  ;;  %8897 = vmatmul.mubr.msk.bf16.vlgmr.msra.gmra.mxu1 %vm1673_vm2, %v4872_v51 }
 0xbba   : > { %8876 = vmatprep.subr.bf16.mxu0 %v4751_v26  ;;  %5920 = vrot.lane.b32.xlu0 %v11246_v25, %s10175_s19  ;;  %v4604_v25 = vmul.f32 %v9721_v55, %v13033_v2 }
 0xbbb   : > { %8877 = vmatpush3.bf16.msra.mxu0 %v4751_v26  ;;  %v8853_v8 = vpop.f32.mrf.mxu1  ;;  %v9725_v22 = vpop.eup %9724 }
 0xbbc   : > { %v4874_v20 = vpack.c.bf16 %v8853_v8, %v8852_v54  ;;  %v9727_v48 = vpop.eup %9726  ;;  %v4605_v21 = vmul.f32 %v9725_v22, %v13061_v3  ;;  %v4624_v19 = vpack.c.bf16 %v4604_v25, %v4603_v38 }
 0xbbd   : > { %v13185_v52 = vpop.permute.xlu1 %5159  ;;  %v4706_v39 = vpop.f32.mrf.mxu1  ;;  %v4606_v49 = vmul.f32 %v9727_v48, %v13055_v12 }
 0xbbe   : > { %8879 = vmatmul.mubr.bf16.vlgmr.msra.gmra.mxu0 %v4622_v43  ;;  %v4873_v46 = vpack.c.bf16 %v4706_v39, %v4703_v18  ;;  %v9729_v5 = vpop.eup %9728  ;;  %v5206_v43 = vsel %vm1673_vm2, %v13185_v52, 0 }
 0xbbf   : > { %8882 = vmatprep.mubr.bf16.mxu0 %v4623_v34  ;;  %v4625_v31 = vpack.c.bf16 %v4606_v49, %v4605_v21  ;;  %v9731_v11 = vpop.eup %9730  ;;  %v4607_v62 = vmul.f32 %v9729_v5, %v13058_v35 }
 0xbc0   : > { %8900 = vmatprep.mubr.msk.bf16.mxu1 %vm1673_vm2, %v4873_v46  ;;  %v4608_v37 = vmul.f32 %v9731_v11, %v13047_v36 }
 0xbc1   : > { %v13190_v27 = vpop.permute.xlu1 %5157  ;;  %8901 = vmatmul.mubr.msk.bf16.gmra.mxu1 %vm1673_vm2, %v4874_v20 }
 0xbc2   : > { %v4626_v3 = vpack.c.bf16 %v4608_v37, %v4607_v62  ;;  %v5203_v20 = vsel %vm1673_vm2, %v13190_v27, 0 }
 0xbc3   : > { %v9733_v54 = vpop.eup %9732 }
 0xbc4   : > { %v4609_v23 = vmul.f32 %v9733_v54, %v13067_v14  ;;  %v14972_v54 = vld [vmem:[#allocation27_spill] sm:$0xff] }
 0xbc5   : > { %v13195_v33 = vpop.permute.xlu1 %5155 }
 0xbc6   : > { %8883 = vmatmul.mubr.bf16.gmra.mxu0 %v4624_v19 }
 0xbc7   : > { %8886 = vmatprep.mubr.bf16.mxu0 %v4625_v31 }
 0xbc9   : > { %v5339_v28 = vpop.permute.xlu1 %5338 }
 0xbca   : > { %9235 = vmatprep.subr.msk.bf16.mxu1 %vm1673_vm2, %v5339_v28  ;;  %v5386_v2 = vsel %vm1673_vm2, %v5339_v28, 0 }
 0xbcb   : > { %8961 = vmatpush3.bf16.xpose.msra.mxu1 %v5386_v2 }
 0xbcd   : > { %v8856_v12 = vpop.f32.mrf.mxu1  ;;  %v5337_v61 = vpop.permute.xlu1 %5336 }
 0xbce   : > { %8887 = vmatmul.mubr.bf16.gmra.mxu0 %v4626_v3  ;;  %9236 = vmatprep.subr.msk.bf16.mxu1 %vm1673_vm2, %v5337_v61  ;;  %v5383_v0 = vsel %vm1673_vm2, %v5337_v61, 0 }
 0xbcf   : > { %v4719_v60 = vpop.f32.mrf.mxu1 }
 0xbd1   : > { %v8857_v9 = vpop.f32.mrf.mxu1  ;;  %v5335_v40 = vpop.permute.xlu1 %5334 }
 0xbd2   : > { %v4876_v32 = vpack.c.bf16 %v8857_v9, %v8856_v12  ;;  %v5380_v6 = vsel %vm1673_vm2, %v5335_v40, 0 }
 0xbd3   : > { %v4722_v35 = vpop.f32.mrf.mxu1  ;;  %8963 = vmatpush3.bf16.xpose.msra.mxu1 %v5383_v0 }
 0xbd4   : > { %v4875_v45 = vpack.c.bf16 %v4722_v35, %v4719_v60  ;;  %9237 = vmatprep.subr.msk.bf16.mxu1 %vm1673_vm2, %v5335_v40 }
 0xbd5   : > { %v5333_v57 = vpop.permute.xlu1 %5332 }
 0xbd6   : > { %8904 = vmatprep.mubr.msk.bf16.mxu1 %vm1673_vm2, %v4875_v45  ;;  %v5377_v53 = vsel %vm1673_vm2, %v5333_v57, 0 }
 0xbd7   : > { %8905 = vmatmul.mubr.msk.bf16.gmra.mxu1 %vm1673_vm2, %v4876_v32 }
 0xbd9   : > { %v4544_v36 = vpop.xlane.xlu0 %4543  ;;  %v13217_v18 = vpop.permute.xlu1 %5133 }
 0xbda   : > { %9734 = vrcp.f32 %v4544_v36 }
 0xbdb   : > { %8965 = vmatpush3.bf16.xpose.msra.mxu1 %v5380_v6  ;;  %9736 = vrcp.f32 %v13169_v44 }
 0xbdc   : > { %9238 = vmatprep.subr.msk.bf16.mxu1 %vm1673_vm2, %v5333_v57 }
 0xbdd   : > { %v8860_v47 = vpop.f32.mrf.mxu1  ;;  %v4548_v42 = vpop.xlane.xlu0 %4547 }
 0xbde   : > { %9738 = vrcp.f32 %v4548_v42  ;;  %v5136_v22 = vpop.permute.xlu1 %5135 }
 0xbdf   : > { %v4735_v15 = vpop.f32.mrf.mxu1 }
 0xbe1   : > { %v8861_v58 = vpop.f32.mrf.mxu1  ;;  %v5162_v29 = vpop.permute.xlu0 %5161 }
 0xbe2   : > { %9227 = vmatprep.subr.msk.bf16.mxu0 %vm1673_vm2, %v5162_v29  ;;  %v5209_v56 = vsel %vm1673_vm2, %v5162_v29, 0  ;;  %v4878_v63 = vpack.c.bf16 %v8861_v58, %v8860_v47  ;;  %v5329_v48 = vpop.permute.xlu1 %5328 }
 0xbe3   : > { %v4738_v24 = vpop.f32.mrf.mxu1  ;;  %8967 = vmatpush3.bf16.xpose.msra.mxu1 %v5377_v53  ;;  %8929 = vmatpush3.bf16.xpose.msra.mxu0 %v5209_v56  ;;  %v5371_v5 = vsel %vm1673_vm2, %v5329_v48, 0 }
 0xbe4   : > { %v4877_v51 = vpack.c.bf16 %v4738_v24, %v4735_v15  ;;  %9228 = vmatprep.subr.msk.bf16.mxu0 %vm1673_vm2, %v13185_v52  ;;  %v14971_v24 = vld [vmem:[#allocation21_spill] sm:$0xff] }
 0xbe5   : > { %v5154_v44 = vpop.permute.xlu0 %5153 }
 0xbe6   : > { %8908 = vmatprep.mubr.msk.bf16.mxu1 %vm1673_vm2, %v4877_v51  ;;  %v13232_v38 = vpop.permute.xlu1 %5141  ;;  %v5197_v19 = vsel %vm1673_vm2, %v5154_v44, 0 }
 0xbe7   : > { %v9735_v26 = vpop.eup %9734  ;;  %8909 = vmatmul.mubr.msk.bf16.gmra.mxu1 %vm1673_vm2, %v4878_v63 }
 0xbe8   : > { %v4610_v50 = vmul.f32 %v9735_v26, %v13087_v1  ;;  %v9737_v13 = vpop.eup %9736 }
 0xbe9   : > { %v5152_v8 = vpop.permute.xlu0 %5151  ;;  %v4611_v39 = vmul.f32 %v9737_v13, %v13064_v4 }
 0xbea   : > { %v4627_v55 = vpack.c.bf16 %v4610_v50, %v4609_v23  ;;  %v5144_v21 = vpop.permute.xlu1 %5143  ;;  %v5194_v62 = vsel %vm1673_vm2, %v5152_v8, 0 }
 0xbeb   : > { %v9739_v7 = vpop.eup %9738  ;;  %8931 = vmatpush3.bf16.xpose.msra.mxu0 %v5206_v43  ;;  %v14974_v43 = vld [vmem:[#allocation31_spill] sm:$0xff] }
 0xbec   : > { %8890 = vmatprep.mubr.bf16.mxu0 %v4627_v55  ;;  %9229 = vmatprep.subr.msk.bf16.mxu0 %vm1673_vm2, %v13190_v27  ;;  %v4612_v34 = vmul.f32 %v9739_v7, %v13092_v17  ;;  %v5200_v17 = vsel %vm1673_vm2, %v13195_v33, 0 }
 0xbed   : > { %v5150_v14 = vpop.permute.xlu0 %5149 }
 0xbee   : > { %v4628_v46 = vpack.c.bf16 %v4612_v34, %v4611_v39  ;;  %v5191_v61 = vsel %vm1673_vm2, %v5150_v14, 0 }
 0xbf0   : > { %8891 = vmatmul.mubr.bf16.gmra.mxu0 %v4628_v46 }
 0xbf1   : > { %v5148_v1 = vpop.permute.xlu0 %5147 }
 0xbf2   : > { %v5188_v35 = vsel %vm1673_vm2, %v5148_v1, 0 }
 0xbf3   : > { %8933 = vmatpush3.bf16.xpose.msra.mxu0 %v5203_v20 }
 0xbf4   : > { %9230 = vmatprep.subr.msk.bf16.mxu0 %vm1673_vm2, %v13195_v33  ;;  %v5325_v33 = vpop.permute.xlu1 %5324 }
 0xbf5   : > { %v5132_v52 = vpop.permute.xlu0 %5131  ;;  %v5365_v60 = vsel %vm1673_vm2, %v5325_v33, 0 }
 0xbf6   : > { %8944 = vmatprep.mubr.msk.bf16.mxu0 %vm1673_vm2, %v5132_v52  ;;  %v14976_v52 = vld [vmem:[#allocation33_spill] sm:$0xff] }
 0xbf8   : > { %v13246_v2 = vpop.permute.xlu1 %5310 }
 0xbf9   : > { %v5331_v4 = vpop.permute.xlu0 %5330 }
 0xbfa   : > { %9239 = vmatprep.subr.msk.bf16.mxu1 %vm1673_vm2, %v5331_v4  ;;  %v5374_v25 = vsel %vm1673_vm2, %v5331_v4, 0 }
 0xbfb   : > { %8935 = vmatpush3.bf16.xpose.msra.mxu0 %v5200_v17  ;;  %8969 = vmatpush3.bf16.xpose.msra.mxu1 %v5374_v25 }
 0xbfc   : > { %9231 = vmatprep.subr.msk.bf16.mxu0 %vm1673_vm2, %v5154_v44  ;;  %9240 = vmatprep.subr.msk.bf16.mxu1 %vm1673_vm2, %v5329_v48  ;;  %v13252_v3 = vpop.permute.xlu1 %5314 }
 0xbfd   : > { %v5138_v27 = vpop.permute.xlu0 %5137 }
 0xc00   : > { %v13261_v0 = vpop.permute.xlu1 %5318 }
 0xc01   : > { %v5140_v49 = vpop.permute.xlu0 %5139 }
 0xc03   : > { %8937 = vmatpush3.bf16.xpose.msra.mxu0 %v5197_v19  ;;  %8971 = vmatpush3.bf16.xpose.msra.mxu1 %v5371_v5 }
 0xc04   : > { %9232 = vmatprep.subr.msk.bf16.mxu0 %vm1673_vm2, %v5152_v8  ;;  %v13266_v45 = vpop.permute.xlu1 %5322 }
 0xc05   : > { %v5327_v31 = vpop.permute.xlu0 %5326 }
 0xc06   : > { %9241 = vmatprep.subr.msk.bf16.mxu1 %vm1673_vm2, %v5327_v31  ;;  %v5368_v28 = vsel %vm1673_vm2, %v5327_v31, 0 }
 0xc08   : > { %v5802_v6 = vpop.permute.xlu1 %5801 }
 0xc09   : > { %v5146_v11 = vpop.permute.xlu0 %5145 }
 0xc0b   : > { %8939 = vmatpush3.bf16.xpose.msra.mxu0 %v5194_v62  ;;  %8973 = vmatpush3.bf16.xpose.msra.mxu1 %v5368_v28 }
 0xc0c   : > { %9233 = vmatprep.subr.msk.bf16.mxu0 %vm1673_vm2, %v5150_v14  ;;  %9242 = vmatprep.subr.msk.bf16.mxu1 %vm1673_vm2, %v5325_v33  ;;  %v5796_v42 = vpop.permute.xlu1 %5795 }
 0xc0d   : > { %v13250_v37 = vpop.permute.xlu0 %5308 }
 0xc10   : > { %v5794_v58 = vpop.permute.xlu1 %5793 }
 0xc11   : > { %v13254_v12 = vpop.permute.xlu0 %5312 }
 0xc13   : > { %8941 = vmatpush3.bf16.xpose.msra.mxu0 %v5191_v61  ;;  %8975 = vmatpush3.bf16.xpose.msra.mxu1 %v5365_v60  ;;  %v14977_v61 = vld [vmem:[#allocation35_spill] sm:$0xff] }
 0xc14   : > { %9234 = vmatprep.subr.msk.bf16.mxu0 %vm1673_vm2, %v5148_v1  ;;  %v5790_v29 = vpop.permute.xlu1 %5789 }
 0xc15   : > { %v13259_v9 = vpop.permute.xlu0 %5316 }
 0xc19   : > { %v13263_v40 = vpop.permute.xlu0 %5320 }
 0xc1b   : > { %8943 = vmatpush3.bf16.xpose.msra.mxu0 %v5188_v35 }
 0xc1d   : > { %v5804_v32 = vpop.permute.xlu0 %5803 }
 0xc1e   : > { %8992 = vmatprep.subr.bf16.mxu0 %v5804_v32 }
 0xc21   : > { %v5800_v36 = vpop.permute.xlu0 %5799 }
 0xc22   : > { %8945 = vmatmul.mubr.msk.bf16.vlgmr.msra.gmra.mxu0 %vm1673_vm2, %v13217_v18  ;;  %v14973_v18 = vld [vmem:[#allocation28_spill] sm:$0xff] }
 0xc23   : > { %8948 = vmatprep.mubr.msk.bf16.mxu0 %vm1673_vm2, %v5136_v22  ;;  %8993 = vmatpush3.bf16.msra.mxu0 %v5804_v32  ;;  %v14975_v22 = vld [vmem:[#allocation32_spill] sm:$0xff] }
 0xc24   : > { %8994 = vmatprep.subr.bf16.mxu0 %v5802_v6  ;;  %v14978_v32 = vld [vmem:[#allocation36_spill] sm:$0xff] }
 0xc25   : > { %v5798_v57 = vpop.permute.xlu0 %5797 }
 0xc27   : > { %8995 = vmatpush3.bf16.msra.mxu0 %v5802_v6 }
 0xc28   : > { %8996 = vmatprep.subr.bf16.mxu0 %v5800_v36 }
 0xc29   : > { %v5792_v47 = vpop.permute.xlu0 %5791 }
 0xc2a   : > { %8949 = vmatmul.mubr.msk.bf16.gmra.mxu0 %vm1673_vm2, %v5138_v27 }
 0xc2b   : > { %8952 = vmatprep.mubr.msk.bf16.mxu0 %vm1673_vm2, %v5140_v49  ;;  %8997 = vmatpush3.bf16.msra.mxu0 %v5800_v36 }
 0xc2c   : > { %8998 = vmatprep.subr.bf16.mxu0 %v5798_v57 }
 0xc2d   : > { %v13273_v15 = vpop.permute.xlu0 %5924 }
 0xc2e   : > { %9024 = vmatprep.subr.bf16.mxu1 %v13273_v15 }
 0xc2f   : > { %8999 = vmatpush3.bf16.msra.mxu0 %v5798_v57  ;;  %v14979_v57 = vld [vmem:[#allocation37_spill] sm:$0xff] }
 0xc30   : > { %9000 = vmatprep.subr.bf16.mxu0 %v5796_v42 }
 0xc32   : > { %8953 = vmatmul.mubr.msk.bf16.gmra.mxu0 %vm1673_vm2, %v13232_v38 }
 0xc33   : > { %8956 = vmatprep.mubr.msk.bf16.mxu0 %vm1673_vm2, %v5144_v21  ;;  %9001 = vmatpush3.bf16.msra.mxu0 %v5796_v42 }
 0xc34   : > { %9002 = vmatprep.subr.bf16.mxu0 %v5794_v58 }
 0xc37   : > { %9003 = vmatpush3.bf16.msra.mxu0 %v5794_v58 }
 0xc38   : > { %9004 = vmatprep.subr.bf16.mxu0 %v5792_v47 }
 0xc3a   : > { %8957 = vmatmul.mubr.msk.bf16.gmra.mxu0 %vm1673_vm2, %v5146_v11 }
 0xc3b   : > { %9005 = vmatpush3.bf16.msra.mxu0 %v5792_v47 }
 0xc3c   : > { %9006 = vmatprep.subr.bf16.mxu0 %v5790_v29 }
 0xc3f   : > { %9007 = vmatpush3.bf16.msra.mxu0 %v5790_v29  ;;  %v14981_v29 = vld [vmem:[#allocation39_spill] sm:$0xff] }
 0xc79   : > { %v8898_v53 = vpop.f32.mrf.mxu1 }
 0xc7a   : > { %v13281_v56 = vadd.f32 %v8898_v53, %v14971_v24 }
 0xc7b   : > { %v4972_v51 = vpop.f32.mrf.mxu1 }
 0xc7c   : > { %v13284_v63 = vadd.f32 %v4972_v51, %v14972_v54  ;;  %v14983_v51 = vld [vmem:[#allocation40_spill] sm:$0xff] }
 0xc7d   : > { %v8899_v44 = vpop.f32.mrf.mxu1 }
 0xc7e   : > { %v8880_v26 = vpop.f32.mrf.mxu0  ;;  %v13287_v23 = vadd.f32 %v8899_v44, %v14973_v18 }
 0xc7f   : > { %v13289_v50 = vpop.f32.mrf.mxu1 }
 0xc80   : > { %v4808_v13 = vpop.f32.mrf.mxu0 }
 0xc81   : > { %v8902_v8 = vpop.f32.mrf.mxu1 }
 0xc82   : > { %v8881_v55 = vpop.f32.mrf.mxu0  ;;  %v13292_v7 = vadd.f32 %v8902_v8, %v14974_v43 }
 0xc83   : > { %v4988_v39 = vpop.f32.mrf.mxu1  ;;  %v4880_v20 = vpack.c.bf16 %v8881_v55, %v8880_v26  ;;  %v14985_v26 = vld [vmem:[#allocation41_spill] sm:$0xff] }
 0xc84   : > { %v4811_v34 = vpop.f32.mrf.mxu0  ;;  %v13295_v14 = vadd.f32 %v4988_v39, %v14975_v22  ;;  %v5923_v22 = vpop.permute.xlu1 %5922 }
 0xc85   : > { %v4879_v46 = vpack.c.bf16 %v4811_v34, %v4808_v13  ;;  %v8903_v1 = vpop.f32.mrf.mxu1 }
 0xc86   : > { %v8884_v48 = vpop.f32.mrf.mxu0  ;;  %v13298_v38 = vadd.f32 %v8903_v1, %v14976_v52  ;;  %v13376_v52 = vld [vmem:[%s14829_s26 + $0x18] sm:$0xff] }
 0xc87   : > { %8912 = vmatprep.mubr.msk.bf16.mxu1 %vm1673_vm2, %v4879_v46  ;;  %v13304_v31 = vpop.f32.mrf.mxu1  ;;  %v5921_v46 = vpop.permute.xlu0 %5920 }
 0xc88   : > { %v4824_v4 = vpop.f32.mrf.mxu0  ;;  %8913 = vmatmul.mubr.msk.bf16.gmra.mxu1 %vm1673_vm2, %v4880_v20  ;;  %v5919_v1 = vpop.permute.xlu1 %5918 }
 0xc8a   : > { %v8885_v17 = vpop.f32.mrf.mxu0 }
 0xc8b   : > { %v4882_v21 = vpack.c.bf16 %v8885_v17, %v8884_v48 }
 0xc8c   : > { %v4827_v25 = vpop.f32.mrf.mxu0 }
 0xc8d   : > { %v4881_v27 = vpack.c.bf16 %v4827_v25, %v4824_v4 }
 0xc8e   : > { %v8888_v49 = vpop.f32.mrf.mxu0 }
 0xc8f   : > { %8916 = vmatprep.mubr.msk.bf16.mxu1 %vm1673_vm2, %v4881_v27  ;;  %v13386_v27 = vld [vmem:[%s14829_s26 + $0x30] sm:$0xff] }
 0xc90   : > { %v4840_v19 = vpop.f32.mrf.mxu0  ;;  %8917 = vmatmul.mubr.msk.bf16.gmra.mxu1 %vm1673_vm2, %v4882_v21 }
 0xc92   : > { %v8889_v5 = vpop.f32.mrf.mxu0 }
 0xc93   : > { %v4884_v62 = vpack.c.bf16 %v8889_v5, %v8888_v49  ;;  %v13394_v49 = vld [vmem:[%s14829_s26 + $0x38] sm:$0xff] }
 0xc94   : > { %v4843_v33 = vpop.f32.mrf.mxu0 }
 0xc95   : > { %v4883_v11 = vpack.c.bf16 %v4843_v33, %v4840_v19 }
 0xc97   : > { %v8906_v28 = vpop.f32.mrf.mxu1  ;;  %8920 = vmatprep.mubr.msk.bf16.mxu1 %vm1673_vm2, %v4883_v11  ;;  %v13404_v11 = vld [vmem:[%s14829_s26 + $0x20] sm:$0xff] }
 0xc98   : > { %v13308_v60 = vadd.f32 %v8906_v28, %v14977_v61  ;;  %8921 = vmatmul.mubr.msk.bf16.gmra.mxu1 %vm1673_vm2, %v4884_v62  ;;  %v13412_v28 = vld [vmem:[%s14829_s26 + $0x28] sm:$0xff] }
 0xc99   : > { %v5004_v35 = vpop.f32.mrf.mxu1 }
 0xc9a   : > { %v13312_v36 = vadd.f32 %v5004_v35, %v14978_v32 }
 0xc9b   : > { %v8907_v6 = vpop.f32.mrf.mxu1 }
 0xc9c   : > { %v13315_v47 = vadd.f32 %v8907_v6, %v14979_v57  ;;  %v13422_v6 = vld [vmem:[%s14829_s26 + $0x50] sm:$0xff] }
 0xc9d   : > { %v13317_v42 = vpop.f32.mrf.mxu1 }
 0xc9e   : > { %14980 = vst [vmem:[#allocation8_spill] sm:$0xff] %v13317_v42 }
 0xca7   : > { %v8910_v58 = vpop.f32.mrf.mxu1 }
 0xca8   : > { %v13320_v53 = vadd.f32 %v8910_v58, %v14981_v29  ;;  %v13430_v58 = vld [vmem:[%s14829_s26 + $0x58] sm:$0xff] }
 0xca9   : > { %v5020_v24 = vpop.f32.mrf.mxu1 }
 0xcaa   : > { %14982 = vst [vmem:[#allocation9_spill] sm:$0xff] %v13320_v53  ;;  %v13323_v54 = vadd.f32 %v5020_v24, %v14983_v51 }
 0xcab   : > { %v8911_v44 = vpop.f32.mrf.mxu1 }
 0xcac   : > { %14984 = vst [vmem:[#allocation11_spill] sm:$0xff] %v13323_v54  ;;  %v13326_v18 = vadd.f32 %v8911_v44, %v14985_v26  ;;  %v13440_v44 = vld [vmem:[%s14829_s26 + $0x40] sm:$0xff] }
 0xcae   : > { %14986 = vst [vmem:[#allocation14_spill] sm:$0xff] %v13326_v18  ;;  %v14995_v18 = vld [vmem:[#allocation47_spill] sm:$0xff] }
 0xcb0   : > { %v8892_v13 = vpop.f32.mrf.mxu0 }
 0xcb2   : > { %v4856_v8 = vpop.f32.mrf.mxu0 }
 0xcb4   : > { %v8893_v55 = vpop.f32.mrf.mxu0 }
 0xcb5   : > { %v4886_v34 = vpack.c.bf16 %v8893_v55, %v8892_v13  ;;  %v13448_v13 = vld [vmem:[%s14829_s26 + $0x48] sm:$0xff] }
 0xcb6   : > { %v4859_v43 = vpop.f32.mrf.mxu0 }
 0xcb7   : > { %v4885_v39 = vpack.c.bf16 %v4859_v43, %v4856_v8 }
 0xcb9   : > { %8924 = vmatprep.mubr.msk.bf16.mxu1 %vm1673_vm2, %v4885_v39  ;;  %v13458_v39 = vld [vmem:[%s14829_s26 + $0x70] sm:$0xff] }
 0xcba   : > { %8925 = vmatmul.mubr.msk.bf16.gmra.mxu1 %vm1673_vm2, %v4886_v34 }
 0xcbb   : > { %8976 = vmatprep.mubr.msk.bf16.mxu1 %vm1673_vm2, %v13250_v37  ;;  %v13350_v37 = vld [vmem:[%s14829_s26 + $0x10] sm:$0xff] }
 0xcc2   : > { %8977 = vmatmul.mubr.msk.bf16.vlgmr.msra.gmra.mxu1 %vm1673_vm2, %v13246_v2 }
 0xcc3   : > { %9025 = vmatpush3.bf16.msra.mxu1 %v13273_v15  ;;  %8980 = vmatprep.mubr.msk.bf16.mxu1 %vm1673_vm2, %v13254_v12  ;;  %v13367_v15 = vld [vmem:[%s14829_s26 + $0x8] sm:$0xff] }
 0xcc4   : > { %9026 = vmatprep.subr.bf16.mxu1 %v5923_v22 }
 0xcc7   : > { %9027 = vmatpush3.bf16.msra.mxu1 %v5923_v22  ;;  %v13466_v22 = vld [vmem:[%s14829_s26 + $0x78] sm:$0xff] }
 0xcc8   : > { %9028 = vmatprep.subr.bf16.mxu1 %v5921_v46 }
 0xcca   : > { %8981 = vmatmul.mubr.msk.bf16.gmra.mxu1 %vm1673_vm2, %v13252_v3 }
 0xccb   : > { %9029 = vmatpush3.bf16.msra.mxu1 %v5921_v46  ;;  %8984 = vmatprep.mubr.msk.bf16.mxu1 %vm1673_vm2, %v13259_v9 }
 0xccc   : > { %9030 = vmatprep.subr.bf16.mxu1 %v5919_v1 }
 0xccf   : > { %9031 = vmatpush3.bf16.msra.mxu1 %v5919_v1 }
 0xcd2   : > { %8985 = vmatmul.mubr.msk.bf16.gmra.mxu1 %vm1673_vm2, %v13261_v0  ;;  %v13359_v0 = vld [vmem:[%s14829_s26] sm:$0xff] }
 0xcd3   : > { %8988 = vmatprep.mubr.msk.bf16.mxu1 %vm1673_vm2, %v13263_v40 }
 0xcda   : > { %8989 = vmatmul.mubr.msk.bf16.gmra.mxu1 %vm1673_vm2, %v13266_v45 }
 0xce2   : > { %v8946_v2 = vpop.f32.mrf.mxu0 }
 0xce3   : > { %v13353_v3 = vadd.f32 %v13350_v37, %v8946_v2  ;;  %v13476_v2 = vld [vmem:[%s14829_s26 + $0x60] sm:$0xff] }
 0xce4   : > { %v5245_v12 = vpop.f32.mrf.mxu0 }
 0xce5   : > { %5489 = vmax.xlane.f32.xlu0 %v13353_v3  ;;  %v13362_v40 = vadd.f32 %v13359_v0, %v5245_v12 }
 0xce6   : > { %v8947_v9 = vpop.f32.mrf.mxu0 }
 0xce7   : > { %v13379_v4 = vadd.f32 %v13376_v52, %v8947_v9  ;;  %v13484_v9 = vld [vmem:[%s14829_s26 + $0x68] sm:$0xff] }
 0xce8   : > { %v5248_v45 = vpop.f32.mrf.mxu0 }
 0xce9   : > { %v13370_v20 = vadd.f32 %v13367_v15, %v5248_v45  ;;  %5485 = vmax.xlane.f32.xlu0 %v13362_v40 }
 0xcea   : > { %v8950_v48 = vpop.f32.mrf.mxu0 }
 0xceb   : > { %5487 = vmax.xlane.f32.xlu1 %v13370_v20  ;;  %v13389_v21 = vadd.f32 %v13386_v27, %v8950_v48  ;;  %v13491_v48 = vpop.f32.mrf.mxu1 }
 0xcec   : > { %v5261_v17 = vpop.f32.mrf.mxu0  ;;  %14987 = vst [vmem:[#allocation13_spill] sm:$0xff] %v13491_v48  ;;  %v14997_v48 = vld [vmem:[#allocation48_spill] sm:$0xff] }
 0xced   : > { %5491 = vmax.xlane.f32.xlu0 %v13379_v4  ;;  %v13407_v62 = vadd.f32 %v13404_v11, %v5261_v17 }
 0xcee   : > { %v8951_v25 = vpop.f32.mrf.mxu0 }
 0xcef   : > { %v13397_v19 = vadd.f32 %v13394_v49, %v8951_v25  ;;  %v14988_v25 = vld [vmem:[#allocation43_spill] sm:$0xff] }
 0xcf0   : > { %v5264_v5 = vpop.f32.mrf.mxu0 }
 0xcf1   : > { %5497 = vmax.xlane.f32.xlu0 %v13389_v21  ;;  %5499 = vmax.xlane.f32.xlu1 %v13397_v19  ;;  %v13415_v61 = vadd.f32 %v13412_v28, %v5264_v5 }
 0xcf2   : > { %v8954_v33 = vpop.f32.mrf.mxu0 }
 0xcf3   : > { %v13425_v57 = vadd.f32 %v13422_v6, %v8954_v33 }
 0xcf4   : > { %v5277_v35 = vpop.f32.mrf.mxu0 }
 0xcf5   : > { %5495 = vmax.xlane.f32.xlu1 %v13415_v61  ;;  %5493 = vmax.xlane.f32.xlu0 %v13407_v62  ;;  %v13443_v26 = vadd.f32 %v13440_v44, %v5277_v35  ;;  %v14990_v35 = vld [vmem:[#allocation44_spill] sm:$0xff] }
 0xcf6   : > { %v8955_v32 = vpop.f32.mrf.mxu0 }
 0xcf7   : > { %v13433_v29 = vadd.f32 %v13430_v58, %v8955_v32 }
 0xcf8   : > { %v5280_v24 = vpop.f32.mrf.mxu0 }
 0xcf9   : > { %5505 = vmax.xlane.f32.xlu0 %v13425_v57  ;;  %5507 = vmax.xlane.f32.xlu1 %v13433_v29  ;;  %v13451_v8 = vadd.f32 %v13448_v13, %v5280_v24 }
 0xcfa   : > { %v8958_v51 = vpop.f32.mrf.mxu0 }
 0xcfb   : > { %v13461_v34 = vadd.f32 %v13458_v39, %v8958_v51  ;;  %v14992_v51 = vld [vmem:[#allocation45_spill] sm:$0xff] }
 0xcfc   : > { %v5293_v55 = vpop.f32.mrf.mxu0 }
 0xcfd   : > { %5503 = vmax.xlane.f32.xlu1 %v13451_v8  ;;  %5501 = vmax.xlane.f32.xlu0 %v13443_v26  ;;  %v13479_v12 = vadd.f32 %v13476_v2, %v5293_v55 }
 0xcfe   : > { %v8959_v43 = vpop.f32.mrf.mxu0 }
 0xcff   : > { %v13469_v46 = vadd.f32 %v13466_v22, %v8959_v43 }
 0xd00   : > { %v5296_v1 = vpop.f32.mrf.mxu0 }
 0xd01   : > { %5513 = vmax.xlane.f32.xlu0 %v13461_v34  ;;  %5515 = vmax.xlane.f32.xlu1 %v13469_v46  ;;  %v13487_v45 = vadd.f32 %v13484_v9, %v5296_v1 }
 0xd05   : > { %5511 = vmax.xlane.f32.xlu1 %v13487_v45  ;;  %5509 = vmax.xlane.f32.xlu0 %v13479_v12 }
 0xd48   : > { %v8914_v17 = vpop.f32.mrf.mxu1 }
 0xd49   : > { %v13494_v5 = vadd.f32 %v8914_v17, %v14988_v25  ;;  %v14999_v25 = vld [vmem:[#allocation49_spill] sm:$0xff] }
 0xd4a   : > { %v5036_v33 = vpop.f32.mrf.mxu1 }
 0xd4b   : > { %14989 = vst [vmem:[#allocation15_spill] sm:$0xff] %v13494_v5  ;;  %v13497_v32 = vadd.f32 %v5036_v33, %v14990_v35 }
 0xd4c   : > { %v8915_v24 = vpop.f32.mrf.mxu1 }
 0xd4d   : > { %14991 = vst [vmem:[#allocation16_spill] sm:$0xff] %v13497_v32  ;;  %v13500_v55 = vadd.f32 %v8915_v24, %v14992_v51 }
 0xd4e   : > { %v13502_v43 = vpop.f32.mrf.mxu1 }
 0xd4f   : > { %14993 = vst [vmem:[#allocation17_spill] sm:$0xff] %v13500_v55  ;;  %14994 = vst [vmem:[#allocation20_spill] sm:$0xff] %v13502_v43  ;;  %v15003_v55 = vld [vmem:[#allocation51_spill] sm:$0xff] }
 0xd50   : > { %v8918_v1 = vpop.f32.mrf.mxu1 }
 0xd51   : > { %v13505_v54 = vadd.f32 %v8918_v1, %v14995_v18  ;;  %v15005_v1 = vld [vmem:[#allocation52_spill] sm:$0xff] }
 0xd52   : > { %v5052_v53 = vpop.f32.mrf.mxu1 }
 0xd53   : > { %14996 = vst [vmem:[#allocation19_spill] sm:$0xff] %v13505_v54  ;;  %v13508_v42 = vadd.f32 %v5052_v53, %v14997_v48 }
 0xd54   : > { %v8919_v17 = vpop.f32.mrf.mxu1 }
 0xd55   : > { %14998 = vst [vmem:[#allocation23_spill] sm:$0xff] %v13508_v42  ;;  %v13511_v5 = vadd.f32 %v8919_v17, %v14999_v25 }
 0xd56   : > { %v13513_v33 = vpop.f32.mrf.mxu1 }
 0xd57   : > { %15000 = vst [vmem:[#allocation6_spill] sm:$0xff] %v13511_v5  ;;  %15001 = vst [vmem:[#allocation25_spill] sm:$0xff] %v13513_v33 }
 0xd58   : > { %v8922_v35 = vpop.f32.mrf.mxu1 }
 0xd59   : > { %v13516_v24 = vadd.f32 %v8922_v35, %v12834_v41 }
 0xd5a   : > { %v5068_v51 = vpop.f32.mrf.mxu1 }
 0xd5b   : > { %15002 = vst [vmem:[#allocation7_spill] sm:$0xff] %v13516_v24  ;;  %v13519_v43 = vadd.f32 %v5068_v51, %v15003_v55 }
 0xd5c   : > { %v8923_v18 = vpop.f32.mrf.mxu1 }
 0xd5d   : > { %15004 = vst [vmem:[#allocation10_spill] sm:$0xff] %v13519_v43  ;;  %v13522_v54 = vadd.f32 %v8923_v18, %v15005_v1 }
 0xd5e   : > { %v13528_v51 = vpop.f32.mrf.mxu1 }
 0xd5f   : > { %15006 = vst [vmem:[#allocation12_spill] sm:$0xff] %v13522_v54  ;;  %15007 = vst [vmem:[#allocation18_spill] sm:$0xff] %v13528_v51 }
 0xd6e   : > { %v5490_v53 = vpop.xlane.xlu0 %5489 }
 0xd6f   : > { %v5551_v48 = vsub.f32 %v13353_v3, %v5490_v53  ;;  %v15008_v3 = vld [vmem:[#allocation55_spill] sm:$0xff] }
 0xd71   : > { %v5585_v42 = vmul.f32 1.442695, %v5551_v48 }
 0xd72   : > { %v5486_v17 = vpop.xlane.xlu0 %5485 }
 0xd73   : > { %9740 = vpow2.f32 %v5585_v42  ;;  %v5549_v25 = vsub.f32 %v13362_v40, %v5486_v17  ;;  %v15010_v17 = vld [vmem:[#allocation56_spill] sm:$0xff] }
 0xd74   : > { %v5488_v5 = vpop.xlane.xlu1 %5487 }
 0xd75   : > { %v5581_v33 = vmul.f32 1.442695, %v5549_v25  ;;  %v5550_v35 = vsub.f32 %v13370_v20, %v5488_v5  ;;  %v15012_v25 = vld [vmem:[#allocation57_spill] sm:$0xff] }
 0xd76   : > { %v5492_v41 = vpop.xlane.xlu0 %5491 }
 0xd77   : > { %9742 = vpow2.f32 %v5581_v33  ;;  %v5552_v55 = vsub.f32 %v13379_v4, %v5492_v41  ;;  %v5583_v24 = vmul.f32 1.442695, %v5550_v35 }
 0xd79   : > { %v5587_v18 = vmul.f32 1.442695, %v5552_v55 }
 0xd7a   : > { %v8926_v1 = vpop.f32.mrf.mxu1  ;;  %v5500_v54 = vpop.xlane.xlu1 %5499 }
 0xd7b   : > { %9744 = vpow2.f32 %v5587_v18  ;;  %v13531_v53 = vadd.f32 %v8926_v1, %v15008_v3  ;;  %v5498_v42 = vpop.xlane.xlu0 %5497  ;;  %v5556_v1 = vsub.f32 %v13397_v19, %v5500_v54 }
 0xd7c   : > { %v5555_v40 = vsub.f32 %v13389_v21, %v5498_v42  ;;  %v5084_v48 = vpop.f32.mrf.mxu1  ;;  %9746 = vpow2.f32 %v5583_v24 }
 0xd7d   : > { %15009 = vst [vmem:[#allocation22_spill] sm:$0xff] %v13531_v53  ;;  %v13535_v33 = vadd.f32 %v5084_v48, %v15010_v17 }
 0xd7e   : > { %v5593_v20 = vmul.f32 1.442695, %v5555_v40  ;;  %v8927_v5 = vpop.f32.mrf.mxu1  ;;  %v5496_v4 = vpop.xlane.xlu1 %5495 }
 0xd7f   : > { %15011 = vst [vmem:[#allocation24_spill] sm:$0xff] %v13535_v33  ;;  %v13538_v41 = vadd.f32 %v8927_v5, %v15012_v25  ;;  %v5554_v35 = vsub.f32 %v13415_v61, %v5496_v4  ;;  %v5494_v55 = vpop.xlane.xlu0 %5493  ;;  %v5595_v61 = vmul.f32 1.442695, %v5556_v1 }
 0xd80   : > { %v13541_v18 = vpop.eup %9740  ;;  %9748 = vpow2.f32 %v5593_v20  ;;  %v5553_v21 = vsub.f32 %v13407_v62, %v5494_v55  ;;  %v13545_v3 = vpop.f32.mrf.mxu1 }
 0xd81   : > { %15013 = vst [vmem:[#allocation26_spill] sm:$0xff] %v13538_v41  ;;  %15014 = vst [vmem:[#allocation21_spill] sm:$0xff] %v13545_v3  ;;  %v5591_v42 = vmul.f32 1.442695, %v5554_v35  ;;  %5649 = vadd.xlane.f32.xlu1 %v13541_v18 }
 0xd82   : > { %v5589_v40 = vmul.f32 1.442695, %v5553_v21  ;;  %v8978_v24 = vpop.f32.mrf.mxu1  ;;  %v5508_v25 = vpop.xlane.xlu1 %5507 }
 0xd83   : > { %9750 = vpow2.f32 %v5591_v42  ;;  %v5506_v48 = vpop.xlane.xlu0 %5505 }
 0xd84   : > { %v13548_v17 = vpop.eup %9742  ;;  %9752 = vpow2.f32 %v5589_v40  ;;  %v5422_v5 = vpop.f32.mrf.mxu1  ;;  %v5559_v62 = vsub.f32 %v13425_v57, %v5506_v48  ;;  %v5560_v57 = vsub.f32 %v13433_v29, %v5508_v25 }
 0xd85   : > { %5645 = vadd.xlane.f32.xlu1 %v13548_v17  ;;  %9754 = vpow2.f32 %v5595_v61 }
 0xd86   : > { %v8979_v4 = vpop.f32.mrf.mxu1  ;;  %v5601_v1 = vmul.f32 1.442695, %v5559_v62  ;;  %v5504_v48 = vpop.xlane.xlu1 %5503 }
 0xd87   : > { %v5502_v54 = vpop.xlane.xlu0 %5501  ;;  %v5558_v41 = vsub.f32 %v13451_v8, %v5504_v48 }
 0xd88   : > { %v13551_v19 = vpop.eup %9744  ;;  %v5557_v20 = vsub.f32 %v13443_v26, %v5502_v54  ;;  %v5425_v40 = vpop.f32.mrf.mxu1 }
 0xd89   : > { %5651 = vadd.xlane.f32.xlu1 %v13551_v19  ;;  %v13556_v21 = vpop.eup %9746 }
 0xd8a   : > { %v5597_v35 = vmul.f32 1.442695, %v5557_v20  ;;  %v8982_v20 = vpop.f32.mrf.mxu1  ;;  %v5516_v8 = vpop.xlane.xlu1 %5515 }
 0xd8b   : > { %v5514_v55 = vpop.xlane.xlu0 %5513 }
 0xd8c   : > { %9756 = vpow2.f32 %v5597_v35  ;;  %v5563_v61 = vsub.f32 %v13461_v34, %v5514_v55  ;;  %v5603_v35 = vmul.f32 1.442695, %v5560_v57  ;;  %v5599_v34 = vmul.f32 1.442695, %v5558_v41 }
 0xd8d   : > { %v13558_v42 = vpop.eup %9748  ;;  %5647 = vadd.xlane.f32.xlu1 %v13556_v21  ;;  %9758 = vpow2.f32 %v5601_v1  ;;  %v5438_v1 = vpop.f32.mrf.mxu1  ;;  %v13576_v55 = vadd.f32 %v13350_v37, %v8978_v24  ;;  %v13590_v37 = vadd.f32 %v13359_v0, %v5422_v5  ;;  %v5564_v24 = vsub.f32 %v13469_v46, %v5516_v8 }
 0xd8e   : > { %5657 = vadd.xlane.f32.xlu0 %v13558_v42  ;;  %v5609_v53 = vmul.f32 1.442695, %v5563_v61  ;;  %9760 = vpow2.f32 %v5603_v35  ;;  %v5512_v61 = vpop.xlane.xlu1 %5511  ;;  %v13620_v8 = vadd.f32 %v13404_v11, %v5438_v1 }
 0xd8f   : > { %v5510_v62 = vpop.xlane.xlu0 %5509  ;;  %v8983_v57 = vpop.f32.mrf.mxu1 }
 0xd90   : > { %v13563_v26 = vpop.eup %9750  ;;  %v5561_v29 = vsub.f32 %v13479_v12, %v5510_v62  ;;  %9762 = vpow2.f32 %v5609_v53  ;;  %v13583_v12 = vadd.f32 %v13376_v52, %v8979_v4  ;;  %v13593_v53 = vadd.f32 %v13367_v15, %v5425_v40 }
 0xd91   : > { %v13566_v54 = vpop.eup %9752  ;;  %5655 = vadd.xlane.f32.xlu1 %v13563_v26  ;;  %9764 = vpow2.f32 %v5599_v34  ;;  %v5441_v41 = vpop.f32.mrf.mxu1  ;;  %v5562_v4 = vsub.f32 %v13487_v45, %v5512_v61  ;;  %v13612_v45 = vadd.f32 %v13386_v27, %v8982_v20 }
 0xd92   : > { %5653 = vadd.xlane.f32.xlu0 %v13566_v54  ;;  %v13572_v25 = vpop.eup %9754  ;;  %v5605_v3 = vmul.f32 1.442695, %v5561_v29  ;;  %v13615_v29 = vadd.f32 %v13394_v49, %v8983_v57 }
 0xd93   : > { %v8986_v62 = vpop.f32.mrf.mxu1  ;;  %v5607_v46 = vmul.f32 1.442695, %v5562_v4 }
 0xd94   : > { %9766 = vpow2.f32 %v5605_v3  ;;  %v5611_v3 = vmul.f32 1.442695, %v5564_v24  ;;  %v13623_v24 = vadd.f32 %v13412_v28, %v5441_v41 }
 0xd95   : > { %v5454_v0 = vpop.f32.mrf.mxu1 }
 0xd96   : > { %5659 = vadd.xlane.f32.xlu0 %v13572_v25  ;;  %9768 = vpow2.f32 %v5611_v3 }
 0xd97   : > { %v8987_v40 = vpop.f32.mrf.mxu1  ;;  %9770 = vpow2.f32 %v5607_v46 }
 0xd98   : > { %v13628_v27 = vadd.f32 %v13430_v58, %v8987_v40  ;;  %v13642_v58 = vadd.f32 %v13422_v6, %v8986_v62 }
 0xd99   : > { %v13578_v33 = vpop.eup %9756  ;;  %v5457_v34 = vpop.f32.mrf.mxu1 }
 0xd9a   : > { %5521 = vmax.xlane.f32.xlu0 %v13576_v55  ;;  %5661 = vadd.xlane.f32.xlu1 %v13578_v33  ;;  %v13585_v48 = vpop.eup %9758  ;;  %v13635_v11 = vadd.f32 %v13448_v13, %v5457_v34  ;;  %v13650_v13 = vadd.f32 %v13440_v44, %v5454_v0 }
 0xd9b   : > { %v13598_v52 = vpop.eup %9760  ;;  %v8990_v61 = vpop.f32.mrf.mxu1 }
 0xd9c   : > { %v13658_v6 = vadd.f32 %v13458_v39, %v8990_v61 }
 0xd9d   : > { %v13601_v35 = vpop.eup %9762  ;;  %v5470_v20 = vpop.f32.mrf.mxu1 }
 0xd9e   : > { %5665 = vadd.xlane.f32.xlu0 %v13585_v48  ;;  %5523 = vmax.xlane.f32.xlu1 %v13583_v12  ;;  %v13605_v15 = vpop.eup %9764 }
 0xd9f   : > { %v8991_v1 = vpop.f32.mrf.mxu1 }
 0xda0   : > { %v13645_v57 = vadd.f32 %v13466_v22, %v8991_v1  ;;  %v13662_v22 = vadd.f32 %v13476_v2, %v5470_v20 }
 0xda1   : > { %v13607_v5 = vpop.eup %9766  ;;  %v5473_v41 = vpop.f32.mrf.mxu1 }
 0xda2   : > { %5517 = vmax.xlane.f32.xlu0 %v13590_v37  ;;  %5519 = vmax.xlane.f32.xlu1 %v13593_v53  ;;  %v13653_v3 = vadd.f32 %v13484_v9, %v5473_v41 }
 0xda3   : > { %v13630_v49 = vpop.eup %9768 }
 0xda4   : > { %v13637_v28 = vpop.eup %9770 }
 0xda6   : > { %5667 = vadd.xlane.f32.xlu0 %v13598_v52  ;;  %5673 = vadd.xlane.f32.xlu1 %v13601_v35 }
 0xdaa   : > { %5663 = vadd.xlane.f32.xlu0 %v13605_v15  ;;  %5669 = vadd.xlane.f32.xlu1 %v13607_v5 }
 0xdae   : > { %5529 = vmax.xlane.f32.xlu0 %v13612_v45  ;;  %5531 = vmax.xlane.f32.xlu1 %v13615_v29 }
 0xdb2   : > { %5525 = vmax.xlane.f32.xlu0 %v13620_v8  ;;  %5527 = vmax.xlane.f32.xlu1 %v13623_v24 }
 0xdb6   : > { %5675 = vadd.xlane.f32.xlu0 %v13630_v49  ;;  %5539 = vmax.xlane.f32.xlu1 %v13628_v27 }
 0xdba   : > { %5671 = vadd.xlane.f32.xlu0 %v13637_v28  ;;  %5535 = vmax.xlane.f32.xlu1 %v13635_v11 }
 0xdbe   : > { %5537 = vmax.xlane.f32.xlu0 %v13642_v58  ;;  %5547 = vmax.xlane.f32.xlu1 %v13645_v57 }
 0xdc2   : > { %5533 = vmax.xlane.f32.xlu0 %v13650_v13  ;;  %5543 = vmax.xlane.f32.xlu1 %v13653_v3 }
 0xdc6   : > { %5545 = vmax.xlane.f32.xlu0 %v13658_v6 }
 0xdca   : > { %5541 = vmax.xlane.f32.xlu0 %v13662_v22 }
 0xdd3   : > { %5914 = vrot.lane.b32.xlu1 %v11258_v59, %s10175_s19 }
 0xde0   : > { %5916 = vrot.lane.b32.xlu0 %v14888_v10, %s10175_s19 }
 0xe0a   : > { %v5650_v44 = vpop.xlane.xlu1 %5649 }
 0xe0e   : > { %v5646_v9 = vpop.xlane.xlu1 %5645 }
 0xe12   : > { %v5652_v62 = vpop.xlane.xlu1 %5651 }
 0xe13   : > { %9772 = vrcp.f32 %v5652_v62 }
 0xe14   : > { %9774 = vrcp.f32 %v5646_v9 }
 0xe15   : > { %9776 = vrcp.f32 %v5650_v44 }
 0xe16   : > { %v5648_v39 = vpop.xlane.xlu1 %5647 }
 0xe17   : > { %9778 = vrcp.f32 %v5648_v39  ;;  %v5658_v4 = vpop.xlane.xlu0 %5657 }
 0xe1a   : > { %v5656_v0 = vpop.xlane.xlu1 %5655 }
 0xe1b   : > { %9780 = vrcp.f32 %v5656_v0  ;;  %v5654_v2 = vpop.xlane.xlu0 %5653 }
 0xe1c   : > { %9782 = vrcp.f32 %v5654_v2 }
 0xe1d   : > { %9784 = vrcp.f32 %v5658_v4 }
 0xe1f   : > { %v5660_v46 = vpop.xlane.xlu0 %5659 }
 0xe20   : > { %9786 = vrcp.f32 %v5660_v46  ;;  %v9773_v59 = vpop.eup %9772 }
 0xe21   : > { %v9775_v40 = vpop.eup %9774  ;;  %v5744_v1 = vmul.f32 %v9773_v59, %v13551_v19 }
 0xe22   : > { %v9777_v34 = vpop.eup %9776  ;;  %v5741_v44 = vmul.f32 %v9775_v40, %v13548_v17 }
 0xe23   : > { %v5662_v10 = vpop.xlane.xlu1 %5661  ;;  %v5522_v61 = vpop.xlane.xlu0 %5521  ;;  %v5743_v62 = vmul.f32 %v9777_v34, %v13541_v18 }
 0xe24   : > { %v9779_v20 = vpop.eup %9778  ;;  %v5567_v41 = vsub.f32 %v13576_v55, %v5522_v61 }
 0xe25   : > { %v5742_v9 = vmul.f32 %v9779_v20, %v13556_v21  ;;  %v5774_v43 = vpack.c.bf16 %v5744_v1, %v5743_v62 }
 0xe26   : > { %v5617_v39 = vmul.f32 1.442695, %v5567_v41 }
 0xe27   : > { %v5524_v4 = vpop.xlane.xlu1 %5523  ;;  %v5666_v0 = vpop.xlane.xlu0 %5665  ;;  %v5773_v2 = vpack.c.bf16 %v5742_v9, %v5741_v44 }
 0xe28   : > { %v9781_v46 = vpop.eup %9780  ;;  %9788 = vpow2.f32 %v5617_v39  ;;  %v5568_v51 = vsub.f32 %v13583_v12, %v5524_v4 }
 0xe29   : > { %v9783_v32 = vpop.eup %9782  ;;  %9008 = vmatprep.mubr.bf16.mxu0 %v5773_v2  ;;  %v5746_v19 = vmul.f32 %v9781_v46, %v13563_v26 }
 0xe2a   : > { %v5619_v55 = vmul.f32 1.442695, %v5568_v51  ;;  %9009 = vmatmul.mubr.bf16.vlgmr.msra.gmra.mxu0 %v5774_v43  ;;  %v5745_v17 = vmul.f32 %v9783_v32, %v13566_v54  ;;  %v9785_v21 = vpop.eup %9784 }
 0xe2b   : > { %v5520_v59 = vpop.xlane.xlu1 %5519  ;;  %v5518_v18 = vpop.xlane.xlu0 %5517  ;;  %v5747_v41 = vmul.f32 %v9785_v21, %v13558_v42 }
 0xe2c   : > { %9790 = vpow2.f32 %v5619_v55  ;;  %v5566_v40 = vsub.f32 %v13593_v53, %v5520_v59  ;;  %v5565_v34 = vsub.f32 %v13590_v37, %v5518_v18  ;;  %v5775_v61 = vpack.c.bf16 %v5746_v19, %v5745_v17 }
 0xe2d   : > { %v9787_v20 = vpop.eup %9786 }
 0xe2e   : > { %v5615_v12 = vmul.f32 1.442695, %v5566_v40  ;;  %v5613_v1 = vmul.f32 1.442695, %v5565_v34  ;;  %9012 = vmatprep.mubr.bf16.mxu0 %v5775_v61  ;;  %v5748_v51 = vmul.f32 %v9787_v20, %v13572_v25 }
 0xe2f   : > { %v5674_v43 = vpop.xlane.xlu1 %5673  ;;  %v5668_v26 = vpop.xlane.xlu0 %5667 }
 0xe30   : > { %9792 = vpow2.f32 %v5615_v12  ;;  %v5776_v32 = vpack.c.bf16 %v5748_v51, %v5747_v41 }
 0xe31   : > { %9794 = vpow2.f32 %v5613_v1 }
 0xe32   : > { %9796 = vrcp.f32 %v5662_v10  ;;  %9013 = vmatmul.mubr.bf16.gmra.mxu0 %v5776_v32 }
 0xe33   : > { %9798 = vrcp.f32 %v5668_v26  ;;  %v5670_v54 = vpop.xlane.xlu1 %5669  ;;  %v5664_v53 = vpop.xlane.xlu0 %5663 }
 0xe34   : > { %9800 = vrcp.f32 %v5666_v0 }
 0xe35   : > { %v13681_v37 = vpop.eup %9788  ;;  %9802 = vrcp.f32 %v5664_v53 }
 0xe36   : > { %5681 = vadd.xlane.f32.xlu1 %v13681_v37 }
 0xe37   : > { %v5532_v44 = vpop.xlane.xlu1 %5531  ;;  %v5530_v42 = vpop.xlane.xlu0 %5529 }
 0xe38   : > { %v5572_v25 = vsub.f32 %v13615_v29, %v5532_v44  ;;  %v5571_v9 = vsub.f32 %v13612_v45, %v5530_v42 }
 0xe39   : > { %v13686_v62 = vpop.eup %9790 }
 0xe3a   : > { %v5627_v39 = vmul.f32 1.442695, %v5572_v25  ;;  %v5625_v10 = vmul.f32 1.442695, %v5571_v9  ;;  %5683 = vadd.xlane.f32.xlu0 %v13686_v62 }
 0xe3b   : > { %v5528_v4 = vpop.xlane.xlu1 %5527  ;;  %v5526_v2 = vpop.xlane.xlu0 %5525 }
 0xe3c   : > { %9804 = vpow2.f32 %v5627_v39  ;;  %v5570_v0 = vsub.f32 %v13623_v24, %v5528_v4  ;;  %v5569_v46 = vsub.f32 %v13620_v8, %v5526_v2 }
 0xe3d   : > { %v13691_v19 = vpop.eup %9792  ;;  %9806 = vpow2.f32 %v5625_v10 }
 0xe3e   : > { %v13693_v55 = vpop.eup %9794  ;;  %v5623_v29 = vmul.f32 1.442695, %v5570_v0  ;;  %v5621_v45 = vmul.f32 1.442695, %v5569_v46  ;;  %5679 = vadd.xlane.f32.xlu0 %v13691_v19  ;;  %9808 = vrcp.f32 %v5674_v43 }
 0xe3f   : > { %v9797_v17 = vpop.eup %9796  ;;  %5677 = vadd.xlane.f32.xlu1 %v13693_v55  ;;  %v5540_v21 = vpop.xlane.xlu1 %5539 }
 0xe40   : > { %v5676_v59 = vpop.xlane.xlu0 %5675  ;;  %v9799_v18 = vpop.eup %9798  ;;  %9810 = vpow2.f32 %v5623_v29  ;;  %v5576_v24 = vsub.f32 %v13628_v27, %v5540_v21  ;;  %v5749_v1 = vmul.f32 %v9797_v17, %v13578_v33 }
 0xe41   : > { %v9801_v8 = vpop.eup %9800  ;;  %9812 = vpow2.f32 %v5621_v45  ;;  %v5752_v61 = vmul.f32 %v9799_v18, %v13598_v52 }
 0xe42   : > { %v9803_v40 = vpop.eup %9802  ;;  %v5635_v34 = vmul.f32 1.442695, %v5576_v24  ;;  %9814 = vrcp.f32 %v5676_v59  ;;  %v5751_v43 = vmul.f32 %v9801_v8, %v13585_v48 }
 0xe43   : > { %9816 = vrcp.f32 %v5670_v54  ;;  %v5536_v20 = vpop.xlane.xlu1 %5535  ;;  %v5750_v41 = vmul.f32 %v9803_v40, %v13605_v15 }
 0xe44   : > { %v5672_v12 = vpop.xlane.xlu0 %5671  ;;  %9818 = vpow2.f32 %v5635_v34  ;;  %v5574_v51 = vsub.f32 %v13635_v11, %v5536_v20  ;;  %v5778_v32 = vpack.c.bf16 %v5752_v61, %v5751_v43  ;;  %v13744_v20 = vld [vmem:[%s14830_s20 + $0xc] sm:$0xf] }
 0xe45   : > { %9820 = vrcp.f32 %v5672_v12  ;;  %v5777_v27 = vpack.c.bf16 %v5750_v41, %v5749_v1  ;;  %9243 = vmatprep.subr.msk.bf16.mxu0 %vm2598_vm3, %v13744_v20  ;;  %v13750_v12 = vsel %vm2598_vm3, %v13744_v20, 0 }
 0xe46   : > { %v5631_v26 = vmul.f32 1.442695, %v5574_v51  ;;  %9057 = vmatpush3.bf16.msra.mxu0 %v13750_v12 }
 0xe47   : > { %9016 = vmatprep.mubr.bf16.mxu0 %v5777_v27  ;;  %v5548_v25 = vpop.xlane.xlu1 %5547 }
 0xe48   : > { %v5538_v53 = vpop.xlane.xlu0 %5537  ;;  %9822 = vpow2.f32 %v5631_v26  ;;  %9017 = vmatmul.mubr.bf16.gmra.mxu0 %v5778_v32  ;;  %v5580_v41 = vsub.f32 %v13645_v57, %v5548_v25 }
 0xe49   : > { %v5575_v52 = vsub.f32 %v13642_v58, %v5538_v53  ;;  %v13704_v54 = vpop.eup %9804 }
 0xe4a   : > { %v13706_v33 = vpop.eup %9806  ;;  %5691 = vadd.xlane.f32.xlu0 %v13704_v54 }
 0xe4b   : > { %v5633_v15 = vmul.f32 1.442695, %v5575_v52  ;;  %5689 = vadd.xlane.f32.xlu1 %v13706_v33  ;;  %v9809_v11 = vpop.eup %9808  ;;  %v5544_v45 = vpop.xlane.xlu1 %5543 }
 0xe4c   : > { %v5534_v48 = vpop.xlane.xlu0 %5533  ;;  %v5578_v1 = vsub.f32 %v13653_v3, %v5544_v45 }
 0xe4d   : > { %v5573_v44 = vsub.f32 %v13650_v13, %v5534_v48  ;;  %v13711_v42 = vpop.eup %9810  ;;  %9824 = vpow2.f32 %v5633_v15 }
 0xe4e   : > { %v13713_v9 = vpop.eup %9812  ;;  %5687 = vadd.xlane.f32.xlu0 %v13711_v42  ;;  %v5639_v51 = vmul.f32 1.442695, %v5578_v1 }
 0xe4f   : > { %v5629_v58 = vmul.f32 1.442695, %v5573_v44  ;;  %v9815_v39 = vpop.eup %9814  ;;  %5685 = vadd.xlane.f32.xlu1 %v13713_v9 }
 0xe50   : > { %v5546_v10 = vpop.xlane.xlu0 %5545  ;;  %v9817_v4 = vpop.eup %9816  ;;  %v5756_v29 = vmul.f32 %v9815_v39, %v13630_v49 }
 0xe51   : > { %v5579_v2 = vsub.f32 %v13658_v6, %v5546_v10  ;;  %v13718_v0 = vpop.eup %9818  ;;  %9826 = vpow2.f32 %v5629_v58  ;;  %v5753_v21 = vmul.f32 %v9817_v4, %v13607_v5  ;;  %v5755_v6 = vmul.f32 %v9809_v11, %v13601_v35  ;;  %v5915_v5 = vpop.permute.xlu1 %5914 }
 0xe52   : > { %v9821_v13 = vpop.eup %9820  ;;  %5699 = vadd.xlane.f32.xlu0 %v13718_v0 }
 0xe53   : > { %v5641_v46 = vmul.f32 1.442695, %v5579_v2  ;;  %v5754_v59 = vmul.f32 %v9821_v13, %v13637_v28  ;;  %v5780_v34 = vpack.c.bf16 %v5756_v29, %v5755_v6 }
 0xe54   : > { %v5542_v17 = vpop.xlane.xlu0 %5541 }
 0xe55   : > { %9828 = vpow2.f32 %v5641_v46  ;;  %v5577_v18 = vsub.f32 %v13662_v22, %v5542_v17  ;;  %v13726_v24 = vpop.eup %9822  ;;  %v5779_v8 = vpack.c.bf16 %v5754_v59, %v5753_v21 }
 0xe56   : > { %5695 = vadd.xlane.f32.xlu0 %v13726_v24 }
 0xe57   : > { %v5637_v40 = vmul.f32 1.442695, %v5577_v18  ;;  %9020 = vmatprep.mubr.bf16.mxu0 %v5779_v8 }
 0xe58   : > { %v5917_v49 = vpop.permute.xlu0 %5916  ;;  %9021 = vmatmul.mubr.bf16.gmra.mxu0 %v5780_v34 }
 0xe59   : > { %9830 = vpow2.f32 %v5637_v40  ;;  %9032 = vmatprep.subr.bf16.mxu1 %v5917_v49 }
 0xe5a   : > { %9033 = vmatpush3.bf16.msra.mxu1 %v5917_v49  ;;  %v13729_v28 = vpop.eup %9824  ;;  %9832 = vpow2.f32 %v5639_v51 }
 0xe5b   : > { %9034 = vmatprep.subr.bf16.mxu1 %v5915_v5  ;;  %5697 = vadd.xlane.f32.xlu1 %v13729_v28 }
 0xe5e   : > { %9035 = vmatpush3.bf16.msra.mxu1 %v5915_v5  ;;  %v13732_v35 = vpop.eup %9826 }
 0xe5f   : > { %5693 = vadd.xlane.f32.xlu1 %v13732_v35 }
 0xe62   : > { %v13735_v22 = vpop.eup %9828 }
 0xe63   : > { %5705 = vadd.xlane.f32.xlu1 %v13735_v22 }
 0xe66   : > { %v13738_v61 = vpop.eup %9830 }
 0xe67   : > { %5701 = vadd.xlane.f32.xlu1 %v13738_v61  ;;  %v13757_v43 = vpop.eup %9832 }
 0xe6c   : > { %5912 = vrot.lane.b32.xlu0 %v11215_v16, %s10175_s19  ;;  %v5643_v16 = vmul.f32 1.442695, %v5580_v41 }
 0xe6e   : > { %9834 = vpow2.f32 %v5643_v16 }
 0xe78   : > { %5910 = vrot.lane.b32.xlu1 %v11266_v30, %s10175_s19 }
 0xe7b   : > { %v13760_v27 = vpop.eup %9834 }
 0xe8b   : > { %5703 = vadd.xlane.f32.xlu0 %v13757_v43 }
 0xe8f   : > { %5707 = vadd.xlane.f32.xlu0 %v13760_v27 }
 0xebf   : > { %v5682_v32 = vpop.xlane.xlu1 %5681 }
 0xec3   : > { %v5684_v26 = vpop.xlane.xlu0 %5683 }
 0xec7   : > { %v5680_v3 = vpop.xlane.xlu0 %5679 }
 0xec8   : > { %v5678_v53 = vpop.xlane.xlu1 %5677  ;;  %9836 = vrcp.f32 %v5680_v3 }
 0xec9   : > { %9838 = vrcp.f32 %v5678_v53 }
 0xeca   : > { %9840 = vrcp.f32 %v5684_v26 }
 0xed3   : > { %v5692_v30 = vpop.xlane.xlu0 %5691 }
 0xed4   : > { %v5690_v25 = vpop.xlane.xlu1 %5689 }
 0xed5   : > { %v9837_v57 = vpop.eup %9836 }
 0xed6   : > { %v9839_v52 = vpop.eup %9838  ;;  %v5758_v15 = vmul.f32 %v9837_v57, %v13691_v19 }
 0xed7   : > { %v5688_v48 = vpop.xlane.xlu0 %5687  ;;  %v5757_v11 = vmul.f32 %v9839_v52, %v13693_v55  ;;  %v9841_v45 = vpop.eup %9840 }
 0xed8   : > { %v5686_v10 = vpop.xlane.xlu1 %5685  ;;  %9842 = vrcp.f32 %v5688_v48  ;;  %v5760_v49 = vmul.f32 %v9841_v45, %v13686_v62 }
 0xed9   : > { %v5781_v44 = vpack.c.bf16 %v5758_v15, %v5757_v11  ;;  %9844 = vrcp.f32 %v5686_v10 }
 0xeda   : > { %9846 = vrcp.f32 %v5682_v32 }
 0xedb   : > { %9040 = vmatprep.mubr.bf16.mxu1 %v5781_v44  ;;  %v5700_v58 = vpop.xlane.xlu0 %5699  ;;  %9848 = vrcp.f32 %v5692_v30 }
 0xedc   : > { %9850 = vrcp.f32 %v5690_v25 }
 0xedf   : > { %v5696_v39 = vpop.xlane.xlu0 %5695 }
 0xee3   : > { %v5913_v4 = vpop.permute.xlu0 %5912 }
 0xee4   : > { %v5698_v2 = vpop.xlane.xlu1 %5697  ;;  %9036 = vmatprep.subr.bf16.mxu1 %v5913_v4 }
 0xee5   : > { %9037 = vmatpush3.bf16.msra.mxu1 %v5913_v4  ;;  %v9843_v17 = vpop.eup %9842 }
 0xee6   : > { %v9845_v18 = vpop.eup %9844  ;;  %v5762_v51 = vmul.f32 %v9843_v17, %v13711_v42 }
 0xee7   : > { %v9847_v8 = vpop.eup %9846  ;;  %v5761_v41 = vmul.f32 %v9845_v18, %v13713_v9 }
 0xee8   : > { %v5694_v13 = vpop.xlane.xlu1 %5693  ;;  %v5759_v16 = vmul.f32 %v9847_v8, %v13681_v37  ;;  %v9849_v32 = vpop.eup %9848 }
 0xee9   : > { %9852 = vrcp.f32 %v5694_v13  ;;  %v9851_v62 = vpop.eup %9850  ;;  %v5783_v30 = vpack.c.bf16 %v5762_v51, %v5761_v41  ;;  %v5764_v15 = vmul.f32 %v9849_v32, %v13704_v54  ;;  %v10132_v41 = vld [vmem:[%s14716_s14 + $0x8] sm:$0xff]  ;;  %v13797_v51 = vld [vmem:[%s10290_s30] ss:$0 sm:$0xff] }
 0xeea   : > { %v9010_v19 = vpop.f32.mrf.mxu0  ;;  %9854 = vrcp.f32 %v5696_v39  ;;  %v5782_v3 = vpack.c.bf16 %v5760_v49, %v5759_v16  ;;  %v5763_v42 = vmul.f32 %v9851_v62, %v13706_v33  ;;  %v15015_v32 = vld [vmem:[#allocation30_spill] sm:$0xff] }
 0xeeb   : > { %9856 = vrcp.f32 %v5698_v2 }
 0xeec   : > { %v13765_v55 = vpop.xlane.xlu1 %5705  ;;  %v5847_v46 = vpop.f32.mrf.mxu0  ;;  %9858 = vrcp.f32 %v5700_v58  ;;  %v5784_v11 = vpack.c.bf16 %v5764_v15, %v5763_v42 }
 0xeee   : > { %v9011_v29 = vpop.f32.mrf.mxu0 }
 0xeef   : > { %v6032_v40 = vpack.c.bf16 %v9011_v29, %v9010_v19 }
 0xef0   : > { %v5702_v21 = vpop.xlane.xlu1 %5701  ;;  %v5850_v59 = vpop.f32.mrf.mxu0 }
 0xef1   : > { %v6031_v6 = vpack.c.bf16 %v5850_v59, %v5847_v46  ;;  %9860 = vrcp.f32 %v5702_v21 }
 0xef2   : > { %v9014_v34 = vpop.f32.mrf.mxu0 }
 0xef3   : > { %9058 = vmatprep.mubr.msk.bf16.mxu0 %vm1673_vm2, %v6031_v6 }
 0xef4   : > { %v5911_v5 = vpop.permute.xlu1 %5910  ;;  %v5863_v1 = vpop.f32.mrf.mxu0  ;;  %9059 = vmatmul.mubr.msk.bf16.vlgmr.msra.gmra.mxu0 %vm1673_vm2, %v6032_v40 }
 0xef5   : > { %9038 = vmatprep.subr.bf16.mxu1 %v5911_v5 }
 0xef6   : > { %9039 = vmatpush3.bf16.msra.mxu1 %v5911_v5  ;;  %v9015_v26 = vpop.f32.mrf.mxu0  ;;  %v9853_v57 = vpop.eup %9852 }
 0xef7   : > { %9244 = vmatprep.subr.msk.bf16.mxu1 %vm2598_vm3, %v13744_v20  ;;  %v6034_v9 = vpack.c.bf16 %v9015_v26, %v9014_v34  ;;  %v9855_v37 = vpop.eup %9854  ;;  %v5765_v20 = vmul.f32 %v9853_v57, %v13732_v35 }
 0xef8   : > { %v5866_v53 = vpop.f32.mrf.mxu0  ;;  %v5766_v48 = vmul.f32 %v9855_v37, %v13726_v24  ;;  %v9857_v44 = vpop.eup %9856 }
 0xef9   : > { %9041 = vmatmul.mubr.bf16.vlgmr.msra.gmra.mxu1 %v5782_v3  ;;  %v6033_v52 = vpack.c.bf16 %v5866_v53, %v5863_v1  ;;  %v9859_v58 = vpop.eup %9858 }
 0xefa   : > { %9044 = vmatprep.mubr.bf16.mxu1 %v5783_v30  ;;  %9175 = vmatpush3.bf16.msra.mxu1 %v13750_v12  ;;  %v5785_v25 = vpack.c.bf16 %v5766_v48, %v5765_v20  ;;  %v5767_v12 = vmul.f32 %v9857_v44, %v13729_v28  ;;  %v5768_v39 = vmul.f32 %v9859_v58, %v13718_v0  ;;  %v15016_v30 = vld [vmem:[#allocation29_spill] sm:$0xff] }
 0xefb   : > { %9062 = vmatprep.mubr.msk.bf16.mxu0 %vm1673_vm2, %v6033_v52 }
 0xefc   : > { %9063 = vmatmul.mubr.msk.bf16.gmra.mxu0 %vm1673_vm2, %v6034_v9  ;;  %v5786_v10 = vpack.c.bf16 %v5768_v39, %v5767_v12 }
 0xefe   : > { %v9861_v17 = vpop.eup %9860 }
 0xeff   : > { %v5769_v21 = vmul.f32 %v9861_v17, %v13738_v61  ;;  %v1554_v61 = vadd.f32 %v13797_v51, %v10132_v41 }
 0xf01   : > { %9045 = vmatmul.mubr.bf16.gmra.mxu1 %v5784_v11  ;;  %v2764_v3 = vadd.f32 %v15015_v32, %v1554_v61  ;;  %v15020_v32 = vld [vmem:[#allocation60_spill] sm:$0xff] }
 0xf02   : > { %9048 = vmatprep.mubr.bf16.mxu1 %v5785_v25  ;;  %v10134_v25 = vld [vmem:[%s14716_s14 + $0x28] sm:$0xff] }
 0xf03   : > { %v3940_v57 = vadd.f32 %v15016_v30, %v2764_v3  ;;  %v1558_v58 = vadd.f32 %v10134_v25, %v13797_v51  ;;  %v15021_v30 = vld [vmem:[#allocation8_spill] sm:$0xff]  ;;  %v15025_v25 = vld [vmem:[#allocation61_spill] sm:$0xff] }
 0xf05   : > { %v5100_v37 = vadd.f32 %v13289_v50, %v3940_v57 }
 0xf08   : > { %v9018_v33 = vpop.f32.mrf.mxu0 }
 0xf09   : > { %9049 = vmatmul.mubr.bf16.gmra.mxu1 %v5786_v10 }
 0xf0a   : > { %v5879_v54 = vpop.f32.mrf.mxu0 }
 0xf0c   : > { %v9019_v4 = vpop.f32.mrf.mxu0 }
 0xf0d   : > { %v6036_v35 = vpack.c.bf16 %v9019_v4, %v9018_v33  ;;  %v15017_v4 = vld [vmem:[#allocation34_spill] sm:$0xff] }
 0xf0e   : > { %v5882_v2 = vpop.f32.mrf.mxu0 }
 0xf0f   : > { %v6035_v13 = vpack.c.bf16 %v5882_v2, %v5879_v54  ;;  %v2768_v2 = vadd.f32 %v15017_v4, %v1558_v58 }
 0xf11   : > { %9066 = vmatprep.mubr.msk.bf16.mxu0 %vm1673_vm2, %v6035_v13 }
 0xf12   : > { %9067 = vmatmul.mubr.msk.bf16.gmra.mxu0 %vm1673_vm2, %v6036_v35  ;;  %v15018_v35 = vld [vmem:[#allocation59_spill] sm:$0xff] }
 0xf14   : > { %v5704_v24 = vpop.xlane.xlu0 %5703 }
 0xf15   : > { %9862 = vrcp.f32 %v5704_v24  ;;  %v3944_v24 = vadd.f32 %v15018_v35, %v2768_v2  ;;  %v15030_v35 = vld [vmem:[#allocation14_spill] sm:$0xff] }
 0xf16   : > { %9864 = vrcp.f32 %v13765_v55 }
 0xf18   : > { %v9022_v28 = vpop.f32.mrf.mxu0  ;;  %v5708_v19 = vpop.xlane.xlu0 %5707 }
 0xf19   : > { %9866 = vrcp.f32 %v5708_v19 }
 0xf1a   : > { %v5895_v0 = vpop.f32.mrf.mxu0 }
 0xf1c   : > { %v9023_v46 = vpop.f32.mrf.mxu0 }
 0xf1d   : > { %v6038_v59 = vpack.c.bf16 %v9023_v46, %v9022_v28 }
 0xf1e   : > { %v5898_v29 = vpop.f32.mrf.mxu0 }
 0xf1f   : > { %v6037_v45 = vpack.c.bf16 %v5898_v29, %v5895_v0  ;;  %v5104_v29 = vadd.f32 %v13304_v31, %v3944_v24 }
 0xf21   : > { %9070 = vmatprep.mubr.msk.bf16.mxu0 %vm1673_vm2, %v6037_v45 }
 0xf22   : > { %v9863_v18 = vpop.eup %9862  ;;  %9071 = vmatmul.mubr.msk.bf16.gmra.mxu0 %vm1673_vm2, %v6038_v59 }
 0xf23   : > { %v5770_v6 = vmul.f32 %v9863_v18, %v13757_v43  ;;  %v9865_v55 = vpop.eup %9864 }
 0xf24   : > { %v5771_v34 = vmul.f32 %v9865_v55, %v13735_v22 }
 0xf25   : > { %v5787_v8 = vpack.c.bf16 %v5770_v6, %v5769_v21 }
 0xf26   : > { %v9867_v40 = vpop.eup %9866 }
 0xf27   : > { %9052 = vmatprep.mubr.bf16.mxu1 %v5787_v8  ;;  %v5772_v49 = vmul.f32 %v9867_v40, %v13760_v27 }
 0xf29   : > { %v5788_v5 = vpack.c.bf16 %v5772_v49, %v5771_v34  ;;  %v10135_v34 = vld [vmem:[%s14716_s14 + $0x48] sm:$0xff] }
 0xf2a   : > { %v1562_v49 = vadd.f32 %v10135_v34, %v13797_v51 }
 0xf2b   : > { %9053 = vmatmul.mubr.bf16.gmra.mxu1 %v5788_v5 }
 0xfb4   : > { %v9060_v1 = vpop.f32.mrf.mxu0 }
 0xfb5   : > { %v13801_v43 = vadd.f32 %v9060_v1, %v13281_v56 }
 0xfb6   : > { %v6132_v16 = vpop.f32.mrf.mxu0 }
 0xfb7   : > { %v13804_v26 = vadd.f32 %v6132_v16, %v13284_v63  ;;  %v6299_v22 = vsel %vm784_vm1, %v13801_v43, 0.0 }
 0xfb8   : > { %6300 = vadd.xlane.f32.xlu0 %v6299_v22  ;;  %v9061_v27 = vpop.f32.mrf.mxu0  ;;  %v15019_v22 = vld [vmem:[#allocation38_spill] sm:$0xff] }
 0xfb9   : > { %v9042_v62 = vpop.f32.mrf.mxu1  ;;  %v13811_v52 = vadd.f32 %v9061_v27, %v13287_v23  ;;  %v6293_v9 = vsel %vm784_vm1, %v13804_v26, 0.0  ;;  %v2772_v27 = vadd.f32 %v15019_v22, %v1562_v49  ;;  %v15034_v49 = vld [vmem:[#allocation16_spill] sm:$0xff]  ;;  %v10138_v22 = vld [vmem:[%s14716_s14 + $0xa8] sm:$0xff] }
 0xfba   : > { %v6135_v53 = vpop.f32.mrf.mxu0 }
 0xfbb   : > { %v5968_v56 = vpop.f32.mrf.mxu1  ;;  %v13816_v20 = vadd.f32 %v6135_v53, %v5100_v37  ;;  %v6302_v23 = vsel %vm784_vm1, %v13811_v52, 0.0  ;;  %v3948_v3 = vadd.f32 %v15020_v32, %v2772_v27  ;;  %v1574_v27 = vadd.f32 %v10138_v22, %v13797_v51  ;;  %v15036_v32 = vld [vmem:[#allocation20_spill] sm:$0xff] }
 0xfbc   : > { %6294 = vadd.xlane.f32.xlu0 %v6293_v9  ;;  %v9064_v63 = vpop.f32.mrf.mxu0  ;;  %v10136_v9 = vld [vmem:[%s14716_s14 + $0x68] sm:$0xff] }
 0xfbd   : > { %v9043_v42 = vpop.f32.mrf.mxu1  ;;  %v6296_v33 = vsel %vm784_vm1, %v13816_v20, 0.0 }
 0xfbe   : > { %v6148_v15 = vpop.f32.mrf.mxu0  ;;  %v6040_v50 = vpack.c.bf16 %v9043_v42, %v9042_v62  ;;  %v15022_v42 = vld [vmem:[#allocation42_spill] sm:$0xff] }
 0xfbf   : > { %v5971_v48 = vpop.f32.mrf.mxu1  ;;  %v13819_v11 = vadd.f32 %v6148_v15, %v13295_v14  ;;  %v13831_v14 = vadd.f32 %v9064_v63, %v13292_v7 }
 0xfc0   : > { %v6039_v44 = vpack.c.bf16 %v5971_v48, %v5968_v56  ;;  %6303 = vadd.xlane.f32.xlu0 %v6302_v23  ;;  %v9065_v54 = vpop.f32.mrf.mxu0  ;;  %v15023_v48 = vld [vmem:[#allocation9_spill] sm:$0xff] }
 0xfc1   : > { %v9046_v12 = vpop.f32.mrf.mxu1  ;;  %v6305_v39 = vsel %vm784_vm1, %v13819_v11, 0.0  ;;  %v13839_v28 = vadd.f32 %v9065_v54, %v13298_v38  ;;  %v6311_v7 = vsel %vm784_vm1, %v13831_v14, 0.0 }
 0xfc2   : > { %9074 = vmatprep.mubr.msk.bf16.mxu0 %vm1673_vm2, %v6039_v44  ;;  %6306 = vadd.xlane.f32.xlu1 %v6305_v39  ;;  %v6151_v0 = vpop.f32.mrf.mxu0 }
 0xfc3   : > { %v5984_v10 = vpop.f32.mrf.mxu1  ;;  %9075 = vmatmul.mubr.msk.bf16.gmra.mxu0 %vm1673_vm2, %v6040_v50  ;;  %v13845_v59 = vadd.f32 %v6151_v0, %v5104_v29  ;;  %v6314_v38 = vsel %vm784_vm1, %v13839_v28, 0.0  ;;  %v15026_v50 = vld [vmem:[#allocation11_spill] sm:$0xff] }
 0xfc4   : > { %6297 = vadd.xlane.f32.xlu0 %v6296_v33  ;;  %v15028_v33 = vld [vmem:[#allocation13_spill] sm:$0xff] }
 0xfc5   : > { %v9047_v13 = vpop.f32.mrf.mxu1  ;;  %v6308_v55 = vsel %vm784_vm1, %v13845_v59, 0.0 }
 0xfc6   : > { %v6042_v45 = vpack.c.bf16 %v9047_v13, %v9046_v12 }
 0xfc7   : > { %v5987_v19 = vpop.f32.mrf.mxu1 }
 0xfc8   : > { %v6041_v46 = vpack.c.bf16 %v5987_v19, %v5984_v10  ;;  %6312 = vadd.xlane.f32.xlu0 %v6311_v7 }
 0xfc9   : > { %v9050_v17 = vpop.f32.mrf.mxu1 }
 0xfca   : > { %9078 = vmatprep.mubr.msk.bf16.mxu0 %vm1673_vm2, %v6041_v46 }
 0xfcb   : > { %v6000_v18 = vpop.f32.mrf.mxu1  ;;  %9079 = vmatmul.mubr.msk.bf16.gmra.mxu0 %vm1673_vm2, %v6042_v45 }
 0xfcc   : > { %6315 = vadd.xlane.f32.xlu0 %v6314_v38  ;;  %v10137_v38 = vld [vmem:[%s14716_s14 + $0x88] sm:$0xff] }
 0xfcd   : > { %v9051_v21 = vpop.f32.mrf.mxu1 }
 0xfce   : > { %v6044_v31 = vpack.c.bf16 %v9051_v21, %v9050_v17  ;;  %v1570_v21 = vadd.f32 %v10137_v38, %v13797_v51  ;;  %v15050_v38 = vld [vmem:[#allocation54_spill] sm:$0xff] }
 0xfcf   : > { %v6003_v6 = vpop.f32.mrf.mxu1 }
 0xfd0   : > { %v6043_v8 = vpack.c.bf16 %v6003_v6, %v6000_v18  ;;  %6309 = vadd.xlane.f32.xlu0 %v6308_v55  ;;  %v15032_v55 = vld [vmem:[#allocation46_spill] sm:$0xff] }
 0xfd2   : > { %v9068_v40 = vpop.f32.mrf.mxu0  ;;  %9082 = vmatprep.mubr.msk.bf16.mxu1 %vm1673_vm2, %v6043_v8  ;;  %v2780_v8 = vadd.f32 %v15032_v55, %v1570_v21 }
 0xfd3   : > { %v13858_v5 = vadd.f32 %v9068_v40, %v13308_v60  ;;  %9083 = vmatmul.mubr.msk.bf16.vlgmr.msra.gmra.mxu1 %vm1673_vm2, %v6044_v31  ;;  %v15033_v40 = vld [vmem:[#allocation62_spill] sm:$0xff] }
 0xfd4   : > { %v6164_v1 = vpop.f32.mrf.mxu0  ;;  %v3956_v34 = vadd.f32 %v15033_v40, %v2780_v8 }
 0xfd5   : > { %v13862_v41 = vadd.f32 %v6164_v1, %v13312_v36  ;;  %v6323_v61 = vsel %vm784_vm1, %v13858_v5, 0.0  ;;  %v5108_v36 = vadd.f32 %v15021_v30, %v3948_v3 }
 0xfd6   : > { %6324 = vadd.xlane.f32.xlu0 %v6323_v61  ;;  %v9069_v16 = vpop.f32.mrf.mxu0  ;;  %v5116_v3 = vadd.f32 %v15036_v32, %v3956_v34  ;;  %v15053_v34 = vld [vmem:[#allocation53_spill] sm:$0xff]  ;;  %v15056_v32 = vld [vmem:[#allocation18_spill] sm:$0xff] }
 0xfd7   : > { %v13869_v62 = vadd.f32 %v9069_v16, %v13315_v47  ;;  %v6317_v60 = vsel %vm784_vm1, %v13862_v41, 0.0  ;;  %v1566_v47 = vadd.f32 %v10136_v9, %v13797_v51 }
 0xfd8   : > { %v6167_v53 = vpop.f32.mrf.mxu0 }
 0xfd9   : > { %v13874_v57 = vadd.f32 %v6167_v53, %v5108_v36  ;;  %v6326_v56 = vsel %vm784_vm1, %v13869_v62, 0.0  ;;  %v2776_v15 = vadd.f32 %v15022_v42, %v1566_v47  ;;  %v15040_v47 = vld [vmem:[#allocation50_spill] sm:$0xff] }
 0xfda   : > { %6318 = vadd.xlane.f32.xlu0 %v6317_v60  ;;  %v15037_v60 = vld [vmem:[#allocation15_spill] sm:$0xff] }
 0xfdb   : > { %v6320_v63 = vsel %vm784_vm1, %v13874_v57, 0.0  ;;  %v3952_v58 = vadd.f32 %v15025_v25, %v2776_v15 }
 0xfdd   : > { %v5112_v54 = vadd.f32 %v15028_v33, %v3952_v58  ;;  %v15043_v58 = vld [vmem:[#allocation63_spill] sm:$0xff] }
 0xfde   : > { %6327 = vadd.xlane.f32.xlu0 %v6326_v56  ;;  %v10139_v33 = vld [vmem:[%s14716_s14 + $0xc8] sm:$0xff] }
 0xfe2   : > { %6321 = vadd.xlane.f32.xlu0 %v6320_v63  ;;  %v9072_v37 = vpop.f32.mrf.mxu0  ;;  %v2784_v63 = vadd.f32 %v15040_v47, %v1574_v27 }
 0xfe3   : > { %v13886_v23 = vadd.f32 %v9072_v37, %v15023_v48  ;;  %v15041_v37 = vld [vmem:[#allocation17_spill] sm:$0xff] }
 0xfe4   : > { %v6180_v44 = vpop.f32.mrf.mxu0 }
 0xfe5   : > { %15024 = vst [vmem:[#allocation27_spill] sm:$0xff] %v13886_v23  ;;  %v13890_v12 = vadd.f32 %v6180_v44, %v15026_v50  ;;  %v6335_v39 = vsel %vm784_vm1, %v13886_v23, 0.0  ;;  %v3960_v50 = vadd.f32 %v15043_v58, %v2784_v63 }
 0xfe6   : > { %v9073_v10 = vpop.f32.mrf.mxu0  ;;  %6336 = vadd.xlane.f32.xlu1 %v6335_v39  ;;  %v15044_v39 = vld [vmem:[#allocation23_spill] sm:$0xff] }
 0xfe7   : > { %15027 = vst [vmem:[#allocation28_spill] sm:$0xff] %v13890_v12  ;;  %v6329_v4 = vsel %vm784_vm1, %v13890_v12, 0.0  ;;  %v13900_v24 = vadd.f32 %v9073_v10, %v15030_v35 }
 0xfe8   : > { %6330 = vadd.xlane.f32.xlu0 %v6329_v4  ;;  %v6183_v2 = vpop.f32.mrf.mxu0 }
 0xfe9   : > { %v13897_v13 = vadd.f32 %v6183_v2, %v5112_v54  ;;  %15031 = vst [vmem:[#allocation32_spill] sm:$0xff] %v13900_v24  ;;  %v6338_v46 = vsel %vm784_vm1, %v13900_v24, 0.0  ;;  %v1578_v54 = vadd.f32 %v10139_v33, %v13797_v51  ;;  %v15046_v2 = vld [vmem:[#allocation25_spill] sm:$0xff] }
 0xfea   : > { %v5120_v35 = vadd.f32 %v15046_v2, %v3960_v50  ;;  %v10140_v2 = vld [vmem:[%s14716_s14 + $0xe8] sm:$0xff] }
 0xfeb   : > { %15029 = vst [vmem:[#allocation31_spill] sm:$0xff] %v13897_v13  ;;  %v6332_v19 = vsel %vm784_vm1, %v13897_v13, 0.0  ;;  %v9054_v7 = vpop.f32.mrf.mxu1  ;;  %v2788_v21 = vadd.f32 %v15050_v38, %v1578_v54 }
 0xfec   : > { %6333 = vadd.xlane.f32.xlu0 %v6332_v19  ;;  %v15047_v19 = vld [vmem:[#allocation19_spill] sm:$0xff] }
 0xfed   : > { %v6016_v0 = vpop.f32.mrf.mxu1 }
 0xfef   : > { %v9055_v29 = vpop.f32.mrf.mxu1 }
 0xff0   : > { %6339 = vadd.xlane.f32.xlu0 %v6338_v46  ;;  %v6046_v18 = vpack.c.bf16 %v9055_v29, %v9054_v7 }
 0xff1   : > { %v6019_v45 = vpop.f32.mrf.mxu1 }
 0xff2   : > { %v6045_v17 = vpack.c.bf16 %v6019_v45, %v6016_v0 }
 0xff4   : > { %9086 = vmatprep.mubr.msk.bf16.mxu1 %vm1673_vm2, %v6045_v17 }
 0xff5   : > { %9087 = vmatmul.mubr.msk.bf16.gmra.mxu1 %vm1673_vm2, %v6046_v18 }
0x1041   : > { %v13917_v61 = vpop.xlane.xlu0 %6300 }
0x1045   : > { %v6295_v44 = vpop.xlane.xlu0 %6294 }
0x1049   : > { %v6304_v17 = vpop.xlane.xlu0 %6303 }
0x104d   : > { %v6298_v47 = vpop.xlane.xlu0 %6297 }
0x1051   : > { %v6313_v50 = vpop.xlane.xlu0 %6312 }
0x1055   : > { %v6316_v33 = vpop.xlane.xlu0 %6315 }
0x1059   : > { %v6310_v54 = vpop.xlane.xlu0 %6309 }
0x1083   : > { %v9076_v6 = vpop.f32.mrf.mxu0 }
0x1084   : > { %v13925_v53 = vadd.f32 %v9076_v6, %v15037_v60  ;;  %v15051_v6 = vld [vmem:[#allocation6_spill] sm:$0xff]  ;;  %v15057_v60 = vld [vmem:[#allocation7_spill] sm:$0xff] }
0x1085   : > { %v6196_v31 = vpop.f32.mrf.mxu0 }
0x1086   : > { %v13915_v1 = vadd.f32 %v6196_v31, %v15034_v49  ;;  %15038 = vst [vmem:[#allocation35_spill] sm:$0xff] %v13925_v53  ;;  %v6347_v15 = vsel %vm784_vm1, %v13925_v53, 0.0  ;;  %v3964_v49 = vadd.f32 %v15053_v34, %v2788_v21  ;;  %v15063_v21 = vld [vmem:[#allocation64_spill] sm:$0xff] }
0x1087   : > { %v9077_v16 = vpop.f32.mrf.mxu0 }
0x1088   : > { %15035 = vst [vmem:[#allocation33_spill] sm:$0xff] %v13915_v1  ;;  %v6341_v30 = vsel %vm784_vm1, %v13915_v1, 0.0  ;;  %v13933_v42 = vadd.f32 %v9077_v16, %v15041_v37  ;;  %v15054_v16 = vld [vmem:[#allocation10_spill] sm:$0xff] }
0x1089   : > { %6342 = vadd.xlane.f32.xlu1 %v6341_v30  ;;  %v6199_v36 = vpop.f32.mrf.mxu0 }
0x108a   : > { %v13929_v56 = vadd.f32 %v6199_v36, %v5116_v3  ;;  %15042 = vst [vmem:[#allocation37_spill] sm:$0xff] %v13933_v42  ;;  %v6350_v0 = vsel %vm784_vm1, %v13933_v42, 0.0  ;;  %v5124_v3 = vadd.f32 %v15056_v32, %v3964_v49  ;;  %v15067_v32 = vld [vmem:[#allocation22_spill] sm:$0xff] }
0x108b   : > { %v9080_v9 = vpop.f32.mrf.mxu0 }
0x108c   : > { %15039 = vst [vmem:[#allocation36_spill] sm:$0xff] %v13929_v56  ;;  %v6344_v48 = vsel %vm784_vm1, %v13929_v56, 0.0  ;;  %v13949_v7 = vadd.f32 %v9080_v9, %v15047_v19  ;;  %v6389_v19 = vmul.f32 0.03125, %v6295_v44  ;;  %v6390_v44 = vmul.f32 0.03125, %v6298_v47 }
0x108d   : > { %6348 = vadd.xlane.f32.xlu1 %v6347_v15  ;;  %6345 = vadd.xlane.f32.xlu0 %v6344_v48  ;;  %v6212_v25 = vpop.f32.mrf.mxu0  ;;  %v15060_v15 = vld [vmem:[#allocation12_spill] sm:$0xff] }
0x108e   : > { %v13941_v10 = vadd.f32 %v6212_v25, %v15044_v39  ;;  %15048 = vst [vmem:[#allocation40_spill] sm:$0xff] %v13949_v7  ;;  %v6359_v8 = vsel %vm784_vm1, %v13949_v7, 0.0  ;;  %v13999_v34 = vsub.f32 %v13804_v26, %v6389_v19  ;;  %v14015_v47 = vsub.f32 %v13816_v20, %v6390_v44 }
0x108f   : > { %v9081_v4 = vpop.f32.mrf.mxu0 }
0x1090   : > { %15045 = vst [vmem:[#allocation39_spill] sm:$0xff] %v13941_v10  ;;  %v6353_v46 = vsel %vm784_vm1, %v13941_v10, 0.0  ;;  %v13959_v55 = vadd.f32 %v9081_v4, %v15051_v6  ;;  %v6325_v4 = vpop.xlane.xlu0 %6324 }
0x1091   : > { %6351 = vadd.xlane.f32.xlu0 %v6350_v0  ;;  %6354 = vadd.xlane.f32.xlu1 %v6353_v46  ;;  %v6215_v29 = vpop.f32.mrf.mxu0  ;;  %v15062_v46 = vld [vmem:[#allocation58_spill] sm:$0xff] }
0x1092   : > { %v13955_v45 = vadd.f32 %v6215_v29, %v5120_v35  ;;  %15052 = vst [vmem:[#allocation43_spill] sm:$0xff] %v13959_v55  ;;  %v6362_v36 = vsel %vm784_vm1, %v13959_v55, 0.0  ;;  %v1582_v35 = vadd.f32 %v10140_v2, %v13797_v51  ;;  %v6307_v51 = vpop.xlane.xlu1 %6306 }
0x1093   : > { %v9084_v18 = vpop.f32.mrf.mxu1 }
0x1094   : > { %15049 = vst [vmem:[#allocation41_spill] sm:$0xff] %v13955_v45  ;;  %v6356_v31 = vsel %vm784_vm1, %v13955_v45, 0.0  ;;  %v13971_v30 = vadd.f32 %v9084_v18, %v15057_v60  ;;  %v2792_v29 = vadd.f32 %v15062_v46, %v1582_v35  ;;  %v6319_v18 = vpop.xlane.xlu0 %6318 }
0x1095   : > { %6360 = vadd.xlane.f32.xlu1 %v6359_v8  ;;  %6357 = vadd.xlane.f32.xlu0 %v6356_v31  ;;  %v6228_v40 = vpop.f32.mrf.mxu1  ;;  %v15064_v8 = vld [vmem:[#allocation24_spill] sm:$0xff] }
0x1096   : > { %v13967_v22 = vadd.f32 %v6228_v40, %v15054_v16  ;;  %15058 = vst [vmem:[#allocation45_spill] sm:$0xff] %v13971_v30  ;;  %v6371_v25 = vsel %vm784_vm1, %v13971_v30, 0.0  ;;  %v3968_v6 = vadd.f32 %v15063_v21, %v2792_v29  ;;  %v6391_v40 = vmul.f32 0.03125, %v13917_v61  ;;  %v15066_v16 = vld [vmem:[#allocation21_spill] sm:$0xff] }
0x1097   : > { %v9085_v27 = vpop.f32.mrf.mxu1  ;;  %v6394_v21 = vmul.f32 0.03125, %v6310_v54 }
0x1098   : > { %15055 = vst [vmem:[#allocation44_spill] sm:$0xff] %v13967_v22  ;;  %v6365_v9 = vsel %vm784_vm1, %v13967_v22, 0.0  ;;  %v13980_v48 = vadd.f32 %v9085_v27, %v15060_v15  ;;  %v5128_v27 = vadd.f32 %v15066_v16, %v3968_v6  ;;  %v14010_v61 = vsub.f32 %v13801_v43, %v6391_v40 }
0x1099   : > { %6363 = vadd.xlane.f32.xlu0 %v6362_v36  ;;  %6366 = vadd.xlane.f32.xlu1 %v6365_v9  ;;  %v6231_v63 = vpop.f32.mrf.mxu1  ;;  %v6393_v15 = vmul.f32 0.03125, %v6307_v51  ;;  %v14044_v54 = vsub.f32 %v13845_v59, %v6394_v21  ;;  %v6397_v51 = vmul.f32 0.03125, %v6319_v18 }
0x109a   : > { %v13977_v37 = vadd.f32 %v6231_v63, %v5124_v3  ;;  %15061 = vst [vmem:[#allocation48_spill] sm:$0xff] %v13980_v48  ;;  %v6374_v39 = vsel %vm784_vm1, %v13980_v48, 0.0  ;;  %v6392_v63 = vmul.f32 0.03125, %v6304_v17  ;;  %v6455_v29 = vmul.f32 %v14010_v61, %v14010_v61 }
0x109c   : > { %15059 = vst [vmem:[#allocation47_spill] sm:$0xff] %v13977_v37  ;;  %v6368_v58 = vsel %vm784_vm1, %v13977_v37, 0.0  ;;  %v14025_v17 = vsub.f32 %v13811_v52, %v6392_v63  ;;  %v6491_v16 = vsel %vm784_vm1, %v6455_v29, 0.0 }
0x109d   : > { %6372 = vadd.xlane.f32.xlu1 %v6371_v25  ;;  %6369 = vadd.xlane.f32.xlu0 %v6368_v58  ;;  %v6328_v25 = vpop.xlane.xlu0 %6327  ;;  %v6453_v58 = vmul.f32 %v13999_v34, %v13999_v34 }
0x109f   : > { %v6485_v46 = vsel %vm784_vm1, %v6453_v58, 0.0  ;;  %v14056_v58 = vsub.f32 %v13862_v41, %v6397_v51 }
0x10a1   : > { %6375 = vadd.xlane.f32.xlu0 %v6374_v39  ;;  %v15070_v39 = vld [vmem:[#allocation26_spill] sm:$0xff]  ;;  %v6322_v40 = vpop.xlane.xlu0 %6321 }
0x10a2   : > { %v6398_v18 = vmul.f32 0.03125, %v6322_v40 }
0x10a4   : > { %v14068_v21 = vsub.f32 %v13874_v57, %v6398_v18 }
0x10b5   : > { %v9088_v0 = vpop.f32.mrf.mxu1 }
0x10b6   : > { %v14003_v3 = vadd.f32 %v9088_v0, %v15067_v32  ;;  %v6395_v0 = vmul.f32 0.03125, %v6313_v50 }
0x10b7   : > { %v6244_v38 = vpop.f32.mrf.mxu1 }
0x10b8   : > { %v13995_v31 = vadd.f32 %v6244_v38, %v15064_v8  ;;  %15068 = vst [vmem:[#allocation51_spill] sm:$0xff] %v14003_v3  ;;  %v6383_v35 = vsel %vm784_vm1, %v14003_v3, 0.0  ;;  %v14031_v38 = vsub.f32 %v13819_v11, %v6393_v15  ;;  %v6454_v8 = vmul.f32 %v14015_v47, %v14015_v47 }
0x10b9   : > { %v9089_v49 = vpop.f32.mrf.mxu1  ;;  %v14038_v50 = vsub.f32 %v13831_v14, %v6395_v0 }
0x10ba   : > { %15065 = vst [vmem:[#allocation49_spill] sm:$0xff] %v13995_v31  ;;  %v6377_v60 = vsel %vm784_vm1, %v13995_v31, 0.0  ;;  %v14018_v2 = vadd.f32 %v9089_v49, %v15070_v39  ;;  %v6396_v49 = vmul.f32 0.03125, %v6316_v33  ;;  %v6488_v44 = vsel %vm784_vm1, %v6454_v8, 0.0 }
0x10bb   : > { %6378 = vadd.xlane.f32.xlu1 %v6377_v60  ;;  %v6247_v36 = vpop.f32.mrf.mxu1  ;;  %v6457_v32 = vmul.f32 %v14031_v38, %v14031_v38  ;;  %v6331_v60 = vpop.xlane.xlu0 %6330  ;;  %v6399_v33 = vmul.f32 0.03125, %v6325_v4  ;;  %v6459_v15 = vmul.f32 %v14038_v50, %v14038_v50  ;;  %v6400_v4 = vmul.f32 0.03125, %v6328_v25 }
0x10bc   : > { %v14007_v9 = vadd.f32 %v6247_v36, %v5128_v27  ;;  %15071 = vst [vmem:[#allocation55_spill] sm:$0xff] %v14018_v2  ;;  %v6386_v6 = vsel %vm784_vm1, %v14018_v2, 0.0  ;;  %v6456_v27 = vmul.f32 %v14025_v17, %v14025_v17  ;;  %v14050_v36 = vsub.f32 %v13839_v28, %v6396_v49 }
0x10bd   : > { %v6497_v39 = vsel %vm784_vm1, %v6457_v32, 0.0  ;;  %v6401_v8 = vmul.f32 0.03125, %v6331_v60  ;;  %v6461_v49 = vmul.f32 %v14056_v58, %v14056_v58  ;;  %v14074_v25 = vsub.f32 %v13869_v62, %v6400_v4 }
0x10be   : > { %15069 = vst [vmem:[#allocation52_spill] sm:$0xff] %v14007_v9  ;;  %v6380_v19 = vsel %vm784_vm1, %v14007_v9, 0.0  ;;  %v6494_v63 = vsel %vm784_vm1, %v6456_v27, 0.0  ;;  %v6460_v29 = vmul.f32 %v14050_v36, %v14050_v36 }
0x10bf   : > { %6384 = vadd.xlane.f32.xlu1 %v6383_v35  ;;  %6381 = vadd.xlane.f32.xlu0 %v6380_v19  ;;  %v6458_v35 = vmul.f32 %v14044_v54, %v14044_v54  ;;  %v14062_v19 = vsub.f32 %v13858_v5, %v6399_v33  ;;  %v6334_v0 = vpop.xlane.xlu0 %6333  ;;  %v6509_v60 = vsel %vm784_vm1, %v6461_v49, 0.0  ;;  %v6462_v33 = vmul.f32 %v14068_v21, %v14068_v21 }
0x10c0   : > { %v6506_v27 = vsel %vm784_vm1, %v6460_v29, 0.0  ;;  %v6402_v32 = vmul.f32 0.03125, %v6334_v0 }
0x10c1   : > { %v6500_v40 = vsel %vm784_vm1, %v6458_v35, 0.0  ;;  %v6463_v51 = vmul.f32 %v14062_v19, %v14062_v19  ;;  %v6512_v0 = vsel %vm784_vm1, %v6462_v33, 0.0  ;;  %v9283_v33 = vld [vmem:[%s10311_s28] sm:$0xff]  }
0x10c2   : > { %v14092_v35 = vsub.f32 %v13897_v13, %v6402_v32 }
0x10c3   : > { %6387 = vadd.xlane.f32.xlu0 %v6386_v6  ;;  %6486 = vadd.xlane.f32.xlu1 %v6485_v46  ;;  %v6503_v46 = vsel %vm784_vm1, %v6459_v15, 0.0  ;;  %v6337_v6 = vpop.xlane.xlu1 %6336  ;;  %v6515_v18 = vsel %vm784_vm1, %v6463_v51, 0.0 }
0x10c4   : > { %v6466_v49 = vmul.f32 %v14092_v35, %v14092_v35 }
0x10c7   : > { %6492 = vadd.xlane.f32.xlu1 %v6491_v16  ;;  %6489 = vadd.xlane.f32.xlu0 %v6488_v44  ;;  %v6403_v16 = vmul.f32 0.03125, %v6337_v6  ;;  %v14080_v44 = vsub.f32 %v13890_v12, %v6401_v8 }
0x10c9   : > { %v14086_v15 = vsub.f32 %v13886_v23, %v6403_v16 }
0x10cb   : > { %6498 = vadd.xlane.f32.xlu1 %v6497_v39  ;;  %6495 = vadd.xlane.f32.xlu0 %v6494_v63  ;;  %v6340_v63 = vpop.xlane.xlu0 %6339  ;;  %v6464_v39 = vmul.f32 %v14074_v25, %v14074_v25 }
0x10cc   : > { %v6404_v4 = vmul.f32 0.03125, %v6340_v63 }
0x10cd   : > { %v6518_v29 = vsel %vm784_vm1, %v6464_v39, 0.0 }
0x10ce   : > { %v14099_v6 = vsub.f32 %v13900_v24, %v6404_v4 }
0x10cf   : > { %6504 = vadd.xlane.f32.xlu1 %v6503_v46  ;;  %6501 = vadd.xlane.f32.xlu0 %v6500_v40  ;;  %v6465_v46 = vmul.f32 %v14080_v44, %v14080_v44  ;;  %v6467_v40 = vmul.f32 %v14086_v15, %v14086_v15 }
0x10d0   : > { %v6468_v51 = vmul.f32 %v14099_v6, %v14099_v6 }
0x10d1   : > { %v6521_v8 = vsel %vm784_vm1, %v6465_v46, 0.0  ;;  %v6527_v16 = vsel %vm784_vm1, %v6467_v40, 0.0 }
0x10d2   : > { %v6530_v32 = vsel %vm784_vm1, %v6468_v51, 0.0 }
0x10d3   : > { %6507 = vadd.xlane.f32.xlu0 %v6506_v27  ;;  %6510 = vadd.xlane.f32.xlu1 %v6509_v60  ;;  %v6524_v27 = vsel %vm784_vm1, %v6466_v49, 0.0  ;;  %v9282_v60 = vld [vmem:[%s10311_s28 + $0x8] sm:$0xff]  }
0x10d4   : > { %9090 = vmatprep.subr.bf16.mxu1 %v9282_v60 }
0x10d5   : > { %9091 = vmatpush3.bf16.msra.mxu1 %v9282_v60 }
0x10d6   : > { %9092 = vmatprep.subr.bf16.mxu1 %v9283_v33 }
0x10d7   : > { %6516 = vadd.xlane.f32.xlu1 %v6515_v18  ;;  %6513 = vadd.xlane.f32.xlu0 %v6512_v0 }
0x10d9   : > { %9093 = vmatpush3.bf16.msra.mxu1 %v9283_v33 }
0x10db   : > { %6519 = vadd.xlane.f32.xlu0 %v6518_v29  ;;  %6522 = vadd.xlane.f32.xlu1 %v6521_v8 }
0x10df   : > { %6528 = vadd.xlane.f32.xlu1 %v6527_v16  ;;  %6525 = vadd.xlane.f32.xlu0 %v6524_v27 }
0x10e3   : > { %6531 = vadd.xlane.f32.xlu0 %v6530_v32 }
0x1112   : > { %v6343_v63 = vpop.xlane.xlu1 %6342 }
0x1113   : > { %v6405_v18 = vmul.f32 0.03125, %v6343_v63 }
0x1115   : > { %v14114_v39 = vsub.f32 %v13915_v1, %v6405_v18 }
0x1116   : > { %v6349_v4 = vpop.xlane.xlu1 %6348  ;;  %v6346_v0 = vpop.xlane.xlu0 %6345 }
0x1117   : > { %v6407_v46 = vmul.f32 0.03125, %v6349_v4  ;;  %v6406_v29 = vmul.f32 0.03125, %v6346_v0  ;;  %v6469_v8 = vmul.f32 %v14114_v39, %v14114_v39 }
0x1119   : > { %v14119_v40 = vsub.f32 %v13925_v53, %v6407_v46  ;;  %v14122_v49 = vsub.f32 %v13929_v56, %v6406_v29  ;;  %v6533_v16 = vsel %vm784_vm1, %v6469_v8, 0.0 }
0x111a   : > { %v6355_v27 = vpop.xlane.xlu1 %6354  ;;  %6534 = vadd.xlane.f32.xlu1 %v6533_v16  ;;  %v6352_v51 = vpop.xlane.xlu0 %6351 }
0x111b   : > { %v6409_v32 = vmul.f32 0.03125, %v6355_v27  ;;  %v6408_v60 = vmul.f32 0.03125, %v6352_v51  ;;  %v6471_v33 = vmul.f32 %v14119_v40, %v14119_v40  ;;  %v6470_v63 = vmul.f32 %v14122_v49, %v14122_v49 }
0x111d   : > { %v14130_v18 = vsub.f32 %v13941_v10, %v6409_v32  ;;  %v14133_v4 = vsub.f32 %v13933_v42, %v6408_v60  ;;  %v6539_v0 = vsel %vm784_vm1, %v6471_v33, 0.0  ;;  %v6536_v46 = vsel %vm784_vm1, %v6470_v63, 0.0 }
0x111e   : > { %v6361_v29 = vpop.xlane.xlu1 %6360  ;;  %6540 = vadd.xlane.f32.xlu1 %v6539_v0  ;;  %6537 = vadd.xlane.f32.xlu0 %v6536_v46  ;;  %v6358_v8 = vpop.xlane.xlu0 %6357 }
0x111f   : > { %v6411_v16 = vmul.f32 0.03125, %v6361_v29  ;;  %v6410_v27 = vmul.f32 0.03125, %v6358_v8  ;;  %v6473_v51 = vmul.f32 %v14130_v18, %v14130_v18  ;;  %v6472_v32 = vmul.f32 %v14133_v4, %v14133_v4 }
0x1121   : > { %v14142_v10 = vsub.f32 %v13949_v7, %v6411_v16  ;;  %v14145_v60 = vsub.f32 %v13955_v45, %v6410_v27  ;;  %v6545_v33 = vsel %vm784_vm1, %v6473_v51, 0.0  ;;  %v6542_v63 = vsel %vm784_vm1, %v6472_v32, 0.0 }
0x1122   : > { %v6367_v0 = vpop.xlane.xlu1 %6366  ;;  %6546 = vadd.xlane.f32.xlu1 %v6545_v33  ;;  %6543 = vadd.xlane.f32.xlu0 %v6542_v63  ;;  %v6364_v46 = vpop.xlane.xlu0 %6363 }
0x1123   : > { %v6413_v29 = vmul.f32 0.03125, %v6367_v0  ;;  %v6412_v8 = vmul.f32 0.03125, %v6364_v46  ;;  %v6475_v56 = vmul.f32 %v14142_v10, %v14142_v10  ;;  %v6474_v16 = vmul.f32 %v14145_v60, %v14145_v60 }
0x1125   : > { %v14154_v7 = vsub.f32 %v13967_v22, %v6413_v29  ;;  %v14157_v27 = vsub.f32 %v13959_v55, %v6412_v8  ;;  %v6551_v51 = vsel %vm784_vm1, %v6475_v56, 0.0  ;;  %v6548_v32 = vsel %vm784_vm1, %v6474_v16, 0.0 }
0x1126   : > { %v6373_v33 = vpop.xlane.xlu1 %6372  ;;  %6552 = vadd.xlane.f32.xlu1 %v6551_v51  ;;  %6549 = vadd.xlane.f32.xlu0 %v6548_v32  ;;  %v6370_v63 = vpop.xlane.xlu0 %6369 }
0x1127   : > { %v6415_v0 = vmul.f32 0.03125, %v6373_v33  ;;  %v6414_v46 = vmul.f32 0.03125, %v6370_v63  ;;  %v6477_v45 = vmul.f32 %v14154_v7, %v14154_v7  ;;  %v6476_v29 = vmul.f32 %v14157_v27, %v14157_v27 }
0x1129   : > { %v14166_v22 = vsub.f32 %v13971_v30, %v6415_v0  ;;  %v14169_v8 = vsub.f32 %v13977_v37, %v6414_v46  ;;  %v6557_v56 = vsel %vm784_vm1, %v6477_v45, 0.0  ;;  %v6554_v16 = vsel %vm784_vm1, %v6476_v29, 0.0 }
0x112a   : > { %6558 = vadd.xlane.f32.xlu1 %v6557_v56  ;;  %6555 = vadd.xlane.f32.xlu0 %v6554_v16  ;;  %v6376_v51 = vpop.xlane.xlu0 %6375 }
0x112b   : > { %v6416_v32 = vmul.f32 0.03125, %v6376_v51  ;;  %v6479_v33 = vmul.f32 %v14166_v22, %v14166_v22  ;;  %v6478_v63 = vmul.f32 %v14169_v8, %v14169_v8 }
0x112d   : > { %v14178_v0 = vsub.f32 %v13980_v48, %v6416_v32  ;;  %v6563_v46 = vsel %vm784_vm1, %v6479_v33, 0.0  ;;  %v6560_v37 = vsel %vm784_vm1, %v6478_v63, 0.0 }
0x112e   : > { %6564 = vadd.xlane.f32.xlu1 %v6563_v46  ;;  %6561 = vadd.xlane.f32.xlu0 %v6560_v37 }
0x112f   : > { %v6480_v45 = vmul.f32 %v14178_v0, %v14178_v0 }
0x1131   : > { %v6566_v29 = vsel %vm784_vm1, %v6480_v45, 0.0 }
0x1132   : > { %6567 = vadd.xlane.f32.xlu0 %v6566_v29 }
0x1144   : > { %v6379_v56 = vpop.xlane.xlu1 %6378 }
0x1145   : > { %v6417_v16 = vmul.f32 0.03125, %v6379_v56 }
0x1147   : > { %v14186_v51 = vsub.f32 %v13995_v31, %v6417_v16 }
0x1148   : > { %v6385_v30 = vpop.xlane.xlu1 %6384  ;;  %v6382_v32 = vpop.xlane.xlu0 %6381 }
0x1149   : > { %v6419_v48 = vmul.f32 0.03125, %v6385_v30  ;;  %v6418_v55 = vmul.f32 0.03125, %v6382_v32  ;;  %v6481_v33 = vmul.f32 %v14186_v51, %v14186_v51 }
0x114b   : > { %v14191_v37 = vsub.f32 %v14003_v3, %v6419_v48  ;;  %v14194_v63 = vsub.f32 %v14007_v9, %v6418_v55  ;;  %v6569_v46 = vsel %vm784_vm1, %v6481_v33, 0.0 }
0x114c   : > { %v6487_v45 = vpop.xlane.xlu1 %6486  ;;  %6570 = vadd.xlane.f32.xlu1 %v6569_v46  ;;  %v6388_v29 = vpop.xlane.xlu0 %6387 }
0x114d   : > { %v6581_v56 = vmul.f32 0.03125, %v6487_v45  ;;  %v6420_v16 = vmul.f32 0.03125, %v6388_v29  ;;  %v6483_v30 = vmul.f32 %v14191_v37, %v14191_v37  ;;  %v6482_v32 = vmul.f32 %v14194_v63, %v14194_v63 }
0x114f   : > { %v6613_v31 = vadd.f32 1e-05, %v6581_v56  ;;  %v14202_v48 = vsub.f32 %v14018_v2, %v6420_v16  ;;  %v6575_v55 = vsel %vm784_vm1, %v6483_v30, 0.0  ;;  %v6572_v9 = vsel %vm784_vm1, %v6482_v32, 0.0 }
0x1150   : > { %v6493_v33 = vpop.xlane.xlu1 %6492  ;;  %6576 = vadd.xlane.f32.xlu1 %v6575_v55  ;;  %6573 = vadd.xlane.f32.xlu0 %v6572_v9  ;;  %v6490_v46 = vpop.xlane.xlu0 %6489 }
0x1151   : > { %9868 = vrsqrt.f32 %v6613_v31  ;;  %v6583_v45 = vmul.f32 0.03125, %v6493_v33  ;;  %v6582_v29 = vmul.f32 0.03125, %v6490_v46  ;;  %v6484_v3 = vmul.f32 %v14202_v48, %v14202_v48 }
0x1153   : > { %v6615_v42 = vadd.f32 1e-05, %v6583_v45  ;;  %v6614_v1 = vadd.f32 1e-05, %v6582_v29  ;;  %v6578_v56 = vsel %vm784_vm1, %v6484_v3, 0.0 }
0x1154   : > { %v6499_v16 = vpop.xlane.xlu1 %6498  ;;  %6579 = vadd.xlane.f32.xlu0 %v6578_v56  ;;  %v6496_v2 = vpop.xlane.xlu0 %6495 }
0x1155   : > { %9870 = vrsqrt.f32 %v6615_v42  ;;  %v6585_v30 = vmul.f32 0.03125, %v6499_v16  ;;  %v6584_v32 = vmul.f32 0.03125, %v6496_v2 }
0x1156   : > { %9872 = vrsqrt.f32 %v6614_v1 }
0x1157   : > { %v6617_v55 = vadd.f32 1e-05, %v6585_v30  ;;  %v6616_v9 = vadd.f32 1e-05, %v6584_v32 }
0x1158   : > { %v6505_v53 = vpop.xlane.xlu1 %6504  ;;  %v6502_v31 = vpop.xlane.xlu0 %6501 }
0x1159   : > { %9874 = vrsqrt.f32 %v6617_v55  ;;  %v6587_v33 = vmul.f32 0.03125, %v6505_v53  ;;  %v6586_v46 = vmul.f32 0.03125, %v6502_v31  ;;  %v14215_v53 = vld [vmem:[%s653_s3] ss:$0 sm:$0xff] }
0x115a   : > { %9876 = vrsqrt.f32 %v6616_v9 }
0x115b   : > { %v6619_v45 = vadd.f32 1e-05, %v6587_v33  ;;  %v6618_v29 = vadd.f32 1e-05, %v6586_v46 }
0x115c   : > { %v6511_v13 = vpop.xlane.xlu1 %6510  ;;  %v6508_v3 = vpop.xlane.xlu0 %6507 }
0x115d   : > { %9878 = vrsqrt.f32 %v6619_v45  ;;  %v6589_v56 = vmul.f32 0.03125, %v6511_v13  ;;  %v6588_v24 = vmul.f32 0.03125, %v6508_v3 }
0x115e   : > { %v9869_v42 = vpop.eup %9868  ;;  %9880 = vrsqrt.f32 %v6618_v29 }
0x115f   : > { %v6621_v2 = vadd.f32 1e-05, %v6589_v56  ;;  %v6620_v1 = vadd.f32 1e-05, %v6588_v24  ;;  %v6677_v32 = vmul.f32 %v9869_v42, %v13999_v34  ;;  %v14225_v56 = vld [vmem:[%s656_s4] ss:$0 sm:$0xff] }
0x1160   : > { %v6517_v16 = vpop.xlane.xlu1 %6516  ;;  %v6514_v30 = vpop.xlane.xlu0 %6513 }
0x1161   : > { %9882 = vrsqrt.f32 %v6621_v2  ;;  %v6591_v55 = vmul.f32 0.03125, %v6517_v16  ;;  %v6590_v9 = vmul.f32 0.03125, %v6514_v30  ;;  %v6715_v3 = vmul.f32 %v14215_v53, %v6677_v32 }
0x1162   : > { %v9871_v13 = vpop.eup %9870  ;;  %9884 = vrsqrt.f32 %v6620_v1 }
0x1163   : > { %v9873_v31 = vpop.eup %9872  ;;  %v6679_v33 = vmul.f32 %v9871_v13, %v14010_v61  ;;  %v6623_v24 = vadd.f32 1e-05, %v6591_v55  ;;  %v6622_v46 = vadd.f32 1e-05, %v6590_v9 }
0x1164   : > { %v6523_v45 = vpop.xlane.xlu1 %6522  ;;  %v6520_v29 = vpop.xlane.xlu0 %6519  ;;  %v6678_v34 = vmul.f32 %v9873_v31, %v14015_v47  ;;  %v6753_v31 = vadd.f32 %v14225_v56, %v6715_v3 }
0x1165   : > { %9886 = vrsqrt.f32 %v6623_v24  ;;  %v6593_v42 = vmul.f32 0.03125, %v6523_v45  ;;  %v6592_v2 = vmul.f32 0.03125, %v6520_v29  ;;  %v6717_v30 = vmul.f32 %v14215_v53, %v6679_v33 }
0x1166   : > { %v9875_v1 = vpop.eup %9874  ;;  %9888 = vrsqrt.f32 %v6622_v46  ;;  %v6716_v61 = vmul.f32 %v14215_v53, %v6678_v34 }
0x1167   : > { %v9877_v16 = vpop.eup %9876  ;;  %v6625_v55 = vadd.f32 1e-05, %v6593_v42  ;;  %v6624_v47 = vadd.f32 1e-05, %v6592_v2  ;;  %v6681_v24 = vmul.f32 %v9875_v1, %v14031_v38  ;;  %v6755_v2 = vadd.f32 %v14225_v56, %v6717_v30 }
0x1168   : > { %v6680_v32 = vmul.f32 %v9877_v16, %v14025_v17  ;;  %v6529_v9 = vpop.xlane.xlu1 %6528  ;;  %v6526_v13 = vpop.xlane.xlu0 %6525  ;;  %v6754_v12 = vadd.f32 %v14225_v56, %v6716_v61 }
0x1169   : > { %9890 = vrsqrt.f32 %v6625_v55  ;;  %v6595_v45 = vmul.f32 0.03125, %v6529_v9  ;;  %v6594_v46 = vmul.f32 0.03125, %v6526_v13  ;;  %v6719_v61 = vmul.f32 %v14215_v53, %v6681_v24 }
0x116a   : > { %v9879_v29 = vpop.eup %9878  ;;  %v6718_v34 = vmul.f32 %v14215_v53, %v6680_v32  ;;  %9892 = vrsqrt.f32 %v6624_v47  ;;  %v6785_v33 = vpack.c.bf16 %v6754_v12, %v6753_v31 }
0x116b   : > { %v9881_v42 = vpop.eup %9880  ;;  %v6627_v17 = vadd.f32 1e-05, %v6595_v45  ;;  %v6626_v16 = vadd.f32 1e-05, %v6594_v46  ;;  %v6683_v3 = vmul.f32 %v9879_v29, %v14038_v50  ;;  %v6757_v31 = vadd.f32 %v14225_v56, %v6719_v61 }
0x116c   : > { %v6756_v23 = vadd.f32 %v14225_v56, %v6718_v34  ;;  %9094 = vmatprep.mubr.msk.bf16.mxu1 %vm784_vm1, %v6785_v33  ;;  %v6532_v38 = vpop.xlane.xlu0 %6531  ;;  %v6682_v1 = vmul.f32 %v9881_v42, %v14044_v54 }
0x116d   : > { %9894 = vrsqrt.f32 %v6627_v17  ;;  %v6596_v55 = vmul.f32 0.03125, %v6532_v38  ;;  %v6721_v24 = vmul.f32 %v14215_v53, %v6683_v3 }
0x116e   : > { %v9883_v47 = vpop.eup %9882  ;;  %v6786_v12 = vpack.c.bf16 %v6756_v23, %v6755_v2  ;;  %9896 = vrsqrt.f32 %v6626_v16  ;;  %v6720_v30 = vmul.f32 %v14215_v53, %v6682_v1 }
0x116f   : > { %v9885_v32 = vpop.eup %9884  ;;  %v6628_v9 = vadd.f32 1e-05, %v6596_v55  ;;  %v6685_v13 = vmul.f32 %v9883_v47, %v14056_v58 }
0x1170   : > { %v6684_v50 = vmul.f32 %v9885_v32, %v14050_v36  ;;  %9095 = vmatmul.mubr.msk.bf16.vlgmr.msra.gmra.mxu1 %vm784_vm1, %v6786_v12  ;;  %v6758_v54 = vadd.f32 %v14225_v56, %v6720_v30  ;;  %v6759_v36 = vadd.f32 %v14225_v56, %v6721_v24 }
0x1171   : > { %9898 = vrsqrt.f32 %v6628_v9  ;;  %v6723_v34 = vmul.f32 %v14215_v53, %v6685_v13 }
0x1172   : > { %v9887_v45 = vpop.eup %9886  ;;  %v6787_v23 = vpack.c.bf16 %v6758_v54, %v6757_v31  ;;  %v6722_v46 = vmul.f32 %v14215_v53, %v6684_v50 }
0x1173   : > { %v9889_v29 = vpop.eup %9888  ;;  %v6687_v58 = vmul.f32 %v9887_v45, %v14062_v19  ;;  %v6761_v38 = vadd.f32 %v14225_v56, %v6723_v34 }
0x1174   : > { %9098 = vmatprep.mubr.msk.bf16.mxu1 %vm784_vm1, %v6787_v23  ;;  %v6760_v33 = vadd.f32 %v14225_v56, %v6722_v46  ;;  %v6686_v42 = vmul.f32 %v9889_v29, %v14068_v21 }
0x1175   : > { %v6725_v61 = vmul.f32 %v14215_v53, %v6687_v58 }
0x1176   : > { %v9891_v2 = vpop.eup %9890  ;;  %v6788_v17 = vpack.c.bf16 %v6760_v33, %v6759_v36  ;;  %v6724_v16 = vmul.f32 %v14215_v53, %v6686_v42 }
0x1177   : > { %v9893_v3 = vpop.eup %9892  ;;  %v6689_v55 = vmul.f32 %v9891_v2, %v14080_v44  ;;  %v6763_v9 = vadd.f32 %v14225_v56, %v6725_v61 }
0x1178   : > { %v6688_v1 = vmul.f32 %v9893_v3, %v14074_v25  ;;  %9099 = vmatmul.mubr.msk.bf16.gmra.mxu1 %vm784_vm1, %v6788_v17  ;;  %v6762_v19 = vadd.f32 %v14225_v56, %v6724_v16 }
0x1179   : > { %v6727_v50 = vmul.f32 %v14215_v53, %v6689_v55 }
0x117a   : > { %v9895_v47 = vpop.eup %9894  ;;  %v6789_v12 = vpack.c.bf16 %v6762_v19, %v6761_v38  ;;  %v6726_v21 = vmul.f32 %v14215_v53, %v6688_v1 }
0x117b   : > { %v9897_v30 = vpop.eup %9896  ;;  %v6691_v32 = vmul.f32 %v9895_v47, %v14086_v15  ;;  %v6765_v15 = vadd.f32 %v14225_v56, %v6727_v50 }
0x117c   : > { %9102 = vmatprep.mubr.msk.bf16.mxu1 %vm784_vm1, %v6789_v12  ;;  %v6764_v25 = vadd.f32 %v14225_v56, %v6726_v21  ;;  %v6690_v13 = vmul.f32 %v9897_v30, %v14092_v35 }
0x117d   : > { %v6729_v45 = vmul.f32 %v14215_v53, %v6691_v32 }
0x117e   : > { %v9899_v31 = vpop.eup %9898  ;;  %v6790_v54 = vpack.c.bf16 %v6764_v25, %v6763_v9  ;;  %v6728_v44 = vmul.f32 %v14215_v53, %v6690_v13 }
0x117f   : > { %v6692_v24 = vmul.f32 %v9899_v31, %v14099_v6  ;;  %v6767_v35 = vadd.f32 %v14225_v56, %v6729_v45 }
0x1180   : > { %9103 = vmatmul.mubr.msk.bf16.gmra.mxu1 %vm784_vm1, %v6790_v54  ;;  %v6766_v23 = vadd.f32 %v14225_v56, %v6728_v44 }
0x1181   : > { %v6730_v46 = vmul.f32 %v14215_v53, %v6692_v24 }
0x1182   : > { %v6791_v29 = vpack.c.bf16 %v6766_v23, %v6765_v15 }
0x1183   : > { %v6768_v34 = vadd.f32 %v14225_v56, %v6730_v46 }
0x1184   : > { %9106 = vmatprep.mubr.msk.bf16.mxu1 %vm784_vm1, %v6791_v29 }
0x1185   : > { %v6792_v58 = vpack.c.bf16 %v6768_v34, %v6767_v35 }
0x1188   : > { %9107 = vmatmul.mubr.msk.bf16.gmra.mxu1 %vm784_vm1, %v6792_v58 }
0x11a3   : > { %v6535_v6 = vpop.xlane.xlu1 %6534 }
0x11a4   : > { %v6597_v36 = vmul.f32 0.03125, %v6535_v6 }
0x11a6   : > { %v6629_v33 = vadd.f32 1e-05, %v6597_v36 }
0x11a7   : > { %v6541_v42 = vpop.xlane.xlu1 %6540  ;;  %v6538_v2 = vpop.xlane.xlu0 %6537 }
0x11a8   : > { %9900 = vrsqrt.f32 %v6629_v33  ;;  %v6599_v17 = vmul.f32 0.03125, %v6541_v42  ;;  %v6598_v16 = vmul.f32 0.03125, %v6538_v2 }
0x11aa   : > { %v6631_v3 = vadd.f32 1e-05, %v6599_v17  ;;  %v6630_v38 = vadd.f32 1e-05, %v6598_v16 }
0x11ab   : > { %v6547_v1 = vpop.xlane.xlu1 %6546  ;;  %v6544_v19 = vpop.xlane.xlu0 %6543 }
0x11ac   : > { %9902 = vrsqrt.f32 %v6631_v3  ;;  %v6601_v61 = vmul.f32 0.03125, %v6547_v1  ;;  %v6600_v55 = vmul.f32 0.03125, %v6544_v19 }
0x11ad   : > { %9904 = vrsqrt.f32 %v6630_v38 }
0x11ae   : > { %v6633_v47 = vadd.f32 1e-05, %v6601_v61  ;;  %v6632_v12 = vadd.f32 1e-05, %v6600_v55 }
0x11af   : > { %v6553_v21 = vpop.xlane.xlu1 %6552  ;;  %v6550_v30 = vpop.xlane.xlu0 %6549 }
0x11b0   : > { %9906 = vrsqrt.f32 %v6633_v47  ;;  %v6603_v32 = vmul.f32 0.03125, %v6553_v21  ;;  %v6602_v9 = vmul.f32 0.03125, %v6550_v30 }
0x11b1   : > { %9908 = vrsqrt.f32 %v6632_v12  ;;  %v9284_v12 = vld [vmem:[%s10321_s22 + $0x38] sm:$0xff]  }
0x11b2   : > { %v6635_v25 = vadd.f32 1e-05, %v6603_v32  ;;  %v6634_v13 = vadd.f32 1e-05, %v6602_v9  ;;  %9126 = vmatprep.subr.bf16.mxu0 %v9284_v12 }
0x11b3   : > { %v6559_v50 = vpop.xlane.xlu1 %6558  ;;  %v6556_v31 = vpop.xlane.xlu0 %6555  ;;  %9127 = vmatpush3.bf16.msra.mxu0 %v9284_v12 }
0x11b4   : > { %9910 = vrsqrt.f32 %v6635_v25  ;;  %v6605_v54 = vmul.f32 0.03125, %v6559_v50  ;;  %v6604_v44 = vmul.f32 0.03125, %v6556_v31  ;;  %v9285_v31 = vld [vmem:[%s10321_s22 + $0x30] sm:$0xff]  }
0x11b5   : > { %v9901_v24 = vpop.eup %9900  ;;  %9912 = vrsqrt.f32 %v6634_v13  ;;  %9128 = vmatprep.subr.bf16.mxu0 %v9285_v31 }
0x11b6   : > { %v6637_v45 = vadd.f32 1e-05, %v6605_v54  ;;  %v6636_v15 = vadd.f32 1e-05, %v6604_v44  ;;  %v6693_v29 = vmul.f32 %v9901_v24, %v14114_v39 }
0x11b7   : > { %v6565_v23 = vpop.xlane.xlu1 %6564  ;;  %v6562_v46 = vpop.xlane.xlu0 %6561  ;;  %9129 = vmatpush3.bf16.msra.mxu0 %v9285_v31 }
0x11b8   : > { %9914 = vrsqrt.f32 %v6637_v45  ;;  %v6607_v35 = vmul.f32 0.03125, %v6565_v23  ;;  %v6606_v34 = vmul.f32 0.03125, %v6562_v46  ;;  %v6731_v16 = vmul.f32 %v14215_v53, %v6693_v29  ;;  %v9286_v29 = vld [vmem:[%s10321_s22 + $0x28] sm:$0xff]  }
0x11b9   : > { %v9903_v58 = vpop.eup %9902  ;;  %9916 = vrsqrt.f32 %v6636_v15  ;;  %9130 = vmatprep.subr.bf16.mxu0 %v9286_v29 }
0x11ba   : > { %v9905_v6 = vpop.eup %9904  ;;  %v6639_v36 = vadd.f32 1e-05, %v6607_v35  ;;  %v6638_v33 = vadd.f32 1e-05, %v6606_v34  ;;  %v6695_v42 = vmul.f32 %v9903_v58, %v14119_v40  ;;  %v6769_v40 = vadd.f32 %v14225_v56, %v6731_v16 }
0x11bb   : > { %v6568_v2 = vpop.xlane.xlu0 %6567  ;;  %v6694_v17 = vmul.f32 %v9905_v6, %v14122_v49  ;;  %9131 = vmatpush3.bf16.msra.mxu0 %v9286_v29 }
0x11bc   : > { %9918 = vrsqrt.f32 %v6639_v36  ;;  %v6608_v3 = vmul.f32 0.03125, %v6568_v2  ;;  %v6733_v49 = vmul.f32 %v14215_v53, %v6695_v42  ;;  %v9287_v2 = vld [vmem:[%s10321_s22 + $0x20] sm:$0xff]  }
0x11bd   : > { %v9907_v38 = vpop.eup %9906  ;;  %9920 = vrsqrt.f32 %v6638_v33  ;;  %v6732_v39 = vmul.f32 %v14215_v53, %v6694_v17  ;;  %9132 = vmatprep.subr.bf16.mxu0 %v9287_v2 }
0x11be   : > { %v9909_v1 = vpop.eup %9908  ;;  %v6640_v19 = vadd.f32 1e-05, %v6608_v3  ;;  %v6697_v61 = vmul.f32 %v9907_v38, %v14130_v18 }
0x11bf   : > { %v6696_v55 = vmul.f32 %v9909_v1, %v14133_v4  ;;  %v6770_v47 = vadd.f32 %v14225_v56, %v6732_v39  ;;  %v6771_v4 = vadd.f32 %v14225_v56, %v6733_v49  ;;  %9133 = vmatpush3.bf16.msra.mxu0 %v9287_v2 }
0x11c0   : > { %9922 = vrsqrt.f32 %v6640_v19  ;;  %v6735_v18 = vmul.f32 %v14215_v53, %v6697_v61  ;;  %v9288_v19 = vld [vmem:[%s10321_s22 + $0x18] sm:$0xff]  }
0x11c1   : > { %v9911_v21 = vpop.eup %9910  ;;  %v6793_v30 = vpack.c.bf16 %v6770_v47, %v6769_v40  ;;  %v6734_v32 = vmul.f32 %v14215_v53, %v6696_v55  ;;  %9134 = vmatprep.subr.bf16.mxu0 %v9288_v19  ;;  %v9289_v47 = vld [vmem:[%s10321_s22 + $0x10] sm:$0xff]  }
0x11c2   : > { %v9913_v9 = vpop.eup %9912  ;;  %v6699_v25 = vmul.f32 %v9911_v21, %v14142_v10  ;;  %v6773_v10 = vadd.f32 %v14225_v56, %v6735_v18 }
0x11c3   : > { %9110 = vmatprep.mubr.msk.bf16.mxu1 %vm784_vm1, %v6793_v30  ;;  %v6772_v13 = vadd.f32 %v14225_v56, %v6734_v32  ;;  %v6698_v50 = vmul.f32 %v9913_v9, %v14145_v60  ;;  %9135 = vmatpush3.bf16.msra.mxu0 %v9288_v19  ;;  %v9290_v30 = vld [vmem:[%s10321_s22 + $0x8] sm:$0xff]  }
0x11c4   : > { %v6737_v15 = vmul.f32 %v14215_v53, %v6699_v25  ;;  %9136 = vmatprep.subr.bf16.mxu0 %v9289_v47 }
0x11c5   : > { %v9915_v54 = vpop.eup %9914  ;;  %v6794_v44 = vpack.c.bf16 %v6772_v13, %v6771_v4  ;;  %v6736_v24 = vmul.f32 %v14215_v53, %v6698_v50  ;;  %v9291_v50 = vld [vmem:[%s10321_s22] sm:$0xff]  }
0x11c6   : > { %v9917_v45 = vpop.eup %9916  ;;  %v6701_v60 = vmul.f32 %v9915_v54, %v14154_v7  ;;  %v6775_v33 = vadd.f32 %v14225_v56, %v6737_v15 }
0x11c7   : > { %v6700_v23 = vmul.f32 %v9917_v45, %v14157_v27  ;;  %9111 = vmatmul.mubr.msk.bf16.gmra.mxu1 %vm784_vm1, %v6794_v44  ;;  %v6774_v46 = vadd.f32 %v14225_v56, %v6736_v24  ;;  %9137 = vmatpush3.bf16.msra.mxu0 %v9289_v47 }
0x11c8   : > { %v6739_v7 = vmul.f32 %v14215_v53, %v6701_v60  ;;  %9138 = vmatprep.subr.bf16.mxu0 %v9290_v30 }
0x11c9   : > { %v9919_v35 = vpop.eup %9918  ;;  %v6795_v34 = vpack.c.bf16 %v6774_v46, %v6773_v10  ;;  %v6738_v58 = vmul.f32 %v14215_v53, %v6700_v23 }
0x11ca   : > { %v9921_v6 = vpop.eup %9920  ;;  %v6703_v36 = vmul.f32 %v9919_v35, %v14166_v22  ;;  %v6777_v39 = vadd.f32 %v14225_v56, %v6739_v7 }
0x11cb   : > { %9114 = vmatprep.mubr.msk.bf16.mxu1 %vm784_vm1, %v6795_v34  ;;  %v6776_v27 = vadd.f32 %v14225_v56, %v6738_v58  ;;  %v6702_v42 = vmul.f32 %v9921_v6, %v14169_v8  ;;  %9139 = vmatpush3.bf16.msra.mxu0 %v9290_v30 }
0x11cc   : > { %v6741_v38 = vmul.f32 %v14215_v53, %v6703_v36  ;;  %9140 = vmatprep.subr.bf16.mxu0 %v9291_v50 }
0x11cd   : > { %v9923_v17 = vpop.eup %9922  ;;  %v6796_v16 = vpack.c.bf16 %v6776_v27, %v6775_v33  ;;  %v6740_v3 = vmul.f32 %v14215_v53, %v6702_v42 }
0x11ce   : > { %v6704_v22 = vmul.f32 %v9923_v17, %v14178_v0  ;;  %v6779_v55 = vadd.f32 %v14225_v56, %v6741_v38 }
0x11cf   : > { %9115 = vmatmul.mubr.msk.bf16.gmra.mxu1 %vm784_vm1, %v6796_v16  ;;  %v6778_v8 = vadd.f32 %v14225_v56, %v6740_v3  ;;  %9141 = vmatpush3.bf16.msra.mxu0 %v9291_v50 }
0x11d0   : > { %v6742_v1 = vmul.f32 %v14215_v53, %v6704_v22 }
0x11d1   : > { %v6797_v61 = vpack.c.bf16 %v6778_v8, %v6777_v39 }
0x11d2   : > { %v6780_v0 = vadd.f32 %v14225_v56, %v6742_v1 }
0x11d3   : > { %9118 = vmatprep.mubr.msk.bf16.mxu1 %vm784_vm1, %v6797_v61 }
0x11d4   : > { %v6798_v40 = vpack.c.bf16 %v6780_v0, %v6779_v55 }
0x11d5   : > { %v6571_v49 = vpop.xlane.xlu1 %6570 }
0x11d6   : > { %v6609_v12 = vmul.f32 0.03125, %v6571_v49 }
0x11d7   : > { %9119 = vmatmul.mubr.msk.bf16.gmra.mxu1 %vm784_vm1, %v6798_v40 }
0x11d8   : > { %v6641_v21 = vadd.f32 1e-05, %v6609_v12 }
0x11d9   : > { %v6577_v32 = vpop.xlane.xlu1 %6576  ;;  %v6574_v9 = vpop.xlane.xlu0 %6573 }
0x11da   : > { %9924 = vrsqrt.f32 %v6641_v21  ;;  %v6611_v25 = vmul.f32 0.03125, %v6577_v32  ;;  %v6610_v18 = vmul.f32 0.03125, %v6574_v9 }
0x11dc   : > { %v6643_v4 = vadd.f32 1e-05, %v6611_v25  ;;  %v6642_v13 = vadd.f32 1e-05, %v6610_v18 }
0x11dd   : > { %v6580_v31 = vpop.xlane.xlu0 %6579 }
0x11de   : > { %9926 = vrsqrt.f32 %v6643_v4  ;;  %v6612_v54 = vmul.f32 0.03125, %v6580_v31 }
0x11df   : > { %9928 = vrsqrt.f32 %v6642_v13 }
0x11e0   : > { %v6644_v44 = vadd.f32 1e-05, %v6612_v54 }
0x11e2   : > { %9930 = vrsqrt.f32 %v6644_v44 }
0x11e7   : > { %v9925_v24 = vpop.eup %9924 }
0x11e8   : > { %v6705_v45 = vmul.f32 %v9925_v24, %v14186_v51 }
0x11ea   : > { %v6743_v60 = vmul.f32 %v14215_v53, %v6705_v45 }
0x11eb   : > { %v9927_v10 = vpop.eup %9926 }
0x11ec   : > { %v9929_v15 = vpop.eup %9928  ;;  %v6707_v23 = vmul.f32 %v9927_v10, %v14191_v37  ;;  %v6781_v6 = vadd.f32 %v14225_v56, %v6743_v60 }
0x11ed   : > { %v6706_v46 = vmul.f32 %v9929_v15, %v14194_v63 }
0x11ee   : > { %v6745_v58 = vmul.f32 %v14215_v53, %v6707_v23 }
0x11ef   : > { %v9931_v29 = vpop.eup %9930  ;;  %v6744_v35 = vmul.f32 %v14215_v53, %v6706_v46 }
0x11f0   : > { %v6708_v34 = vmul.f32 %v9931_v29, %v14202_v48  ;;  %v6783_v37 = vadd.f32 %v14225_v56, %v6745_v58  ;;  %v14348_v48 = vld [vmem:[%s664_s15] ss:$0 sm:$0xff] }
0x11f1   : > { %v6782_v51 = vadd.f32 %v14225_v56, %v6744_v35 }
0x11f2   : > { %v6746_v36 = vmul.f32 %v14215_v53, %v6708_v34 }
0x11f3   : > { %v6799_v33 = vpack.c.bf16 %v6782_v51, %v6781_v6 }
0x11f4   : > { %v6784_v63 = vadd.f32 %v14225_v56, %v6746_v36 }
0x11f5   : > { %9122 = vmatprep.mubr.msk.bf16.mxu1 %vm784_vm1, %v6799_v33 }
0x11f6   : > { %v6800_v27 = vpack.c.bf16 %v6784_v63, %v6783_v37 }
0x11f8   : > { %9123 = vmatmul.mubr.msk.bf16.gmra.mxu1 %vm784_vm1, %v6800_v27 }
0x1230   : > { %v9096_v42 = vpop.f32.mrf.mxu1 }
0x1231   : > { %v14351_v7 = vadd.f32 %v9096_v42, %v14348_v48 }
0x1232   : > { %v6906_v53 = vpop.f32.mrf.mxu1 }
0x1233   : > { %v7975_v2 = vmul.f32 -1.702, %v14351_v7  ;;  %v14355_v56 = vadd.f32 %v14348_v48, %v6906_v53 }
0x1234   : > { %v9097_v17 = vpop.f32.mrf.mxu1 }
0x1235   : > { %v7101_v16 = vmul.f32 1.442695, %v7975_v2  ;;  %v7973_v3 = vmul.f32 -1.702, %v14355_v56  ;;  %v14359_v22 = vadd.f32 %v9097_v17, %v14348_v48 }
0x1236   : > { %v6909_v38 = vpop.f32.mrf.mxu1 }
0x1237   : > { %9932 = vpow2.f32 %v7101_v16  ;;  %v7097_v39 = vmul.f32 1.442695, %v7973_v3  ;;  %v7976_v8 = vmul.f32 -1.702, %v14359_v22  ;;  %v14363_v1 = vadd.f32 %v14348_v48, %v6909_v38 }
0x1238   : > { %v9100_v19 = vpop.f32.mrf.mxu1 }
0x1239   : > { %9934 = vpow2.f32 %v7097_v39  ;;  %v7103_v61 = vmul.f32 1.442695, %v7976_v8  ;;  %v7974_v55 = vmul.f32 -1.702, %v14363_v1  ;;  %v14367_v0 = vadd.f32 %v9100_v19, %v14348_v48 }
0x123a   : > { %v6922_v40 = vpop.f32.mrf.mxu1 }
0x123b   : > { %9936 = vpow2.f32 %v7103_v61  ;;  %v7099_v47 = vmul.f32 1.442695, %v7974_v55  ;;  %v7979_v49 = vmul.f32 -1.702, %v14367_v0  ;;  %v14371_v12 = vadd.f32 %v14348_v48, %v6922_v40 }
0x123c   : > { %v9101_v21 = vpop.f32.mrf.mxu1 }
0x123d   : > { %9938 = vpow2.f32 %v7099_v47  ;;  %v7109_v30 = vmul.f32 1.442695, %v7979_v49  ;;  %v7977_v32 = vmul.f32 -1.702, %v14371_v12  ;;  %v14375_v9 = vadd.f32 %v9101_v21, %v14348_v48 }
0x123e   : > { %v6925_v25 = vpop.f32.mrf.mxu1 }
0x123f   : > { %9940 = vpow2.f32 %v7109_v30  ;;  %v7105_v18 = vmul.f32 1.442695, %v7977_v32  ;;  %v7980_v4 = vmul.f32 -1.702, %v14375_v9  ;;  %v14379_v13 = vadd.f32 %v14348_v48, %v6925_v25 }
0x1240   : > { %v9104_v50 = vpop.f32.mrf.mxu1 }
0x1241   : > { %9942 = vpow2.f32 %v7105_v18  ;;  %v7111_v31 = vmul.f32 1.442695, %v7980_v4  ;;  %v7978_v54 = vmul.f32 -1.702, %v14379_v13  ;;  %v14383_v44 = vadd.f32 %v9104_v50, %v14348_v48 }
0x1242   : > { %v6938_v24 = vpop.f32.mrf.mxu1 }
0x1243   : > { %9944 = vpow2.f32 %v7111_v31  ;;  %v7107_v45 = vmul.f32 1.442695, %v7978_v54  ;;  %v7983_v10 = vmul.f32 -1.702, %v14383_v44  ;;  %v14387_v15 = vadd.f32 %v14348_v48, %v6938_v24 }
0x1244   : > { %v9933_v23 = vpop.eup %9932  ;;  %v9105_v46 = vpop.f32.mrf.mxu1 }
0x1245   : > { %v7163_v60 = vadd.f32 1.0, %v9933_v23  ;;  %9946 = vpow2.f32 %v7107_v45  ;;  %v7117_v29 = vmul.f32 1.442695, %v7983_v10  ;;  %v7981_v35 = vmul.f32 -1.702, %v14387_v15 }
0x1246   : > { %v9935_v34 = vpop.eup %9934  ;;  %v14391_v58 = vadd.f32 %v9105_v46, %v14348_v48  ;;  %v6941_v6 = vpop.f32.mrf.mxu1 }
0x1247   : > { %9948 = vrcp.f32 %v7163_v60  ;;  %v7161_v51 = vadd.f32 1.0, %v9935_v34  ;;  %v7113_v36 = vmul.f32 1.442695, %v7981_v35  ;;  %v14394_v33 = vadd.f32 %v14348_v48, %v6941_v6 }
0x1248   : > { %v9937_v37 = vpop.eup %9936  ;;  %9950 = vpow2.f32 %v7117_v29  ;;  %v7984_v63 = vmul.f32 -1.702, %v14391_v58  ;;  %v9108_v27 = vpop.f32.mrf.mxu1 }
0x1249   : > { %9952 = vrcp.f32 %v7161_v51  ;;  %v7164_v42 = vadd.f32 1.0, %v9937_v37  ;;  %v7982_v53 = vmul.f32 -1.702, %v14394_v33  ;;  %v14399_v2 = vadd.f32 %v9108_v27, %v14348_v48 }
0x124a   : > { %v9939_v17 = vpop.eup %9938  ;;  %9954 = vpow2.f32 %v7113_v36  ;;  %v7119_v16 = vmul.f32 1.442695, %v7984_v63  ;;  %v6954_v3 = vpop.f32.mrf.mxu1 }
0x124b   : > { %9956 = vrcp.f32 %v7164_v42  ;;  %v7162_v38 = vadd.f32 1.0, %v9939_v17  ;;  %v7115_v39 = vmul.f32 1.442695, %v7982_v53  ;;  %v7987_v8 = vmul.f32 -1.702, %v14399_v2 }
0x124c   : > { %v9941_v19 = vpop.eup %9940  ;;  %9958 = vpow2.f32 %v7119_v16  ;;  %v14403_v61 = vadd.f32 %v14348_v48, %v6954_v3  ;;  %v9109_v55 = vpop.f32.mrf.mxu1 }
0x124d   : > { %9960 = vrcp.f32 %v7162_v38  ;;  %v7167_v40 = vadd.f32 1.0, %v9941_v19  ;;  %v7125_v47 = vmul.f32 1.442695, %v7987_v8  ;;  %v14406_v49 = vadd.f32 %v9109_v55, %v14348_v48 }
0x124e   : > { %v9943_v21 = vpop.eup %9942  ;;  %9962 = vpow2.f32 %v7115_v39  ;;  %v7985_v30 = vmul.f32 -1.702, %v14403_v61  ;;  %v6957_v32 = vpop.f32.mrf.mxu1 }
0x124f   : > { %9964 = vrcp.f32 %v7167_v40  ;;  %v7165_v25 = vadd.f32 1.0, %v9943_v21  ;;  %v7988_v18 = vmul.f32 -1.702, %v14406_v49  ;;  %v14411_v4 = vadd.f32 %v14348_v48, %v6957_v32 }
0x1250   : > { %v9945_v50 = vpop.eup %9944  ;;  %9966 = vpow2.f32 %v7125_v47  ;;  %v7121_v31 = vmul.f32 1.442695, %v7985_v30 }
0x1251   : > { %9968 = vrcp.f32 %v7165_v25  ;;  %v7168_v54 = vadd.f32 1.0, %v9945_v50  ;;  %v7127_v24 = vmul.f32 1.442695, %v7988_v18  ;;  %v7986_v45 = vmul.f32 -1.702, %v14411_v4 }
0x1252   : > { %v9947_v10 = vpop.eup %9946  ;;  %9970 = vpow2.f32 %v7121_v31 }
0x1253   : > { %9972 = vrcp.f32 %v7168_v54  ;;  %v7166_v23 = vadd.f32 1.0, %v9947_v10  ;;  %v7123_v46 = vmul.f32 1.442695, %v7986_v45 }
0x1254   : > { %v9949_v60 = vpop.eup %9948  ;;  %9974 = vpow2.f32 %v7127_v24 }
0x1255   : > { %v9951_v29 = vpop.eup %9950  ;;  %9976 = vrcp.f32 %v7166_v23  ;;  %v7259_v38 = vmul.f32 %v9949_v60, %v14351_v7 }
0x1256   : > { %v9953_v35 = vpop.eup %9952  ;;  %9978 = vpow2.f32 %v7123_v46  ;;  %v7171_v37 = vadd.f32 1.0, %v9951_v29 }
0x1257   : > { %v9955_v34 = vpop.eup %9954  ;;  %v7257_v17 = vmul.f32 %v9953_v35, %v14355_v56 }
0x1258   : > { %v9957_v6 = vpop.eup %9956  ;;  %v7169_v51 = vadd.f32 1.0, %v9955_v34 }
0x1259   : > { %v9959_v36 = vpop.eup %9958  ;;  %v7260_v27 = vmul.f32 %v9957_v6, %v14359_v22 }
0x125a   : > { %v9961_v63 = vpop.eup %9960  ;;  %v7172_v42 = vadd.f32 1.0, %v9959_v36  ;;  %9980 = vrcp.f32 %v7169_v51 }
0x125b   : > { %v9963_v53 = vpop.eup %9962  ;;  %v7258_v16 = vmul.f32 %v9961_v63, %v14363_v1  ;;  %v7290_v40 = vpack.c.bf16 %v7260_v27, %v7259_v38 }
0x125c   : > { %v9965_v3 = vpop.eup %9964  ;;  %9982 = vrcp.f32 %v7172_v42  ;;  %v7170_v39 = vadd.f32 1.0, %v9963_v53 }
0x125d   : > { %v9967_v8 = vpop.eup %9966  ;;  %9984 = vrcp.f32 %v7171_v37  ;;  %v7289_v19 = vpack.c.bf16 %v7258_v16, %v7257_v17  ;;  %v7263_v31 = vmul.f32 %v9965_v3, %v14367_v0 }
0x125e   : > { %v9969_v55 = vpop.eup %9968  ;;  %9986 = vrcp.f32 %v7170_v39  ;;  %v7175_v30 = vadd.f32 1.0, %v9967_v8 }
0x125f   : > { %v9971_v47 = vpop.eup %9970  ;;  %9142 = vmatprep.mubr.bf16.mxu0 %v7289_v19  ;;  %v7261_v18 = vmul.f32 %v9969_v55, %v14371_v12 }
0x1260   : > { %v9973_v22 = vpop.eup %9972  ;;  %v7173_v21 = vadd.f32 1.0, %v9971_v47  ;;  %9143 = vmatmul.mubr.bf16.vlgmr.msra.gmra.mxu0 %v7290_v40 }
0x1261   : > { %v9975_v56 = vpop.eup %9974  ;;  %v7264_v32 = vmul.f32 %v9973_v22, %v14375_v9 }
0x1262   : > { %v9977_v1 = vpop.eup %9976  ;;  %v7176_v25 = vadd.f32 1.0, %v9975_v56  ;;  %9988 = vrcp.f32 %v7173_v21 }
0x1263   : > { %v9979_v7 = vpop.eup %9978  ;;  %v7262_v50 = vmul.f32 %v9977_v1, %v14379_v13  ;;  %v7292_v45 = vpack.c.bf16 %v7264_v32, %v7263_v31 }
0x1264   : > { %9990 = vrcp.f32 %v7176_v25  ;;  %v7174_v54 = vadd.f32 1.0, %v9979_v7 }
0x1265   : > { %9992 = vrcp.f32 %v7175_v30  ;;  %v7291_v24 = vpack.c.bf16 %v7262_v50, %v7261_v18 }
0x1266   : > { %9994 = vrcp.f32 %v7174_v54 }
0x1267   : > { %9146 = vmatprep.mubr.bf16.mxu0 %v7291_v24  ;;  %v9981_v10 = vpop.eup %9980 }
0x1268   : > { %9147 = vmatmul.mubr.bf16.gmra.mxu0 %v7292_v45  ;;  %v7265_v12 = vmul.f32 %v9981_v10, %v14387_v15 }
0x1269   : > { %v9983_v23 = vpop.eup %9982 }
0x126a   : > { %v9985_v9 = vpop.eup %9984  ;;  %v7268_v60 = vmul.f32 %v9983_v23, %v14391_v58 }
0x126b   : > { %v9987_v46 = vpop.eup %9986  ;;  %v7267_v0 = vmul.f32 %v9985_v9, %v14383_v44 }
0x126c   : > { %v7266_v13 = vmul.f32 %v9987_v46, %v14394_v33 }
0x126d   : > { %v7294_v35 = vpack.c.bf16 %v7268_v60, %v7267_v0 }
0x126e   : > { %v7293_v29 = vpack.c.bf16 %v7266_v13, %v7265_v12 }
0x126f   : > { %v9989_v34 = vpop.eup %9988 }
0x1270   : > { %9150 = vmatprep.mubr.bf16.mxu0 %v7293_v29  ;;  %v7269_v63 = vmul.f32 %v9989_v34, %v14403_v61 }
0x1271   : > { %v9991_v6 = vpop.eup %9990  ;;  %9151 = vmatmul.mubr.bf16.gmra.mxu0 %v7294_v35 }
0x1272   : > { %v9993_v51 = vpop.eup %9992  ;;  %v7272_v37 = vmul.f32 %v9991_v6, %v14406_v49 }
0x1273   : > { %v9995_v36 = vpop.eup %9994  ;;  %v7271_v15 = vmul.f32 %v9993_v51, %v14399_v2 }
0x1274   : > { %v7270_v58 = vmul.f32 %v9995_v36, %v14411_v4 }
0x1275   : > { %v7296_v33 = vpack.c.bf16 %v7272_v37, %v7271_v15 }
0x1276   : > { %v7295_v27 = vpack.c.bf16 %v7270_v58, %v7269_v63 }
0x1278   : > { %9154 = vmatprep.mubr.bf16.mxu0 %v7295_v27 }
0x1279   : > { %9155 = vmatmul.mubr.bf16.gmra.mxu0 %v7296_v33 }
0x1287   : > { %v9112_v44 = vpop.f32.mrf.mxu1 }
0x1288   : > { %v14431_v42 = vadd.f32 %v9112_v44, %v14348_v48 }
0x1289   : > { %v6970_v53 = vpop.f32.mrf.mxu1 }
0x128a   : > { %v7991_v17 = vmul.f32 -1.702, %v14431_v42  ;;  %v14435_v16 = vadd.f32 %v14348_v48, %v6970_v53 }
0x128b   : > { %v9113_v49 = vpop.f32.mrf.mxu1 }
0x128c   : > { %v7133_v61 = vmul.f32 1.442695, %v7991_v17  ;;  %v7989_v4 = vmul.f32 -1.702, %v14435_v16  ;;  %v14439_v2 = vadd.f32 %v9113_v49, %v14348_v48 }
0x128d   : > { %v6973_v3 = vpop.f32.mrf.mxu1 }
0x128e   : > { %9996 = vpow2.f32 %v7133_v61  ;;  %v7129_v38 = vmul.f32 1.442695, %v7989_v4  ;;  %v7992_v39 = vmul.f32 -1.702, %v14439_v2  ;;  %v14443_v8 = vadd.f32 %v14348_v48, %v6973_v3 }
0x128f   : > { %v9116_v19 = vpop.f32.mrf.mxu1 }
0x1290   : > { %9998 = vpow2.f32 %v7129_v38  ;;  %v7135_v55 = vmul.f32 1.442695, %v7992_v39  ;;  %v7990_v40 = vmul.f32 -1.702, %v14443_v8  ;;  %v14447_v47 = vadd.f32 %v9116_v19, %v14348_v48 }
0x1291   : > { %v6986_v22 = vpop.f32.mrf.mxu1 }
0x1292   : > { %10000 = vpow2.f32 %v7135_v55  ;;  %v7131_v21 = vmul.f32 1.442695, %v7990_v40  ;;  %v7995_v56 = vmul.f32 -1.702, %v14447_v47  ;;  %v14451_v30 = vadd.f32 %v14348_v48, %v6986_v22 }
0x1293   : > { %v9117_v1 = vpop.f32.mrf.mxu1 }
0x1294   : > { %10002 = vpow2.f32 %v7131_v21  ;;  %v7141_v32 = vmul.f32 1.442695, %v7995_v56  ;;  %v7993_v25 = vmul.f32 -1.702, %v14451_v30  ;;  %v14455_v7 = vadd.f32 %v9117_v1, %v14348_v48 }
0x1295   : > { %v6989_v18 = vpop.f32.mrf.mxu1 }
0x1296   : > { %v7137_v50 = vmul.f32 1.442695, %v7993_v25  ;;  %v7996_v31 = vmul.f32 -1.702, %v14455_v7  ;;  %v14459_v54 = vadd.f32 %v14348_v48, %v6989_v18  ;;  %10004 = vpow2.f32 %v7141_v32 }
0x1297   : > { %v9120_v24 = vpop.f32.mrf.mxu1 }
0x1298   : > { %10006 = vpow2.f32 %v7137_v50  ;;  %v7143_v45 = vmul.f32 1.442695, %v7996_v31  ;;  %v7994_v10 = vmul.f32 -1.702, %v14459_v54  ;;  %v14463_v23 = vadd.f32 %v9120_v24, %v14348_v48 }
0x1299   : > { %v7002_v9 = vpop.f32.mrf.mxu1 }
0x129a   : > { %10008 = vpow2.f32 %v7143_v45  ;;  %v7139_v46 = vmul.f32 1.442695, %v7994_v10  ;;  %v7999_v60 = vmul.f32 -1.702, %v14463_v23  ;;  %v14467_v12 = vadd.f32 %v14348_v48, %v7002_v9 }
0x129b   : > { %v9997_v13 = vpop.eup %9996  ;;  %v9121_v0 = vpop.f32.mrf.mxu1 }
0x129c   : > { %v7179_v29 = vadd.f32 1.0, %v9997_v13  ;;  %10010 = vpow2.f32 %v7139_v46  ;;  %v7149_v35 = vmul.f32 1.442695, %v7999_v60  ;;  %v7997_v34 = vmul.f32 -1.702, %v14467_v12 }
0x129d   : > { %v9999_v6 = vpop.eup %9998  ;;  %v14471_v51 = vadd.f32 %v9121_v0, %v14348_v48  ;;  %v7005_v36 = vpop.f32.mrf.mxu1 }
0x129e   : > { %10012 = vrcp.f32 %v7179_v29  ;;  %v7177_v37 = vadd.f32 1.0, %v9999_v6  ;;  %v7145_v63 = vmul.f32 1.442695, %v7997_v34  ;;  %v14474_v58 = vadd.f32 %v14348_v48, %v7005_v36 }
0x129f   : > { %v10001_v15 = vpop.eup %10000  ;;  %10014 = vpow2.f32 %v7149_v35  ;;  %v8000_v27 = vmul.f32 -1.702, %v14471_v51 }
0x12a0   : > { %10016 = vrcp.f32 %v7177_v37  ;;  %v7180_v33 = vadd.f32 1.0, %v10001_v15  ;;  %v7998_v44 = vmul.f32 -1.702, %v14474_v58 }
0x12a1   : > { %v10003_v53 = vpop.eup %10002  ;;  %10018 = vpow2.f32 %v7145_v63  ;;  %v7151_v17 = vmul.f32 1.442695, %v8000_v27 }
0x12a2   : > { %10020 = vrcp.f32 %v7180_v33  ;;  %v7178_v49 = vadd.f32 1.0, %v10003_v53  ;;  %v7147_v61 = vmul.f32 1.442695, %v7998_v44 }
0x12a3   : > { %10022 = vpow2.f32 %v7151_v17  ;;  %v10005_v4 = vpop.eup %10004 }
0x12a4   : > { %10024 = vrcp.f32 %v7178_v49  ;;  %v7183_v19 = vadd.f32 1.0, %v10005_v4 }
0x12a5   : > { %v10007_v3 = vpop.eup %10006  ;;  %10026 = vpow2.f32 %v7147_v61 }
0x12a6   : > { %v7181_v38 = vadd.f32 1.0, %v10007_v3 }
0x12a7   : > { %v10009_v39 = vpop.eup %10008 }
0x12a8   : > { %v7184_v55 = vadd.f32 1.0, %v10009_v39  ;;  %10028 = vrcp.f32 %v7181_v38 }
0x12a9   : > { %v10011_v40 = vpop.eup %10010 }
0x12aa   : > { %10030 = vrcp.f32 %v7184_v55  ;;  %v7182_v22 = vadd.f32 1.0, %v10011_v40 }
0x12ab   : > { %v10013_v21 = vpop.eup %10012  ;;  %10032 = vrcp.f32 %v7183_v19 }
0x12ac   : > { %v10015_v56 = vpop.eup %10014  ;;  %10034 = vrcp.f32 %v7182_v22  ;;  %v7275_v13 = vmul.f32 %v10013_v21, %v14431_v42 }
0x12ad   : > { %v10017_v1 = vpop.eup %10016  ;;  %v7187_v31 = vadd.f32 1.0, %v10015_v56 }
0x12ae   : > { %v10019_v32 = vpop.eup %10018  ;;  %v7273_v46 = vmul.f32 %v10017_v1, %v14435_v16 }
0x12af   : > { %v10021_v25 = vpop.eup %10020  ;;  %v7185_v18 = vadd.f32 1.0, %v10019_v32 }
0x12b0   : > { %v10023_v50 = vpop.eup %10022  ;;  %v7276_v45 = vmul.f32 %v10021_v25, %v14439_v2 }
0x12b1   : > { %v10025_v24 = vpop.eup %10024  ;;  %v7188_v10 = vadd.f32 1.0, %v10023_v50  ;;  %10036 = vrcp.f32 %v7185_v18 }
0x12b2   : > { %v10027_v9 = vpop.eup %10026  ;;  %v7274_v60 = vmul.f32 %v10025_v24, %v14443_v8  ;;  %v7298_v35 = vpack.c.bf16 %v7276_v45, %v7275_v13 }
0x12b3   : > { %10038 = vrcp.f32 %v7188_v10  ;;  %v7186_v0 = vadd.f32 1.0, %v10027_v9 }
0x12b4   : > { %10040 = vrcp.f32 %v7187_v31  ;;  %v7297_v29 = vpack.c.bf16 %v7274_v60, %v7273_v46 }
0x12b5   : > { %10042 = vrcp.f32 %v7186_v0  ;;  %v10029_v34 = vpop.eup %10028 }
0x12b6   : > { %9158 = vmatprep.mubr.bf16.mxu0 %v7297_v29  ;;  %v7277_v63 = vmul.f32 %v10029_v34, %v14451_v30 }
0x12b7   : > { %v10031_v6 = vpop.eup %10030  ;;  %9159 = vmatmul.mubr.bf16.gmra.mxu0 %v7298_v35 }
0x12b8   : > { %v10033_v2 = vpop.eup %10032  ;;  %v9124_v36 = vpop.f32.mrf.mxu1  ;;  %v7280_v16 = vmul.f32 %v10031_v6, %v14455_v7 }
0x12b9   : > { %v10035_v37 = vpop.eup %10034  ;;  %v7027_v8 = vadd.f32 %v9124_v36, %v14348_v48  ;;  %v7279_v27 = vmul.f32 %v10033_v2, %v14447_v47  ;;  %v14499_v2 = vld [vmem:[%s672_s25] ss:$0 sm:$0xff] }
0x12ba   : > { %v7278_v42 = vmul.f32 %v10035_v37, %v14459_v54  ;;  %v7018_v15 = vpop.f32.mrf.mxu1 }
0x12bb   : > { %v8003_v33 = vmul.f32 -1.702, %v7027_v8  ;;  %v7019_v44 = vadd.f32 %v14348_v48, %v7018_v15  ;;  %v7300_v49 = vpack.c.bf16 %v7280_v16, %v7279_v27 }
0x12bc   : > { %v9125_v53 = vpop.f32.mrf.mxu1  ;;  %v7299_v17 = vpack.c.bf16 %v7278_v42, %v7277_v63 }
0x12bd   : > { %v7157_v61 = vmul.f32 1.442695, %v8003_v33  ;;  %v8001_v4 = vmul.f32 -1.702, %v7019_v44  ;;  %v7030_v3 = vadd.f32 %v9125_v53, %v14348_v48 }
0x12be   : > { %9162 = vmatprep.mubr.bf16.mxu0 %v7299_v17  ;;  %v7021_v7 = vpop.f32.mrf.mxu1  ;;  %v10037_v38 = vpop.eup %10036 }
0x12bf   : > { %v7153_v39 = vmul.f32 1.442695, %v8001_v4  ;;  %v8004_v30 = vmul.f32 -1.702, %v7030_v3  ;;  %9163 = vmatmul.mubr.bf16.gmra.mxu0 %v7300_v49  ;;  %10044 = vpow2.f32 %v7157_v61  ;;  %v7022_v47 = vadd.f32 %v14348_v48, %v7021_v7 }
0x12c0   : > { %v10039_v54 = vpop.eup %10038  ;;  %v7281_v56 = vmul.f32 %v10037_v38, %v14467_v12 }
0x12c1   : > { %v10041_v19 = vpop.eup %10040  ;;  %10046 = vpow2.f32 %v7153_v39  ;;  %v7159_v55 = vmul.f32 1.442695, %v8004_v30  ;;  %v7284_v22 = vmul.f32 %v10039_v54, %v14471_v51  ;;  %v8002_v21 = vmul.f32 -1.702, %v7022_v47 }
0x12c2   : > { %v10043_v40 = vpop.eup %10042  ;;  %v7283_v32 = vmul.f32 %v10041_v19, %v14463_v23 }
0x12c3   : > { %v7282_v1 = vmul.f32 %v10043_v40, %v14474_v58  ;;  %10048 = vpow2.f32 %v7159_v55  ;;  %v7155_v25 = vmul.f32 1.442695, %v8002_v21 }
0x12c4   : > { %v7302_v50 = vpack.c.bf16 %v7284_v22, %v7283_v32  ;;  %v15072_v32 = vld [vmem:[#allocation27_spill] sm:$0xff] }
0x12c5   : > { %v7301_v18 = vpack.c.bf16 %v7282_v1, %v7281_v56  ;;  %10050 = vpow2.f32 %v7155_v25 }
0x12c7   : > { %9166 = vmatprep.mubr.bf16.mxu0 %v7301_v18 }
0x12c8   : > { %9167 = vmatmul.mubr.bf16.gmra.mxu0 %v7302_v50  ;;  %v15073_v50 = vld [vmem:[#allocation28_spill] sm:$0xff] }
0x12cc   : > { %v10045_v48 = vpop.eup %10044 }
0x12cd   : > { %v7191_v10 = vadd.f32 1.0, %v10045_v48 }
0x12ce   : > { %v10047_v31 = vpop.eup %10046 }
0x12cf   : > { %v7189_v45 = vadd.f32 1.0, %v10047_v31 }
0x12d0   : > { %v10049_v24 = vpop.eup %10048 }
0x12d1   : > { %v7192_v51 = vadd.f32 1.0, %v10049_v24  ;;  %v15074_v24 = vld [vmem:[#allocation32_spill] sm:$0xff] }
0x12d2   : > { %v10051_v9 = vpop.eup %10050 }
0x12d3   : > { %10052 = vrcp.f32 %v7192_v51  ;;  %v7190_v12 = vadd.f32 1.0, %v10051_v9  ;;  %v15075_v51 = vld [vmem:[#allocation31_spill] sm:$0xff] }
0x12d4   : > { %10054 = vrcp.f32 %v7189_v45 }
0x12d5   : > { %10056 = vrcp.f32 %v7191_v10 }
0x12d6   : > { %10058 = vrcp.f32 %v7190_v12 }
0x12e0   : > { %v10053_v23 = vpop.eup %10052 }
0x12e1   : > { %v10055_v58 = vpop.eup %10054  ;;  %v7288_v13 = vmul.f32 %v10053_v23, %v7030_v3 }
0x12e2   : > { %v10057_v46 = vpop.eup %10056  ;;  %v7285_v0 = vmul.f32 %v10055_v58, %v7019_v44 }
0x12e3   : > { %v10059_v60 = vpop.eup %10058  ;;  %v7287_v35 = vmul.f32 %v10057_v46, %v7027_v8  ;;  %v15076_v46 = vld [vmem:[#allocation35_spill] sm:$0xff] }
0x12e4   : > { %v7286_v29 = vmul.f32 %v10059_v60, %v7022_v47 }
0x12e5   : > { %v7304_v6 = vpack.c.bf16 %v7288_v13, %v7287_v35 }
0x12e6   : > { %v7303_v34 = vpack.c.bf16 %v7286_v29, %v7285_v0  ;;  %v15077_v29 = vld [vmem:[#allocation33_spill] sm:$0xff] }
0x12e8   : > { %9170 = vmatprep.mubr.bf16.mxu0 %v7303_v34 }
0x12e9   : > { %9171 = vmatmul.mubr.bf16.gmra.mxu0 %v7304_v6 }
0x1320   : > { %v9144_v36 = vpop.f32.mrf.mxu0 }
0x1321   : > { %v7419_v37 = vadd.f32 %v9144_v36, %v14499_v2  ;;  %v15078_v36 = vld [vmem:[#allocation37_spill] sm:$0xff] }
0x1322   : > { %v7410_v16 = vpop.f32.mrf.mxu0 }
0x1323   : > { %v7539_v63 = vadd.f32 %v7419_v37, %v13801_v43  ;;  %v7411_v42 = vadd.f32 %v14499_v2, %v7410_v16 }
0x1324   : > { %v9145_v15 = vpop.f32.mrf.mxu0 }
0x1325   : > { %7571 = vst.msk [vmem:[%s14716_s14 + $0x10] sm:$0xff] %vm784_vm1, %v7539_v63  ;;  %v7537_v8 = vadd.f32 %v7411_v42, %v13804_v26  ;;  %v7422_v27 = vadd.f32 %v9145_v15, %v14499_v2  ;;  %v15079_v42 = vld [vmem:[#allocation36_spill] sm:$0xff] }
0x1326   : > { %v7413_v33 = vpop.f32.mrf.mxu0 }
0x1327   : > { %7569 = vst.msk [vmem:[%s14716_s14] sm:$0xff] %vm784_vm1, %v7537_v8  ;;  %v7540_v43 = vadd.f32 %v7422_v27, %v13811_v52  ;;  %v7414_v44 = vadd.f32 %v14499_v2, %v7413_v33  ;;  %v15080_v33 = vld [vmem:[#allocation40_spill] sm:$0xff] }
0x1328   : > { %v9148_v53 = vpop.f32.mrf.mxu0 }
0x1329   : > { %7572 = vst.msk [vmem:[%s14716_s14 + $0x18] sm:$0xff] %vm784_vm1, %v7540_v43  ;;  %v7538_v26 = vadd.f32 %v7414_v44, %v13816_v20  ;;  %v7435_v17 = vadd.f32 %v9148_v53, %v14499_v2 }
0x132a   : > { %v7426_v49 = vpop.f32.mrf.mxu0 }
0x132b   : > { %7570 = vst.msk [vmem:[%s14716_s14 + $0x8] sm:$0xff] %vm784_vm1, %v7538_v26  ;;  %v7543_v52 = vadd.f32 %v7435_v17, %v13831_v14  ;;  %v7427_v61 = vadd.f32 %v14499_v2, %v7426_v49  ;;  %v15081_v26 = vld [vmem:[#allocation39_spill] sm:$0xff] }
0x132c   : > { %v9149_v4 = vpop.f32.mrf.mxu0 }
0x132d   : > { %7575 = vst.msk [vmem:[%s14716_s14 + $0x30] sm:$0xff] %vm784_vm1, %v7543_v52  ;;  %v7541_v20 = vadd.f32 %v7427_v61, %v13819_v11  ;;  %v7438_v3 = vadd.f32 %v9149_v4, %v14499_v2  ;;  %v15082_v61 = vld [vmem:[#allocation43_spill] sm:$0xff] }
0x132e   : > { %v7429_v7 = vpop.f32.mrf.mxu0 }
0x132f   : > { %7573 = vst.msk [vmem:[%s14716_s14 + $0x20] sm:$0xff] %vm784_vm1, %v7541_v20  ;;  %v7544_v14 = vadd.f32 %v7438_v3, %v13839_v28  ;;  %v7430_v38 = vadd.f32 %v14499_v2, %v7429_v7  ;;  %v15083_v3 = vld [vmem:[#allocation41_spill] sm:$0xff] }
0x1331   : > { %7576 = vst.msk [vmem:[%s14716_s14 + $0x38] sm:$0xff] %vm784_vm1, %v7544_v14  ;;  %v7542_v39 = vadd.f32 %v7430_v38, %v13845_v59  ;;  %v9152_v11 = vpop.f32.mrf.mxu0 }
0x1332   : > { %v7451_v30 = vadd.f32 %v9152_v11, %v14499_v2  ;;  %v15084_v11 = vld [vmem:[#allocation45_spill] sm:$0xff] }
0x1333   : > { %7574 = vst.msk [vmem:[%s14716_s14 + $0x28] sm:$0xff] %vm784_vm1, %v7542_v39  ;;  %v7442_v54 = vpop.f32.mrf.mxu0 }
0x1334   : > { %v7547_v28 = vadd.f32 %v7451_v30, %v13858_v5  ;;  %v7443_v47 = vadd.f32 %v14499_v2, %v7442_v54 }
0x1335   : > { %v9153_v19 = vpop.f32.mrf.mxu0 }
0x1336   : > { %7579 = vst.msk [vmem:[%s14716_s14 + $0x50] sm:$0xff] %vm784_vm1, %v7547_v28  ;;  %v7545_v59 = vadd.f32 %v7443_v47, %v13862_v41  ;;  %v7454_v55 = vadd.f32 %v9153_v19, %v14499_v2  ;;  %v15085_v47 = vld [vmem:[#allocation44_spill] sm:$0xff] }
0x1337   : > { %v7445_v40 = vpop.f32.mrf.mxu0 }
0x1338   : > { %7577 = vst.msk [vmem:[%s14716_s14 + $0x40] sm:$0xff] %vm784_vm1, %v7545_v59  ;;  %v7548_v5 = vadd.f32 %v7454_v55, %v13869_v62  ;;  %v7446_v22 = vadd.f32 %v14499_v2, %v7445_v40  ;;  %v15086_v40 = vld [vmem:[#allocation48_spill] sm:$0xff] }
0x1339   : > { %v9156_v21 = vpop.f32.mrf.mxu0 }
0x133a   : > { %7580 = vst.msk [vmem:[%s14716_s14 + $0x58] sm:$0xff] %vm784_vm1, %v7548_v5  ;;  %v7546_v41 = vadd.f32 %v7446_v22, %v13874_v57  ;;  %v7467_v56 = vadd.f32 %v9156_v21, %v14499_v2  ;;  %v15087_v21 = vld [vmem:[#allocation47_spill] sm:$0xff] }
0x133b   : > { %v7458_v1 = vpop.f32.mrf.mxu0 }
0x133c   : > { %7578 = vst.msk [vmem:[%s14716_s14 + $0x48] sm:$0xff] %vm784_vm1, %v7546_v41  ;;  %v7551_v62 = vadd.f32 %v7467_v56, %v15072_v32  ;;  %v7459_v25 = vadd.f32 %v14499_v2, %v7458_v1 }
0x133d   : > { %v9157_v18 = vpop.f32.mrf.mxu0 }
0x133e   : > { %7583 = vst.msk [vmem:[%s14716_s14 + $0x70] sm:$0xff] %vm784_vm1, %v7551_v62  ;;  %v7549_v57 = vadd.f32 %v7459_v25, %v15073_v50  ;;  %v7470_v48 = vadd.f32 %v9157_v18, %v14499_v2  ;;  %v15088_v62 = vld [vmem:[#allocation51_spill] sm:$0xff] }
0x133f   : > { %v7461_v31 = vpop.f32.mrf.mxu0 }
0x1340   : > { %7581 = vst.msk [vmem:[%s14716_s14 + $0x60] sm:$0xff] %vm784_vm1, %v7549_v57  ;;  %v7552_v45 = vadd.f32 %v7470_v48, %v15074_v24  ;;  %v7462_v10 = vadd.f32 %v14499_v2, %v7461_v31  ;;  %v15089_v57 = vld [vmem:[#allocation49_spill] sm:$0xff] }
0x1342   : > { %7584 = vst.msk [vmem:[%s14716_s14 + $0x78] sm:$0xff] %vm784_vm1, %v7552_v45  ;;  %v7550_v9 = vadd.f32 %v7462_v10, %v15075_v51  ;;  %v15090_v45 = vld [vmem:[#allocation55_spill] sm:$0xff] }
0x1344   : > { %7582 = vst.msk [vmem:[%s14716_s14 + $0x68] sm:$0xff] %vm784_vm1, %v7550_v9  ;;  %v15091_v9 = vld [vmem:[#allocation52_spill] sm:$0xff] }
0x1377   : > { %v9160_v12 = vpop.f32.mrf.mxu0 }
0x1378   : > { %v7483_v23 = vadd.f32 %v9160_v12, %v14499_v2 }
0x1379   : > { %v7474_v58 = vpop.f32.mrf.mxu0 }
0x137a   : > { %v7555_v60 = vadd.f32 %v7483_v23, %v15076_v46  ;;  %v7475_v13 = vadd.f32 %v14499_v2, %v7474_v58 }
0x137b   : > { %v9161_v0 = vpop.f32.mrf.mxu0 }
0x137c   : > { %7587 = vst.msk [vmem:[%s14716_s14 + $0x90] sm:$0xff] %vm784_vm1, %v7555_v60  ;;  %v7553_v35 = vadd.f32 %v7475_v13, %v15077_v29  ;;  %v7486_v34 = vadd.f32 %v9161_v0, %v14499_v2 }
0x137d   : > { %v7477_v6 = vpop.f32.mrf.mxu0 }
0x137e   : > { %7585 = vst.msk [vmem:[%s14716_s14 + $0x80] sm:$0xff] %vm784_vm1, %v7553_v35  ;;  %v7556_v37 = vadd.f32 %v7486_v34, %v15078_v36  ;;  %v7478_v16 = vadd.f32 %v14499_v2, %v7477_v6 }
0x137f   : > { %v9164_v63 = vpop.f32.mrf.mxu0 }
0x1380   : > { %7588 = vst.msk [vmem:[%s14716_s14 + $0x98] sm:$0xff] %vm784_vm1, %v7556_v37  ;;  %v7554_v15 = vadd.f32 %v7478_v16, %v15079_v42  ;;  %v7499_v8 = vadd.f32 %v9164_v63, %v14499_v2 }
0x1381   : > { %v7490_v27 = vpop.f32.mrf.mxu0 }
0x1382   : > { %7586 = vst.msk [vmem:[%s14716_s14 + $0x88] sm:$0xff] %vm784_vm1, %v7554_v15  ;;  %v7559_v43 = vadd.f32 %v7499_v8, %v15080_v33  ;;  %v7491_v44 = vadd.f32 %v14499_v2, %v7490_v27 }
0x1383   : > { %v9165_v53 = vpop.f32.mrf.mxu0 }
0x1384   : > { %7591 = vst.msk [vmem:[%s14716_s14 + $0xb0] sm:$0xff] %vm784_vm1, %v7559_v43  ;;  %v7557_v17 = vadd.f32 %v7491_v44, %v15081_v26  ;;  %v7502_v49 = vadd.f32 %v9165_v53, %v14499_v2 }
0x1385   : > { %v7493_v52 = vpop.f32.mrf.mxu0 }
0x1386   : > { %7589 = vst.msk [vmem:[%s14716_s14 + $0xa0] sm:$0xff] %vm784_vm1, %v7557_v17  ;;  %v7560_v4 = vadd.f32 %v7502_v49, %v15082_v61  ;;  %v7494_v20 = vadd.f32 %v14499_v2, %v7493_v52 }
0x1388   : > { %7592 = vst.msk [vmem:[%s14716_s14 + $0xb8] sm:$0xff] %vm784_vm1, %v7560_v4  ;;  %v7558_v7 = vadd.f32 %v7494_v20, %v15083_v3  ;;  %v9168_v14 = vpop.f32.mrf.mxu0 }
0x1389   : > { %v7515_v38 = vadd.f32 %v9168_v14, %v14499_v2 }
0x138a   : > { %7590 = vst.msk [vmem:[%s14716_s14 + $0xa8] sm:$0xff] %vm784_vm1, %v7558_v7  ;;  %v7506_v39 = vpop.f32.mrf.mxu0 }
0x138b   : > { %v7563_v30 = vadd.f32 %v7515_v38, %v15084_v11  ;;  %v7507_v54 = vadd.f32 %v14499_v2, %v7506_v39 }
0x138c   : > { %v9169_v28 = vpop.f32.mrf.mxu0 }
0x138d   : > { %7595 = vst.msk [vmem:[%s14716_s14 + $0xd0] sm:$0xff] %vm784_vm1, %v7563_v30  ;;  %v7561_v19 = vadd.f32 %v7507_v54, %v15085_v47  ;;  %v7518_v59 = vadd.f32 %v9169_v28, %v14499_v2 }
0x138e   : > { %v7509_v55 = vpop.f32.mrf.mxu0 }
0x138f   : > { %7593 = vst.msk [vmem:[%s14716_s14 + $0xc0] sm:$0xff] %vm784_vm1, %v7561_v19  ;;  %v7564_v5 = vadd.f32 %v7518_v59, %v15086_v40  ;;  %v7510_v22 = vadd.f32 %v14499_v2, %v7509_v55 }
0x1391   : > { %7596 = vst.msk [vmem:[%s14716_s14 + $0xd8] sm:$0xff] %vm784_vm1, %v7564_v5  ;;  %v7562_v41 = vadd.f32 %v7510_v22, %v15087_v21 }
0x1393   : > { %7594 = vst.msk [vmem:[%s14716_s14 + $0xc8] sm:$0xff] %vm784_vm1, %v7562_v41 }
0x13a9   : > { %v9172_v56 = vpop.f32.mrf.mxu0 }
0x13aa   : > { %v7531_v1 = vadd.f32 %v9172_v56, %v14499_v2 }
0x13ab   : > { %v7522_v32 = vpop.f32.mrf.mxu0 }
0x13ac   : > { %v7567_v25 = vadd.f32 %v7531_v1, %v15088_v62  ;;  %v7523_v18 = vadd.f32 %v14499_v2, %v7522_v32 }
0x13ad   : > { %v9173_v50 = vpop.f32.mrf.mxu0 }
0x13ae   : > { %7599 = vst.msk [vmem:[%s14716_s14 + $0xf0] sm:$0xff] %vm784_vm1, %v7567_v25  ;;  %v7565_v48 = vadd.f32 %v7523_v18, %v15089_v57  ;;  %v7534_v31 = vadd.f32 %v9173_v50, %v14499_v2 }
0x13af   : > { %v7525_v24 = vpop.f32.mrf.mxu0 }
0x13b0   : > { %7597 = vst.msk [vmem:[%s14716_s14 + $0xe0] sm:$0xff] %vm784_vm1, %v7565_v48  ;;  %v7568_v10 = vadd.f32 %v7534_v31, %v15090_v45  ;;  %v7526_v51 = vadd.f32 %v14499_v2, %v7525_v24 }
0x13b2   : > { %7600 = vst.msk [vmem:[%s14716_s14 + $0xf8] sm:$0xff] %vm784_vm1, %v7568_v10  ;;  %v7566_v12 = vadd.f32 %v7526_v51, %v15091_v9 }
0x13b4   : > { %7598 = vst.msk [vmem:[%s14716_s14 + $0xe8] sm:$0xff] %vm784_vm1, %v7566_v12 }
0x13b5 PF: > { %s15092_s24 = sld [smem:[#allocation3_spill]] }
0x13b6   : > { %s15093_s29 = sld [smem:[#allocation2_spill]] }
0x13b7   : > { %s15094_s30 = sld [smem:[#allocation4_spill]] }
0x13bb   : > { %s24_s15 = sadd.s32 1, %s15092_s24  }
0x13bc   : > { %p21_p6 = scmp.ge.s32.totalorder %s24_s15, 4  }
0x13be   :  { %23 = sbr.rel (!%p21_p6) target bundleno = 6 (0x6), region = 146 }

</bundles_post_ra>
